<compile_context>
chip_gen: v7x
topology: tpu7x:2x2x1
jax: 0.10.0
libtpu: 0.0.40
codegen_flags: <defaults>
</compile_context>

<pallas_src>
import functools
import math

import jax
import jax.numpy as jnp
from jax import lax
from jax.experimental import pallas as pl
from jax.experimental.pallas import tpu as pltpu

BF16 = jnp.bfloat16
F32 = jnp.float32


# ------------------------------ small helpers -------------------------------

def _row_tiles(M):
    """Pick a row tile: 2 parallel blocks when cleanly divisible, else 1."""
    if M >= 64 and M % 16 == 0:
        return M // 2, 2
    return M, 1


def _im2col_strided(x, K, S):
    """x: (B, Tin, Cin) channels-last -> patches (B*Tout, K*Cin), Tout.

    Patch layout is tap-major (k*Cin + c) to match the pre-packed weights.
    For K == 2*S this is a pure reshape + concat (no gather, no Kx copy)."""
    B, Tin, Cin = x.shape
    Tout = (Tin - K) // S + 1
    if K == 2 * S:
        used = (Tout + 1) * S
        xr = x[:, :used, :].reshape(B, Tout + 1, S * Cin)
        patches = jnp.concatenate([xr[:, :Tout, :], xr[:, 1:, :]], axis=-1)
    else:
        # TODO(synk): generic K/S path keeps the gather-based im2col.
        idx = jnp.arange(Tout)[:, None] * S + jnp.arange(K)[None, :]
        patches = x[:, idx, :].reshape(B, Tout, K * Cin)
    return patches.reshape(B * Tout, K * Cin), Tout


def _im2col_same(x, K):
    """Stride-1, padding K//2 conv patches. x: (B, T, C) -> (B*Tout, K*C)."""
    B, Tin, Cin = x.shape
    pad = K // 2
    xp = jnp.pad(x, ((0, 0), (pad, pad), (0, 0)))
    Tout = Tin + 2 * pad - K + 1
    cols = [xp[:, k:k + Tout, :] for k in range(K)]
    return jnp.concatenate(cols, axis=-1).reshape(B * Tout, K * Cin), Tout


# ------------------------------ Pallas kernels -------------------------------

def _mm_kernel(x_ref, w_ref, b_ref, o_ref, *, act):
    """Generic (M,K)@(K,N) + bias (+ ReLU); bf16 in, f32 accumulate."""
    y = jnp.dot(x_ref[...], w_ref[...], preferred_element_type=F32) + b_ref[...]
    if act == "relu":
        y = jnp.maximum(y, 0.0)
    o_ref[...] = y


def _enc_conv_kernel(p_ref, w1_ref, w2_ref, vec_ref, o_ref):
    """Fused (strided conv via im2col patches) + ReLU + 1x1 conv + ReLU."""
    vec = vec_ref[...]                       # (2, C) f32: [b1, b2]
    h = jnp.dot(p_ref[...], w1_ref[...], preferred_element_type=F32) + vec[0:1, :]
    h = jnp.maximum(h, 0.0)
    y = jnp.dot(h.astype(BF16), w2_ref[...], preferred_element_type=F32) + vec[1:2, :]
    o_ref[...] = jnp.maximum(y, 0.0)


def _enc_level_kernel(p_ref, s_ref, w1_ref, w2_ref, wlx_ref, wls_ref, vec_ref,
                      o_ref, *, eps):
    """One full UNet encoder level:
       strided conv + ReLU + 1x1 conv + ReLU + ConcatBlock
       (PReLU+LN -> [y|s] Linear -> PReLU+LN -> residual)."""
    vec = vec_ref[...]                       # (9, C) f32 parameter table
    b1, b2 = vec[0:1, :], vec[1:2, :]
    pre_a, pre_g, pre_b = vec[2:3, :], vec[3:4, :], vec[4:5, :]
    lin_b = vec[5:6, :]
    post_a, post_g, post_b = vec[6:7, :], vec[7:8, :], vec[8:9, :]

    h = jnp.dot(p_ref[...], w1_ref[...], preferred_element_type=F32) + b1
    h = jnp.maximum(h, 0.0)
    x = jnp.dot(h.astype(BF16), w2_ref[...], preferred_element_type=F32) + b2
    x = jnp.maximum(x, 0.0)                  # encoder output (residual base)

    # ConcatBlock.pre: PReLU + LayerNorm(C)
    y = jnp.where(x >= 0.0, x, pre_a * x)
    mu = jnp.mean(y, axis=-1, keepdims=True)
    var = jnp.mean((y - mu) ** 2, axis=-1, keepdims=True)
    y = (y - mu) * lax.rsqrt(var + eps) * pre_g + pre_b

    # ConcatBlock.post: Linear(cat(y, s)) + PReLU + LayerNorm(C)
    z = (jnp.dot(y.astype(BF16), wlx_ref[...], preferred_element_type=F32)
         + jnp.dot(s_ref[...], wls_ref[...], preferred_element_type=F32)
         + lin_b)
    z = jnp.where(z >= 0.0, z, post_a * z)
    mu2 = jnp.mean(z, axis=-1, keepdims=True)
    var2 = jnp.mean((z - mu2) ** 2, axis=-1, keepdims=True)
    z = (z - mu2) * lax.rsqrt(var2 + eps) * post_g + post_b

    o_ref[...] = x + z                       # residual


def _dec_level_kernel(x_ref, skip_ref, w1_ref, wt_ref, vec_ref, o_ref):
    """One UNet decoder level: skip add + 1x1 conv + ReLU + ConvTranspose
    projection to (rows, K*Cout) (overlap-add done by two shifted adds in the
    wrapper)."""
    xs = (x_ref[...] + skip_ref[...]).astype(BF16)
    h = jnp.dot(xs, w1_ref[...], preferred_element_type=F32) + vec_ref[...]
    h = jnp.maximum(h, 0.0).astype(BF16)
    o_ref[...] = jnp.dot(h, wt_ref[...], preferred_element_type=F32)


def _spk_head_kernel(p_ref, wc_ref, bc_ref, pool_ref, wl_ref, bl_ref,
                     ym_ref, z_ref):
    """Speaker head: K-wide conv (patches matmul) + time-mean (matmul with a
    pooling matrix) + ReLU + Linear, all in one call."""
    h = jnp.dot(p_ref[...], wc_ref[...], preferred_element_type=F32) + bc_ref[...]
    ym = jnp.dot(pool_ref[...], h, preferred_element_type=F32)   # (B, C) mean
    ym_ref[...] = ym
    zr = jnp.maximum(ym, 0.0).astype(BF16)
    z_ref[...] = jnp.dot(zr, wl_ref[...], preferred_element_type=F32) + bl_ref[...]


def _lstm_dir_kernel(x_ref, wih_ref, whh_ref, b_ref, o_ref, *, T, H):
    """One LSTM layer, one direction per grid step (d=0 fwd, d=1 bwd).
    Weights stay vreg/VMEM resident, recurrence fully unrolled in-kernel."""
    d = pl.program_id(0)
    wih = wih_ref[...]                       # (I, 4H) bf16
    whh = whh_ref[...]                       # (H, 4H) bf16
    bias = b_ref[...]                        # (1, 4H) f32
    B = x_ref.shape[1]

    # Direction-dependent index: hoist the select out of the unrolled loop.
    base = jnp.where(d == 0, 0, T - 1)       # scalar
    sign = jnp.where(d == 0, 1, -1)          # scalar

    def step(t, carry):
        h, c = carry
        t_idx = base + sign * t
        xt = x_ref[t_idx]                    # (B, I) bf16
        g = (jnp.dot(xt, wih, preferred_element_type=F32)
             + jnp.dot(h.astype(BF16), whh, preferred_element_type=F32)
             + bias)
        i = jax.nn.sigmoid(g[:, 0 * H:1 * H])
        f = jax.nn.sigmoid(g[:, 1 * H:2 * H])
        gg = jnp.tanh(g[:, 2 * H:3 * H])
        o = jax.nn.sigmoid(g[:, 3 * H:4 * H])
        c = f * c + i * gg
        h = o * jnp.tanh(c)
        o_ref[t_idx] = h
        return (h, c)

    h0 = jnp.zeros((B, H), F32)
    lax.fori_loop(0, T, step, (h0, h0), unroll=True)


# ------------------------------ call wrappers --------------------------------

def matmul_bias(x, w, b, act=None):
    M, Kd = x.shape
    N = w.shape[1]
    TM, ng = _row_tiles(M)
    return pl.pallas_call(
        functools.partial(_mm_kernel, act=act),
        out_shape=jax.ShapeDtypeStruct((M, N), F32),
        grid=(ng,),
        in_specs=[pl.BlockSpec((TM, Kd), lambda i: (i, 0)),
                  pl.BlockSpec((Kd, N), lambda i: (0, 0)),
                  pl.BlockSpec((1, N), lambda i: (0, 0))],
        out_specs=pl.BlockSpec((TM, N), lambda i: (i, 0)),
        compiler_params=pltpu.CompilerParams(dimension_semantics=("parallel",)),
    )(x.astype(BF16), w, b)


def encoder_level(patches, s_rep, p):
    M, KC = patches.shape
    C = p['w1'].shape[1]
    Cs = p['wls'].shape[0]
    TM, ng = _row_tiles(M)
    return pl.pallas_call(
        functools.partial(_enc_level_kernel, eps=1e-8),
        out_shape=jax.ShapeDtypeStruct((M, C), F32),
        grid=(ng,),
        in_specs=[pl.BlockSpec((TM, KC), lambda i: (i, 0)),
                  pl.BlockSpec((TM, Cs), lambda i: (i, 0)),
                  pl.BlockSpec((KC, C), lambda i: (0, 0)),
                  pl.BlockSpec((C, C), lambda i: (0, 0)),
                  pl.BlockSpec((C, C), lambda i: (0, 0)),
                  pl.BlockSpec((Cs, C), lambda i: (0, 0)),
                  pl.BlockSpec((9, C), lambda i: (0, 0))],
        out_specs=pl.BlockSpec((TM, C), lambda i: (i, 0)),
        compiler_params=pltpu.CompilerParams(dimension_semantics=("parallel",)),
    )(patches, s_rep, p['w1'], p['w2'], p['wlx'], p['wls'], p['vec'])


def decoder_level(x_flat, skip_flat, dp):
    M, C = x_flat.shape
    KC = dp['wt'].shape[1]
    TM, ng = _row_tiles(M)
    return pl.pallas_call(
        _dec_level_kernel,
        out_shape=jax.ShapeDtypeStruct((M, KC), F32),
        grid=(ng,),
        in_specs=[pl.BlockSpec((TM, C), lambda i: (i, 0)),
                  pl.BlockSpec((TM, C), lambda i: (i, 0)),
                  pl.BlockSpec(dp['w1'].shape, lambda i: (0, 0)),
                  pl.BlockSpec(dp['wt'].shape, lambda i: (0, 0)),
                  pl.BlockSpec(dp['b1'].shape, lambda i: (0, 0))],
        out_specs=pl.BlockSpec((TM, KC), lambda i: (i, 0)),
        compiler_params=pltpu.CompilerParams(dimension_semantics=("parallel",)),
    )(x_flat, skip_flat, dp['w1'], dp['wt'], dp['b1'])


def speaker_forward(p, enr_cl, K, S):
    """SpeakerNetwork. enr_cl: (B, T, 1) channels-last -> (mean emb, logits)."""
    B = enr_cl.shape[0]
    C = p['enc_w2'].shape[1]
    nspk = p['lin_b'].shape[-1]

    patches, T1 = _im2col_strided(enr_cl, K, S)
    M1 = B * T1
    TM, ng = _row_tiles(M1)
    h = pl.pallas_call(
        _enc_conv_kernel,
        out_shape=jax.ShapeDtypeStruct((M1, C), F32),
        grid=(ng,),
        in_specs=[pl.BlockSpec((TM, patches.shape[1]), lambda i: (i, 0)),
                  pl.BlockSpec(p['enc_w1'].shape, lambda i: (0, 0)),
                  pl.BlockSpec(p['enc_w2'].shape, lambda i: (0, 0)),
                  pl.BlockSpec(p['enc_vec'].shape, lambda i: (0, 0))],
        out_specs=pl.BlockSpec((TM, C), lambda i: (i, 0)),
        compiler_params=pltpu.CompilerParams(dimension_semantics=("parallel",)),
    )(patches.astype(BF16), p['enc_w1'], p['enc_w2'], p['enc_vec'])

    patches2, T2 = _im2col_same(h.reshape(B, T1, C), K)
    M2 = B * T2
    pool = jnp.kron(jnp.eye(B, dtype=F32),
                    jnp.full((1, T2), 1.0 / T2, F32))        # (B, M2) averaging
    ym, z = pl.pallas_call(
        _spk_head_kernel,
        out_shape=(jax.ShapeDtypeStruct((B, C), F32),
                   jax.ShapeDtypeStruct((B, nspk), F32)),
        grid=(1,),
        in_specs=[pl.BlockSpec((M2, patches2.shape[1]), lambda i: (0, 0)),
                  pl.BlockSpec(p['conv_w'].shape, lambda i: (0, 0)),
                  pl.BlockSpec(p['conv_b'].shape, lambda i: (0, 0)),
                  pl.BlockSpec((B, M2), lambda i: (0, 0)),
                  pl.BlockSpec(p['lin_w'].shape, lambda i: (0, 0)),
                  pl.BlockSpec(p['lin_b'].shape, lambda i: (0, 0))],
        out_specs=(pl.BlockSpec((B, C), lambda i: (0, 0)),
                   pl.BlockSpec((B, nspk), lambda i: (0, 0))),
        compiler_params=pltpu.CompilerParams(dimension_semantics=("arbitrary",)),
    )(patches2.astype(BF16), p['conv_w'], p['conv_b'], pool,
      p['lin_w'], p['lin_b'])
    return ym, z


def blstm_forward(p, x_btc):
    """2-layer bidirectional LSTM + Linear(2H, H). x_btc: (B, T, C) -> same."""
    B, T, _ = x_btc.shape
    out = jnp.transpose(x_btc, (1, 0, 2))     # time-major (T, B, C)
    H = p['l0']['whh'].shape[1]
    for layer in range(2):
        lp = p[f'l{layer}']
        I = out.shape[-1]
        hs = pl.pallas_call(
            functools.partial(_lstm_dir_kernel, T=T, H=H),
            out_shape=jax.ShapeDtypeStruct((2, T, B, H), F32),
            grid=(2,),
            in_specs=[pl.BlockSpec((T, B, I), lambda d: (0, 0, 0)),
                      pl.BlockSpec((None, I, 4 * H), lambda d: (d, 0, 0)),
                      pl.BlockSpec((None, H, 4 * H), lambda d: (d, 0, 0)),
                      pl.BlockSpec((None, 1, 4 * H), lambda d: (d, 0, 0))],
            out_specs=pl.BlockSpec((None, T, B, H), lambda d: (d, 0, 0, 0)),
            compiler_params=pltpu.CompilerParams(
                dimension_semantics=("parallel",)),
        )(out.astype(BF16), lp['wih'], lp['whh'], lp['b'])
        out = jnp.concatenate([hs[0], hs[1]], axis=-1)   # (T, B, 2H)
    y = matmul_bias(out.reshape(T * B, 2 * H), p['lin_w'], p['lin_b'])
    return jnp.transpose(y.reshape(T, B, H), (1, 0, 2))   # (B, T, H)


# ------------------------------- UNet forward --------------------------------

def valid_length(length, depth, kernel_size, stride, resample):
    length = math.ceil(length * resample)
    for _ in range(depth):
        length = math.ceil((length - kernel_size) / stride) + 1
        length = max(length, 1)
    for _ in range(depth):
        length = (length - 1) * stride + kernel_size
    return int(math.ceil(length / resample))


def unet_forward(params, mix, enr, cfg):
    u = cfg['unet']
    depth, K, S = u['depth'], u['kernel_size'], u['stride']
    if mix.ndim == 2:
        mix = mix[:, None, :]
    if enr.ndim == 2:
        enr = enr[:, None, :]
    # TODO(synk): normalize branch not implemented (config normalize=False).
    std = 1.0
    B = mix.shape[0]
    length = mix.shape[-1]
    vl = valid_length(length, depth, K, S, u['resample'])

    x = jnp.transpose(mix.astype(F32), (0, 2, 1))          # (B, T, 1) ch-last
    x = jnp.pad(x, ((0, 0), (0, vl - length), (0, 0)))
    # TODO(synk): resample==2/4 sinc up/downsampling not exercised (resample=1).

    enr_cl = jnp.transpose(enr.astype(F32), (0, 2, 1))
    enc_s, y_spk = speaker_forward(params['speaker'], enr_cl, K, S)
    enc_s_bf = enc_s.astype(BF16)

    # -------- encoder (one fused pallas_call per level) --------
    skips = []
    for n in range(depth):
        p = params['encoder'][n]
        patches, T_out = _im2col_strided(x, K, S)
        M = B * T_out
        s_rep = jnp.broadcast_to(enc_s_bf[:, None, :],
                                 (B, T_out, enc_s.shape[-1])).reshape(M, -1)
        xf = encoder_level(patches.astype(BF16), s_rep, p)  # (M, C) f32
        skips.append((xf, T_out))
        x = xf.reshape(B, T_out, -1)

    # -------- BLSTM bottleneck (attention branch disabled by config) --------
    x = blstm_forward(params['lstm'], x)                    # (B, T, C)

    # -------- decoder (one fused pallas_call per level) --------
    for di, dp in enumerate(params['decoder']):
        build_idx = depth - 1 - di
        skip, T_skip = skips.pop(-1)
        T, C = x.shape[1], x.shape[2]
        if T_skip != T:
            skip = skip.reshape(B, T_skip, -1)[:, :T, :].reshape(B * T, -1)
        proj = decoder_level(x.reshape(B * T, C), skip, dp)  # (B*T, K*Cout)
        Cout = dp['bt'].shape[0]
        y = proj.reshape(B, T, K, Cout)
        if K == 2 * S:
            yA = y[:, :, :S, :].reshape(B, T * S, Cout)
            yB = y[:, :, S:, :].reshape(B, T * S, Cout)
            out = (jnp.pad(yA, ((0, 0), (0, S), (0, 0)))
                   + jnp.pad(yB, ((0, 0), (S, 0), (0, 0))))  # (B,(T-1)*S+K,Cout)
        else:
            # TODO(synk): generic-K overlap-add fallback (scatter adds).
            out = jnp.zeros((B, (T - 1) * S + K, Cout), F32)
            for j in range(K):
                out = out.at[:, j:j + (T - 1) * S + 1:S, :].add(y[:, :, j, :])
        out = out + dp['bt'][None, None, :]
        if build_idx > 0:
            out = jnp.maximum(out, 0.0)
        x = out

    # TODO(synk): CTC block disabled by config (ctc.use = False).
    z = None
    if x.shape[-1] == 1:
        x = x[:, :length, 0]
    else:
        x = jnp.transpose(x, (0, 2, 1))[..., :length]
    return std * x, y_spk, z


# -------------------------------- parameters ---------------------------------

def _uniform(key, shape, bound):
    return jax.random.uniform(key, shape, F32, -bound, bound)


def _init_conv(key, cout, cin, k):
    k1, k2 = jax.random.split(key)
    bound = 1.0 / math.sqrt(cin * k)
    return _uniform(k1, (cout, cin, k), bound), _uniform(k2, (cout,), bound)


def _init_convT(key, cin, cout, k):
    k1, k2 = jax.random.split(key)
    bound = 1.0 / math.sqrt(cout * k)
    return _uniform(k1, (cin, cout, k), bound), _uniform(k2, (cout,), bound)


def _init_linear(key, fout, fin):
    k1, k2 = jax.random.split(key)
    bound = 1.0 / math.sqrt(fin)
    return _uniform(k1, (fout, fin), bound), _uniform(k2, (fout,), bound)


def init_params(key, cfg):
    """Init with PyTorch-style distributions, then pre-pack into matmul-ready
    bf16 layouts once (so no per-forward weight reshaping / padding)."""
    u = cfg['unet']
    depth, K = u['depth'], u['kernel_size']
    ch_in, ch_mid, ch_out = u['in_channels'], u['mid_channels'], u['out_channels']
    growth, max_ch = u['growth'], u['max_channels']
    ki = iter(jax.random.split(key, 64))

    enc, dec_build = [], []
    for _ in range(depth):
        w1, b1 = _init_conv(next(ki), ch_mid, ch_in, K)
        w2, b2 = _init_conv(next(ki), ch_mid, ch_mid, 1)
        lw, lb = _init_linear(next(ki), ch_mid, 2 * ch_mid)
        # NOTE: latent shape bug in the reference for growth>1 / max_channels:
        # concat width (ch_mid + speaker_mid) must equal 2*ch_mid; holds here.
        lwT = lw.T
        vec = jnp.stack([
            b1, b2,
            jnp.full((ch_mid,), 0.25, F32), jnp.ones((ch_mid,), F32),
            jnp.zeros((ch_mid,), F32),
            lb,
            jnp.full((ch_mid,), 0.25, F32), jnp.ones((ch_mid,), F32),
            jnp.zeros((ch_mid,), F32)], axis=0)
        enc.append(dict(
            w1=w1.transpose(2, 1, 0).reshape(K * ch_in, ch_mid).astype(BF16),
            w2=w2[:, :, 0].T.astype(BF16),
            wlx=lwT[:ch_mid].astype(BF16),
            wls=lwT[ch_mid:].astype(BF16),
            vec=vec))
        dw1, db1 = _init_conv(next(ki), ch_mid, ch_mid, 1)
        wt, bt = _init_convT(next(ki), ch_mid, ch_out, K)
        dec_build.append(dict(
            w1=dw1[:, :, 0].T.astype(BF16),
            b1=db1.reshape(1, ch_mid),
            wt=wt.transpose(0, 2, 1).reshape(ch_mid, K * ch_out).astype(BF16),
            bt=bt))
        ch_out = ch_mid
        ch_in = ch_mid
        ch_mid = min(int(growth * ch_mid), max_ch)

    dim = ch_in
    lstm = {}
    bound = 1.0 / math.sqrt(dim)
    for layer in range(2):
        isz = dim if layer == 0 else 2 * dim
        wih_l, whh_l, b_l = [], [], []
        for _name in ('fwd', 'bwd'):
            k1, k2, k3, k4 = jax.random.split(next(ki), 4)
            wih_l.append(_uniform(k1, (4 * dim, isz), bound).T)
            whh_l.append(_uniform(k2, (4 * dim, dim), bound).T)
            b_l.append((_uniform(k3, (4 * dim,), bound)
                        + _uniform(k4, (4 * dim,), bound)).reshape(1, 4 * dim))
        lstm[f'l{layer}'] = dict(wih=jnp.stack(wih_l).astype(BF16),
                                 whh=jnp.stack(whh_l).astype(BF16),
                                 b=jnp.stack(b_l))
    lw, lb = _init_linear(next(ki), dim, 2 * dim)
    lstm['lin_w'] = lw.T.astype(BF16)
    lstm['lin_b'] = lb.reshape(1, dim)

    spk = {}
    w1, b1 = _init_conv(next(ki), u['mid_channels'], u['in_channels'], K)
    w2, b2 = _init_conv(next(ki), u['mid_channels'], u['mid_channels'], 1)
    cw, cb = _init_conv(next(ki), u['mid_channels'], u['mid_channels'], K)
    lw, lb = _init_linear(next(ki), u['num_speakers'], u['mid_channels'])
    spk['enc_w1'] = w1.transpose(2, 1, 0).reshape(
        K * u['in_channels'], u['mid_channels']).astype(BF16)
    spk['enc_w2'] = w2[:, :, 0].T.astype(BF16)
    spk['enc_vec'] = jnp.stack([b1, b2], axis=0)
    spk['conv_w'] = cw.transpose(2, 1, 0).reshape(
        K * u['mid_channels'], u['mid_channels']).astype(BF16)
    spk['conv_b'] = cb.reshape(1, u['mid_channels'])
    spk['lin_w'] = lw.T.astype(BF16)
    spk['lin_b'] = lb.reshape(1, u['num_speakers'])

    return dict(encoder=enc, decoder=list(reversed(dec_build)),
                lstm=lstm, speaker=spk)


# ----------------------------------- main -------------------------------------

if __name__ == "__main__":
    cfg = {
        'unet': {
            'normalize': False, 'floor': 1e-3, 'resample': 1, 'depth': 2,
            'in_channels': 1, 'mid_channels': 16, 'out_channels': 1,
            'max_channels': 64, 'kernel_size': 8, 'growth': 1,
            'rescale': False, 'stride': 4, 'reference': 0.1,
            'attention': False, 'causal': False, 'num_speakers': 4,
        },
        'ctc': {'use': False},
    }

    key = jax.random.PRNGKey(0)
    pkey, mkey, ekey = jax.random.split(key, 3)
    params = init_params(pkey, cfg)

    B, T = 2, 256
    mix = jax.random.normal(mkey, (B, T), F32)
    enr = jax.random.normal(ekey, (B, T), F32)

    fwd = jax.jit(lambda p, m, e: unet_forward(p, m, e, cfg))
    out, y_spk, z = fwd(params, mix, enr)
    jax.block_until_ready((out, y_spk))

    assert out.shape == (B, T), out.shape
    assert y_spk.shape == (B, cfg['unet']['num_speakers']), y_spk.shape
    assert bool(jnp.all(jnp.isfinite(out))) and bool(jnp.all(jnp.isfinite(y_spk)))
    print("KERNEL_OK")
</pallas_src>

<mosaic_0001>
module attributes {stable_mosaic.version = 11 : i64} {
  func.func @_enc_conv_kernel(%arg0: i32, %arg1: memref<126x8xbf16, #tpu.memory_space<vmem>>, %arg2: memref<8x16xbf16, #tpu.memory_space<vmem>>, %arg3: memref<16x16xbf16, #tpu.memory_space<vmem>>, %arg4: memref<2x16xf32, #tpu.memory_space<vmem>>, %arg5: memref<126x16xf32, #tpu.memory_space<vmem>>) attributes {dimension_semantics = [#tpu.dimension_semantics<parallel>], iteration_bounds = array<i64: 1>, scalar_prefetch = 0 : i64, scratch_operands = 0 : i64, tpu.core_type = #tpu.core_type<tc>, window_params = [{transform_indices = @transform_0, window_bounds = array<i64: 126, 8>}, {pipeline_mode = #tpu.pipeline_mode<synchronous>, transform_indices = @transform_1, window_bounds = array<i64: 8, 16>}, {pipeline_mode = #tpu.pipeline_mode<synchronous>, transform_indices = @transform_2, window_bounds = array<i64: 16, 16>}, {pipeline_mode = #tpu.pipeline_mode<synchronous>, transform_indices = @transform_3, window_bounds = array<i64: 2, 16>}, {transform_indices = @transform_4, window_bounds = array<i64: 126, 16>}]} {
    %c0 = arith.constant 0 : index
    %c0_0 = arith.constant 0 : index
    %0 = vector.load %arg4[%c0, %c0_0] : memref<2x16xf32, #tpu.memory_space<vmem>>, vector<2x16xf32>
    %c0_1 = arith.constant 0 : index
    %c0_2 = arith.constant 0 : index
    %1 = vector.load %arg1[%c0_1, %c0_2] : memref<126x8xbf16, #tpu.memory_space<vmem>>, vector<126x8xbf16>
    %c0_3 = arith.constant 0 : index
    %c0_4 = arith.constant 0 : index
    %2 = vector.load %arg2[%c0_3, %c0_4] : memref<8x16xbf16, #tpu.memory_space<vmem>>, vector<8x16xbf16>
    %cst = arith.constant dense<0.000000e+00> : vector<126x16xf32>
    %3 = tpu.matmul %1, %2, %cst {dimension_numbers = #tpu.dot_dimension_numbers<[1], [0], [0], [1], [0, 0, 1, 1], [], []>} : vector<126x8xbf16>, vector<8x16xbf16>, vector<126x16xf32> -> vector<126x16xf32>
    %4 = vector.extract_strided_slice %0 {offsets = [0, 0], sizes = [1, 16], strides = [1, 1]} : vector<2x16xf32> to vector<1x16xf32>
    %5 = vector.broadcast %4 : vector<1x16xf32> to vector<126x16xf32>
    %6 = arith.addf %3, %5 : vector<126x16xf32>
    %cst_5 = arith.constant 0.000000e+00 : f32
    %7 = vector.broadcast %cst_5 : f32 to vector<126x16xf32>
    %8 = arith.maximumf %6, %7 : vector<126x16xf32>
    %9 = arith.truncf %8 : vector<126x16xf32> to vector<126x16xbf16>
    %c0_6 = arith.constant 0 : index
    %c0_7 = arith.constant 0 : index
    %10 = vector.load %arg3[%c0_6, %c0_7] : memref<16x16xbf16, #tpu.memory_space<vmem>>, vector<16x16xbf16>
    %cst_8 = arith.constant dense<0.000000e+00> : vector<126x16xf32>
    %11 = tpu.matmul %9, %10, %cst_8 {dimension_numbers = #tpu.dot_dimension_numbers<[1], [0], [0], [1], [0, 0, 1, 1], [], []>} : vector<126x16xbf16>, vector<16x16xbf16>, vector<126x16xf32> -> vector<126x16xf32>
    %12 = vector.extract_strided_slice %0 {offsets = [1, 0], sizes = [1, 16], strides = [1, 1]} : vector<2x16xf32> to vector<1x16xf32>
    %13 = vector.broadcast %12 : vector<1x16xf32> to vector<126x16xf32>
    %14 = arith.addf %11, %13 : vector<126x16xf32>
    %cst_9 = arith.constant 0.000000e+00 : f32
    %15 = vector.broadcast %cst_9 : f32 to vector<126x16xf32>
    %16 = arith.maximumf %14, %15 : vector<126x16xf32>
    %c0_10 = arith.constant 0 : index
    %c0_11 = arith.constant 0 : index
    %17 = vector.load %arg5[%c0_10, %c0_11] : memref<126x16xf32, #tpu.memory_space<vmem>>, vector<126x16xf32>
    tpu.vector_store %arg5[%c0_10, %c0_11], %16 {strides = array<i32>} : memref<126x16xf32, #tpu.memory_space<vmem>>, vector<126x16xf32>,
    return
  }
  func.func @transform_0(%arg0: i32) -> (i32, i32) {
    %c0_i32 = arith.constant 0 : i32
    %c0_i32_0 = arith.constant 0 : i32
    return %arg0, %c0_i32 : i32, i32
  }
  func.func @transform_1(%arg0: i32) -> (i32, i32) {
    %c0_i32 = arith.constant 0 : i32
    %c0_i32_0 = arith.constant 0 : i32
    %c0_i32_1 = arith.constant 0 : i32
    return %c0_i32, %c0_i32_0 : i32, i32
  }
  func.func @transform_2(%arg0: i32) -> (i32, i32) {
    %c0_i32 = arith.constant 0 : i32
    %c0_i32_0 = arith.constant 0 : i32
    %c0_i32_1 = arith.constant 0 : i32
    return %c0_i32, %c0_i32_0 : i32, i32
  }
  func.func @transform_3(%arg0: i32) -> (i32, i32) {
    %c0_i32 = arith.constant 0 : i32
    %c0_i32_0 = arith.constant 0 : i32
    %c0_i32_1 = arith.constant 0 : i32
    return %c0_i32, %c0_i32_0 : i32, i32
  }
  func.func @transform_4(%arg0: i32) -> (i32, i32) {
    %c0_i32 = arith.constant 0 : i32
    %c0_i32_0 = arith.constant 0 : i32
    return %arg0, %c0_i32 : i32, i32
  }
}

module attributes {stable_mosaic.version = 11 : i64} {
  func.func @_spk_head_kernel(%arg0: i32, %arg1: memref<128x128xbf16, #tpu.memory_space<vmem>>, %arg2: memref<128x16xbf16, #tpu.memory_space<vmem>>, %arg3: memref<1x16xf32, #tpu.memory_space<vmem>>, %arg4: memref<2x128xf32, #tpu.memory_space<vmem>>, %arg5: memref<16x4xbf16, #tpu.memory_space<vmem>>, %arg6: memref<1x4xf32, #tpu.memory_space<vmem>>, %arg7: memref<2x16xf32, #tpu.memory_space<vmem>>, %arg8: memref<2x4xf32, #tpu.memory_space<vmem>>) attributes {dimension_semantics = [#tpu.dimension_semantics<arbitrary>], iteration_bounds = array<i64: 1>, scalar_prefetch = 0 : i64, scratch_operands = 0 : i64, tpu.core_type = #tpu.core_type<tc>, window_params = [{pipeline_mode = #tpu.pipeline_mode<synchronous>, transform_indices = @transform_0, window_bounds = array<i64: 128, 128>}, {pipeline_mode = #tpu.pipeline_mode<synchronous>, transform_indices = @transform_1, window_bounds = array<i64: 128, 16>}, {pipeline_mode = #tpu.pipeline_mode<synchronous>, transform_indices = @transform_2, window_bounds = array<i64: 1, 16>}, {pipeline_mode = #tpu.pipeline_mode<synchronous>, transform_indices = @transform_3, window_bounds = array<i64: 2, 128>}, {pipeline_mode = #tpu.pipeline_mode<synchronous>, transform_indices = @transform_4, window_bounds = array<i64: 16, 4>}, {pipeline_mode = #tpu.pipeline_mode<synchronous>, transform_indices = @transform_5, window_bounds = array<i64: 1, 4>}, {pipeline_mode = #tpu.pipeline_mode<synchronous>, transform_indices = @transform_6, window_bounds = array<i64: 2, 16>}, {pipeline_mode = #tpu.pipeline_mode<synchronous>, transform_indices = @transform_7, window_bounds = array<i64: 2, 4>}]} {
    %c0 = arith.constant 0 : index
    %c0_0 = arith.constant 0 : index
    %0 = vector.load %arg1[%c0, %c0_0] : memref<128x128xbf16, #tpu.memory_space<vmem>>, vector<128x128xbf16>
    %c0_1 = arith.constant 0 : index
    %c0_2 = arith.constant 0 : index
    %1 = vector.load %arg2[%c0_1, %c0_2] : memref<128x16xbf16, #tpu.memory_space<vmem>>, vector<128x16xbf16>
    %cst = arith.constant dense<0.000000e+00> : vector<128x16xf32>
    %2 = tpu.matmul %0, %1, %cst {dimension_numbers = #tpu.dot_dimension_numbers<[1], [0], [0], [1], [0, 0, 1, 1], [], []>} : vector<128x128xbf16>, vector<128x16xbf16>, vector<128x16xf32> -> vector<128x16xf32>
    %c0_3 = arith.constant 0 : index
    %c0_4 = arith.constant 0 : index
    %3 = vector.load %arg3[%c0_3, %c0_4] : memref<1x16xf32, #tpu.memory_space<vmem>>, vector<1x16xf32>
    %4 = vector.broadcast %3 : vector<1x16xf32> to vector<128x16xf32>
    %5 = arith.addf %2, %4 : vector<128x16xf32>
    %c0_5 = arith.constant 0 : index
    %c0_6 = arith.constant 0 : index
    %6 = vector.load %arg4[%c0_5, %c0_6] : memref<2x128xf32, #tpu.memory_space<vmem>>, vector<2x128xf32>
    %cst_7 = arith.constant dense<0.000000e+00> : vector<2x16xf32>
    %7 = tpu.matmul %6, %5, %cst_7 {dimension_numbers = #tpu.dot_dimension_numbers<[1], [0], [0], [1], [0, 0, 1, 1], [], []>} : vector<2x128xf32>, vector<128x16xf32>, vector<2x16xf32> -> vector<2x16xf32>
    %c0_8 = arith.constant 0 : index
    %c0_9 = arith.constant 0 : index
    %8 = vector.load %arg7[%c0_8, %c0_9] : memref<2x16xf32, #tpu.memory_space<vmem>>, vector<2x16xf32>
    tpu.vector_store %arg7[%c0_8, %c0_9], %7 {strides = array<i32>} : memref<2x16xf32, #tpu.memory_space<vmem>>, vector<2x16xf32>,
    %cst_10 = arith.constant 0.000000e+00 : f32
    %9 = vector.broadcast %cst_10 : f32 to vector<2x16xf32>
    %10 = arith.maximumf %7, %9 : vector<2x16xf32>
    %11 = arith.truncf %10 : vector<2x16xf32> to vector<2x16xbf16>
    %c0_11 = arith.constant 0 : index
    %c0_12 = arith.constant 0 : index
    %12 = vector.load %arg5[%c0_11, %c0_12] : memref<16x4xbf16, #tpu.memory_space<vmem>>, vector<16x4xbf16>
    %cst_13 = arith.constant dense<0.000000e+00> : vector<2x4xf32>
    %13 = tpu.matmul %11, %12, %cst_13 {dimension_numbers = #tpu.dot_dimension_numbers<[1], [0], [0], [1], [0, 0, 1, 1], [], []>} : vector<2x16xbf16>, vector<16x4xbf16>, vector<2x4xf32> -> vector<2x4xf32>
    %c0_14 = arith.constant 0 : index
    %c0_15 = arith.constant 0 : index
    %14 = vector.load %arg6[%c0_14, %c0_15] : memref<1x4xf32, #tpu.memory_space<vmem>>, vector<1x4xf32>
    %15 = vector.broadcast %14 : vector<1x4xf32> to vector<2x4xf32>
    %16 = arith.addf %13, %15 : vector<2x4xf32>
    %c0_16 = arith.constant 0 : index
    %c0_17 = arith.constant 0 : index
    %17 = vector.load %arg8[%c0_16, %c0_17] : memref<2x4xf32, #tpu.memory_space<vmem>>, vector<2x4xf32>
    tpu.vector_store %arg8[%c0_16, %c0_17], %16 {strides = array<i32>} : memref<2x4xf32, #tpu.memory_space<vmem>>, vector<2x4xf32>,
    return
  }
  func.func @transform_0(%arg0: i32) -> (i32, i32) {
    %c0_i32 = arith.constant 0 : i32
    %c0_i32_0 = arith.constant 0 : i32
    %c0_i32_1 = arith.constant 0 : i32
    return %c0_i32, %c0_i32_0 : i32, i32
  }
  func.func @transform_1(%arg0: i32) -> (i32, i32) {
    %c0_i32 = arith.constant 0 : i32
    %c0_i32_0 = arith.constant 0 : i32
    %c0_i32_1 = arith.constant 0 : i32
    return %c0_i32, %c0_i32_0 : i32, i32
  }
  func.func @transform_2(%arg0: i32) -> (i32, i32) {
    %c0_i32 = arith.constant 0 : i32
    %c0_i32_0 = arith.constant 0 : i32
    %c0_i32_1 = arith.constant 0 : i32
    return %c0_i32, %c0_i32_0 : i32, i32
  }
  func.func @transform_3(%arg0: i32) -> (i32, i32) {
    %c0_i32 = arith.constant 0 : i32
    %c0_i32_0 = arith.constant 0 : i32
    %c0_i32_1 = arith.constant 0 : i32
    return %c0_i32, %c0_i32_0 : i32, i32
  }
  func.func @transform_4(%arg0: i32) -> (i32, i32) {
    %c0_i32 = arith.constant 0 : i32
    %c0_i32_0 = arith.constant 0 : i32
    %c0_i32_1 = arith.constant 0 : i32
    return %c0_i32, %c0_i32_0 : i32, i32
  }
  func.func @transform_5(%arg0: i32) -> (i32, i32) {
    %c0_i32 = arith.constant 0 : i32
    %c0_i32_0 = arith.constant 0 : i32
    %c0_i32_1 = arith.constant 0 : i32
    return %c0_i32, %c0_i32_0 : i32, i32
  }
  func.func @transform_6(%arg0: i32) -> (i32, i32) {
    %c0_i32 = arith.constant 0 : i32
    %c0_i32_0 = arith.constant 0 : i32
    %c0_i32_1 = arith.constant 0 : i32
    return %c0_i32, %c0_i32_0 : i32, i32
  }
  func.func @transform_7(%arg0: i32) -> (i32, i32) {
    %c0_i32 = arith.constant 0 : i32
    %c0_i32_0 = arith.constant 0 : i32
    %c0_i32_1 = arith.constant 0 : i32
    return %c0_i32, %c0_i32_0 : i32, i32
  }
}

module attributes {stable_mosaic.version = 11 : i64} {
  func.func @_enc_level_kernel(%arg0: i32, %arg1: memref<64x8xbf16, #tpu.memory_space<vmem>>, %arg2: memref<64x16xbf16, #tpu.memory_space<vmem>>, %arg3: memref<8x16xbf16, #tpu.memory_space<vmem>>, %arg4: memref<16x16xbf16, #tpu.memory_space<vmem>>, %arg5: memref<16x16xbf16, #tpu.memory_space<vmem>>, %arg6: memref<16x16xbf16, #tpu.memory_space<vmem>>, %arg7: memref<9x16xf32, #tpu.memory_space<vmem>>, %arg8: memref<64x16xf32, #tpu.memory_space<vmem>>) attributes {dimension_semantics = [#tpu.dimension_semantics<parallel>], iteration_bounds = array<i64: 2>, scalar_prefetch = 0 : i64, scratch_operands = 0 : i64, tpu.core_type = #tpu.core_type<tc>, window_params = [{transform_indices = @transform_0, window_bounds = array<i64: 64, 8>}, {transform_indices = @transform_1, window_bounds = array<i64: 64, 16>}, {pipeline_mode = #tpu.pipeline_mode<synchronous>, transform_indices = @transform_2, window_bounds = array<i64: 8, 16>}, {pipeline_mode = #tpu.pipeline_mode<synchronous>, transform_indices = @transform_3, window_bounds = array<i64: 16, 16>}, {pipeline_mode = #tpu.pipeline_mode<synchronous>, transform_indices = @transform_4, window_bounds = array<i64: 16, 16>}, {pipeline_mode = #tpu.pipeline_mode<synchronous>, transform_indices = @transform_5, window_bounds = array<i64: 16, 16>}, {pipeline_mode = #tpu.pipeline_mode<synchronous>, transform_indices = @transform_6, window_bounds = array<i64: 9, 16>}, {transform_indices = @transform_7, window_bounds = array<i64: 64, 16>}]} {
    %c0 = arith.constant 0 : index
    %c0_0 = arith.constant 0 : index
    %0 = vector.load %arg7[%c0, %c0_0] : memref<9x16xf32, #tpu.memory_space<vmem>>, vector<9x16xf32>
    %1 = vector.extract_strided_slice %0 {offsets = [0, 0], sizes = [1, 16], strides = [1, 1]} : vector<9x16xf32> to vector<1x16xf32>
    %2 = vector.extract_strided_slice %0 {offsets = [1, 0], sizes = [1, 16], strides = [1, 1]} : vector<9x16xf32> to vector<1x16xf32>
    %3 = vector.extract_strided_slice %0 {offsets = [2, 0], sizes = [1, 16], strides = [1, 1]} : vector<9x16xf32> to vector<1x16xf32>
    %4 = vector.extract_strided_slice %0 {offsets = [3, 0], sizes = [1, 16], strides = [1, 1]} : vector<9x16xf32> to vector<1x16xf32>
    %5 = vector.extract_strided_slice %0 {offsets = [4, 0], sizes = [1, 16], strides = [1, 1]} : vector<9x16xf32> to vector<1x16xf32>
    %6 = vector.extract_strided_slice %0 {offsets = [5, 0], sizes = [1, 16], strides = [1, 1]} : vector<9x16xf32> to vector<1x16xf32>
    %7 = vector.extract_strided_slice %0 {offsets = [6, 0], sizes = [1, 16], strides = [1, 1]} : vector<9x16xf32> to vector<1x16xf32>
    %8 = vector.extract_strided_slice %0 {offsets = [7, 0], sizes = [1, 16], strides = [1, 1]} : vector<9x16xf32> to vector<1x16xf32>
    %9 = vector.extract_strided_slice %0 {offsets = [8, 0], sizes = [1, 16], strides = [1, 1]} : vector<9x16xf32> to vector<1x16xf32>
    %c0_1 = arith.constant 0 : index
    %c0_2 = arith.constant 0 : index
    %10 = vector.load %arg1[%c0_1, %c0_2] : memref<64x8xbf16, #tpu.memory_space<vmem>>, vector<64x8xbf16>
    %c0_3 = arith.constant 0 : index
    %c0_4 = arith.constant 0 : index
    %11 = vector.load %arg3[%c0_3, %c0_4] : memref<8x16xbf16, #tpu.memory_space<vmem>>, vector<8x16xbf16>
    %cst = arith.constant dense<0.000000e+00> : vector<64x16xf32>
    %12 = tpu.matmul %10, %11, %cst {dimension_numbers = #tpu.dot_dimension_numbers<[1], [0], [0], [1], [0, 0, 1, 1], [], []>} : vector<64x8xbf16>, vector<8x16xbf16>, vector<64x16xf32> -> vector<64x16xf32>
    %13 = vector.broadcast %1 : vector<1x16xf32> to vector<64x16xf32>
    %14 = arith.addf %12, %13 : vector<64x16xf32>
    %cst_5 = arith.constant 0.000000e+00 : f32
    %15 = vector.broadcast %cst_5 : f32 to vector<64x16xf32>
    %16 = arith.maximumf %14, %15 : vector<64x16xf32>
    %17 = arith.truncf %16 : vector<64x16xf32> to vector<64x16xbf16>
    %c0_6 = arith.constant 0 : index
    %c0_7 = arith.constant 0 : index
    %18 = vector.load %arg4[%c0_6, %c0_7] : memref<16x16xbf16, #tpu.memory_space<vmem>>, vector<16x16xbf16>
    %cst_8 = arith.constant dense<0.000000e+00> : vector<64x16xf32>
    %19 = tpu.matmul %17, %18, %cst_8 {dimension_numbers = #tpu.dot_dimension_numbers<[1], [0], [0], [1], [0, 0, 1, 1], [], []>} : vector<64x16xbf16>, vector<16x16xbf16>, vector<64x16xf32> -> vector<64x16xf32>
    %20 = vector.broadcast %2 : vector<1x16xf32> to vector<64x16xf32>
    %21 = arith.addf %19, %20 : vector<64x16xf32>
    %cst_9 = arith.constant 0.000000e+00 : f32
    %22 = vector.broadcast %cst_9 : f32 to vector<64x16xf32>
    %23 = arith.maximumf %21, %22 : vector<64x16xf32>
    %cst_10 = arith.constant 0.000000e+00 : f32
    %24 = vector.broadcast %cst_10 : f32 to vector<64x16xf32>
    %25 = arith.cmpf oge, %23, %24 : vector<64x16xf32>
    %26 = vector.broadcast %3 : vector<1x16xf32> to vector<64x16xf32>
    %27 = arith.mulf %26, %23 : vector<64x16xf32>
    %28 = arith.select %25, %23, %27 : vector<64x16xi1>, vector<64x16xf32>
    %cst_11 = arith.constant dense<0.000000e+00> : vector<64xf32>
    %29 = vector.multi_reduction <add>, %28, %cst_11 [1] : vector<64x16xf32> to vector<64xf32>
    %30 = vector.shape_cast %29 : vector<64xf32> to vector<64x1xf32>
    %cst_12 = arith.constant 1.600000e+01 : f32
    %31 = vector.broadcast %cst_12 : f32 to vector<64x1xf32>
    %32 = arith.divf %30, %31 : vector<64x1xf32>
    %33 = vector.broadcast %32 : vector<64x1xf32> to vector<64x16xf32>
    %34 = arith.subf %28, %33 : vector<64x16xf32>
    %35 = arith.mulf %34, %34 : vector<64x16xf32>
    %cst_13 = arith.constant dense<0.000000e+00> : vector<64xf32>
    %36 = vector.multi_reduction <add>, %35, %cst_13 [1] : vector<64x16xf32> to vector<64xf32>
    %37 = vector.shape_cast %36 : vector<64xf32> to vector<64x1xf32>
    %cst_14 = arith.constant 1.600000e+01 : f32
    %38 = vector.broadcast %cst_14 : f32 to vector<64x1xf32>
    %39 = arith.divf %37, %38 : vector<64x1xf32>
    %40 = vector.broadcast %32 : vector<64x1xf32> to vector<64x16xf32>
    %41 = arith.subf %28, %40 : vector<64x16xf32>
    %cst_15 = arith.constant 9.99999993E-9 : f32
    %42 = vector.broadcast %cst_15 : f32 to vector<64x1xf32>
    %43 = arith.addf %39, %42 : vector<64x1xf32>
    %44 = math.rsqrt %43 : vector<64x1xf32>
    %45 = vector.broadcast %44 : vector<64x1xf32> to vector<64x16xf32>
    %46 = arith.mulf %41, %45 : vector<64x16xf32>
    %47 = vector.broadcast %4 : vector<1x16xf32> to vector<64x16xf32>
    %48 = arith.mulf %46, %47 : vector<64x16xf32>
    %49 = vector.broadcast %5 : vector<1x16xf32> to vector<64x16xf32>
    %50 = arith.addf %48, %49 : vector<64x16xf32>
    %51 = arith.truncf %50 : vector<64x16xf32> to vector<64x16xbf16>
    %c0_16 = arith.constant 0 : index
    %c0_17 = arith.constant 0 : index
    %52 = vector.load %arg5[%c0_16, %c0_17] : memref<16x16xbf16, #tpu.memory_space<vmem>>, vector<16x16xbf16>
    %cst_18 = arith.constant dense<0.000000e+00> : vector<64x16xf32>
    %53 = tpu.matmul %51, %52, %cst_18 {dimension_numbers = #tpu.dot_dimension_numbers<[1], [0], [0], [1], [0, 0, 1, 1], [], []>} : vector<64x16xbf16>, vector<16x16xbf16>, vector<64x16xf32> -> vector<64x16xf32>
    %c0_19 = arith.constant 0 : index
    %c0_20 = arith.constant 0 : index
    %54 = vector.load %arg2[%c0_19, %c0_20] : memref<64x16xbf16, #tpu.memory_space<vmem>>, vector<64x16xbf16>
    %c0_21 = arith.constant 0 : index
    %c0_22 = arith.constant 0 : index
    %55 = vector.load %arg6[%c0_21, %c0_22] : memref<16x16xbf16, #tpu.memory_space<vmem>>, vector<16x16xbf16>
    %cst_23 = arith.constant dense<0.000000e+00> : vector<64x16xf32>
    %56 = tpu.matmul %54, %55, %cst_23 {dimension_numbers = #tpu.dot_dimension_numbers<[1], [0], [0], [1], [0, 0, 1, 1], [], []>} : vector<64x16xbf16>, vector<16x16xbf16>, vector<64x16xf32> -> vector<64x16xf32>
    %57 = arith.addf %53, %56 : vector<64x16xf32>
    %58 = vector.broadcast %6 : vector<1x16xf32> to vector<64x16xf32>
    %59 = arith.addf %57, %58 : vector<64x16xf32>
    %cst_24 = arith.constant 0.000000e+00 : f32
    %60 = vector.broadcast %cst_24 : f32 to vector<64x16xf32>
    %61 = arith.cmpf oge, %59, %60 : vector<64x16xf32>
    %62 = vector.broadcast %7 : vector<1x16xf32> to vector<64x16xf32>
    %63 = arith.mulf %62, %59 : vector<64x16xf32>
    %64 = arith.select %61, %59, %63 : vector<64x16xi1>, vector<64x16xf32>
    %cst_25 = arith.constant dense<0.000000e+00> : vector<64xf32>
    %65 = vector.multi_reduction <add>, %64, %cst_25 [1] : vector<64x16xf32> to vector<64xf32>
    %66 = vector.shape_cast %65 : vector<64xf32> to vector<64x1xf32>
    %cst_26 = arith.constant 1.600000e+01 : f32
    %67 = vector.broadcast %cst_26 : f32 to vector<64x1xf32>
    %68 = arith.divf %66, %67 : vector<64x1xf32>
    %69 = vector.broadcast %68 : vector<64x1xf32> to vector<64x16xf32>
    %70 = arith.subf %64, %69 : vector<64x16xf32>
    %71 = arith.mulf %70, %70 : vector<64x16xf32>
    %cst_27 = arith.constant dense<0.000000e+00> : vector<64xf32>
    %72 = vector.multi_reduction <add>, %71, %cst_27 [1] : vector<64x16xf32> to vector<64xf32>
    %73 = vector.shape_cast %72 : vector<64xf32> to vector<64x1xf32>
    %cst_28 = arith.constant 1.600000e+01 : f32
    %74 = vector.broadcast %cst_28 : f32 to vector<64x1xf32>
    %75 = arith.divf %73, %74 : vector<64x1xf32>
    %76 = vector.broadcast %68 : vector<64x1xf32> to vector<64x16xf32>
    %77 = arith.subf %64, %76 : vector<64x16xf32>
    %cst_29 = arith.constant 9.99999993E-9 : f32
    %78 = vector.broadcast %cst_29 : f32 to vector<64x1xf32>
    %79 = arith.addf %75, %78 : vector<64x1xf32>
    %80 = math.rsqrt %79 : vector<64x1xf32>
    %81 = vector.broadcast %80 : vector<64x1xf32> to vector<64x16xf32>
    %82 = arith.mulf %77, %81 : vector<64x16xf32>
    %83 = vector.broadcast %8 : vector<1x16xf32> to vector<64x16xf32>
    %84 = arith.mulf %82, %83 : vector<64x16xf32>
    %85 = vector.broadcast %9 : vector<1x16xf32> to vector<64x16xf32>
    %86 = arith.addf %84, %85 : vector<64x16xf32>
    %87 = arith.addf %23, %86 : vector<64x16xf32>
    %c0_30 = arith.constant 0 : index
    %c0_31 = arith.constant 0 : index
    %88 = vector.load %arg8[%c0_30, %c0_31] : memref<64x16xf32, #tpu.memory_space<vmem>>, vector<64x16xf32>
    tpu.vector_store %arg8[%c0_30, %c0_31], %87 {strides = array<i32>} : memref<64x16xf32, #tpu.memory_space<vmem>>, vector<64x16xf32>,
    return
  }
  func.func @transform_0(%arg0: i32) -> (i32, i32) {
    %c0_i32 = arith.constant 0 : i32
    %c0_i32_0 = arith.constant 0 : i32
    return %arg0, %c0_i32 : i32, i32
  }
  func.func @transform_1(%arg0: i32) -> (i32, i32) {
    %c0_i32 = arith.constant 0 : i32
    %c0_i32_0 = arith.constant 0 : i32
    return %arg0, %c0_i32 : i32, i32
  }
  func.func @transform_2(%arg0: i32) -> (i32, i32) {
    %c0_i32 = arith.constant 0 : i32
    %c0_i32_0 = arith.constant 0 : i32
    %c0_i32_1 = arith.constant 0 : i32
    return %c0_i32, %c0_i32_0 : i32, i32
  }
  func.func @transform_3(%arg0: i32) -> (i32, i32) {
    %c0_i32 = arith.constant 0 : i32
    %c0_i32_0 = arith.constant 0 : i32
    %c0_i32_1 = arith.constant 0 : i32
    return %c0_i32, %c0_i32_0 : i32, i32
  }
  func.func @transform_4(%arg0: i32) -> (i32, i32) {
    %c0_i32 = arith.constant 0 : i32
    %c0_i32_0 = arith.constant 0 : i32
    %c0_i32_1 = arith.constant 0 : i32
    return %c0_i32, %c0_i32_0 : i32, i32
  }
  func.func @transform_5(%arg0: i32) -> (i32, i32) {
    %c0_i32 = arith.constant 0 : i32
    %c0_i32_0 = arith.constant 0 : i32
    %c0_i32_1 = arith.constant 0 : i32
    return %c0_i32, %c0_i32_0 : i32, i32
  }
  func.func @transform_6(%arg0: i32) -> (i32, i32) {
    %c0_i32 = arith.constant 0 : i32
    %c0_i32_0 = arith.constant 0 : i32
    %c0_i32_1 = arith.constant 0 : i32
    return %c0_i32, %c0_i32_0 : i32, i32
  }
  func.func @transform_7(%arg0: i32) -> (i32, i32) {
    %c0_i32 = arith.constant 0 : i32
    %c0_i32_0 = arith.constant 0 : i32
    return %arg0, %c0_i32 : i32, i32
  }
}

module attributes {stable_mosaic.version = 11 : i64} {
  func.func @_enc_level_kernel(%arg0: i32, %arg1: memref<30x128xbf16, #tpu.memory_space<vmem>>, %arg2: memref<30x16xbf16, #tpu.memory_space<vmem>>, %arg3: memref<128x16xbf16, #tpu.memory_space<vmem>>, %arg4: memref<16x16xbf16, #tpu.memory_space<vmem>>, %arg5: memref<16x16xbf16, #tpu.memory_space<vmem>>, %arg6: memref<16x16xbf16, #tpu.memory_space<vmem>>, %arg7: memref<9x16xf32, #tpu.memory_space<vmem>>, %arg8: memref<30x16xf32, #tpu.memory_space<vmem>>) attributes {dimension_semantics = [#tpu.dimension_semantics<parallel>], iteration_bounds = array<i64: 1>, scalar_prefetch = 0 : i64, scratch_operands = 0 : i64, tpu.core_type = #tpu.core_type<tc>, window_params = [{transform_indices = @transform_0, window_bounds = array<i64: 30, 128>}, {transform_indices = @transform_1, window_bounds = array<i64: 30, 16>}, {pipeline_mode = #tpu.pipeline_mode<synchronous>, transform_indices = @transform_2, window_bounds = array<i64: 128, 16>}, {pipeline_mode = #tpu.pipeline_mode<synchronous>, transform_indices = @transform_3, window_bounds = array<i64: 16, 16>}, {pipeline_mode = #tpu.pipeline_mode<synchronous>, transform_indices = @transform_4, window_bounds = array<i64: 16, 16>}, {pipeline_mode = #tpu.pipeline_mode<synchronous>, transform_indices = @transform_5, window_bounds = array<i64: 16, 16>}, {pipeline_mode = #tpu.pipeline_mode<synchronous>, transform_indices = @transform_6, window_bounds = array<i64: 9, 16>}, {transform_indices = @transform_7, window_bounds = array<i64: 30, 16>}]} {
    %c0 = arith.constant 0 : index
    %c0_0 = arith.constant 0 : index
    %0 = vector.load %arg7[%c0, %c0_0] : memref<9x16xf32, #tpu.memory_space<vmem>>, vector<9x16xf32>
    %1 = vector.extract_strided_slice %0 {offsets = [0, 0], sizes = [1, 16], strides = [1, 1]} : vector<9x16xf32> to vector<1x16xf32>
    %2 = vector.extract_strided_slice %0 {offsets = [1, 0], sizes = [1, 16], strides = [1, 1]} : vector<9x16xf32> to vector<1x16xf32>
    %3 = vector.extract_strided_slice %0 {offsets = [2, 0], sizes = [1, 16], strides = [1, 1]} : vector<9x16xf32> to vector<1x16xf32>
    %4 = vector.extract_strided_slice %0 {offsets = [3, 0], sizes = [1, 16], strides = [1, 1]} : vector<9x16xf32> to vector<1x16xf32>
    %5 = vector.extract_strided_slice %0 {offsets = [4, 0], sizes = [1, 16], strides = [1, 1]} : vector<9x16xf32> to vector<1x16xf32>
    %6 = vector.extract_strided_slice %0 {offsets = [5, 0], sizes = [1, 16], strides = [1, 1]} : vector<9x16xf32> to vector<1x16xf32>
    %7 = vector.extract_strided_slice %0 {offsets = [6, 0], sizes = [1, 16], strides = [1, 1]} : vector<9x16xf32> to vector<1x16xf32>
    %8 = vector.extract_strided_slice %0 {offsets = [7, 0], sizes = [1, 16], strides = [1, 1]} : vector<9x16xf32> to vector<1x16xf32>
    %9 = vector.extract_strided_slice %0 {offsets = [8, 0], sizes = [1, 16], strides = [1, 1]} : vector<9x16xf32> to vector<1x16xf32>
    %c0_1 = arith.constant 0 : index
    %c0_2 = arith.constant 0 : index
    %10 = vector.load %arg1[%c0_1, %c0_2] : memref<30x128xbf16, #tpu.memory_space<vmem>>, vector<30x128xbf16>
    %c0_3 = arith.constant 0 : index
    %c0_4 = arith.constant 0 : index
    %11 = vector.load %arg3[%c0_3, %c0_4] : memref<128x16xbf16, #tpu.memory_space<vmem>>, vector<128x16xbf16>
    %cst = arith.constant dense<0.000000e+00> : vector<30x16xf32>
    %12 = tpu.matmul %10, %11, %cst {dimension_numbers = #tpu.dot_dimension_numbers<[1], [0], [0], [1], [0, 0, 1, 1], [], []>} : vector<30x128xbf16>, vector<128x16xbf16>, vector<30x16xf32> -> vector<30x16xf32>
    %13 = vector.broadcast %1 : vector<1x16xf32> to vector<30x16xf32>
    %14 = arith.addf %12, %13 : vector<30x16xf32>
    %cst_5 = arith.constant 0.000000e+00 : f32
    %15 = vector.broadcast %cst_5 : f32 to vector<30x16xf32>
    %16 = arith.maximumf %14, %15 : vector<30x16xf32>
    %17 = arith.truncf %16 : vector<30x16xf32> to vector<30x16xbf16>
    %c0_6 = arith.constant 0 : index
    %c0_7 = arith.constant 0 : index
    %18 = vector.load %arg4[%c0_6, %c0_7] : memref<16x16xbf16, #tpu.memory_space<vmem>>, vector<16x16xbf16>
    %cst_8 = arith.constant dense<0.000000e+00> : vector<30x16xf32>
    %19 = tpu.matmul %17, %18, %cst_8 {dimension_numbers = #tpu.dot_dimension_numbers<[1], [0], [0], [1], [0, 0, 1, 1], [], []>} : vector<30x16xbf16>, vector<16x16xbf16>, vector<30x16xf32> -> vector<30x16xf32>
    %20 = vector.broadcast %2 : vector<1x16xf32> to vector<30x16xf32>
    %21 = arith.addf %19, %20 : vector<30x16xf32>
    %cst_9 = arith.constant 0.000000e+00 : f32
    %22 = vector.broadcast %cst_9 : f32 to vector<30x16xf32>
    %23 = arith.maximumf %21, %22 : vector<30x16xf32>
    %cst_10 = arith.constant 0.000000e+00 : f32
    %24 = vector.broadcast %cst_10 : f32 to vector<30x16xf32>
    %25 = arith.cmpf oge, %23, %24 : vector<30x16xf32>
    %26 = vector.broadcast %3 : vector<1x16xf32> to vector<30x16xf32>
    %27 = arith.mulf %26, %23 : vector<30x16xf32>
    %28 = arith.select %25, %23, %27 : vector<30x16xi1>, vector<30x16xf32>
    %cst_11 = arith.constant dense<0.000000e+00> : vector<30xf32>
    %29 = vector.multi_reduction <add>, %28, %cst_11 [1] : vector<30x16xf32> to vector<30xf32>
    %30 = vector.shape_cast %29 : vector<30xf32> to vector<30x1xf32>
    %cst_12 = arith.constant 1.600000e+01 : f32
    %31 = vector.broadcast %cst_12 : f32 to vector<30x1xf32>
    %32 = arith.divf %30, %31 : vector<30x1xf32>
    %33 = vector.broadcast %32 : vector<30x1xf32> to vector<30x16xf32>
    %34 = arith.subf %28, %33 : vector<30x16xf32>
    %35 = arith.mulf %34, %34 : vector<30x16xf32>
    %cst_13 = arith.constant dense<0.000000e+00> : vector<30xf32>
    %36 = vector.multi_reduction <add>, %35, %cst_13 [1] : vector<30x16xf32> to vector<30xf32>
    %37 = vector.shape_cast %36 : vector<30xf32> to vector<30x1xf32>
    %cst_14 = arith.constant 1.600000e+01 : f32
    %38 = vector.broadcast %cst_14 : f32 to vector<30x1xf32>
    %39 = arith.divf %37, %38 : vector<30x1xf32>
    %40 = vector.broadcast %32 : vector<30x1xf32> to vector<30x16xf32>
    %41 = arith.subf %28, %40 : vector<30x16xf32>
    %cst_15 = arith.constant 9.99999993E-9 : f32
    %42 = vector.broadcast %cst_15 : f32 to vector<30x1xf32>
    %43 = arith.addf %39, %42 : vector<30x1xf32>
    %44 = math.rsqrt %43 : vector<30x1xf32>
    %45 = vector.broadcast %44 : vector<30x1xf32> to vector<30x16xf32>
    %46 = arith.mulf %41, %45 : vector<30x16xf32>
    %47 = vector.broadcast %4 : vector<1x16xf32> to vector<30x16xf32>
    %48 = arith.mulf %46, %47 : vector<30x16xf32>
    %49 = vector.broadcast %5 : vector<1x16xf32> to vector<30x16xf32>
    %50 = arith.addf %48, %49 : vector<30x16xf32>
    %51 = arith.truncf %50 : vector<30x16xf32> to vector<30x16xbf16>
    %c0_16 = arith.constant 0 : index
    %c0_17 = arith.constant 0 : index
    %52 = vector.load %arg5[%c0_16, %c0_17] : memref<16x16xbf16, #tpu.memory_space<vmem>>, vector<16x16xbf16>
    %cst_18 = arith.constant dense<0.000000e+00> : vector<30x16xf32>
    %53 = tpu.matmul %51, %52, %cst_18 {dimension_numbers = #tpu.dot_dimension_numbers<[1], [0], [0], [1], [0, 0, 1, 1], [], []>} : vector<30x16xbf16>, vector<16x16xbf16>, vector<30x16xf32> -> vector<30x16xf32>
    %c0_19 = arith.constant 0 : index
    %c0_20 = arith.constant 0 : index
    %54 = vector.load %arg2[%c0_19, %c0_20] : memref<30x16xbf16, #tpu.memory_space<vmem>>, vector<30x16xbf16>
    %c0_21 = arith.constant 0 : index
    %c0_22 = arith.constant 0 : index
    %55 = vector.load %arg6[%c0_21, %c0_22] : memref<16x16xbf16, #tpu.memory_space<vmem>>, vector<16x16xbf16>
    %cst_23 = arith.constant dense<0.000000e+00> : vector<30x16xf32>
    %56 = tpu.matmul %54, %55, %cst_23 {dimension_numbers = #tpu.dot_dimension_numbers<[1], [0], [0], [1], [0, 0, 1, 1], [], []>} : vector<30x16xbf16>, vector<16x16xbf16>, vector<30x16xf32> -> vector<30x16xf32>
    %57 = arith.addf %53, %56 : vector<30x16xf32>
    %58 = vector.broadcast %6 : vector<1x16xf32> to vector<30x16xf32>
    %59 = arith.addf %57, %58 : vector<30x16xf32>
    %cst_24 = arith.constant 0.000000e+00 : f32
    %60 = vector.broadcast %cst_24 : f32 to vector<30x16xf32>
    %61 = arith.cmpf oge, %59, %60 : vector<30x16xf32>
    %62 = vector.broadcast %7 : vector<1x16xf32> to vector<30x16xf32>
    %63 = arith.mulf %62, %59 : vector<30x16xf32>
    %64 = arith.select %61, %59, %63 : vector<30x16xi1>, vector<30x16xf32>
    %cst_25 = arith.constant dense<0.000000e+00> : vector<30xf32>
    %65 = vector.multi_reduction <add>, %64, %cst_25 [1] : vector<30x16xf32> to vector<30xf32>
    %66 = vector.shape_cast %65 : vector<30xf32> to vector<30x1xf32>
    %cst_26 = arith.constant 1.600000e+01 : f32
    %67 = vector.broadcast %cst_26 : f32 to vector<30x1xf32>
    %68 = arith.divf %66, %67 : vector<30x1xf32>
    %69 = vector.broadcast %68 : vector<30x1xf32> to vector<30x16xf32>
    %70 = arith.subf %64, %69 : vector<30x16xf32>
    %71 = arith.mulf %70, %70 : vector<30x16xf32>
    %cst_27 = arith.constant dense<0.000000e+00> : vector<30xf32>
    %72 = vector.multi_reduction <add>, %71, %cst_27 [1] : vector<30x16xf32> to vector<30xf32>
    %73 = vector.shape_cast %72 : vector<30xf32> to vector<30x1xf32>
    %cst_28 = arith.constant 1.600000e+01 : f32
    %74 = vector.broadcast %cst_28 : f32 to vector<30x1xf32>
    %75 = arith.divf %73, %74 : vector<30x1xf32>
    %76 = vector.broadcast %68 : vector<30x1xf32> to vector<30x16xf32>
    %77 = arith.subf %64, %76 : vector<30x16xf32>
    %cst_29 = arith.constant 9.99999993E-9 : f32
    %78 = vector.broadcast %cst_29 : f32 to vector<30x1xf32>
    %79 = arith.addf %75, %78 : vector<30x1xf32>
    %80 = math.rsqrt %79 : vector<30x1xf32>
    %81 = vector.broadcast %80 : vector<30x1xf32> to vector<30x16xf32>
    %82 = arith.mulf %77, %81 : vector<30x16xf32>
    %83 = vector.broadcast %8 : vector<1x16xf32> to vector<30x16xf32>
    %84 = arith.mulf %82, %83 : vector<30x16xf32>
    %85 = vector.broadcast %9 : vector<1x16xf32> to vector<30x16xf32>
    %86 = arith.addf %84, %85 : vector<30x16xf32>
    %87 = arith.addf %23, %86 : vector<30x16xf32>
    %c0_30 = arith.constant 0 : index
    %c0_31 = arith.constant 0 : index
    %88 = vector.load %arg8[%c0_30, %c0_31] : memref<30x16xf32, #tpu.memory_space<vmem>>, vector<30x16xf32>
    tpu.vector_store %arg8[%c0_30, %c0_31], %87 {strides = array<i32>} : memref<30x16xf32, #tpu.memory_space<vmem>>, vector<30x16xf32>,
    return
  }
  func.func @transform_0(%arg0: i32) -> (i32, i32) {
    %c0_i32 = arith.constant 0 : i32
    %c0_i32_0 = arith.constant 0 : i32
    return %arg0, %c0_i32 : i32, i32
  }
  func.func @transform_1(%arg0: i32) -> (i32, i32) {
    %c0_i32 = arith.constant 0 : i32
    %c0_i32_0 = arith.constant 0 : i32
    return %arg0, %c0_i32 : i32, i32
  }
  func.func @transform_2(%arg0: i32) -> (i32, i32) {
    %c0_i32 = arith.constant 0 : i32
    %c0_i32_0 = arith.constant 0 : i32
    %c0_i32_1 = arith.constant 0 : i32
    return %c0_i32, %c0_i32_0 : i32, i32
  }
  func.func @transform_3(%arg0: i32) -> (i32, i32) {
    %c0_i32 = arith.constant 0 : i32
    %c0_i32_0 = arith.constant 0 : i32
    %c0_i32_1 = arith.constant 0 : i32
    return %c0_i32, %c0_i32_0 : i32, i32
  }
  func.func @transform_4(%arg0: i32) -> (i32, i32) {
    %c0_i32 = arith.constant 0 : i32
    %c0_i32_0 = arith.constant 0 : i32
    %c0_i32_1 = arith.constant 0 : i32
    return %c0_i32, %c0_i32_0 : i32, i32
  }
  func.func @transform_5(%arg0: i32) -> (i32, i32) {
    %c0_i32 = arith.constant 0 : i32
    %c0_i32_0 = arith.constant 0 : i32
    %c0_i32_1 = arith.constant 0 : i32
    return %c0_i32, %c0_i32_0 : i32, i32
  }
  func.func @transform_6(%arg0: i32) -> (i32, i32) {
    %c0_i32 = arith.constant 0 : i32
    %c0_i32_0 = arith.constant 0 : i32
    %c0_i32_1 = arith.constant 0 : i32
    return %c0_i32, %c0_i32_0 : i32, i32
  }
  func.func @transform_7(%arg0: i32) -> (i32, i32) {
    %c0_i32 = arith.constant 0 : i32
    %c0_i32_0 = arith.constant 0 : i32
    return %arg0, %c0_i32 : i32, i32
  }
}

module attributes {stable_mosaic.version = 11 : i64} {
  func.func @_lstm_dir_kernel(%arg0: i32, %arg1: memref<15x2x16xbf16, #tpu.memory_space<vmem>>, %arg2: memref<1x16x64xbf16, #tpu.memory_space<vmem>>, %arg3: memref<1x16x64xbf16, #tpu.memory_space<vmem>>, %arg4: memref<1x1x64xf32, #tpu.memory_space<vmem>>, %arg5: memref<1x15x2x16xf32, #tpu.memory_space<vmem>>) attributes {dimension_semantics = [#tpu.dimension_semantics<parallel>], iteration_bounds = array<i64: 2>, scalar_prefetch = 0 : i64, scratch_operands = 0 : i64, tpu.core_type = #tpu.core_type<tc>, window_params = [{pipeline_mode = #tpu.pipeline_mode<synchronous>, transform_indices = @transform_0, window_bounds = array<i64: 15, 2, 16>}, {transform_indices = @transform_1, window_bounds = array<i64: 1, 16, 64>}, {transform_indices = @transform_2, window_bounds = array<i64: 1, 16, 64>}, {transform_indices = @transform_3, window_bounds = array<i64: 1, 1, 64>}, {transform_indices = @transform_4, window_bounds = array<i64: 1, 15, 2, 16>}]} {
    %c0 = arith.constant 0 : index
    %c0_0 = arith.constant 0 : index
    %c0_1 = arith.constant 0 : index
    %0 = vector.load %arg2[%c0, %c0_0, %c0_1] : memref<1x16x64xbf16, #tpu.memory_space<vmem>>, vector<1x16x64xbf16>
    %1 = vector.shape_cast %0 : vector<1x16x64xbf16> to vector<16x64xbf16>
    %c0_2 = arith.constant 0 : index
    %c0_3 = arith.constant 0 : index
    %c0_4 = arith.constant 0 : index
    %2 = vector.load %arg3[%c0_2, %c0_3, %c0_4] : memref<1x16x64xbf16, #tpu.memory_space<vmem>>, vector<1x16x64xbf16>
    %3 = vector.shape_cast %2 : vector<1x16x64xbf16> to vector<16x64xbf16>
    %c0_5 = arith.constant 0 : index
    %c0_6 = arith.constant 0 : index
    %c0_7 = arith.constant 0 : index
    %4 = vector.load %arg4[%c0_5, %c0_6, %c0_7] : memref<1x1x64xf32, #tpu.memory_space<vmem>>, vector<1x1x64xf32>
    %5 = vector.shape_cast %4 : vector<1x1x64xf32> to vector<1x64xf32>
    %c0_i32 = arith.constant 0 : i32
    %6 = arith.cmpi eq, %arg0, %c0_i32 : i32
    %c0_i32_8 = arith.constant 0 : i32
    %c14_i32 = arith.constant 14 : i32
    %7 = arith.select %6, %c0_i32_8, %c14_i32 : i32
    %c0_i32_9 = arith.constant 0 : i32
    %8 = arith.cmpi eq, %arg0, %c0_i32_9 : i32
    %c1_i32 = arith.constant 1 : i32
    %c-1_i32 = arith.constant -1 : i32
    %9 = arith.select %8, %c1_i32, %c-1_i32 : i32
    %cst = arith.constant 0.000000e+00 : f32
    %10 = vector.broadcast %cst : f32 to vector<2x16xf32>
    %c0_i32_10 = arith.constant 0 : i32
    %11 = arith.muli %9, %c0_i32_10 : i32
    %12 = arith.addi %7, %11 : i32
    %13 = arith.index_cast %12 : i32 to index
    %c0_11 = arith.constant 0 : index
    %c0_12 = arith.constant 0 : index
    %14 = vector.load %arg1[%13, %c0_11, %c0_12] : memref<15x2x16xbf16, #tpu.memory_space<vmem>>, vector<1x2x16xbf16>
    %15 = vector.shape_cast %14 : vector<1x2x16xbf16> to vector<2x16xbf16>
    %cst_13 = arith.constant dense<0.000000e+00> : vector<2x64xf32>
    %16 = tpu.matmul %15, %1, %cst_13 {dimension_numbers = #tpu.dot_dimension_numbers<[1], [0], [0], [1], [0, 0, 1, 1], [], []>} : vector<2x16xbf16>, vector<16x64xbf16>, vector<2x64xf32> -> vector<2x64xf32>
    %17 = arith.truncf %10 : vector<2x16xf32> to vector<2x16xbf16>
    %cst_14 = arith.constant dense<0.000000e+00> : vector<2x64xf32>
    %18 = tpu.matmul %17, %3, %cst_14 {dimension_numbers = #tpu.dot_dimension_numbers<[1], [0], [0], [1], [0, 0, 1, 1], [], []>} : vector<2x16xbf16>, vector<16x64xbf16>, vector<2x64xf32> -> vector<2x64xf32>
    %19 = arith.addf %16, %18 : vector<2x64xf32>
    %20 = vector.broadcast %5 : vector<1x64xf32> to vector<2x64xf32>
    %21 = arith.addf %19, %20 : vector<2x64xf32>
    %22 = vector.extract_strided_slice %21 {offsets = [0, 0], sizes = [2, 16], strides = [1, 1]} : vector<2x64xf32> to vector<2x16xf32>
    %23 = arith.negf %22 : vector<2x16xf32>
    %24 = math.exp %23 : vector<2x16xf32>
    %cst_15 = arith.constant 1.000000e+00 : f32
    %25 = vector.broadcast %cst_15 : f32 to vector<2x16xf32>
    %26 = arith.addf %25, %24 : vector<2x16xf32>
    %27 = arith.divf %25, %26 : vector<2x16xf32>
    %28 = vector.extract_strided_slice %21 {offsets = [0, 16], sizes = [2, 16], strides = [1, 1]} : vector<2x64xf32> to vector<2x16xf32>
    %29 = arith.negf %28 : vector<2x16xf32>
    %30 = math.exp %29 : vector<2x16xf32>
    %cst_16 = arith.constant 1.000000e+00 : f32
    %31 = vector.broadcast %cst_16 : f32 to vector<2x16xf32>
    %32 = arith.addf %31, %30 : vector<2x16xf32>
    %33 = arith.divf %31, %32 : vector<2x16xf32>
    %34 = vector.extract_strided_slice %21 {offsets = [0, 32], sizes = [2, 16], strides = [1, 1]} : vector<2x64xf32> to vector<2x16xf32>
    %35 = math.tanh %34 : vector<2x16xf32>
    %36 = vector.extract_strided_slice %21 {offsets = [0, 48], sizes = [2, 16], strides = [1, 1]} : vector<2x64xf32> to vector<2x16xf32>
    %37 = arith.negf %36 : vector<2x16xf32>
    %38 = math.exp %37 : vector<2x16xf32>
    %cst_17 = arith.constant 1.000000e+00 : f32
    %39 = vector.broadcast %cst_17 : f32 to vector<2x16xf32>
    %40 = arith.addf %39, %38 : vector<2x16xf32>
    %41 = arith.divf %39, %40 : vector<2x16xf32>
    %42 = arith.mulf %33, %10 : vector<2x16xf32>
    %43 = arith.mulf %27, %35 : vector<2x16xf32>
    %44 = arith.addf %42, %43 : vector<2x16xf32>
    %45 = math.tanh %44 : vector<2x16xf32>
    %46 = arith.mulf %41, %45 : vector<2x16xf32>
    %c0_18 = arith.constant 0 : index
    %47 = arith.index_cast %12 : i32 to index
    %c0_19 = arith.constant 0 : index
    %c0_20 = arith.constant 0 : index
    %48 = vector.load %arg5[%c0_18, %47, %c0_19, %c0_20] : memref<1x15x2x16xf32, #tpu.memory_space<vmem>>, vector<1x1x2x16xf32>
    %49 = vector.shape_cast %48 : vector<1x1x2x16xf32> to vector<2x16xf32>
    %50 = vector.shape_cast %46 : vector<2x16xf32> to vector<1x1x2x16xf32>
    tpu.vector_store %arg5[%c0_18, %47, %c0_19, %c0_20], %50 {strides = array<i32>} : memref<1x15x2x16xf32, #tpu.memory_space<vmem>>, vector<1x1x2x16xf32>,
    %c1_i32_21 = arith.constant 1 : i32
    %51 = arith.muli %9, %c1_i32_21 : i32
    %52 = arith.addi %7, %51 : i32
    %53 = arith.index_cast %52 : i32 to index
    %c0_22 = arith.constant 0 : index
    %c0_23 = arith.constant 0 : index
    %54 = vector.load %arg1[%53, %c0_22, %c0_23] : memref<15x2x16xbf16, #tpu.memory_space<vmem>>, vector<1x2x16xbf16>
    %55 = vector.shape_cast %54 : vector<1x2x16xbf16> to vector<2x16xbf16>
    %cst_24 = arith.constant dense<0.000000e+00> : vector<2x64xf32>
    %56 = tpu.matmul %55, %1, %cst_24 {dimension_numbers = #tpu.dot_dimension_numbers<[1], [0], [0], [1], [0, 0, 1, 1], [], []>} : vector<2x16xbf16>, vector<16x64xbf16>, vector<2x64xf32> -> vector<2x64xf32>
    %57 = arith.truncf %46 : vector<2x16xf32> to vector<2x16xbf16>
    %cst_25 = arith.constant dense<0.000000e+00> : vector<2x64xf32>
    %58 = tpu.matmul %57, %3, %cst_25 {dimension_numbers = #tpu.dot_dimension_numbers<[1], [0], [0], [1], [0, 0, 1, 1], [], []>} : vector<2x16xbf16>, vector<16x64xbf16>, vector<2x64xf32> -> vector<2x64xf32>
    %59 = arith.addf %56, %58 : vector<2x64xf32>
    %60 = vector.broadcast %5 : vector<1x64xf32> to vector<2x64xf32>
    %61 = arith.addf %59, %60 : vector<2x64xf32>
    %62 = vector.extract_strided_slice %61 {offsets = [0, 0], sizes = [2, 16], strides = [1, 1]} : vector<2x64xf32> to vector<2x16xf32>
    %63 = arith.negf %62 : vector<2x16xf32>
    %64 = math.exp %63 : vector<2x16xf32>
    %cst_26 = arith.constant 1.000000e+00 : f32
    %65 = vector.broadcast %cst_26 : f32 to vector<2x16xf32>
    %66 = arith.addf %65, %64 : vector<2x16xf32>
    %67 = arith.divf %65, %66 : vector<2x16xf32>
    %68 = vector.extract_strided_slice %61 {offsets = [0, 16], sizes = [2, 16], strides = [1, 1]} : vector<2x64xf32> to vector<2x16xf32>
    %69 = arith.negf %68 : vector<2x16xf32>
    %70 = math.exp %69 : vector<2x16xf32>
    %cst_27 = arith.constant 1.000000e+00 : f32
    %71 = vector.broadcast %cst_27 : f32 to vector<2x16xf32>
    %72 = arith.addf %71, %70 : vector<2x16xf32>
    %73 = arith.divf %71, %72 : vector<2x16xf32>
    %74 = vector.extract_strided_slice %61 {offsets = [0, 32], sizes = [2, 16], strides = [1, 1]} : vector<2x64xf32> to vector<2x16xf32>
    %75 = math.tanh %74 : vector<2x16xf32>
    %76 = vector.extract_strided_slice %61 {offsets = [0, 48], sizes = [2, 16], strides = [1, 1]} : vector<2x64xf32> to vector<2x16xf32>
    %77 = arith.negf %76 : vector<2x16xf32>
    %78 = math.exp %77 : vector<2x16xf32>
    %cst_28 = arith.constant 1.000000e+00 : f32
    %79 = vector.broadcast %cst_28 : f32 to vector<2x16xf32>
    %80 = arith.addf %79, %78 : vector<2x16xf32>
    %81 = arith.divf %79, %80 : vector<2x16xf32>
    %82 = arith.mulf %73, %44 : vector<2x16xf32>
    %83 = arith.mulf %67, %75 : vector<2x16xf32>
    %84 = arith.addf %82, %83 : vector<2x16xf32>
    %85 = math.tanh %84 : vector<2x16xf32>
    %86 = arith.mulf %81, %85 : vector<2x16xf32>
    %c0_29 = arith.constant 0 : index
    %87 = arith.index_cast %52 : i32 to index
    %c0_30 = arith.constant 0 : index
    %c0_31 = arith.constant 0 : index
    %88 = vector.load %arg5[%c0_29, %87, %c0_30, %c0_31] : memref<1x15x2x16xf32, #tpu.memory_space<vmem>>, vector<1x1x2x16xf32>
    %89 = vector.shape_cast %88 : vector<1x1x2x16xf32> to vector<2x16xf32>
    %90 = vector.shape_cast %86 : vector<2x16xf32> to vector<1x1x2x16xf32>
    tpu.vector_store %arg5[%c0_29, %87, %c0_30, %c0_31], %90 {strides = array<i32>} : memref<1x15x2x16xf32, #tpu.memory_space<vmem>>, vector<1x1x2x16xf32>,
    %c2_i32 = arith.constant 2 : i32
    %91 = arith.muli %9, %c2_i32 : i32
    %92 = arith.addi %7, %91 : i32
    %93 = arith.index_cast %92 : i32 to index
    %c0_32 = arith.constant 0 : index
    %c0_33 = arith.constant 0 : index
    %94 = vector.load %arg1[%93, %c0_32, %c0_33] : memref<15x2x16xbf16, #tpu.memory_space<vmem>>, vector<1x2x16xbf16>
    %95 = vector.shape_cast %94 : vector<1x2x16xbf16> to vector<2x16xbf16>
    %cst_34 = arith.constant dense<0.000000e+00> : vector<2x64xf32>
    %96 = tpu.matmul %95, %1, %cst_34 {dimension_numbers = #tpu.dot_dimension_numbers<[1], [0], [0], [1], [0, 0, 1, 1], [], []>} : vector<2x16xbf16>, vector<16x64xbf16>, vector<2x64xf32> -> vector<2x64xf32>
    %97 = arith.truncf %86 : vector<2x16xf32> to vector<2x16xbf16>
    %cst_35 = arith.constant dense<0.000000e+00> : vector<2x64xf32>
    %98 = tpu.matmul %97, %3, %cst_35 {dimension_numbers = #tpu.dot_dimension_numbers<[1], [0], [0], [1], [0, 0, 1, 1], [], []>} : vector<2x16xbf16>, vector<16x64xbf16>, vector<2x64xf32> -> vector<2x64xf32>
    %99 = arith.addf %96, %98 : vector<2x64xf32>
    %100 = vector.broadcast %5 : vector<1x64xf32> to vector<2x64xf32>
    %101 = arith.addf %99, %100 : vector<2x64xf32>
    %102 = vector.extract_strided_slice %101 {offsets = [0, 0], sizes = [2, 16], strides = [1, 1]} : vector<2x64xf32> to vector<2x16xf32>
    %103 = arith.negf %102 : vector<2x16xf32>
    %104 = math.exp %103 : vector<2x16xf32>
    %cst_36 = arith.constant 1.000000e+00 : f32
    %105 = vector.broadcast %cst_36 : f32 to vector<2x16xf32>
    %106 = arith.addf %105, %104 : vector<2x16xf32>
    %107 = arith.divf %105, %106 : vector<2x16xf32>
    %108 = vector.extract_strided_slice %101 {offsets = [0, 16], sizes = [2, 16], strides = [1, 1]} : vector<2x64xf32> to vector<2x16xf32>
    %109 = arith.negf %108 : vector<2x16xf32>
    %110 = math.exp %109 : vector<2x16xf32>
    %cst_37 = arith.constant 1.000000e+00 : f32
    %111 = vector.broadcast %cst_37 : f32 to vector<2x16xf32>
    %112 = arith.addf %111, %110 : vector<2x16xf32>
    %113 = arith.divf %111, %112 : vector<2x16xf32>
    %114 = vector.extract_strided_slice %101 {offsets = [0, 32], sizes = [2, 16], strides = [1, 1]} : vector<2x64xf32> to vector<2x16xf32>
    %115 = math.tanh %114 : vector<2x16xf32>
    %116 = vector.extract_strided_slice %101 {offsets = [0, 48], sizes = [2, 16], strides = [1, 1]} : vector<2x64xf32> to vector<2x16xf32>
    %117 = arith.negf %116 : vector<2x16xf32>
    %118 = math.exp %117 : vector<2x16xf32>
    %cst_38 = arith.constant 1.000000e+00 : f32
    %119 = vector.broadcast %cst_38 : f32 to vector<2x16xf32>
    %120 = arith.addf %119, %118 : vector<2x16xf32>
    %121 = arith.divf %119, %120 : vector<2x16xf32>
    %122 = arith.mulf %113, %84 : vector<2x16xf32>
    %123 = arith.mulf %107, %115 : vector<2x16xf32>
    %124 = arith.addf %122, %123 : vector<2x16xf32>
    %125 = math.tanh %124 : vector<2x16xf32>
    %126 = arith.mulf %121, %125 : vector<2x16xf32>
    %c0_39 = arith.constant 0 : index
    %127 = arith.index_cast %92 : i32 to index
    %c0_40 = arith.constant 0 : index
    %c0_41 = arith.constant 0 : index
    %128 = vector.load %arg5[%c0_39, %127, %c0_40, %c0_41] : memref<1x15x2x16xf32, #tpu.memory_space<vmem>>, vector<1x1x2x16xf32>
    %129 = vector.shape_cast %128 : vector<1x1x2x16xf32> to vector<2x16xf32>
    %130 = vector.shape_cast %126 : vector<2x16xf32> to vector<1x1x2x16xf32>
    tpu.vector_store %arg5[%c0_39, %127, %c0_40, %c0_41], %130 {strides = array<i32>} : memref<1x15x2x16xf32, #tpu.memory_space<vmem>>, vector<1x1x2x16xf32>,
    %c3_i32 = arith.constant 3 : i32
    %131 = arith.muli %9, %c3_i32 : i32
    %132 = arith.addi %7, %131 : i32
    %133 = arith.index_cast %132 : i32 to index
    %c0_42 = arith.constant 0 : index
    %c0_43 = arith.constant 0 : index
    %134 = vector.load %arg1[%133, %c0_42, %c0_43] : memref<15x2x16xbf16, #tpu.memory_space<vmem>>, vector<1x2x16xbf16>
    %135 = vector.shape_cast %134 : vector<1x2x16xbf16> to vector<2x16xbf16>
    %cst_44 = arith.constant dense<0.000000e+00> : vector<2x64xf32>
    %136 = tpu.matmul %135, %1, %cst_44 {dimension_numbers = #tpu.dot_dimension_numbers<[1], [0], [0], [1], [0, 0, 1, 1], [], []>} : vector<2x16xbf16>, vector<16x64xbf16>, vector<2x64xf32> -> vector<2x64xf32>
    %137 = arith.truncf %126 : vector<2x16xf32> to vector<2x16xbf16>
    %cst_45 = arith.constant dense<0.000000e+00> : vector<2x64xf32>
    %138 = tpu.matmul %137, %3, %cst_45 {dimension_numbers = #tpu.dot_dimension_numbers<[1], [0], [0], [1], [0, 0, 1, 1], [], []>} : vector<2x16xbf16>, vector<16x64xbf16>, vector<2x64xf32> -> vector<2x64xf32>
    %139 = arith.addf %136, %138 : vector<2x64xf32>
    %140 = vector.broadcast %5 : vector<1x64xf32> to vector<2x64xf32>
    %141 = arith.addf %139, %140 : vector<2x64xf32>
    %142 = vector.extract_strided_slice %141 {offsets = [0, 0], sizes = [2, 16], strides = [1, 1]} : vector<2x64xf32> to vector<2x16xf32>
    %143 = arith.negf %142 : vector<2x16xf32>
    %144 = math.exp %143 : vector<2x16xf32>
    %cst_46 = arith.constant 1.000000e+00 : f32
    %145 = vector.broadcast %cst_46 : f32 to vector<2x16xf32>
    %146 = arith.addf %145, %144 : vector<2x16xf32>
    %147 = arith.divf %145, %146 : vector<2x16xf32>
    %148 = vector.extract_strided_slice %141 {offsets = [0, 16], sizes = [2, 16], strides = [1, 1]} : vector<2x64xf32> to vector<2x16xf32>
    %149 = arith.negf %148 : vector<2x16xf32>
    %150 = math.exp %149 : vector<2x16xf32>
    %cst_47 = arith.constant 1.000000e+00 : f32
    %151 = vector.broadcast %cst_47 : f32 to vector<2x16xf32>
    %152 = arith.addf %151, %150 : vector<2x16xf32>
    %153 = arith.divf %151, %152 : vector<2x16xf32>
    %154 = vector.extract_strided_slice %141 {offsets = [0, 32], sizes = [2, 16], strides = [1, 1]} : vector<2x64xf32> to vector<2x16xf32>
    %155 = math.tanh %154 : vector<2x16xf32>
    %156 = vector.extract_strided_slice %141 {offsets = [0, 48], sizes = [2, 16], strides = [1, 1]} : vector<2x64xf32> to vector<2x16xf32>
    %157 = arith.negf %156 : vector<2x16xf32>
    %158 = math.exp %157 : vector<2x16xf32>
    %cst_48 = arith.constant 1.000000e+00 : f32
    %159 = vector.broadcast %cst_48 : f32 to vector<2x16xf32>
    %160 = arith.addf %159, %158 : vector<2x16xf32>
    %161 = arith.divf %159, %160 : vector<2x16xf32>
    %162 = arith.mulf %153, %124 : vector<2x16xf32>
    %163 = arith.mulf %147, %155 : vector<2x16xf32>
    %164 = arith.addf %162, %163 : vector<2x16xf32>
    %165 = math.tanh %164 : vector<2x16xf32>
    %166 = arith.mulf %161, %165 : vector<2x16xf32>
    %c0_49 = arith.constant 0 : index
    %167 = arith.index_cast %132 : i32 to index
    %c0_50 = arith.constant 0 : index
    %c0_51 = arith.constant 0 : index
    %168 = vector.load %arg5[%c0_49, %167, %c0_50, %c0_51] : memref<1x15x2x16xf32, #tpu.memory_space<vmem>>, vector<1x1x2x16xf32>
    %169 = vector.shape_cast %168 : vector<1x1x2x16xf32> to vector<2x16xf32>
    %170 = vector.shape_cast %166 : vector<2x16xf32> to vector<1x1x2x16xf32>
    tpu.vector_store %arg5[%c0_49, %167, %c0_50, %c0_51], %170 {strides = array<i32>} : memref<1x15x2x16xf32, #tpu.memory_space<vmem>>, vector<1x1x2x16xf32>,
    %c4_i32 = arith.constant 4 : i32
    %171 = arith.muli %9, %c4_i32 : i32
    %172 = arith.addi %7, %171 : i32
    %173 = arith.index_cast %172 : i32 to index
    %c0_52 = arith.constant 0 : index
    %c0_53 = arith.constant 0 : index
    %174 = vector.load %arg1[%173, %c0_52, %c0_53] : memref<15x2x16xbf16, #tpu.memory_space<vmem>>, vector<1x2x16xbf16>
    %175 = vector.shape_cast %174 : vector<1x2x16xbf16> to vector<2x16xbf16>
    %cst_54 = arith.constant dense<0.000000e+00> : vector<2x64xf32>
    %176 = tpu.matmul %175, %1, %cst_54 {dimension_numbers = #tpu.dot_dimension_numbers<[1], [0], [0], [1], [0, 0, 1, 1], [], []>} : vector<2x16xbf16>, vector<16x64xbf16>, vector<2x64xf32> -> vector<2x64xf32>
    %177 = arith.truncf %166 : vector<2x16xf32> to vector<2x16xbf16>
    %cst_55 = arith.constant dense<0.000000e+00> : vector<2x64xf32>
    %178 = tpu.matmul %177, %3, %cst_55 {dimension_numbers = #tpu.dot_dimension_numbers<[1], [0], [0], [1], [0, 0, 1, 1], [], []>} : vector<2x16xbf16>, vector<16x64xbf16>, vector<2x64xf32> -> vector<2x64xf32>
    %179 = arith.addf %176, %178 : vector<2x64xf32>
    %180 = vector.broadcast %5 : vector<1x64xf32> to vector<2x64xf32>
    %181 = arith.addf %179, %180 : vector<2x64xf32>
    %182 = vector.extract_strided_slice %181 {offsets = [0, 0], sizes = [2, 16], strides = [1, 1]} : vector<2x64xf32> to vector<2x16xf32>
    %183 = arith.negf %182 : vector<2x16xf32>
    %184 = math.exp %183 : vector<2x16xf32>
    %cst_56 = arith.constant 1.000000e+00 : f32
    %185 = vector.broadcast %cst_56 : f32 to vector<2x16xf32>
    %186 = arith.addf %185, %184 : vector<2x16xf32>
    %187 = arith.divf %185, %186 : vector<2x16xf32>
    %188 = vector.extract_strided_slice %181 {offsets = [0, 16], sizes = [2, 16], strides = [1, 1]} : vector<2x64xf32> to vector<2x16xf32>
    %189 = arith.negf %188 : vector<2x16xf32>
    %190 = math.exp %189 : vector<2x16xf32>
    %cst_57 = arith.constant 1.000000e+00 : f32
    %191 = vector.broadcast %cst_57 : f32 to vector<2x16xf32>
    %192 = arith.addf %191, %190 : vector<2x16xf32>
    %193 = arith.divf %191, %192 : vector<2x16xf32>
    %194 = vector.extract_strided_slice %181 {offsets = [0, 32], sizes = [2, 16], strides = [1, 1]} : vector<2x64xf32> to vector<2x16xf32>
    %195 = math.tanh %194 : vector<2x16xf32>
    %196 = vector.extract_strided_slice %181 {offsets = [0, 48], sizes = [2, 16], strides = [1, 1]} : vector<2x64xf32> to vector<2x16xf32>
    %197 = arith.negf %196 : vector<2x16xf32>
    %198 = math.exp %197 : vector<2x16xf32>
    %cst_58 = arith.constant 1.000000e+00 : f32
    %199 = vector.broadcast %cst_58 : f32 to vector<2x16xf32>
    %200 = arith.addf %199, %198 : vector<2x16xf32>
    %201 = arith.divf %199, %200 : vector<2x16xf32>
    %202 = arith.mulf %193, %164 : vector<2x16xf32>
    %203 = arith.mulf %187, %195 : vector<2x16xf32>
    %204 = arith.addf %202, %203 : vector<2x16xf32>
    %205 = math.tanh %204 : vector<2x16xf32>
    %206 = arith.mulf %201, %205 : vector<2x16xf32>
    %c0_59 = arith.constant 0 : index
    %207 = arith.index_cast %172 : i32 to index
    %c0_60 = arith.constant 0 : index
    %c0_61 = arith.constant 0 : index
    %208 = vector.load %arg5[%c0_59, %207, %c0_60, %c0_61] : memref<1x15x2x16xf32, #tpu.memory_space<vmem>>, vector<1x1x2x16xf32>
    %209 = vector.shape_cast %208 : vector<1x1x2x16xf32> to vector<2x16xf32>
    %210 = vector.shape_cast %206 : vector<2x16xf32> to vector<1x1x2x16xf32>
    tpu.vector_store %arg5[%c0_59, %207, %c0_60, %c0_61], %210 {strides = array<i32>} : memref<1x15x2x16xf32, #tpu.memory_space<vmem>>, vector<1x1x2x16xf32>,
    %c5_i32 = arith.constant 5 : i32
    %211 = arith.muli %9, %c5_i32 : i32
    %212 = arith.addi %7, %211 : i32
    %213 = arith.index_cast %212 : i32 to index
    %c0_62 = arith.constant 0 : index
    %c0_63 = arith.constant 0 : index
    %214 = vector.load %arg1[%213, %c0_62, %c0_63] : memref<15x2x16xbf16, #tpu.memory_space<vmem>>, vector<1x2x16xbf16>
    %215 = vector.shape_cast %214 : vector<1x2x16xbf16> to vector<2x16xbf16>
    %cst_64 = arith.constant dense<0.000000e+00> : vector<2x64xf32>
    %216 = tpu.matmul %215, %1, %cst_64 {dimension_numbers = #tpu.dot_dimension_numbers<[1], [0], [0], [1], [0, 0, 1, 1], [], []>} : vector<2x16xbf16>, vector<16x64xbf16>, vector<2x64xf32> -> vector<2x64xf32>
    %217 = arith.truncf %206 : vector<2x16xf32> to vector<2x16xbf16>
    %cst_65 = arith.constant dense<0.000000e+00> : vector<2x64xf32>
    %218 = tpu.matmul %217, %3, %cst_65 {dimension_numbers = #tpu.dot_dimension_numbers<[1], [0], [0], [1], [0, 0, 1, 1], [], []>} : vector<2x16xbf16>, vector<16x64xbf16>, vector<2x64xf32> -> vector<2x64xf32>
    %219 = arith.addf %216, %218 : vector<2x64xf32>
    %220 = vector.broadcast %5 : vector<1x64xf32> to vector<2x64xf32>
    %221 = arith.addf %219, %220 : vector<2x64xf32>
    %222 = vector.extract_strided_slice %221 {offsets = [0, 0], sizes = [2, 16], strides = [1, 1]} : vector<2x64xf32> to vector<2x16xf32>
    %223 = arith.negf %222 : vector<2x16xf32>
    %224 = math.exp %223 : vector<2x16xf32>
    %cst_66 = arith.constant 1.000000e+00 : f32
    %225 = vector.broadcast %cst_66 : f32 to vector<2x16xf32>
    %226 = arith.addf %225, %224 : vector<2x16xf32>
    %227 = arith.divf %225, %226 : vector<2x16xf32>
    %228 = vector.extract_strided_slice %221 {offsets = [0, 16], sizes = [2, 16], strides = [1, 1]} : vector<2x64xf32> to vector<2x16xf32>
    %229 = arith.negf %228 : vector<2x16xf32>
    %230 = math.exp %229 : vector<2x16xf32>
    %cst_67 = arith.constant 1.000000e+00 : f32
    %231 = vector.broadcast %cst_67 : f32 to vector<2x16xf32>
    %232 = arith.addf %231, %230 : vector<2x16xf32>
    %233 = arith.divf %231, %232 : vector<2x16xf32>
    %234 = vector.extract_strided_slice %221 {offsets = [0, 32], sizes = [2, 16], strides = [1, 1]} : vector<2x64xf32> to vector<2x16xf32>
    %235 = math.tanh %234 : vector<2x16xf32>
    %236 = vector.extract_strided_slice %221 {offsets = [0, 48], sizes = [2, 16], strides = [1, 1]} : vector<2x64xf32> to vector<2x16xf32>
    %237 = arith.negf %236 : vector<2x16xf32>
    %238 = math.exp %237 : vector<2x16xf32>
    %cst_68 = arith.constant 1.000000e+00 : f32
    %239 = vector.broadcast %cst_68 : f32 to vector<2x16xf32>
    %240 = arith.addf %239, %238 : vector<2x16xf32>
    %241 = arith.divf %239, %240 : vector<2x16xf32>
    %242 = arith.mulf %233, %204 : vector<2x16xf32>
    %243 = arith.mulf %227, %235 : vector<2x16xf32>
    %244 = arith.addf %242, %243 : vector<2x16xf32>
    %245 = math.tanh %244 : vector<2x16xf32>
    %246 = arith.mulf %241, %245 : vector<2x16xf32>
    %c0_69 = arith.constant 0 : index
    %247 = arith.index_cast %212 : i32 to index
    %c0_70 = arith.constant 0 : index
    %c0_71 = arith.constant 0 : index
    %248 = vector.load %arg5[%c0_69, %247, %c0_70, %c0_71] : memref<1x15x2x16xf32, #tpu.memory_space<vmem>>, vector<1x1x2x16xf32>
    %249 = vector.shape_cast %248 : vector<1x1x2x16xf32> to vector<2x16xf32>
    %250 = vector.shape_cast %246 : vector<2x16xf32> to vector<1x1x2x16xf32>
    tpu.vector_store %arg5[%c0_69, %247, %c0_70, %c0_71], %250 {strides = array<i32>} : memref<1x15x2x16xf32, #tpu.memory_space<vmem>>, vector<1x1x2x16xf32>,
    %c6_i32 = arith.constant 6 : i32
    %251 = arith.muli %9, %c6_i32 : i32
    %252 = arith.addi %7, %251 : i32
    %253 = arith.index_cast %252 : i32 to index
    %c0_72 = arith.constant 0 : index
    %c0_73 = arith.constant 0 : index
    %254 = vector.load %arg1[%253, %c0_72, %c0_73] : memref<15x2x16xbf16, #tpu.memory_space<vmem>>, vector<1x2x16xbf16>
    %255 = vector.shape_cast %254 : vector<1x2x16xbf16> to vector<2x16xbf16>
    %cst_74 = arith.constant dense<0.000000e+00> : vector<2x64xf32>
    %256 = tpu.matmul %255, %1, %cst_74 {dimension_numbers = #tpu.dot_dimension_numbers<[1], [0], [0], [1], [0, 0, 1, 1], [], []>} : vector<2x16xbf16>, vector<16x64xbf16>, vector<2x64xf32> -> vector<2x64xf32>
    %257 = arith.truncf %246 : vector<2x16xf32> to vector<2x16xbf16>
    %cst_75 = arith.constant dense<0.000000e+00> : vector<2x64xf32>
    %258 = tpu.matmul %257, %3, %cst_75 {dimension_numbers = #tpu.dot_dimension_numbers<[1], [0], [0], [1], [0, 0, 1, 1], [], []>} : vector<2x16xbf16>, vector<16x64xbf16>, vector<2x64xf32> -> vector<2x64xf32>
    %259 = arith.addf %256, %258 : vector<2x64xf32>
    %260 = vector.broadcast %5 : vector<1x64xf32> to vector<2x64xf32>
    %261 = arith.addf %259, %260 : vector<2x64xf32>
    %262 = vector.extract_strided_slice %261 {offsets = [0, 0], sizes = [2, 16], strides = [1, 1]} : vector<2x64xf32> to vector<2x16xf32>
    %263 = arith.negf %262 : vector<2x16xf32>
    %264 = math.exp %263 : vector<2x16xf32>
    %cst_76 = arith.constant 1.000000e+00 : f32
    %265 = vector.broadcast %cst_76 : f32 to vector<2x16xf32>
    %266 = arith.addf %265, %264 : vector<2x16xf32>
    %267 = arith.divf %265, %266 : vector<2x16xf32>
    %268 = vector.extract_strided_slice %261 {offsets = [0, 16], sizes = [2, 16], strides = [1, 1]} : vector<2x64xf32> to vector<2x16xf32>
    %269 = arith.negf %268 : vector<2x16xf32>
    %270 = math.exp %269 : vector<2x16xf32>
    %cst_77 = arith.constant 1.000000e+00 : f32
    %271 = vector.broadcast %cst_77 : f32 to vector<2x16xf32>
    %272 = arith.addf %271, %270 : vector<2x16xf32>
    %273 = arith.divf %271, %272 : vector<2x16xf32>
    %274 = vector.extract_strided_slice %261 {offsets = [0, 32], sizes = [2, 16], strides = [1, 1]} : vector<2x64xf32> to vector<2x16xf32>
    %275 = math.tanh %274 : vector<2x16xf32>
    %276 = vector.extract_strided_slice %261 {offsets = [0, 48], sizes = [2, 16], strides = [1, 1]} : vector<2x64xf32> to vector<2x16xf32>
    %277 = arith.negf %276 : vector<2x16xf32>
    %278 = math.exp %277 : vector<2x16xf32>
    %cst_78 = arith.constant 1.000000e+00 : f32
    %279 = vector.broadcast %cst_78 : f32 to vector<2x16xf32>
    %280 = arith.addf %279, %278 : vector<2x16xf32>
    %281 = arith.divf %279, %280 : vector<2x16xf32>
    %282 = arith.mulf %273, %244 : vector<2x16xf32>
    %283 = arith.mulf %267, %275 : vector<2x16xf32>
    %284 = arith.addf %282, %283 : vector<2x16xf32>
    %285 = math.tanh %284 : vector<2x16xf32>
    %286 = arith.mulf %281, %285 : vector<2x16xf32>
    %c0_79 = arith.constant 0 : index
    %287 = arith.index_cast %252 : i32 to index
    %c0_80 = arith.constant 0 : index
    %c0_81 = arith.constant 0 : index
    %288 = vector.load %arg5[%c0_79, %287, %c0_80, %c0_81] : memref<1x15x2x16xf32, #tpu.memory_space<vmem>>, vector<1x1x2x16xf32>
    %289 = vector.shape_cast %288 : vector<1x1x2x16xf32> to vector<2x16xf32>
    %290 = vector.shape_cast %286 : vector<2x16xf32> to vector<1x1x2x16xf32>
    tpu.vector_store %arg5[%c0_79, %287, %c0_80, %c0_81], %290 {strides = array<i32>} : memref<1x15x2x16xf32, #tpu.memory_space<vmem>>, vector<1x1x2x16xf32>,
    %c7_i32 = arith.constant 7 : i32
    %291 = arith.muli %9, %c7_i32 : i32
    %292 = arith.addi %7, %291 : i32
    %293 = arith.index_cast %292 : i32 to index
    %c0_82 = arith.constant 0 : index
    %c0_83 = arith.constant 0 : index
    %294 = vector.load %arg1[%293, %c0_82, %c0_83] : memref<15x2x16xbf16, #tpu.memory_space<vmem>>, vector<1x2x16xbf16>
    %295 = vector.shape_cast %294 : vector<1x2x16xbf16> to vector<2x16xbf16>
    %cst_84 = arith.constant dense<0.000000e+00> : vector<2x64xf32>
    %296 = tpu.matmul %295, %1, %cst_84 {dimension_numbers = #tpu.dot_dimension_numbers<[1], [0], [0], [1], [0, 0, 1, 1], [], []>} : vector<2x16xbf16>, vector<16x64xbf16>, vector<2x64xf32> -> vector<2x64xf32>
    %297 = arith.truncf %286 : vector<2x16xf32> to vector<2x16xbf16>
    %cst_85 = arith.constant dense<0.000000e+00> : vector<2x64xf32>
    %298 = tpu.matmul %297, %3, %cst_85 {dimension_numbers = #tpu.dot_dimension_numbers<[1], [0], [0], [1], [0, 0, 1, 1], [], []>} : vector<2x16xbf16>, vector<16x64xbf16>, vector<2x64xf32> -> vector<2x64xf32>
    %299 = arith.addf %296, %298 : vector<2x64xf32>
    %300 = vector.broadcast %5 : vector<1x64xf32> to vector<2x64xf32>
    %301 = arith.addf %299, %300 : vector<2x64xf32>
    %302 = vector.extract_strided_slice %301 {offsets = [0, 0], sizes = [2, 16], strides = [1, 1]} : vector<2x64xf32> to vector<2x16xf32>
    %303 = arith.negf %302 : vector<2x16xf32>
    %304 = math.exp %303 : vector<2x16xf32>
    %cst_86 = arith.constant 1.000000e+00 : f32
    %305 = vector.broadcast %cst_86 : f32 to vector<2x16xf32>
    %306 = arith.addf %305, %304 : vector<2x16xf32>
    %307 = arith.divf %305, %306 : vector<2x16xf32>
    %308 = vector.extract_strided_slice %301 {offsets = [0, 16], sizes = [2, 16], strides = [1, 1]} : vector<2x64xf32> to vector<2x16xf32>
    %309 = arith.negf %308 : vector<2x16xf32>
    %310 = math.exp %309 : vector<2x16xf32>
    %cst_87 = arith.constant 1.000000e+00 : f32
    %311 = vector.broadcast %cst_87 : f32 to vector<2x16xf32>
    %312 = arith.addf %311, %310 : vector<2x16xf32>
    %313 = arith.divf %311, %312 : vector<2x16xf32>
    %314 = vector.extract_strided_slice %301 {offsets = [0, 32], sizes = [2, 16], strides = [1, 1]} : vector<2x64xf32> to vector<2x16xf32>
    %315 = math.tanh %314 : vector<2x16xf32>
    %316 = vector.extract_strided_slice %301 {offsets = [0, 48], sizes = [2, 16], strides = [1, 1]} : vector<2x64xf32> to vector<2x16xf32>
    %317 = arith.negf %316 : vector<2x16xf32>
    %318 = math.exp %317 : vector<2x16xf32>
    %cst_88 = arith.constant 1.000000e+00 : f32
    %319 = vector.broadcast %cst_88 : f32 to vector<2x16xf32>
    %320 = arith.addf %319, %318 : vector<2x16xf32>
    %321 = arith.divf %319, %320 : vector<2x16xf32>
    %322 = arith.mulf %313, %284 : vector<2x16xf32>
    %323 = arith.mulf %307, %315 : vector<2x16xf32>
    %324 = arith.addf %322, %323 : vector<2x16xf32>
    %325 = math.tanh %324 : vector<2x16xf32>
    %326 = arith.mulf %321, %325 : vector<2x16xf32>
    %c0_89 = arith.constant 0 : index
    %327 = arith.index_cast %292 : i32 to index
    %c0_90 = arith.constant 0 : index
    %c0_91 = arith.constant 0 : index
    %328 = vector.load %arg5[%c0_89, %327, %c0_90, %c0_91] : memref<1x15x2x16xf32, #tpu.memory_space<vmem>>, vector<1x1x2x16xf32>
    %329 = vector.shape_cast %328 : vector<1x1x2x16xf32> to vector<2x16xf32>
    %330 = vector.shape_cast %326 : vector<2x16xf32> to vector<1x1x2x16xf32>
    tpu.vector_store %arg5[%c0_89, %327, %c0_90, %c0_91], %330 {strides = array<i32>} : memref<1x15x2x16xf32, #tpu.memory_space<vmem>>, vector<1x1x2x16xf32>,
    %c8_i32 = arith.constant 8 : i32
    %331 = arith.muli %9, %c8_i32 : i32
    %332 = arith.addi %7, %331 : i32
    %333 = arith.index_cast %332 : i32 to index
    %c0_92 = arith.constant 0 : index
    %c0_93 = arith.constant 0 : index
    %334 = vector.load %arg1[%333, %c0_92, %c0_93] : memref<15x2x16xbf16, #tpu.memory_space<vmem>>, vector<1x2x16xbf16>
    %335 = vector.shape_cast %334 : vector<1x2x16xbf16> to vector<2x16xbf16>
    %cst_94 = arith.constant dense<0.000000e+00> : vector<2x64xf32>
    %336 = tpu.matmul %335, %1, %cst_94 {dimension_numbers = #tpu.dot_dimension_numbers<[1], [0], [0], [1], [0, 0, 1, 1], [], []>} : vector<2x16xbf16>, vector<16x64xbf16>, vector<2x64xf32> -> vector<2x64xf32>
    %337 = arith.truncf %326 : vector<2x16xf32> to vector<2x16xbf16>
    %cst_95 = arith.constant dense<0.000000e+00> : vector<2x64xf32>
    %338 = tpu.matmul %337, %3, %cst_95 {dimension_numbers = #tpu.dot_dimension_numbers<[1], [0], [0], [1], [0, 0, 1, 1], [], []>} : vector<2x16xbf16>, vector<16x64xbf16>, vector<2x64xf32> -> vector<2x64xf32>
    %339 = arith.addf %336, %338 : vector<2x64xf32>
    %340 = vector.broadcast %5 : vector<1x64xf32> to vector<2x64xf32>
    %341 = arith.addf %339, %340 : vector<2x64xf32>
    %342 = vector.extract_strided_slice %341 {offsets = [0, 0], sizes = [2, 16], strides = [1, 1]} : vector<2x64xf32> to vector<2x16xf32>
    %343 = arith.negf %342 : vector<2x16xf32>
    %344 = math.exp %343 : vector<2x16xf32>
    %cst_96 = arith.constant 1.000000e+00 : f32
    %345 = vector.broadcast %cst_96 : f32 to vector<2x16xf32>
    %346 = arith.addf %345, %344 : vector<2x16xf32>
    %347 = arith.divf %345, %346 : vector<2x16xf32>
    %348 = vector.extract_strided_slice %341 {offsets = [0, 16], sizes = [2, 16], strides = [1, 1]} : vector<2x64xf32> to vector<2x16xf32>
    %349 = arith.negf %348 : vector<2x16xf32>
    %350 = math.exp %349 : vector<2x16xf32>
    %cst_97 = arith.constant 1.000000e+00 : f32
    %351 = vector.broadcast %cst_97 : f32 to vector<2x16xf32>
    %352 = arith.addf %351, %350 : vector<2x16xf32>
    %353 = arith.divf %351, %352 : vector<2x16xf32>
    %354 = vector.extract_strided_slice %341 {offsets = [0, 32], sizes = [2, 16], strides = [1, 1]} : vector<2x64xf32> to vector<2x16xf32>
    %355 = math.tanh %354 : vector<2x16xf32>
    %356 = vector.extract_strided_slice %341 {offsets = [0, 48], sizes = [2, 16], strides = [1, 1]} : vector<2x64xf32> to vector<2x16xf32>
    %357 = arith.negf %356 : vector<2x16xf32>
    %358 = math.exp %357 : vector<2x16xf32>
    %cst_98 = arith.constant 1.000000e+00 : f32
    %359 = vector.broadcast %cst_98 : f32 to vector<2x16xf32>
    %360 = arith.addf %359, %358 : vector<2x16xf32>
    %361 = arith.divf %359, %360 : vector<2x16xf32>
    %362 = arith.mulf %353, %324 : vector<2x16xf32>
    %363 = arith.mulf %347, %355 : vector<2x16xf32>
    %364 = arith.addf %362, %363 : vector<2x16xf32>
    %365 = math.tanh %364 : vector<2x16xf32>
    %366 = arith.mulf %361, %365 : vector<2x16xf32>
    %c0_99 = arith.constant 0 : index
    %367 = arith.index_cast %332 : i32 to index
    %c0_100 = arith.constant 0 : index
    %c0_101 = arith.constant 0 : index
    %368 = vector.load %arg5[%c0_99, %367, %c0_100, %c0_101] : memref<1x15x2x16xf32, #tpu.memory_space<vmem>>, vector<1x1x2x16xf32>
    %369 = vector.shape_cast %368 : vector<1x1x2x16xf32> to vector<2x16xf32>
    %370 = vector.shape_cast %366 : vector<2x16xf32> to vector<1x1x2x16xf32>
    tpu.vector_store %arg5[%c0_99, %367, %c0_100, %c0_101], %370 {strides = array<i32>} : memref<1x15x2x16xf32, #tpu.memory_space<vmem>>, vector<1x1x2x16xf32>,
    %c9_i32 = arith.constant 9 : i32
    %371 = arith.muli %9, %c9_i32 : i32
    %372 = arith.addi %7, %371 : i32
    %373 = arith.index_cast %372 : i32 to index
    %c0_102 = arith.constant 0 : index
    %c0_103 = arith.constant 0 : index
    %374 = vector.load %arg1[%373, %c0_102, %c0_103] : memref<15x2x16xbf16, #tpu.memory_space<vmem>>, vector<1x2x16xbf16>
    %375 = vector.shape_cast %374 : vector<1x2x16xbf16> to vector<2x16xbf16>
    %cst_104 = arith.constant dense<0.000000e+00> : vector<2x64xf32>
    %376 = tpu.matmul %375, %1, %cst_104 {dimension_numbers = #tpu.dot_dimension_numbers<[1], [0], [0], [1], [0, 0, 1, 1], [], []>} : vector<2x16xbf16>, vector<16x64xbf16>, vector<2x64xf32> -> vector<2x64xf32>
    %377 = arith.truncf %366 : vector<2x16xf32> to vector<2x16xbf16>
    %cst_105 = arith.constant dense<0.000000e+00> : vector<2x64xf32>
    %378 = tpu.matmul %377, %3, %cst_105 {dimension_numbers = #tpu.dot_dimension_numbers<[1], [0], [0], [1], [0, 0, 1, 1], [], []>} : vector<2x16xbf16>, vector<16x64xbf16>, vector<2x64xf32> -> vector<2x64xf32>
    %379 = arith.addf %376, %378 : vector<2x64xf32>
    %380 = vector.broadcast %5 : vector<1x64xf32> to vector<2x64xf32>
    %381 = arith.addf %379, %380 : vector<2x64xf32>
    %382 = vector.extract_strided_slice %381 {offsets = [0, 0], sizes = [2, 16], strides = [1, 1]} : vector<2x64xf32> to vector<2x16xf32>
    %383 = arith.negf %382 : vector<2x16xf32>
    %384 = math.exp %383 : vector<2x16xf32>
    %cst_106 = arith.constant 1.000000e+00 : f32
    %385 = vector.broadcast %cst_106 : f32 to vector<2x16xf32>
    %386 = arith.addf %385, %384 : vector<2x16xf32>
    %387 = arith.divf %385, %386 : vector<2x16xf32>
    %388 = vector.extract_strided_slice %381 {offsets = [0, 16], sizes = [2, 16], strides = [1, 1]} : vector<2x64xf32> to vector<2x16xf32>
    %389 = arith.negf %388 : vector<2x16xf32>
    %390 = math.exp %389 : vector<2x16xf32>
    %cst_107 = arith.constant 1.000000e+00 : f32
    %391 = vector.broadcast %cst_107 : f32 to vector<2x16xf32>
    %392 = arith.addf %391, %390 : vector<2x16xf32>
    %393 = arith.divf %391, %392 : vector<2x16xf32>
    %394 = vector.extract_strided_slice %381 {offsets = [0, 32], sizes = [2, 16], strides = [1, 1]} : vector<2x64xf32> to vector<2x16xf32>
    %395 = math.tanh %394 : vector<2x16xf32>
    %396 = vector.extract_strided_slice %381 {offsets = [0, 48], sizes = [2, 16], strides = [1, 1]} : vector<2x64xf32> to vector<2x16xf32>
    %397 = arith.negf %396 : vector<2x16xf32>
    %398 = math.exp %397 : vector<2x16xf32>
    %cst_108 = arith.constant 1.000000e+00 : f32
    %399 = vector.broadcast %cst_108 : f32 to vector<2x16xf32>
    %400 = arith.addf %399, %398 : vector<2x16xf32>
    %401 = arith.divf %399, %400 : vector<2x16xf32>
    %402 = arith.mulf %393, %364 : vector<2x16xf32>
    %403 = arith.mulf %387, %395 : vector<2x16xf32>
    %404 = arith.addf %402, %403 : vector<2x16xf32>
    %405 = math.tanh %404 : vector<2x16xf32>
    %406 = arith.mulf %401, %405 : vector<2x16xf32>
    %c0_109 = arith.constant 0 : index
    %407 = arith.index_cast %372 : i32 to index
    %c0_110 = arith.constant 0 : index
    %c0_111 = arith.constant 0 : index
    %408 = vector.load %arg5[%c0_109, %407, %c0_110, %c0_111] : memref<1x15x2x16xf32, #tpu.memory_space<vmem>>, vector<1x1x2x16xf32>
    %409 = vector.shape_cast %408 : vector<1x1x2x16xf32> to vector<2x16xf32>
    %410 = vector.shape_cast %406 : vector<2x16xf32> to vector<1x1x2x16xf32>
    tpu.vector_store %arg5[%c0_109, %407, %c0_110, %c0_111], %410 {strides = array<i32>} : memref<1x15x2x16xf32, #tpu.memory_space<vmem>>, vector<1x1x2x16xf32>,
    %c10_i32 = arith.constant 10 : i32
    %411 = arith.muli %9, %c10_i32 : i32
    %412 = arith.addi %7, %411 : i32
    %413 = arith.index_cast %412 : i32 to index
    %c0_112 = arith.constant 0 : index
    %c0_113 = arith.constant 0 : index
    %414 = vector.load %arg1[%413, %c0_112, %c0_113] : memref<15x2x16xbf16, #tpu.memory_space<vmem>>, vector<1x2x16xbf16>
    %415 = vector.shape_cast %414 : vector<1x2x16xbf16> to vector<2x16xbf16>
    %cst_114 = arith.constant dense<0.000000e+00> : vector<2x64xf32>
    %416 = tpu.matmul %415, %1, %cst_114 {dimension_numbers = #tpu.dot_dimension_numbers<[1], [0], [0], [1], [0, 0, 1, 1], [], []>} : vector<2x16xbf16>, vector<16x64xbf16>, vector<2x64xf32> -> vector<2x64xf32>
    %417 = arith.truncf %406 : vector<2x16xf32> to vector<2x16xbf16>
    %cst_115 = arith.constant dense<0.000000e+00> : vector<2x64xf32>
    %418 = tpu.matmul %417, %3, %cst_115 {dimension_numbers = #tpu.dot_dimension_numbers<[1], [0], [0], [1], [0, 0, 1, 1], [], []>} : vector<2x16xbf16>, vector<16x64xbf16>, vector<2x64xf32> -> vector<2x64xf32>
    %419 = arith.addf %416, %418 : vector<2x64xf32>
    %420 = vector.broadcast %5 : vector<1x64xf32> to vector<2x64xf32>
    %421 = arith.addf %419, %420 : vector<2x64xf32>
    %422 = vector.extract_strided_slice %421 {offsets = [0, 0], sizes = [2, 16], strides = [1, 1]} : vector<2x64xf32> to vector<2x16xf32>
    %423 = arith.negf %422 : vector<2x16xf32>
    %424 = math.exp %423 : vector<2x16xf32>
    %cst_116 = arith.constant 1.000000e+00 : f32
    %425 = vector.broadcast %cst_116 : f32 to vector<2x16xf32>
    %426 = arith.addf %425, %424 : vector<2x16xf32>
    %427 = arith.divf %425, %426 : vector<2x16xf32>
    %428 = vector.extract_strided_slice %421 {offsets = [0, 16], sizes = [2, 16], strides = [1, 1]} : vector<2x64xf32> to vector<2x16xf32>
    %429 = arith.negf %428 : vector<2x16xf32>
    %430 = math.exp %429 : vector<2x16xf32>
    %cst_117 = arith.constant 1.000000e+00 : f32
    %431 = vector.broadcast %cst_117 : f32 to vector<2x16xf32>
    %432 = arith.addf %431, %430 : vector<2x16xf32>
    %433 = arith.divf %431, %432 : vector<2x16xf32>
    %434 = vector.extract_strided_slice %421 {offsets = [0, 32], sizes = [2, 16], strides = [1, 1]} : vector<2x64xf32> to vector<2x16xf32>
    %435 = math.tanh %434 : vector<2x16xf32>
    %436 = vector.extract_strided_slice %421 {offsets = [0, 48], sizes = [2, 16], strides = [1, 1]} : vector<2x64xf32> to vector<2x16xf32>
    %437 = arith.negf %436 : vector<2x16xf32>
    %438 = math.exp %437 : vector<2x16xf32>
    %cst_118 = arith.constant 1.000000e+00 : f32
    %439 = vector.broadcast %cst_118 : f32 to vector<2x16xf32>
    %440 = arith.addf %439, %438 : vector<2x16xf32>
    %441 = arith.divf %439, %440 : vector<2x16xf32>
    %442 = arith.mulf %433, %404 : vector<2x16xf32>
    %443 = arith.mulf %427, %435 : vector<2x16xf32>
    %444 = arith.addf %442, %443 : vector<2x16xf32>
    %445 = math.tanh %444 : vector<2x16xf32>
    %446 = arith.mulf %441, %445 : vector<2x16xf32>
    %c0_119 = arith.constant 0 : index
    %447 = arith.index_cast %412 : i32 to index
    %c0_120 = arith.constant 0 : index
    %c0_121 = arith.constant 0 : index
    %448 = vector.load %arg5[%c0_119, %447, %c0_120, %c0_121] : memref<1x15x2x16xf32, #tpu.memory_space<vmem>>, vector<1x1x2x16xf32>
    %449 = vector.shape_cast %448 : vector<1x1x2x16xf32> to vector<2x16xf32>
    %450 = vector.shape_cast %446 : vector<2x16xf32> to vector<1x1x2x16xf32>
    tpu.vector_store %arg5[%c0_119, %447, %c0_120, %c0_121], %450 {strides = array<i32>} : memref<1x15x2x16xf32, #tpu.memory_space<vmem>>, vector<1x1x2x16xf32>,
    %c11_i32 = arith.constant 11 : i32
    %451 = arith.muli %9, %c11_i32 : i32
    %452 = arith.addi %7, %451 : i32
    %453 = arith.index_cast %452 : i32 to index
    %c0_122 = arith.constant 0 : index
    %c0_123 = arith.constant 0 : index
    %454 = vector.load %arg1[%453, %c0_122, %c0_123] : memref<15x2x16xbf16, #tpu.memory_space<vmem>>, vector<1x2x16xbf16>
    %455 = vector.shape_cast %454 : vector<1x2x16xbf16> to vector<2x16xbf16>
    %cst_124 = arith.constant dense<0.000000e+00> : vector<2x64xf32>
    %456 = tpu.matmul %455, %1, %cst_124 {dimension_numbers = #tpu.dot_dimension_numbers<[1], [0], [0], [1], [0, 0, 1, 1], [], []>} : vector<2x16xbf16>, vector<16x64xbf16>, vector<2x64xf32> -> vector<2x64xf32>
    %457 = arith.truncf %446 : vector<2x16xf32> to vector<2x16xbf16>
    %cst_125 = arith.constant dense<0.000000e+00> : vector<2x64xf32>
    %458 = tpu.matmul %457, %3, %cst_125 {dimension_numbers = #tpu.dot_dimension_numbers<[1], [0], [0], [1], [0, 0, 1, 1], [], []>} : vector<2x16xbf16>, vector<16x64xbf16>, vector<2x64xf32> -> vector<2x64xf32>
    %459 = arith.addf %456, %458 : vector<2x64xf32>
    %460 = vector.broadcast %5 : vector<1x64xf32> to vector<2x64xf32>
    %461 = arith.addf %459, %460 : vector<2x64xf32>
    %462 = vector.extract_strided_slice %461 {offsets = [0, 0], sizes = [2, 16], strides = [1, 1]} : vector<2x64xf32> to vector<2x16xf32>
    %463 = arith.negf %462 : vector<2x16xf32>
    %464 = math.exp %463 : vector<2x16xf32>
    %cst_126 = arith.constant 1.000000e+00 : f32
    %465 = vector.broadcast %cst_126 : f32 to vector<2x16xf32>
    %466 = arith.addf %465, %464 : vector<2x16xf32>
    %467 = arith.divf %465, %466 : vector<2x16xf32>
    %468 = vector.extract_strided_slice %461 {offsets = [0, 16], sizes = [2, 16], strides = [1, 1]} : vector<2x64xf32> to vector<2x16xf32>
    %469 = arith.negf %468 : vector<2x16xf32>
    %470 = math.exp %469 : vector<2x16xf32>
    %cst_127 = arith.constant 1.000000e+00 : f32
    %471 = vector.broadcast %cst_127 : f32 to vector<2x16xf32>
    %472 = arith.addf %471, %470 : vector<2x16xf32>
    %473 = arith.divf %471, %472 : vector<2x16xf32>
    %474 = vector.extract_strided_slice %461 {offsets = [0, 32], sizes = [2, 16], strides = [1, 1]} : vector<2x64xf32> to vector<2x16xf32>
    %475 = math.tanh %474 : vector<2x16xf32>
    %476 = vector.extract_strided_slice %461 {offsets = [0, 48], sizes = [2, 16], strides = [1, 1]} : vector<2x64xf32> to vector<2x16xf32>
    %477 = arith.negf %476 : vector<2x16xf32>
    %478 = math.exp %477 : vector<2x16xf32>
    %cst_128 = arith.constant 1.000000e+00 : f32
    %479 = vector.broadcast %cst_128 : f32 to vector<2x16xf32>
    %480 = arith.addf %479, %478 : vector<2x16xf32>
    %481 = arith.divf %479, %480 : vector<2x16xf32>
    %482 = arith.mulf %473, %444 : vector<2x16xf32>
    %483 = arith.mulf %467, %475 : vector<2x16xf32>
    %484 = arith.addf %482, %483 : vector<2x16xf32>
    %485 = math.tanh %484 : vector<2x16xf32>
    %486 = arith.mulf %481, %485 : vector<2x16xf32>
    %c0_129 = arith.constant 0 : index
    %487 = arith.index_cast %452 : i32 to index
    %c0_130 = arith.constant 0 : index
    %c0_131 = arith.constant 0 : index
    %488 = vector.load %arg5[%c0_129, %487, %c0_130, %c0_131] : memref<1x15x2x16xf32, #tpu.memory_space<vmem>>, vector<1x1x2x16xf32>
    %489 = vector.shape_cast %488 : vector<1x1x2x16xf32> to vector<2x16xf32>
    %490 = vector.shape_cast %486 : vector<2x16xf32> to vector<1x1x2x16xf32>
    tpu.vector_store %arg5[%c0_129, %487, %c0_130, %c0_131], %490 {strides = array<i32>} : memref<1x15x2x16xf32, #tpu.memory_space<vmem>>, vector<1x1x2x16xf32>,
    %c12_i32 = arith.constant 12 : i32
    %491 = arith.muli %9, %c12_i32 : i32
    %492 = arith.addi %7, %491 : i32
    %493 = arith.index_cast %492 : i32 to index
    %c0_132 = arith.constant 0 : index
    %c0_133 = arith.constant 0 : index
    %494 = vector.load %arg1[%493, %c0_132, %c0_133] : memref<15x2x16xbf16, #tpu.memory_space<vmem>>, vector<1x2x16xbf16>
    %495 = vector.shape_cast %494 : vector<1x2x16xbf16> to vector<2x16xbf16>
    %cst_134 = arith.constant dense<0.000000e+00> : vector<2x64xf32>
    %496 = tpu.matmul %495, %1, %cst_134 {dimension_numbers = #tpu.dot_dimension_numbers<[1], [0], [0], [1], [0, 0, 1, 1], [], []>} : vector<2x16xbf16>, vector<16x64xbf16>, vector<2x64xf32> -> vector<2x64xf32>
    %497 = arith.truncf %486 : vector<2x16xf32> to vector<2x16xbf16>
    %cst_135 = arith.constant dense<0.000000e+00> : vector<2x64xf32>
    %498 = tpu.matmul %497, %3, %cst_135 {dimension_numbers = #tpu.dot_dimension_numbers<[1], [0], [0], [1], [0, 0, 1, 1], [], []>} : vector<2x16xbf16>, vector<16x64xbf16>, vector<2x64xf32> -> vector<2x64xf32>
    %499 = arith.addf %496, %498 : vector<2x64xf32>
    %500 = vector.broadcast %5 : vector<1x64xf32> to vector<2x64xf32>
    %501 = arith.addf %499, %500 : vector<2x64xf32>
    %502 = vector.extract_strided_slice %501 {offsets = [0, 0], sizes = [2, 16], strides = [1, 1]} : vector<2x64xf32> to vector<2x16xf32>
    %503 = arith.negf %502 : vector<2x16xf32>
    %504 = math.exp %503 : vector<2x16xf32>
    %cst_136 = arith.constant 1.000000e+00 : f32
    %505 = vector.broadcast %cst_136 : f32 to vector<2x16xf32>
    %506 = arith.addf %505, %504 : vector<2x16xf32>
    %507 = arith.divf %505, %506 : vector<2x16xf32>
    %508 = vector.extract_strided_slice %501 {offsets = [0, 16], sizes = [2, 16], strides = [1, 1]} : vector<2x64xf32> to vector<2x16xf32>
    %509 = arith.negf %508 : vector<2x16xf32>
    %510 = math.exp %509 : vector<2x16xf32>
    %cst_137 = arith.constant 1.000000e+00 : f32
    %511 = vector.broadcast %cst_137 : f32 to vector<2x16xf32>
    %512 = arith.addf %511, %510 : vector<2x16xf32>
    %513 = arith.divf %511, %512 : vector<2x16xf32>
    %514 = vector.extract_strided_slice %501 {offsets = [0, 32], sizes = [2, 16], strides = [1, 1]} : vector<2x64xf32> to vector<2x16xf32>
    %515 = math.tanh %514 : vector<2x16xf32>
    %516 = vector.extract_strided_slice %501 {offsets = [0, 48], sizes = [2, 16], strides = [1, 1]} : vector<2x64xf32> to vector<2x16xf32>
    %517 = arith.negf %516 : vector<2x16xf32>
    %518 = math.exp %517 : vector<2x16xf32>
    %cst_138 = arith.constant 1.000000e+00 : f32
    %519 = vector.broadcast %cst_138 : f32 to vector<2x16xf32>
    %520 = arith.addf %519, %518 : vector<2x16xf32>
    %521 = arith.divf %519, %520 : vector<2x16xf32>
    %522 = arith.mulf %513, %484 : vector<2x16xf32>
    %523 = arith.mulf %507, %515 : vector<2x16xf32>
    %524 = arith.addf %522, %523 : vector<2x16xf32>
    %525 = math.tanh %524 : vector<2x16xf32>
    %526 = arith.mulf %521, %525 : vector<2x16xf32>
    %c0_139 = arith.constant 0 : index
    %527 = arith.index_cast %492 : i32 to index
    %c0_140 = arith.constant 0 : index
    %c0_141 = arith.constant 0 : index
    %528 = vector.load %arg5[%c0_139, %527, %c0_140, %c0_141] : memref<1x15x2x16xf32, #tpu.memory_space<vmem>>, vector<1x1x2x16xf32>
    %529 = vector.shape_cast %528 : vector<1x1x2x16xf32> to vector<2x16xf32>
    %530 = vector.shape_cast %526 : vector<2x16xf32> to vector<1x1x2x16xf32>
    tpu.vector_store %arg5[%c0_139, %527, %c0_140, %c0_141], %530 {strides = array<i32>} : memref<1x15x2x16xf32, #tpu.memory_space<vmem>>, vector<1x1x2x16xf32>,
    %c13_i32 = arith.constant 13 : i32
    %531 = arith.muli %9, %c13_i32 : i32
    %532 = arith.addi %7, %531 : i32
    %533 = arith.index_cast %532 : i32 to index
    %c0_142 = arith.constant 0 : index
    %c0_143 = arith.constant 0 : index
    %534 = vector.load %arg1[%533, %c0_142, %c0_143] : memref<15x2x16xbf16, #tpu.memory_space<vmem>>, vector<1x2x16xbf16>
    %535 = vector.shape_cast %534 : vector<1x2x16xbf16> to vector<2x16xbf16>
    %cst_144 = arith.constant dense<0.000000e+00> : vector<2x64xf32>
    %536 = tpu.matmul %535, %1, %cst_144 {dimension_numbers = #tpu.dot_dimension_numbers<[1], [0], [0], [1], [0, 0, 1, 1], [], []>} : vector<2x16xbf16>, vector<16x64xbf16>, vector<2x64xf32> -> vector<2x64xf32>
    %537 = arith.truncf %526 : vector<2x16xf32> to vector<2x16xbf16>
    %cst_145 = arith.constant dense<0.000000e+00> : vector<2x64xf32>
    %538 = tpu.matmul %537, %3, %cst_145 {dimension_numbers = #tpu.dot_dimension_numbers<[1], [0], [0], [1], [0, 0, 1, 1], [], []>} : vector<2x16xbf16>, vector<16x64xbf16>, vector<2x64xf32> -> vector<2x64xf32>
    %539 = arith.addf %536, %538 : vector<2x64xf32>
    %540 = vector.broadcast %5 : vector<1x64xf32> to vector<2x64xf32>
    %541 = arith.addf %539, %540 : vector<2x64xf32>
    %542 = vector.extract_strided_slice %541 {offsets = [0, 0], sizes = [2, 16], strides = [1, 1]} : vector<2x64xf32> to vector<2x16xf32>
    %543 = arith.negf %542 : vector<2x16xf32>
    %544 = math.exp %543 : vector<2x16xf32>
    %cst_146 = arith.constant 1.000000e+00 : f32
    %545 = vector.broadcast %cst_146 : f32 to vector<2x16xf32>
    %546 = arith.addf %545, %544 : vector<2x16xf32>
    %547 = arith.divf %545, %546 : vector<2x16xf32>
    %548 = vector.extract_strided_slice %541 {offsets = [0, 16], sizes = [2, 16], strides = [1, 1]} : vector<2x64xf32> to vector<2x16xf32>
    %549 = arith.negf %548 : vector<2x16xf32>
    %550 = math.exp %549 : vector<2x16xf32>
    %cst_147 = arith.constant 1.000000e+00 : f32
    %551 = vector.broadcast %cst_147 : f32 to vector<2x16xf32>
    %552 = arith.addf %551, %550 : vector<2x16xf32>
    %553 = arith.divf %551, %552 : vector<2x16xf32>
    %554 = vector.extract_strided_slice %541 {offsets = [0, 32], sizes = [2, 16], strides = [1, 1]} : vector<2x64xf32> to vector<2x16xf32>
    %555 = math.tanh %554 : vector<2x16xf32>
    %556 = vector.extract_strided_slice %541 {offsets = [0, 48], sizes = [2, 16], strides = [1, 1]} : vector<2x64xf32> to vector<2x16xf32>
    %557 = arith.negf %556 : vector<2x16xf32>
    %558 = math.exp %557 : vector<2x16xf32>
    %cst_148 = arith.constant 1.000000e+00 : f32
    %559 = vector.broadcast %cst_148 : f32 to vector<2x16xf32>
    %560 = arith.addf %559, %558 : vector<2x16xf32>
    %561 = arith.divf %559, %560 : vector<2x16xf32>
    %562 = arith.mulf %553, %524 : vector<2x16xf32>
    %563 = arith.mulf %547, %555 : vector<2x16xf32>
    %564 = arith.addf %562, %563 : vector<2x16xf32>
    %565 = math.tanh %564 : vector<2x16xf32>
    %566 = arith.mulf %561, %565 : vector<2x16xf32>
    %c0_149 = arith.constant 0 : index
    %567 = arith.index_cast %532 : i32 to index
    %c0_150 = arith.constant 0 : index
    %c0_151 = arith.constant 0 : index
    %568 = vector.load %arg5[%c0_149, %567, %c0_150, %c0_151] : memref<1x15x2x16xf32, #tpu.memory_space<vmem>>, vector<1x1x2x16xf32>
    %569 = vector.shape_cast %568 : vector<1x1x2x16xf32> to vector<2x16xf32>
    %570 = vector.shape_cast %566 : vector<2x16xf32> to vector<1x1x2x16xf32>
    tpu.vector_store %arg5[%c0_149, %567, %c0_150, %c0_151], %570 {strides = array<i32>} : memref<1x15x2x16xf32, #tpu.memory_space<vmem>>, vector<1x1x2x16xf32>,
    %c14_i32_152 = arith.constant 14 : i32
    %571 = arith.muli %9, %c14_i32_152 : i32
    %572 = arith.addi %7, %571 : i32
    %573 = arith.index_cast %572 : i32 to index
    %c0_153 = arith.constant 0 : index
    %c0_154 = arith.constant 0 : index
    %574 = vector.load %arg1[%573, %c0_153, %c0_154] : memref<15x2x16xbf16, #tpu.memory_space<vmem>>, vector<1x2x16xbf16>
    %575 = vector.shape_cast %574 : vector<1x2x16xbf16> to vector<2x16xbf16>
    %cst_155 = arith.constant dense<0.000000e+00> : vector<2x64xf32>
    %576 = tpu.matmul %575, %1, %cst_155 {dimension_numbers = #tpu.dot_dimension_numbers<[1], [0], [0], [1], [0, 0, 1, 1], [], []>} : vector<2x16xbf16>, vector<16x64xbf16>, vector<2x64xf32> -> vector<2x64xf32>
    %577 = arith.truncf %566 : vector<2x16xf32> to vector<2x16xbf16>
    %cst_156 = arith.constant dense<0.000000e+00> : vector<2x64xf32>
    %578 = tpu.matmul %577, %3, %cst_156 {dimension_numbers = #tpu.dot_dimension_numbers<[1], [0], [0], [1], [0, 0, 1, 1], [], []>} : vector<2x16xbf16>, vector<16x64xbf16>, vector<2x64xf32> -> vector<2x64xf32>
    %579 = arith.addf %576, %578 : vector<2x64xf32>
    %580 = vector.broadcast %5 : vector<1x64xf32> to vector<2x64xf32>
    %581 = arith.addf %579, %580 : vector<2x64xf32>
    %582 = vector.extract_strided_slice %581 {offsets = [0, 0], sizes = [2, 16], strides = [1, 1]} : vector<2x64xf32> to vector<2x16xf32>
    %583 = arith.negf %582 : vector<2x16xf32>
    %584 = math.exp %583 : vector<2x16xf32>
    %cst_157 = arith.constant 1.000000e+00 : f32
    %585 = vector.broadcast %cst_157 : f32 to vector<2x16xf32>
    %586 = arith.addf %585, %584 : vector<2x16xf32>
    %587 = arith.divf %585, %586 : vector<2x16xf32>
    %588 = vector.extract_strided_slice %581 {offsets = [0, 16], sizes = [2, 16], strides = [1, 1]} : vector<2x64xf32> to vector<2x16xf32>
    %589 = arith.negf %588 : vector<2x16xf32>
    %590 = math.exp %589 : vector<2x16xf32>
    %cst_158 = arith.constant 1.000000e+00 : f32
    %591 = vector.broadcast %cst_158 : f32 to vector<2x16xf32>
    %592 = arith.addf %591, %590 : vector<2x16xf32>
    %593 = arith.divf %591, %592 : vector<2x16xf32>
    %594 = vector.extract_strided_slice %581 {offsets = [0, 32], sizes = [2, 16], strides = [1, 1]} : vector<2x64xf32> to vector<2x16xf32>
    %595 = math.tanh %594 : vector<2x16xf32>
    %596 = vector.extract_strided_slice %581 {offsets = [0, 48], sizes = [2, 16], strides = [1, 1]} : vector<2x64xf32> to vector<2x16xf32>
    %597 = arith.negf %596 : vector<2x16xf32>
    %598 = math.exp %597 : vector<2x16xf32>
    %cst_159 = arith.constant 1.000000e+00 : f32
    %599 = vector.broadcast %cst_159 : f32 to vector<2x16xf32>
    %600 = arith.addf %599, %598 : vector<2x16xf32>
    %601 = arith.divf %599, %600 : vector<2x16xf32>
    %602 = arith.mulf %593, %564 : vector<2x16xf32>
    %603 = arith.mulf %587, %595 : vector<2x16xf32>
    %604 = arith.addf %602, %603 : vector<2x16xf32>
    %605 = math.tanh %604 : vector<2x16xf32>
    %606 = arith.mulf %601, %605 : vector<2x16xf32>
    %c0_160 = arith.constant 0 : index
    %607 = arith.index_cast %572 : i32 to index
    %c0_161 = arith.constant 0 : index
    %c0_162 = arith.constant 0 : index
    %608 = vector.load %arg5[%c0_160, %607, %c0_161, %c0_162] : memref<1x15x2x16xf32, #tpu.memory_space<vmem>>, vector<1x1x2x16xf32>
    %609 = vector.shape_cast %608 : vector<1x1x2x16xf32> to vector<2x16xf32>
    %610 = vector.shape_cast %606 : vector<2x16xf32> to vector<1x1x2x16xf32>
    tpu.vector_store %arg5[%c0_160, %607, %c0_161, %c0_162], %610 {strides = array<i32>} : memref<1x15x2x16xf32, #tpu.memory_space<vmem>>, vector<1x1x2x16xf32>,
    %c15_i32 = arith.constant 15 : i32
    return
  }
  func.func @transform_0(%arg0: i32) -> (i32, i32, i32) {
    %c0_i32 = arith.constant 0 : i32
    %c0_i32_0 = arith.constant 0 : i32
    %c0_i32_1 = arith.constant 0 : i32
    %c0_i32_2 = arith.constant 0 : i32
    return %c0_i32, %c0_i32_0, %c0_i32_1 : i32, i32, i32
  }
  func.func @transform_1(%arg0: i32) -> (i32, i32, i32) {
    %c0_i32 = arith.constant 0 : i32
    %c0_i32_0 = arith.constant 0 : i32
    %c0_i32_1 = arith.constant 0 : i32
    return %arg0, %c0_i32, %c0_i32_0 : i32, i32, i32
  }
  func.func @transform_2(%arg0: i32) -> (i32, i32, i32) {
    %c0_i32 = arith.constant 0 : i32
    %c0_i32_0 = arith.constant 0 : i32
    %c0_i32_1 = arith.constant 0 : i32
    return %arg0, %c0_i32, %c0_i32_0 : i32, i32, i32
  }
  func.func @transform_3(%arg0: i32) -> (i32, i32, i32) {
    %c0_i32 = arith.constant 0 : i32
    %c0_i32_0 = arith.constant 0 : i32
    %c0_i32_1 = arith.constant 0 : i32
    return %arg0, %c0_i32, %c0_i32_0 : i32, i32, i32
  }
  func.func @transform_4(%arg0: i32) -> (i32, i32, i32, i32) {
    %c0_i32 = arith.constant 0 : i32
    %c0_i32_0 = arith.constant 0 : i32
    %c0_i32_1 = arith.constant 0 : i32
    %c0_i32_2 = arith.constant 0 : i32
    return %arg0, %c0_i32, %c0_i32_0, %c0_i32_1 : i32, i32, i32, i32
  }
}

module attributes {stable_mosaic.version = 11 : i64} {
  func.func @_lstm_dir_kernel(%arg0: i32, %arg1: memref<15x2x32xbf16, #tpu.memory_space<vmem>>, %arg2: memref<1x32x64xbf16, #tpu.memory_space<vmem>>, %arg3: memref<1x16x64xbf16, #tpu.memory_space<vmem>>, %arg4: memref<1x1x64xf32, #tpu.memory_space<vmem>>, %arg5: memref<1x15x2x16xf32, #tpu.memory_space<vmem>>) attributes {dimension_semantics = [#tpu.dimension_semantics<parallel>], iteration_bounds = array<i64: 2>, scalar_prefetch = 0 : i64, scratch_operands = 0 : i64, tpu.core_type = #tpu.core_type<tc>, window_params = [{pipeline_mode = #tpu.pipeline_mode<synchronous>, transform_indices = @transform_0, window_bounds = array<i64: 15, 2, 32>}, {transform_indices = @transform_1, window_bounds = array<i64: 1, 32, 64>}, {transform_indices = @transform_2, window_bounds = array<i64: 1, 16, 64>}, {transform_indices = @transform_3, window_bounds = array<i64: 1, 1, 64>}, {transform_indices = @transform_4, window_bounds = array<i64: 1, 15, 2, 16>}]} {
    %c0 = arith.constant 0 : index
    %c0_0 = arith.constant 0 : index
    %c0_1 = arith.constant 0 : index
    %0 = vector.load %arg2[%c0, %c0_0, %c0_1] : memref<1x32x64xbf16, #tpu.memory_space<vmem>>, vector<1x32x64xbf16>
    %1 = vector.shape_cast %0 : vector<1x32x64xbf16> to vector<32x64xbf16>
    %c0_2 = arith.constant 0 : index
    %c0_3 = arith.constant 0 : index
    %c0_4 = arith.constant 0 : index
    %2 = vector.load %arg3[%c0_2, %c0_3, %c0_4] : memref<1x16x64xbf16, #tpu.memory_space<vmem>>, vector<1x16x64xbf16>
    %3 = vector.shape_cast %2 : vector<1x16x64xbf16> to vector<16x64xbf16>
    %c0_5 = arith.constant 0 : index
    %c0_6 = arith.constant 0 : index
    %c0_7 = arith.constant 0 : index
    %4 = vector.load %arg4[%c0_5, %c0_6, %c0_7] : memref<1x1x64xf32, #tpu.memory_space<vmem>>, vector<1x1x64xf32>
    %5 = vector.shape_cast %4 : vector<1x1x64xf32> to vector<1x64xf32>
    %c0_i32 = arith.constant 0 : i32
    %6 = arith.cmpi eq, %arg0, %c0_i32 : i32
    %c0_i32_8 = arith.constant 0 : i32
    %c14_i32 = arith.constant 14 : i32
    %7 = arith.select %6, %c0_i32_8, %c14_i32 : i32
    %c0_i32_9 = arith.constant 0 : i32
    %8 = arith.cmpi eq, %arg0, %c0_i32_9 : i32
    %c1_i32 = arith.constant 1 : i32
    %c-1_i32 = arith.constant -1 : i32
    %9 = arith.select %8, %c1_i32, %c-1_i32 : i32
    %cst = arith.constant 0.000000e+00 : f32
    %10 = vector.broadcast %cst : f32 to vector<2x16xf32>
    %c0_i32_10 = arith.constant 0 : i32
    %11 = arith.muli %9, %c0_i32_10 : i32
    %12 = arith.addi %7, %11 : i32
    %13 = arith.index_cast %12 : i32 to index
    %c0_11 = arith.constant 0 : index
    %c0_12 = arith.constant 0 : index
    %14 = vector.load %arg1[%13, %c0_11, %c0_12] : memref<15x2x32xbf16, #tpu.memory_space<vmem>>, vector<1x2x32xbf16>
    %15 = vector.shape_cast %14 : vector<1x2x32xbf16> to vector<2x32xbf16>
    %cst_13 = arith.constant dense<0.000000e+00> : vector<2x64xf32>
    %16 = tpu.matmul %15, %1, %cst_13 {dimension_numbers = #tpu.dot_dimension_numbers<[1], [0], [0], [1], [0, 0, 1, 1], [], []>} : vector<2x32xbf16>, vector<32x64xbf16>, vector<2x64xf32> -> vector<2x64xf32>
    %17 = arith.truncf %10 : vector<2x16xf32> to vector<2x16xbf16>
    %cst_14 = arith.constant dense<0.000000e+00> : vector<2x64xf32>
    %18 = tpu.matmul %17, %3, %cst_14 {dimension_numbers = #tpu.dot_dimension_numbers<[1], [0], [0], [1], [0, 0, 1, 1], [], []>} : vector<2x16xbf16>, vector<16x64xbf16>, vector<2x64xf32> -> vector<2x64xf32>
    %19 = arith.addf %16, %18 : vector<2x64xf32>
    %20 = vector.broadcast %5 : vector<1x64xf32> to vector<2x64xf32>
    %21 = arith.addf %19, %20 : vector<2x64xf32>
    %22 = vector.extract_strided_slice %21 {offsets = [0, 0], sizes = [2, 16], strides = [1, 1]} : vector<2x64xf32> to vector<2x16xf32>
    %23 = arith.negf %22 : vector<2x16xf32>
    %24 = math.exp %23 : vector<2x16xf32>
    %cst_15 = arith.constant 1.000000e+00 : f32
    %25 = vector.broadcast %cst_15 : f32 to vector<2x16xf32>
    %26 = arith.addf %25, %24 : vector<2x16xf32>
    %27 = arith.divf %25, %26 : vector<2x16xf32>
    %28 = vector.extract_strided_slice %21 {offsets = [0, 16], sizes = [2, 16], strides = [1, 1]} : vector<2x64xf32> to vector<2x16xf32>
    %29 = arith.negf %28 : vector<2x16xf32>
    %30 = math.exp %29 : vector<2x16xf32>
    %cst_16 = arith.constant 1.000000e+00 : f32
    %31 = vector.broadcast %cst_16 : f32 to vector<2x16xf32>
    %32 = arith.addf %31, %30 : vector<2x16xf32>
    %33 = arith.divf %31, %32 : vector<2x16xf32>
    %34 = vector.extract_strided_slice %21 {offsets = [0, 32], sizes = [2, 16], strides = [1, 1]} : vector<2x64xf32> to vector<2x16xf32>
    %35 = math.tanh %34 : vector<2x16xf32>
    %36 = vector.extract_strided_slice %21 {offsets = [0, 48], sizes = [2, 16], strides = [1, 1]} : vector<2x64xf32> to vector<2x16xf32>
    %37 = arith.negf %36 : vector<2x16xf32>
    %38 = math.exp %37 : vector<2x16xf32>
    %cst_17 = arith.constant 1.000000e+00 : f32
    %39 = vector.broadcast %cst_17 : f32 to vector<2x16xf32>
    %40 = arith.addf %39, %38 : vector<2x16xf32>
    %41 = arith.divf %39, %40 : vector<2x16xf32>
    %42 = arith.mulf %33, %10 : vector<2x16xf32>
    %43 = arith.mulf %27, %35 : vector<2x16xf32>
    %44 = arith.addf %42, %43 : vector<2x16xf32>
    %45 = math.tanh %44 : vector<2x16xf32>
    %46 = arith.mulf %41, %45 : vector<2x16xf32>
    %c0_18 = arith.constant 0 : index
    %47 = arith.index_cast %12 : i32 to index
    %c0_19 = arith.constant 0 : index
    %c0_20 = arith.constant 0 : index
    %48 = vector.load %arg5[%c0_18, %47, %c0_19, %c0_20] : memref<1x15x2x16xf32, #tpu.memory_space<vmem>>, vector<1x1x2x16xf32>
    %49 = vector.shape_cast %48 : vector<1x1x2x16xf32> to vector<2x16xf32>
    %50 = vector.shape_cast %46 : vector<2x16xf32> to vector<1x1x2x16xf32>
    tpu.vector_store %arg5[%c0_18, %47, %c0_19, %c0_20], %50 {strides = array<i32>} : memref<1x15x2x16xf32, #tpu.memory_space<vmem>>, vector<1x1x2x16xf32>,
    %c1_i32_21 = arith.constant 1 : i32
    %51 = arith.muli %9, %c1_i32_21 : i32
    %52 = arith.addi %7, %51 : i32
    %53 = arith.index_cast %52 : i32 to index
    %c0_22 = arith.constant 0 : index
    %c0_23 = arith.constant 0 : index
    %54 = vector.load %arg1[%53, %c0_22, %c0_23] : memref<15x2x32xbf16, #tpu.memory_space<vmem>>, vector<1x2x32xbf16>
    %55 = vector.shape_cast %54 : vector<1x2x32xbf16> to vector<2x32xbf16>
    %cst_24 = arith.constant dense<0.000000e+00> : vector<2x64xf32>
    %56 = tpu.matmul %55, %1, %cst_24 {dimension_numbers = #tpu.dot_dimension_numbers<[1], [0], [0], [1], [0, 0, 1, 1], [], []>} : vector<2x32xbf16>, vector<32x64xbf16>, vector<2x64xf32> -> vector<2x64xf32>
    %57 = arith.truncf %46 : vector<2x16xf32> to vector<2x16xbf16>
    %cst_25 = arith.constant dense<0.000000e+00> : vector<2x64xf32>
    %58 = tpu.matmul %57, %3, %cst_25 {dimension_numbers = #tpu.dot_dimension_numbers<[1], [0], [0], [1], [0, 0, 1, 1], [], []>} : vector<2x16xbf16>, vector<16x64xbf16>, vector<2x64xf32> -> vector<2x64xf32>
    %59 = arith.addf %56, %58 : vector<2x64xf32>
    %60 = vector.broadcast %5 : vector<1x64xf32> to vector<2x64xf32>
    %61 = arith.addf %59, %60 : vector<2x64xf32>
    %62 = vector.extract_strided_slice %61 {offsets = [0, 0], sizes = [2, 16], strides = [1, 1]} : vector<2x64xf32> to vector<2x16xf32>
    %63 = arith.negf %62 : vector<2x16xf32>
    %64 = math.exp %63 : vector<2x16xf32>
    %cst_26 = arith.constant 1.000000e+00 : f32
    %65 = vector.broadcast %cst_26 : f32 to vector<2x16xf32>
    %66 = arith.addf %65, %64 : vector<2x16xf32>
    %67 = arith.divf %65, %66 : vector<2x16xf32>
    %68 = vector.extract_strided_slice %61 {offsets = [0, 16], sizes = [2, 16], strides = [1, 1]} : vector<2x64xf32> to vector<2x16xf32>
    %69 = arith.negf %68 : vector<2x16xf32>
    %70 = math.exp %69 : vector<2x16xf32>
    %cst_27 = arith.constant 1.000000e+00 : f32
    %71 = vector.broadcast %cst_27 : f32 to vector<2x16xf32>
    %72 = arith.addf %71, %70 : vector<2x16xf32>
    %73 = arith.divf %71, %72 : vector<2x16xf32>
    %74 = vector.extract_strided_slice %61 {offsets = [0, 32], sizes = [2, 16], strides = [1, 1]} : vector<2x64xf32> to vector<2x16xf32>
    %75 = math.tanh %74 : vector<2x16xf32>
    %76 = vector.extract_strided_slice %61 {offsets = [0, 48], sizes = [2, 16], strides = [1, 1]} : vector<2x64xf32> to vector<2x16xf32>
    %77 = arith.negf %76 : vector<2x16xf32>
    %78 = math.exp %77 : vector<2x16xf32>
    %cst_28 = arith.constant 1.000000e+00 : f32
    %79 = vector.broadcast %cst_28 : f32 to vector<2x16xf32>
    %80 = arith.addf %79, %78 : vector<2x16xf32>
    %81 = arith.divf %79, %80 : vector<2x16xf32>
    %82 = arith.mulf %73, %44 : vector<2x16xf32>
    %83 = arith.mulf %67, %75 : vector<2x16xf32>
    %84 = arith.addf %82, %83 : vector<2x16xf32>
    %85 = math.tanh %84 : vector<2x16xf32>
    %86 = arith.mulf %81, %85 : vector<2x16xf32>
    %c0_29 = arith.constant 0 : index
    %87 = arith.index_cast %52 : i32 to index
    %c0_30 = arith.constant 0 : index
    %c0_31 = arith.constant 0 : index
    %88 = vector.load %arg5[%c0_29, %87, %c0_30, %c0_31] : memref<1x15x2x16xf32, #tpu.memory_space<vmem>>, vector<1x1x2x16xf32>
    %89 = vector.shape_cast %88 : vector<1x1x2x16xf32> to vector<2x16xf32>
    %90 = vector.shape_cast %86 : vector<2x16xf32> to vector<1x1x2x16xf32>
    tpu.vector_store %arg5[%c0_29, %87, %c0_30, %c0_31], %90 {strides = array<i32>} : memref<1x15x2x16xf32, #tpu.memory_space<vmem>>, vector<1x1x2x16xf32>,
    %c2_i32 = arith.constant 2 : i32
    %91 = arith.muli %9, %c2_i32 : i32
    %92 = arith.addi %7, %91 : i32
    %93 = arith.index_cast %92 : i32 to index
    %c0_32 = arith.constant 0 : index
    %c0_33 = arith.constant 0 : index
    %94 = vector.load %arg1[%93, %c0_32, %c0_33] : memref<15x2x32xbf16, #tpu.memory_space<vmem>>, vector<1x2x32xbf16>
    %95 = vector.shape_cast %94 : vector<1x2x32xbf16> to vector<2x32xbf16>
    %cst_34 = arith.constant dense<0.000000e+00> : vector<2x64xf32>
    %96 = tpu.matmul %95, %1, %cst_34 {dimension_numbers = #tpu.dot_dimension_numbers<[1], [0], [0], [1], [0, 0, 1, 1], [], []>} : vector<2x32xbf16>, vector<32x64xbf16>, vector<2x64xf32> -> vector<2x64xf32>
    %97 = arith.truncf %86 : vector<2x16xf32> to vector<2x16xbf16>
    %cst_35 = arith.constant dense<0.000000e+00> : vector<2x64xf32>
    %98 = tpu.matmul %97, %3, %cst_35 {dimension_numbers = #tpu.dot_dimension_numbers<[1], [0], [0], [1], [0, 0, 1, 1], [], []>} : vector<2x16xbf16>, vector<16x64xbf16>, vector<2x64xf32> -> vector<2x64xf32>
    %99 = arith.addf %96, %98 : vector<2x64xf32>
    %100 = vector.broadcast %5 : vector<1x64xf32> to vector<2x64xf32>
    %101 = arith.addf %99, %100 : vector<2x64xf32>
    %102 = vector.extract_strided_slice %101 {offsets = [0, 0], sizes = [2, 16], strides = [1, 1]} : vector<2x64xf32> to vector<2x16xf32>
    %103 = arith.negf %102 : vector<2x16xf32>
    %104 = math.exp %103 : vector<2x16xf32>
    %cst_36 = arith.constant 1.000000e+00 : f32
    %105 = vector.broadcast %cst_36 : f32 to vector<2x16xf32>
    %106 = arith.addf %105, %104 : vector<2x16xf32>
    %107 = arith.divf %105, %106 : vector<2x16xf32>
    %108 = vector.extract_strided_slice %101 {offsets = [0, 16], sizes = [2, 16], strides = [1, 1]} : vector<2x64xf32> to vector<2x16xf32>
    %109 = arith.negf %108 : vector<2x16xf32>
    %110 = math.exp %109 : vector<2x16xf32>
    %cst_37 = arith.constant 1.000000e+00 : f32
    %111 = vector.broadcast %cst_37 : f32 to vector<2x16xf32>
    %112 = arith.addf %111, %110 : vector<2x16xf32>
    %113 = arith.divf %111, %112 : vector<2x16xf32>
    %114 = vector.extract_strided_slice %101 {offsets = [0, 32], sizes = [2, 16], strides = [1, 1]} : vector<2x64xf32> to vector<2x16xf32>
    %115 = math.tanh %114 : vector<2x16xf32>
    %116 = vector.extract_strided_slice %101 {offsets = [0, 48], sizes = [2, 16], strides = [1, 1]} : vector<2x64xf32> to vector<2x16xf32>
    %117 = arith.negf %116 : vector<2x16xf32>
    %118 = math.exp %117 : vector<2x16xf32>
    %cst_38 = arith.constant 1.000000e+00 : f32
    %119 = vector.broadcast %cst_38 : f32 to vector<2x16xf32>
    %120 = arith.addf %119, %118 : vector<2x16xf32>
    %121 = arith.divf %119, %120 : vector<2x16xf32>
    %122 = arith.mulf %113, %84 : vector<2x16xf32>
    %123 = arith.mulf %107, %115 : vector<2x16xf32>
    %124 = arith.addf %122, %123 : vector<2x16xf32>
    %125 = math.tanh %124 : vector<2x16xf32>
    %126 = arith.mulf %121, %125 : vector<2x16xf32>
    %c0_39 = arith.constant 0 : index
    %127 = arith.index_cast %92 : i32 to index
    %c0_40 = arith.constant 0 : index
    %c0_41 = arith.constant 0 : index
    %128 = vector.load %arg5[%c0_39, %127, %c0_40, %c0_41] : memref<1x15x2x16xf32, #tpu.memory_space<vmem>>, vector<1x1x2x16xf32>
    %129 = vector.shape_cast %128 : vector<1x1x2x16xf32> to vector<2x16xf32>
    %130 = vector.shape_cast %126 : vector<2x16xf32> to vector<1x1x2x16xf32>
    tpu.vector_store %arg5[%c0_39, %127, %c0_40, %c0_41], %130 {strides = array<i32>} : memref<1x15x2x16xf32, #tpu.memory_space<vmem>>, vector<1x1x2x16xf32>,
    %c3_i32 = arith.constant 3 : i32
    %131 = arith.muli %9, %c3_i32 : i32
    %132 = arith.addi %7, %131 : i32
    %133 = arith.index_cast %132 : i32 to index
    %c0_42 = arith.constant 0 : index
    %c0_43 = arith.constant 0 : index
    %134 = vector.load %arg1[%133, %c0_42, %c0_43] : memref<15x2x32xbf16, #tpu.memory_space<vmem>>, vector<1x2x32xbf16>
    %135 = vector.shape_cast %134 : vector<1x2x32xbf16> to vector<2x32xbf16>
    %cst_44 = arith.constant dense<0.000000e+00> : vector<2x64xf32>
    %136 = tpu.matmul %135, %1, %cst_44 {dimension_numbers = #tpu.dot_dimension_numbers<[1], [0], [0], [1], [0, 0, 1, 1], [], []>} : vector<2x32xbf16>, vector<32x64xbf16>, vector<2x64xf32> -> vector<2x64xf32>
    %137 = arith.truncf %126 : vector<2x16xf32> to vector<2x16xbf16>
    %cst_45 = arith.constant dense<0.000000e+00> : vector<2x64xf32>
    %138 = tpu.matmul %137, %3, %cst_45 {dimension_numbers = #tpu.dot_dimension_numbers<[1], [0], [0], [1], [0, 0, 1, 1], [], []>} : vector<2x16xbf16>, vector<16x64xbf16>, vector<2x64xf32> -> vector<2x64xf32>
    %139 = arith.addf %136, %138 : vector<2x64xf32>
    %140 = vector.broadcast %5 : vector<1x64xf32> to vector<2x64xf32>
    %141 = arith.addf %139, %140 : vector<2x64xf32>
    %142 = vector.extract_strided_slice %141 {offsets = [0, 0], sizes = [2, 16], strides = [1, 1]} : vector<2x64xf32> to vector<2x16xf32>
    %143 = arith.negf %142 : vector<2x16xf32>
    %144 = math.exp %143 : vector<2x16xf32>
    %cst_46 = arith.constant 1.000000e+00 : f32
    %145 = vector.broadcast %cst_46 : f32 to vector<2x16xf32>
    %146 = arith.addf %145, %144 : vector<2x16xf32>
    %147 = arith.divf %145, %146 : vector<2x16xf32>
    %148 = vector.extract_strided_slice %141 {offsets = [0, 16], sizes = [2, 16], strides = [1, 1]} : vector<2x64xf32> to vector<2x16xf32>
    %149 = arith.negf %148 : vector<2x16xf32>
    %150 = math.exp %149 : vector<2x16xf32>
    %cst_47 = arith.constant 1.000000e+00 : f32
    %151 = vector.broadcast %cst_47 : f32 to vector<2x16xf32>
    %152 = arith.addf %151, %150 : vector<2x16xf32>
    %153 = arith.divf %151, %152 : vector<2x16xf32>
    %154 = vector.extract_strided_slice %141 {offsets = [0, 32], sizes = [2, 16], strides = [1, 1]} : vector<2x64xf32> to vector<2x16xf32>
    %155 = math.tanh %154 : vector<2x16xf32>
    %156 = vector.extract_strided_slice %141 {offsets = [0, 48], sizes = [2, 16], strides = [1, 1]} : vector<2x64xf32> to vector<2x16xf32>
    %157 = arith.negf %156 : vector<2x16xf32>
    %158 = math.exp %157 : vector<2x16xf32>
    %cst_48 = arith.constant 1.000000e+00 : f32
    %159 = vector.broadcast %cst_48 : f32 to vector<2x16xf32>
    %160 = arith.addf %159, %158 : vector<2x16xf32>
    %161 = arith.divf %159, %160 : vector<2x16xf32>
    %162 = arith.mulf %153, %124 : vector<2x16xf32>
    %163 = arith.mulf %147, %155 : vector<2x16xf32>
    %164 = arith.addf %162, %163 : vector<2x16xf32>
    %165 = math.tanh %164 : vector<2x16xf32>
    %166 = arith.mulf %161, %165 : vector<2x16xf32>
    %c0_49 = arith.constant 0 : index
    %167 = arith.index_cast %132 : i32 to index
    %c0_50 = arith.constant 0 : index
    %c0_51 = arith.constant 0 : index
    %168 = vector.load %arg5[%c0_49, %167, %c0_50, %c0_51] : memref<1x15x2x16xf32, #tpu.memory_space<vmem>>, vector<1x1x2x16xf32>
    %169 = vector.shape_cast %168 : vector<1x1x2x16xf32> to vector<2x16xf32>
    %170 = vector.shape_cast %166 : vector<2x16xf32> to vector<1x1x2x16xf32>
    tpu.vector_store %arg5[%c0_49, %167, %c0_50, %c0_51], %170 {strides = array<i32>} : memref<1x15x2x16xf32, #tpu.memory_space<vmem>>, vector<1x1x2x16xf32>,
    %c4_i32 = arith.constant 4 : i32
    %171 = arith.muli %9, %c4_i32 : i32
    %172 = arith.addi %7, %171 : i32
    %173 = arith.index_cast %172 : i32 to index
    %c0_52 = arith.constant 0 : index
    %c0_53 = arith.constant 0 : index
    %174 = vector.load %arg1[%173, %c0_52, %c0_53] : memref<15x2x32xbf16, #tpu.memory_space<vmem>>, vector<1x2x32xbf16>
    %175 = vector.shape_cast %174 : vector<1x2x32xbf16> to vector<2x32xbf16>
    %cst_54 = arith.constant dense<0.000000e+00> : vector<2x64xf32>
    %176 = tpu.matmul %175, %1, %cst_54 {dimension_numbers = #tpu.dot_dimension_numbers<[1], [0], [0], [1], [0, 0, 1, 1], [], []>} : vector<2x32xbf16>, vector<32x64xbf16>, vector<2x64xf32> -> vector<2x64xf32>
    %177 = arith.truncf %166 : vector<2x16xf32> to vector<2x16xbf16>
    %cst_55 = arith.constant dense<0.000000e+00> : vector<2x64xf32>
    %178 = tpu.matmul %177, %3, %cst_55 {dimension_numbers = #tpu.dot_dimension_numbers<[1], [0], [0], [1], [0, 0, 1, 1], [], []>} : vector<2x16xbf16>, vector<16x64xbf16>, vector<2x64xf32> -> vector<2x64xf32>
    %179 = arith.addf %176, %178 : vector<2x64xf32>
    %180 = vector.broadcast %5 : vector<1x64xf32> to vector<2x64xf32>
    %181 = arith.addf %179, %180 : vector<2x64xf32>
    %182 = vector.extract_strided_slice %181 {offsets = [0, 0], sizes = [2, 16], strides = [1, 1]} : vector<2x64xf32> to vector<2x16xf32>
    %183 = arith.negf %182 : vector<2x16xf32>
    %184 = math.exp %183 : vector<2x16xf32>
    %cst_56 = arith.constant 1.000000e+00 : f32
    %185 = vector.broadcast %cst_56 : f32 to vector<2x16xf32>
    %186 = arith.addf %185, %184 : vector<2x16xf32>
    %187 = arith.divf %185, %186 : vector<2x16xf32>
    %188 = vector.extract_strided_slice %181 {offsets = [0, 16], sizes = [2, 16], strides = [1, 1]} : vector<2x64xf32> to vector<2x16xf32>
    %189 = arith.negf %188 : vector<2x16xf32>
    %190 = math.exp %189 : vector<2x16xf32>
    %cst_57 = arith.constant 1.000000e+00 : f32
    %191 = vector.broadcast %cst_57 : f32 to vector<2x16xf32>
    %192 = arith.addf %191, %190 : vector<2x16xf32>
    %193 = arith.divf %191, %192 : vector<2x16xf32>
    %194 = vector.extract_strided_slice %181 {offsets = [0, 32], sizes = [2, 16], strides = [1, 1]} : vector<2x64xf32> to vector<2x16xf32>
    %195 = math.tanh %194 : vector<2x16xf32>
    %196 = vector.extract_strided_slice %181 {offsets = [0, 48], sizes = [2, 16], strides = [1, 1]} : vector<2x64xf32> to vector<2x16xf32>
    %197 = arith.negf %196 : vector<2x16xf32>
    %198 = math.exp %197 : vector<2x16xf32>
    %cst_58 = arith.constant 1.000000e+00 : f32
    %199 = vector.broadcast %cst_58 : f32 to vector<2x16xf32>
    %200 = arith.addf %199, %198 : vector<2x16xf32>
    %201 = arith.divf %199, %200 : vector<2x16xf32>
    %202 = arith.mulf %193, %164 : vector<2x16xf32>
    %203 = arith.mulf %187, %195 : vector<2x16xf32>
    %204 = arith.addf %202, %203 : vector<2x16xf32>
    %205 = math.tanh %204 : vector<2x16xf32>
    %206 = arith.mulf %201, %205 : vector<2x16xf32>
    %c0_59 = arith.constant 0 : index
    %207 = arith.index_cast %172 : i32 to index
    %c0_60 = arith.constant 0 : index
    %c0_61 = arith.constant 0 : index
    %208 = vector.load %arg5[%c0_59, %207, %c0_60, %c0_61] : memref<1x15x2x16xf32, #tpu.memory_space<vmem>>, vector<1x1x2x16xf32>
    %209 = vector.shape_cast %208 : vector<1x1x2x16xf32> to vector<2x16xf32>
    %210 = vector.shape_cast %206 : vector<2x16xf32> to vector<1x1x2x16xf32>
    tpu.vector_store %arg5[%c0_59, %207, %c0_60, %c0_61], %210 {strides = array<i32>} : memref<1x15x2x16xf32, #tpu.memory_space<vmem>>, vector<1x1x2x16xf32>,
    %c5_i32 = arith.constant 5 : i32
    %211 = arith.muli %9, %c5_i32 : i32
    %212 = arith.addi %7, %211 : i32
    %213 = arith.index_cast %212 : i32 to index
    %c0_62 = arith.constant 0 : index
    %c0_63 = arith.constant 0 : index
    %214 = vector.load %arg1[%213, %c0_62, %c0_63] : memref<15x2x32xbf16, #tpu.memory_space<vmem>>, vector<1x2x32xbf16>
    %215 = vector.shape_cast %214 : vector<1x2x32xbf16> to vector<2x32xbf16>
    %cst_64 = arith.constant dense<0.000000e+00> : vector<2x64xf32>
    %216 = tpu.matmul %215, %1, %cst_64 {dimension_numbers = #tpu.dot_dimension_numbers<[1], [0], [0], [1], [0, 0, 1, 1], [], []>} : vector<2x32xbf16>, vector<32x64xbf16>, vector<2x64xf32> -> vector<2x64xf32>
    %217 = arith.truncf %206 : vector<2x16xf32> to vector<2x16xbf16>
    %cst_65 = arith.constant dense<0.000000e+00> : vector<2x64xf32>
    %218 = tpu.matmul %217, %3, %cst_65 {dimension_numbers = #tpu.dot_dimension_numbers<[1], [0], [0], [1], [0, 0, 1, 1], [], []>} : vector<2x16xbf16>, vector<16x64xbf16>, vector<2x64xf32> -> vector<2x64xf32>
    %219 = arith.addf %216, %218 : vector<2x64xf32>
    %220 = vector.broadcast %5 : vector<1x64xf32> to vector<2x64xf32>
    %221 = arith.addf %219, %220 : vector<2x64xf32>
    %222 = vector.extract_strided_slice %221 {offsets = [0, 0], sizes = [2, 16], strides = [1, 1]} : vector<2x64xf32> to vector<2x16xf32>
    %223 = arith.negf %222 : vector<2x16xf32>
    %224 = math.exp %223 : vector<2x16xf32>
    %cst_66 = arith.constant 1.000000e+00 : f32
    %225 = vector.broadcast %cst_66 : f32 to vector<2x16xf32>
    %226 = arith.addf %225, %224 : vector<2x16xf32>
    %227 = arith.divf %225, %226 : vector<2x16xf32>
    %228 = vector.extract_strided_slice %221 {offsets = [0, 16], sizes = [2, 16], strides = [1, 1]} : vector<2x64xf32> to vector<2x16xf32>
    %229 = arith.negf %228 : vector<2x16xf32>
    %230 = math.exp %229 : vector<2x16xf32>
    %cst_67 = arith.constant 1.000000e+00 : f32
    %231 = vector.broadcast %cst_67 : f32 to vector<2x16xf32>
    %232 = arith.addf %231, %230 : vector<2x16xf32>
    %233 = arith.divf %231, %232 : vector<2x16xf32>
    %234 = vector.extract_strided_slice %221 {offsets = [0, 32], sizes = [2, 16], strides = [1, 1]} : vector<2x64xf32> to vector<2x16xf32>
    %235 = math.tanh %234 : vector<2x16xf32>
    %236 = vector.extract_strided_slice %221 {offsets = [0, 48], sizes = [2, 16], strides = [1, 1]} : vector<2x64xf32> to vector<2x16xf32>
    %237 = arith.negf %236 : vector<2x16xf32>
    %238 = math.exp %237 : vector<2x16xf32>
    %cst_68 = arith.constant 1.000000e+00 : f32
    %239 = vector.broadcast %cst_68 : f32 to vector<2x16xf32>
    %240 = arith.addf %239, %238 : vector<2x16xf32>
    %241 = arith.divf %239, %240 : vector<2x16xf32>
    %242 = arith.mulf %233, %204 : vector<2x16xf32>
    %243 = arith.mulf %227, %235 : vector<2x16xf32>
    %244 = arith.addf %242, %243 : vector<2x16xf32>
    %245 = math.tanh %244 : vector<2x16xf32>
    %246 = arith.mulf %241, %245 : vector<2x16xf32>
    %c0_69 = arith.constant 0 : index
    %247 = arith.index_cast %212 : i32 to index
    %c0_70 = arith.constant 0 : index
    %c0_71 = arith.constant 0 : index
    %248 = vector.load %arg5[%c0_69, %247, %c0_70, %c0_71] : memref<1x15x2x16xf32, #tpu.memory_space<vmem>>, vector<1x1x2x16xf32>
    %249 = vector.shape_cast %248 : vector<1x1x2x16xf32> to vector<2x16xf32>
    %250 = vector.shape_cast %246 : vector<2x16xf32> to vector<1x1x2x16xf32>
    tpu.vector_store %arg5[%c0_69, %247, %c0_70, %c0_71], %250 {strides = array<i32>} : memref<1x15x2x16xf32, #tpu.memory_space<vmem>>, vector<1x1x2x16xf32>,
    %c6_i32 = arith.constant 6 : i32
    %251 = arith.muli %9, %c6_i32 : i32
    %252 = arith.addi %7, %251 : i32
    %253 = arith.index_cast %252 : i32 to index
    %c0_72 = arith.constant 0 : index
    %c0_73 = arith.constant 0 : index
    %254 = vector.load %arg1[%253, %c0_72, %c0_73] : memref<15x2x32xbf16, #tpu.memory_space<vmem>>, vector<1x2x32xbf16>
    %255 = vector.shape_cast %254 : vector<1x2x32xbf16> to vector<2x32xbf16>
    %cst_74 = arith.constant dense<0.000000e+00> : vector<2x64xf32>
    %256 = tpu.matmul %255, %1, %cst_74 {dimension_numbers = #tpu.dot_dimension_numbers<[1], [0], [0], [1], [0, 0, 1, 1], [], []>} : vector<2x32xbf16>, vector<32x64xbf16>, vector<2x64xf32> -> vector<2x64xf32>
    %257 = arith.truncf %246 : vector<2x16xf32> to vector<2x16xbf16>
    %cst_75 = arith.constant dense<0.000000e+00> : vector<2x64xf32>
    %258 = tpu.matmul %257, %3, %cst_75 {dimension_numbers = #tpu.dot_dimension_numbers<[1], [0], [0], [1], [0, 0, 1, 1], [], []>} : vector<2x16xbf16>, vector<16x64xbf16>, vector<2x64xf32> -> vector<2x64xf32>
    %259 = arith.addf %256, %258 : vector<2x64xf32>
    %260 = vector.broadcast %5 : vector<1x64xf32> to vector<2x64xf32>
    %261 = arith.addf %259, %260 : vector<2x64xf32>
    %262 = vector.extract_strided_slice %261 {offsets = [0, 0], sizes = [2, 16], strides = [1, 1]} : vector<2x64xf32> to vector<2x16xf32>
    %263 = arith.negf %262 : vector<2x16xf32>
    %264 = math.exp %263 : vector<2x16xf32>
    %cst_76 = arith.constant 1.000000e+00 : f32
    %265 = vector.broadcast %cst_76 : f32 to vector<2x16xf32>
    %266 = arith.addf %265, %264 : vector<2x16xf32>
    %267 = arith.divf %265, %266 : vector<2x16xf32>
    %268 = vector.extract_strided_slice %261 {offsets = [0, 16], sizes = [2, 16], strides = [1, 1]} : vector<2x64xf32> to vector<2x16xf32>
    %269 = arith.negf %268 : vector<2x16xf32>
    %270 = math.exp %269 : vector<2x16xf32>
    %cst_77 = arith.constant 1.000000e+00 : f32
    %271 = vector.broadcast %cst_77 : f32 to vector<2x16xf32>
    %272 = arith.addf %271, %270 : vector<2x16xf32>
    %273 = arith.divf %271, %272 : vector<2x16xf32>
    %274 = vector.extract_strided_slice %261 {offsets = [0, 32], sizes = [2, 16], strides = [1, 1]} : vector<2x64xf32> to vector<2x16xf32>
    %275 = math.tanh %274 : vector<2x16xf32>
    %276 = vector.extract_strided_slice %261 {offsets = [0, 48], sizes = [2, 16], strides = [1, 1]} : vector<2x64xf32> to vector<2x16xf32>
    %277 = arith.negf %276 : vector<2x16xf32>
    %278 = math.exp %277 : vector<2x16xf32>
    %cst_78 = arith.constant 1.000000e+00 : f32
    %279 = vector.broadcast %cst_78 : f32 to vector<2x16xf32>
    %280 = arith.addf %279, %278 : vector<2x16xf32>
    %281 = arith.divf %279, %280 : vector<2x16xf32>
    %282 = arith.mulf %273, %244 : vector<2x16xf32>
    %283 = arith.mulf %267, %275 : vector<2x16xf32>
    %284 = arith.addf %282, %283 : vector<2x16xf32>
    %285 = math.tanh %284 : vector<2x16xf32>
    %286 = arith.mulf %281, %285 : vector<2x16xf32>
    %c0_79 = arith.constant 0 : index
    %287 = arith.index_cast %252 : i32 to index
    %c0_80 = arith.constant 0 : index
    %c0_81 = arith.constant 0 : index
    %288 = vector.load %arg5[%c0_79, %287, %c0_80, %c0_81] : memref<1x15x2x16xf32, #tpu.memory_space<vmem>>, vector<1x1x2x16xf32>
    %289 = vector.shape_cast %288 : vector<1x1x2x16xf32> to vector<2x16xf32>
    %290 = vector.shape_cast %286 : vector<2x16xf32> to vector<1x1x2x16xf32>
    tpu.vector_store %arg5[%c0_79, %287, %c0_80, %c0_81], %290 {strides = array<i32>} : memref<1x15x2x16xf32, #tpu.memory_space<vmem>>, vector<1x1x2x16xf32>,
    %c7_i32 = arith.constant 7 : i32
    %291 = arith.muli %9, %c7_i32 : i32
    %292 = arith.addi %7, %291 : i32
    %293 = arith.index_cast %292 : i32 to index
    %c0_82 = arith.constant 0 : index
    %c0_83 = arith.constant 0 : index
    %294 = vector.load %arg1[%293, %c0_82, %c0_83] : memref<15x2x32xbf16, #tpu.memory_space<vmem>>, vector<1x2x32xbf16>
    %295 = vector.shape_cast %294 : vector<1x2x32xbf16> to vector<2x32xbf16>
    %cst_84 = arith.constant dense<0.000000e+00> : vector<2x64xf32>
    %296 = tpu.matmul %295, %1, %cst_84 {dimension_numbers = #tpu.dot_dimension_numbers<[1], [0], [0], [1], [0, 0, 1, 1], [], []>} : vector<2x32xbf16>, vector<32x64xbf16>, vector<2x64xf32> -> vector<2x64xf32>
    %297 = arith.truncf %286 : vector<2x16xf32> to vector<2x16xbf16>
    %cst_85 = arith.constant dense<0.000000e+00> : vector<2x64xf32>
    %298 = tpu.matmul %297, %3, %cst_85 {dimension_numbers = #tpu.dot_dimension_numbers<[1], [0], [0], [1], [0, 0, 1, 1], [], []>} : vector<2x16xbf16>, vector<16x64xbf16>, vector<2x64xf32> -> vector<2x64xf32>
    %299 = arith.addf %296, %298 : vector<2x64xf32>
    %300 = vector.broadcast %5 : vector<1x64xf32> to vector<2x64xf32>
    %301 = arith.addf %299, %300 : vector<2x64xf32>
    %302 = vector.extract_strided_slice %301 {offsets = [0, 0], sizes = [2, 16], strides = [1, 1]} : vector<2x64xf32> to vector<2x16xf32>
    %303 = arith.negf %302 : vector<2x16xf32>
    %304 = math.exp %303 : vector<2x16xf32>
    %cst_86 = arith.constant 1.000000e+00 : f32
    %305 = vector.broadcast %cst_86 : f32 to vector<2x16xf32>
    %306 = arith.addf %305, %304 : vector<2x16xf32>
    %307 = arith.divf %305, %306 : vector<2x16xf32>
    %308 = vector.extract_strided_slice %301 {offsets = [0, 16], sizes = [2, 16], strides = [1, 1]} : vector<2x64xf32> to vector<2x16xf32>
    %309 = arith.negf %308 : vector<2x16xf32>
    %310 = math.exp %309 : vector<2x16xf32>
    %cst_87 = arith.constant 1.000000e+00 : f32
    %311 = vector.broadcast %cst_87 : f32 to vector<2x16xf32>
    %312 = arith.addf %311, %310 : vector<2x16xf32>
    %313 = arith.divf %311, %312 : vector<2x16xf32>
    %314 = vector.extract_strided_slice %301 {offsets = [0, 32], sizes = [2, 16], strides = [1, 1]} : vector<2x64xf32> to vector<2x16xf32>
    %315 = math.tanh %314 : vector<2x16xf32>
    %316 = vector.extract_strided_slice %301 {offsets = [0, 48], sizes = [2, 16], strides = [1, 1]} : vector<2x64xf32> to vector<2x16xf32>
    %317 = arith.negf %316 : vector<2x16xf32>
    %318 = math.exp %317 : vector<2x16xf32>
    %cst_88 = arith.constant 1.000000e+00 : f32
    %319 = vector.broadcast %cst_88 : f32 to vector<2x16xf32>
    %320 = arith.addf %319, %318 : vector<2x16xf32>
    %321 = arith.divf %319, %320 : vector<2x16xf32>
    %322 = arith.mulf %313, %284 : vector<2x16xf32>
    %323 = arith.mulf %307, %315 : vector<2x16xf32>
    %324 = arith.addf %322, %323 : vector<2x16xf32>
    %325 = math.tanh %324 : vector<2x16xf32>
    %326 = arith.mulf %321, %325 : vector<2x16xf32>
    %c0_89 = arith.constant 0 : index
    %327 = arith.index_cast %292 : i32 to index
    %c0_90 = arith.constant 0 : index
    %c0_91 = arith.constant 0 : index
    %328 = vector.load %arg5[%c0_89, %327, %c0_90, %c0_91] : memref<1x15x2x16xf32, #tpu.memory_space<vmem>>, vector<1x1x2x16xf32>
    %329 = vector.shape_cast %328 : vector<1x1x2x16xf32> to vector<2x16xf32>
    %330 = vector.shape_cast %326 : vector<2x16xf32> to vector<1x1x2x16xf32>
    tpu.vector_store %arg5[%c0_89, %327, %c0_90, %c0_91], %330 {strides = array<i32>} : memref<1x15x2x16xf32, #tpu.memory_space<vmem>>, vector<1x1x2x16xf32>,
    %c8_i32 = arith.constant 8 : i32
    %331 = arith.muli %9, %c8_i32 : i32
    %332 = arith.addi %7, %331 : i32
    %333 = arith.index_cast %332 : i32 to index
    %c0_92 = arith.constant 0 : index
    %c0_93 = arith.constant 0 : index
    %334 = vector.load %arg1[%333, %c0_92, %c0_93] : memref<15x2x32xbf16, #tpu.memory_space<vmem>>, vector<1x2x32xbf16>
    %335 = vector.shape_cast %334 : vector<1x2x32xbf16> to vector<2x32xbf16>
    %cst_94 = arith.constant dense<0.000000e+00> : vector<2x64xf32>
    %336 = tpu.matmul %335, %1, %cst_94 {dimension_numbers = #tpu.dot_dimension_numbers<[1], [0], [0], [1], [0, 0, 1, 1], [], []>} : vector<2x32xbf16>, vector<32x64xbf16>, vector<2x64xf32> -> vector<2x64xf32>
    %337 = arith.truncf %326 : vector<2x16xf32> to vector<2x16xbf16>
    %cst_95 = arith.constant dense<0.000000e+00> : vector<2x64xf32>
    %338 = tpu.matmul %337, %3, %cst_95 {dimension_numbers = #tpu.dot_dimension_numbers<[1], [0], [0], [1], [0, 0, 1, 1], [], []>} : vector<2x16xbf16>, vector<16x64xbf16>, vector<2x64xf32> -> vector<2x64xf32>
    %339 = arith.addf %336, %338 : vector<2x64xf32>
    %340 = vector.broadcast %5 : vector<1x64xf32> to vector<2x64xf32>
    %341 = arith.addf %339, %340 : vector<2x64xf32>
    %342 = vector.extract_strided_slice %341 {offsets = [0, 0], sizes = [2, 16], strides = [1, 1]} : vector<2x64xf32> to vector<2x16xf32>
    %343 = arith.negf %342 : vector<2x16xf32>
    %344 = math.exp %343 : vector<2x16xf32>
    %cst_96 = arith.constant 1.000000e+00 : f32
    %345 = vector.broadcast %cst_96 : f32 to vector<2x16xf32>
    %346 = arith.addf %345, %344 : vector<2x16xf32>
    %347 = arith.divf %345, %346 : vector<2x16xf32>
    %348 = vector.extract_strided_slice %341 {offsets = [0, 16], sizes = [2, 16], strides = [1, 1]} : vector<2x64xf32> to vector<2x16xf32>
    %349 = arith.negf %348 : vector<2x16xf32>
    %350 = math.exp %349 : vector<2x16xf32>
    %cst_97 = arith.constant 1.000000e+00 : f32
    %351 = vector.broadcast %cst_97 : f32 to vector<2x16xf32>
    %352 = arith.addf %351, %350 : vector<2x16xf32>
    %353 = arith.divf %351, %352 : vector<2x16xf32>
    %354 = vector.extract_strided_slice %341 {offsets = [0, 32], sizes = [2, 16], strides = [1, 1]} : vector<2x64xf32> to vector<2x16xf32>
    %355 = math.tanh %354 : vector<2x16xf32>
    %356 = vector.extract_strided_slice %341 {offsets = [0, 48], sizes = [2, 16], strides = [1, 1]} : vector<2x64xf32> to vector<2x16xf32>
    %357 = arith.negf %356 : vector<2x16xf32>
    %358 = math.exp %357 : vector<2x16xf32>
    %cst_98 = arith.constant 1.000000e+00 : f32
    %359 = vector.broadcast %cst_98 : f32 to vector<2x16xf32>
    %360 = arith.addf %359, %358 : vector<2x16xf32>
    %361 = arith.divf %359, %360 : vector<2x16xf32>
    %362 = arith.mulf %353, %324 : vector<2x16xf32>
    %363 = arith.mulf %347, %355 : vector<2x16xf32>
    %364 = arith.addf %362, %363 : vector<2x16xf32>
    %365 = math.tanh %364 : vector<2x16xf32>
    %366 = arith.mulf %361, %365 : vector<2x16xf32>
    %c0_99 = arith.constant 0 : index
    %367 = arith.index_cast %332 : i32 to index
    %c0_100 = arith.constant 0 : index
    %c0_101 = arith.constant 0 : index
    %368 = vector.load %arg5[%c0_99, %367, %c0_100, %c0_101] : memref<1x15x2x16xf32, #tpu.memory_space<vmem>>, vector<1x1x2x16xf32>
    %369 = vector.shape_cast %368 : vector<1x1x2x16xf32> to vector<2x16xf32>
    %370 = vector.shape_cast %366 : vector<2x16xf32> to vector<1x1x2x16xf32>
    tpu.vector_store %arg5[%c0_99, %367, %c0_100, %c0_101], %370 {strides = array<i32>} : memref<1x15x2x16xf32, #tpu.memory_space<vmem>>, vector<1x1x2x16xf32>,
    %c9_i32 = arith.constant 9 : i32
    %371 = arith.muli %9, %c9_i32 : i32
    %372 = arith.addi %7, %371 : i32
    %373 = arith.index_cast %372 : i32 to index
    %c0_102 = arith.constant 0 : index
    %c0_103 = arith.constant 0 : index
    %374 = vector.load %arg1[%373, %c0_102, %c0_103] : memref<15x2x32xbf16, #tpu.memory_space<vmem>>, vector<1x2x32xbf16>
    %375 = vector.shape_cast %374 : vector<1x2x32xbf16> to vector<2x32xbf16>
    %cst_104 = arith.constant dense<0.000000e+00> : vector<2x64xf32>
    %376 = tpu.matmul %375, %1, %cst_104 {dimension_numbers = #tpu.dot_dimension_numbers<[1], [0], [0], [1], [0, 0, 1, 1], [], []>} : vector<2x32xbf16>, vector<32x64xbf16>, vector<2x64xf32> -> vector<2x64xf32>
    %377 = arith.truncf %366 : vector<2x16xf32> to vector<2x16xbf16>
    %cst_105 = arith.constant dense<0.000000e+00> : vector<2x64xf32>
    %378 = tpu.matmul %377, %3, %cst_105 {dimension_numbers = #tpu.dot_dimension_numbers<[1], [0], [0], [1], [0, 0, 1, 1], [], []>} : vector<2x16xbf16>, vector<16x64xbf16>, vector<2x64xf32> -> vector<2x64xf32>
    %379 = arith.addf %376, %378 : vector<2x64xf32>
    %380 = vector.broadcast %5 : vector<1x64xf32> to vector<2x64xf32>
    %381 = arith.addf %379, %380 : vector<2x64xf32>
    %382 = vector.extract_strided_slice %381 {offsets = [0, 0], sizes = [2, 16], strides = [1, 1]} : vector<2x64xf32> to vector<2x16xf32>
    %383 = arith.negf %382 : vector<2x16xf32>
    %384 = math.exp %383 : vector<2x16xf32>
    %cst_106 = arith.constant 1.000000e+00 : f32
    %385 = vector.broadcast %cst_106 : f32 to vector<2x16xf32>
    %386 = arith.addf %385, %384 : vector<2x16xf32>
    %387 = arith.divf %385, %386 : vector<2x16xf32>
    %388 = vector.extract_strided_slice %381 {offsets = [0, 16], sizes = [2, 16], strides = [1, 1]} : vector<2x64xf32> to vector<2x16xf32>
    %389 = arith.negf %388 : vector<2x16xf32>
    %390 = math.exp %389 : vector<2x16xf32>
    %cst_107 = arith.constant 1.000000e+00 : f32
    %391 = vector.broadcast %cst_107 : f32 to vector<2x16xf32>
    %392 = arith.addf %391, %390 : vector<2x16xf32>
    %393 = arith.divf %391, %392 : vector<2x16xf32>
    %394 = vector.extract_strided_slice %381 {offsets = [0, 32], sizes = [2, 16], strides = [1, 1]} : vector<2x64xf32> to vector<2x16xf32>
    %395 = math.tanh %394 : vector<2x16xf32>
    %396 = vector.extract_strided_slice %381 {offsets = [0, 48], sizes = [2, 16], strides = [1, 1]} : vector<2x64xf32> to vector<2x16xf32>
    %397 = arith.negf %396 : vector<2x16xf32>
    %398 = math.exp %397 : vector<2x16xf32>
    %cst_108 = arith.constant 1.000000e+00 : f32
    %399 = vector.broadcast %cst_108 : f32 to vector<2x16xf32>
    %400 = arith.addf %399, %398 : vector<2x16xf32>
    %401 = arith.divf %399, %400 : vector<2x16xf32>
    %402 = arith.mulf %393, %364 : vector<2x16xf32>
    %403 = arith.mulf %387, %395 : vector<2x16xf32>
    %404 = arith.addf %402, %403 : vector<2x16xf32>
    %405 = math.tanh %404 : vector<2x16xf32>
    %406 = arith.mulf %401, %405 : vector<2x16xf32>
    %c0_109 = arith.constant 0 : index
    %407 = arith.index_cast %372 : i32 to index
    %c0_110 = arith.constant 0 : index
    %c0_111 = arith.constant 0 : index
    %408 = vector.load %arg5[%c0_109, %407, %c0_110, %c0_111] : memref<1x15x2x16xf32, #tpu.memory_space<vmem>>, vector<1x1x2x16xf32>
    %409 = vector.shape_cast %408 : vector<1x1x2x16xf32> to vector<2x16xf32>
    %410 = vector.shape_cast %406 : vector<2x16xf32> to vector<1x1x2x16xf32>
    tpu.vector_store %arg5[%c0_109, %407, %c0_110, %c0_111], %410 {strides = array<i32>} : memref<1x15x2x16xf32, #tpu.memory_space<vmem>>, vector<1x1x2x16xf32>,
    %c10_i32 = arith.constant 10 : i32
    %411 = arith.muli %9, %c10_i32 : i32
    %412 = arith.addi %7, %411 : i32
    %413 = arith.index_cast %412 : i32 to index
    %c0_112 = arith.constant 0 : index
    %c0_113 = arith.constant 0 : index
    %414 = vector.load %arg1[%413, %c0_112, %c0_113] : memref<15x2x32xbf16, #tpu.memory_space<vmem>>, vector<1x2x32xbf16>
    %415 = vector.shape_cast %414 : vector<1x2x32xbf16> to vector<2x32xbf16>
    %cst_114 = arith.constant dense<0.000000e+00> : vector<2x64xf32>
    %416 = tpu.matmul %415, %1, %cst_114 {dimension_numbers = #tpu.dot_dimension_numbers<[1], [0], [0], [1], [0, 0, 1, 1], [], []>} : vector<2x32xbf16>, vector<32x64xbf16>, vector<2x64xf32> -> vector<2x64xf32>
    %417 = arith.truncf %406 : vector<2x16xf32> to vector<2x16xbf16>
    %cst_115 = arith.constant dense<0.000000e+00> : vector<2x64xf32>
    %418 = tpu.matmul %417, %3, %cst_115 {dimension_numbers = #tpu.dot_dimension_numbers<[1], [0], [0], [1], [0, 0, 1, 1], [], []>} : vector<2x16xbf16>, vector<16x64xbf16>, vector<2x64xf32> -> vector<2x64xf32>
    %419 = arith.addf %416, %418 : vector<2x64xf32>
    %420 = vector.broadcast %5 : vector<1x64xf32> to vector<2x64xf32>
    %421 = arith.addf %419, %420 : vector<2x64xf32>
    %422 = vector.extract_strided_slice %421 {offsets = [0, 0], sizes = [2, 16], strides = [1, 1]} : vector<2x64xf32> to vector<2x16xf32>
    %423 = arith.negf %422 : vector<2x16xf32>
    %424 = math.exp %423 : vector<2x16xf32>
    %cst_116 = arith.constant 1.000000e+00 : f32
    %425 = vector.broadcast %cst_116 : f32 to vector<2x16xf32>
    %426 = arith.addf %425, %424 : vector<2x16xf32>
    %427 = arith.divf %425, %426 : vector<2x16xf32>
    %428 = vector.extract_strided_slice %421 {offsets = [0, 16], sizes = [2, 16], strides = [1, 1]} : vector<2x64xf32> to vector<2x16xf32>
    %429 = arith.negf %428 : vector<2x16xf32>
    %430 = math.exp %429 : vector<2x16xf32>
    %cst_117 = arith.constant 1.000000e+00 : f32
    %431 = vector.broadcast %cst_117 : f32 to vector<2x16xf32>
    %432 = arith.addf %431, %430 : vector<2x16xf32>
    %433 = arith.divf %431, %432 : vector<2x16xf32>
    %434 = vector.extract_strided_slice %421 {offsets = [0, 32], sizes = [2, 16], strides = [1, 1]} : vector<2x64xf32> to vector<2x16xf32>
    %435 = math.tanh %434 : vector<2x16xf32>
    %436 = vector.extract_strided_slice %421 {offsets = [0, 48], sizes = [2, 16], strides = [1, 1]} : vector<2x64xf32> to vector<2x16xf32>
    %437 = arith.negf %436 : vector<2x16xf32>
    %438 = math.exp %437 : vector<2x16xf32>
    %cst_118 = arith.constant 1.000000e+00 : f32
    %439 = vector.broadcast %cst_118 : f32 to vector<2x16xf32>
    %440 = arith.addf %439, %438 : vector<2x16xf32>
    %441 = arith.divf %439, %440 : vector<2x16xf32>
    %442 = arith.mulf %433, %404 : vector<2x16xf32>
    %443 = arith.mulf %427, %435 : vector<2x16xf32>
    %444 = arith.addf %442, %443 : vector<2x16xf32>
    %445 = math.tanh %444 : vector<2x16xf32>
    %446 = arith.mulf %441, %445 : vector<2x16xf32>
    %c0_119 = arith.constant 0 : index
    %447 = arith.index_cast %412 : i32 to index
    %c0_120 = arith.constant 0 : index
    %c0_121 = arith.constant 0 : index
    %448 = vector.load %arg5[%c0_119, %447, %c0_120, %c0_121] : memref<1x15x2x16xf32, #tpu.memory_space<vmem>>, vector<1x1x2x16xf32>
    %449 = vector.shape_cast %448 : vector<1x1x2x16xf32> to vector<2x16xf32>
    %450 = vector.shape_cast %446 : vector<2x16xf32> to vector<1x1x2x16xf32>
    tpu.vector_store %arg5[%c0_119, %447, %c0_120, %c0_121], %450 {strides = array<i32>} : memref<1x15x2x16xf32, #tpu.memory_space<vmem>>, vector<1x1x2x16xf32>,
    %c11_i32 = arith.constant 11 : i32
    %451 = arith.muli %9, %c11_i32 : i32
    %452 = arith.addi %7, %451 : i32
    %453 = arith.index_cast %452 : i32 to index
    %c0_122 = arith.constant 0 : index
    %c0_123 = arith.constant 0 : index
    %454 = vector.load %arg1[%453, %c0_122, %c0_123] : memref<15x2x32xbf16, #tpu.memory_space<vmem>>, vector<1x2x32xbf16>
    %455 = vector.shape_cast %454 : vector<1x2x32xbf16> to vector<2x32xbf16>
    %cst_124 = arith.constant dense<0.000000e+00> : vector<2x64xf32>
    %456 = tpu.matmul %455, %1, %cst_124 {dimension_numbers = #tpu.dot_dimension_numbers<[1], [0], [0], [1], [0, 0, 1, 1], [], []>} : vector<2x32xbf16>, vector<32x64xbf16>, vector<2x64xf32> -> vector<2x64xf32>
    %457 = arith.truncf %446 : vector<2x16xf32> to vector<2x16xbf16>
    %cst_125 = arith.constant dense<0.000000e+00> : vector<2x64xf32>
    %458 = tpu.matmul %457, %3, %cst_125 {dimension_numbers = #tpu.dot_dimension_numbers<[1], [0], [0], [1], [0, 0, 1, 1], [], []>} : vector<2x16xbf16>, vector<16x64xbf16>, vector<2x64xf32> -> vector<2x64xf32>
    %459 = arith.addf %456, %458 : vector<2x64xf32>
    %460 = vector.broadcast %5 : vector<1x64xf32> to vector<2x64xf32>
    %461 = arith.addf %459, %460 : vector<2x64xf32>
    %462 = vector.extract_strided_slice %461 {offsets = [0, 0], sizes = [2, 16], strides = [1, 1]} : vector<2x64xf32> to vector<2x16xf32>
    %463 = arith.negf %462 : vector<2x16xf32>
    %464 = math.exp %463 : vector<2x16xf32>
    %cst_126 = arith.constant 1.000000e+00 : f32
    %465 = vector.broadcast %cst_126 : f32 to vector<2x16xf32>
    %466 = arith.addf %465, %464 : vector<2x16xf32>
    %467 = arith.divf %465, %466 : vector<2x16xf32>
    %468 = vector.extract_strided_slice %461 {offsets = [0, 16], sizes = [2, 16], strides = [1, 1]} : vector<2x64xf32> to vector<2x16xf32>
    %469 = arith.negf %468 : vector<2x16xf32>
    %470 = math.exp %469 : vector<2x16xf32>
    %cst_127 = arith.constant 1.000000e+00 : f32
    %471 = vector.broadcast %cst_127 : f32 to vector<2x16xf32>
    %472 = arith.addf %471, %470 : vector<2x16xf32>
    %473 = arith.divf %471, %472 : vector<2x16xf32>
    %474 = vector.extract_strided_slice %461 {offsets = [0, 32], sizes = [2, 16], strides = [1, 1]} : vector<2x64xf32> to vector<2x16xf32>
    %475 = math.tanh %474 : vector<2x16xf32>
    %476 = vector.extract_strided_slice %461 {offsets = [0, 48], sizes = [2, 16], strides = [1, 1]} : vector<2x64xf32> to vector<2x16xf32>
    %477 = arith.negf %476 : vector<2x16xf32>
    %478 = math.exp %477 : vector<2x16xf32>
    %cst_128 = arith.constant 1.000000e+00 : f32
    %479 = vector.broadcast %cst_128 : f32 to vector<2x16xf32>
    %480 = arith.addf %479, %478 : vector<2x16xf32>
    %481 = arith.divf %479, %480 : vector<2x16xf32>
    %482 = arith.mulf %473, %444 : vector<2x16xf32>
    %483 = arith.mulf %467, %475 : vector<2x16xf32>
    %484 = arith.addf %482, %483 : vector<2x16xf32>
    %485 = math.tanh %484 : vector<2x16xf32>
    %486 = arith.mulf %481, %485 : vector<2x16xf32>
    %c0_129 = arith.constant 0 : index
    %487 = arith.index_cast %452 : i32 to index
    %c0_130 = arith.constant 0 : index
    %c0_131 = arith.constant 0 : index
    %488 = vector.load %arg5[%c0_129, %487, %c0_130, %c0_131] : memref<1x15x2x16xf32, #tpu.memory_space<vmem>>, vector<1x1x2x16xf32>
    %489 = vector.shape_cast %488 : vector<1x1x2x16xf32> to vector<2x16xf32>
    %490 = vector.shape_cast %486 : vector<2x16xf32> to vector<1x1x2x16xf32>
    tpu.vector_store %arg5[%c0_129, %487, %c0_130, %c0_131], %490 {strides = array<i32>} : memref<1x15x2x16xf32, #tpu.memory_space<vmem>>, vector<1x1x2x16xf32>,
    %c12_i32 = arith.constant 12 : i32
    %491 = arith.muli %9, %c12_i32 : i32
    %492 = arith.addi %7, %491 : i32
    %493 = arith.index_cast %492 : i32 to index
    %c0_132 = arith.constant 0 : index
    %c0_133 = arith.constant 0 : index
    %494 = vector.load %arg1[%493, %c0_132, %c0_133] : memref<15x2x32xbf16, #tpu.memory_space<vmem>>, vector<1x2x32xbf16>
    %495 = vector.shape_cast %494 : vector<1x2x32xbf16> to vector<2x32xbf16>
    %cst_134 = arith.constant dense<0.000000e+00> : vector<2x64xf32>
    %496 = tpu.matmul %495, %1, %cst_134 {dimension_numbers = #tpu.dot_dimension_numbers<[1], [0], [0], [1], [0, 0, 1, 1], [], []>} : vector<2x32xbf16>, vector<32x64xbf16>, vector<2x64xf32> -> vector<2x64xf32>
    %497 = arith.truncf %486 : vector<2x16xf32> to vector<2x16xbf16>
    %cst_135 = arith.constant dense<0.000000e+00> : vector<2x64xf32>
    %498 = tpu.matmul %497, %3, %cst_135 {dimension_numbers = #tpu.dot_dimension_numbers<[1], [0], [0], [1], [0, 0, 1, 1], [], []>} : vector<2x16xbf16>, vector<16x64xbf16>, vector<2x64xf32> -> vector<2x64xf32>
    %499 = arith.addf %496, %498 : vector<2x64xf32>
    %500 = vector.broadcast %5 : vector<1x64xf32> to vector<2x64xf32>
    %501 = arith.addf %499, %500 : vector<2x64xf32>
    %502 = vector.extract_strided_slice %501 {offsets = [0, 0], sizes = [2, 16], strides = [1, 1]} : vector<2x64xf32> to vector<2x16xf32>
    %503 = arith.negf %502 : vector<2x16xf32>
    %504 = math.exp %503 : vector<2x16xf32>
    %cst_136 = arith.constant 1.000000e+00 : f32
    %505 = vector.broadcast %cst_136 : f32 to vector<2x16xf32>
    %506 = arith.addf %505, %504 : vector<2x16xf32>
    %507 = arith.divf %505, %506 : vector<2x16xf32>
    %508 = vector.extract_strided_slice %501 {offsets = [0, 16], sizes = [2, 16], strides = [1, 1]} : vector<2x64xf32> to vector<2x16xf32>
    %509 = arith.negf %508 : vector<2x16xf32>
    %510 = math.exp %509 : vector<2x16xf32>
    %cst_137 = arith.constant 1.000000e+00 : f32
    %511 = vector.broadcast %cst_137 : f32 to vector<2x16xf32>
    %512 = arith.addf %511, %510 : vector<2x16xf32>
    %513 = arith.divf %511, %512 : vector<2x16xf32>
    %514 = vector.extract_strided_slice %501 {offsets = [0, 32], sizes = [2, 16], strides = [1, 1]} : vector<2x64xf32> to vector<2x16xf32>
    %515 = math.tanh %514 : vector<2x16xf32>
    %516 = vector.extract_strided_slice %501 {offsets = [0, 48], sizes = [2, 16], strides = [1, 1]} : vector<2x64xf32> to vector<2x16xf32>
    %517 = arith.negf %516 : vector<2x16xf32>
    %518 = math.exp %517 : vector<2x16xf32>
    %cst_138 = arith.constant 1.000000e+00 : f32
    %519 = vector.broadcast %cst_138 : f32 to vector<2x16xf32>
    %520 = arith.addf %519, %518 : vector<2x16xf32>
    %521 = arith.divf %519, %520 : vector<2x16xf32>
    %522 = arith.mulf %513, %484 : vector<2x16xf32>
    %523 = arith.mulf %507, %515 : vector<2x16xf32>
    %524 = arith.addf %522, %523 : vector<2x16xf32>
    %525 = math.tanh %524 : vector<2x16xf32>
    %526 = arith.mulf %521, %525 : vector<2x16xf32>
    %c0_139 = arith.constant 0 : index
    %527 = arith.index_cast %492 : i32 to index
    %c0_140 = arith.constant 0 : index
    %c0_141 = arith.constant 0 : index
    %528 = vector.load %arg5[%c0_139, %527, %c0_140, %c0_141] : memref<1x15x2x16xf32, #tpu.memory_space<vmem>>, vector<1x1x2x16xf32>
    %529 = vector.shape_cast %528 : vector<1x1x2x16xf32> to vector<2x16xf32>
    %530 = vector.shape_cast %526 : vector<2x16xf32> to vector<1x1x2x16xf32>
    tpu.vector_store %arg5[%c0_139, %527, %c0_140, %c0_141], %530 {strides = array<i32>} : memref<1x15x2x16xf32, #tpu.memory_space<vmem>>, vector<1x1x2x16xf32>,
    %c13_i32 = arith.constant 13 : i32
    %531 = arith.muli %9, %c13_i32 : i32
    %532 = arith.addi %7, %531 : i32
    %533 = arith.index_cast %532 : i32 to index
    %c0_142 = arith.constant 0 : index
    %c0_143 = arith.constant 0 : index
    %534 = vector.load %arg1[%533, %c0_142, %c0_143] : memref<15x2x32xbf16, #tpu.memory_space<vmem>>, vector<1x2x32xbf16>
    %535 = vector.shape_cast %534 : vector<1x2x32xbf16> to vector<2x32xbf16>
    %cst_144 = arith.constant dense<0.000000e+00> : vector<2x64xf32>
    %536 = tpu.matmul %535, %1, %cst_144 {dimension_numbers = #tpu.dot_dimension_numbers<[1], [0], [0], [1], [0, 0, 1, 1], [], []>} : vector<2x32xbf16>, vector<32x64xbf16>, vector<2x64xf32> -> vector<2x64xf32>
    %537 = arith.truncf %526 : vector<2x16xf32> to vector<2x16xbf16>
    %cst_145 = arith.constant dense<0.000000e+00> : vector<2x64xf32>
    %538 = tpu.matmul %537, %3, %cst_145 {dimension_numbers = #tpu.dot_dimension_numbers<[1], [0], [0], [1], [0, 0, 1, 1], [], []>} : vector<2x16xbf16>, vector<16x64xbf16>, vector<2x64xf32> -> vector<2x64xf32>
    %539 = arith.addf %536, %538 : vector<2x64xf32>
    %540 = vector.broadcast %5 : vector<1x64xf32> to vector<2x64xf32>
    %541 = arith.addf %539, %540 : vector<2x64xf32>
    %542 = vector.extract_strided_slice %541 {offsets = [0, 0], sizes = [2, 16], strides = [1, 1]} : vector<2x64xf32> to vector<2x16xf32>
    %543 = arith.negf %542 : vector<2x16xf32>
    %544 = math.exp %543 : vector<2x16xf32>
    %cst_146 = arith.constant 1.000000e+00 : f32
    %545 = vector.broadcast %cst_146 : f32 to vector<2x16xf32>
    %546 = arith.addf %545, %544 : vector<2x16xf32>
    %547 = arith.divf %545, %546 : vector<2x16xf32>
    %548 = vector.extract_strided_slice %541 {offsets = [0, 16], sizes = [2, 16], strides = [1, 1]} : vector<2x64xf32> to vector<2x16xf32>
    %549 = arith.negf %548 : vector<2x16xf32>
    %550 = math.exp %549 : vector<2x16xf32>
    %cst_147 = arith.constant 1.000000e+00 : f32
    %551 = vector.broadcast %cst_147 : f32 to vector<2x16xf32>
    %552 = arith.addf %551, %550 : vector<2x16xf32>
    %553 = arith.divf %551, %552 : vector<2x16xf32>
    %554 = vector.extract_strided_slice %541 {offsets = [0, 32], sizes = [2, 16], strides = [1, 1]} : vector<2x64xf32> to vector<2x16xf32>
    %555 = math.tanh %554 : vector<2x16xf32>
    %556 = vector.extract_strided_slice %541 {offsets = [0, 48], sizes = [2, 16], strides = [1, 1]} : vector<2x64xf32> to vector<2x16xf32>
    %557 = arith.negf %556 : vector<2x16xf32>
    %558 = math.exp %557 : vector<2x16xf32>
    %cst_148 = arith.constant 1.000000e+00 : f32
    %559 = vector.broadcast %cst_148 : f32 to vector<2x16xf32>
    %560 = arith.addf %559, %558 : vector<2x16xf32>
    %561 = arith.divf %559, %560 : vector<2x16xf32>
    %562 = arith.mulf %553, %524 : vector<2x16xf32>
    %563 = arith.mulf %547, %555 : vector<2x16xf32>
    %564 = arith.addf %562, %563 : vector<2x16xf32>
    %565 = math.tanh %564 : vector<2x16xf32>
    %566 = arith.mulf %561, %565 : vector<2x16xf32>
    %c0_149 = arith.constant 0 : index
    %567 = arith.index_cast %532 : i32 to index
    %c0_150 = arith.constant 0 : index
    %c0_151 = arith.constant 0 : index
    %568 = vector.load %arg5[%c0_149, %567, %c0_150, %c0_151] : memref<1x15x2x16xf32, #tpu.memory_space<vmem>>, vector<1x1x2x16xf32>
    %569 = vector.shape_cast %568 : vector<1x1x2x16xf32> to vector<2x16xf32>
    %570 = vector.shape_cast %566 : vector<2x16xf32> to vector<1x1x2x16xf32>
    tpu.vector_store %arg5[%c0_149, %567, %c0_150, %c0_151], %570 {strides = array<i32>} : memref<1x15x2x16xf32, #tpu.memory_space<vmem>>, vector<1x1x2x16xf32>,
    %c14_i32_152 = arith.constant 14 : i32
    %571 = arith.muli %9, %c14_i32_152 : i32
    %572 = arith.addi %7, %571 : i32
    %573 = arith.index_cast %572 : i32 to index
    %c0_153 = arith.constant 0 : index
    %c0_154 = arith.constant 0 : index
    %574 = vector.load %arg1[%573, %c0_153, %c0_154] : memref<15x2x32xbf16, #tpu.memory_space<vmem>>, vector<1x2x32xbf16>
    %575 = vector.shape_cast %574 : vector<1x2x32xbf16> to vector<2x32xbf16>
    %cst_155 = arith.constant dense<0.000000e+00> : vector<2x64xf32>
    %576 = tpu.matmul %575, %1, %cst_155 {dimension_numbers = #tpu.dot_dimension_numbers<[1], [0], [0], [1], [0, 0, 1, 1], [], []>} : vector<2x32xbf16>, vector<32x64xbf16>, vector<2x64xf32> -> vector<2x64xf32>
    %577 = arith.truncf %566 : vector<2x16xf32> to vector<2x16xbf16>
    %cst_156 = arith.constant dense<0.000000e+00> : vector<2x64xf32>
    %578 = tpu.matmul %577, %3, %cst_156 {dimension_numbers = #tpu.dot_dimension_numbers<[1], [0], [0], [1], [0, 0, 1, 1], [], []>} : vector<2x16xbf16>, vector<16x64xbf16>, vector<2x64xf32> -> vector<2x64xf32>
    %579 = arith.addf %576, %578 : vector<2x64xf32>
    %580 = vector.broadcast %5 : vector<1x64xf32> to vector<2x64xf32>
    %581 = arith.addf %579, %580 : vector<2x64xf32>
    %582 = vector.extract_strided_slice %581 {offsets = [0, 0], sizes = [2, 16], strides = [1, 1]} : vector<2x64xf32> to vector<2x16xf32>
    %583 = arith.negf %582 : vector<2x16xf32>
    %584 = math.exp %583 : vector<2x16xf32>
    %cst_157 = arith.constant 1.000000e+00 : f32
    %585 = vector.broadcast %cst_157 : f32 to vector<2x16xf32>
    %586 = arith.addf %585, %584 : vector<2x16xf32>
    %587 = arith.divf %585, %586 : vector<2x16xf32>
    %588 = vector.extract_strided_slice %581 {offsets = [0, 16], sizes = [2, 16], strides = [1, 1]} : vector<2x64xf32> to vector<2x16xf32>
    %589 = arith.negf %588 : vector<2x16xf32>
    %590 = math.exp %589 : vector<2x16xf32>
    %cst_158 = arith.constant 1.000000e+00 : f32
    %591 = vector.broadcast %cst_158 : f32 to vector<2x16xf32>
    %592 = arith.addf %591, %590 : vector<2x16xf32>
    %593 = arith.divf %591, %592 : vector<2x16xf32>
    %594 = vector.extract_strided_slice %581 {offsets = [0, 32], sizes = [2, 16], strides = [1, 1]} : vector<2x64xf32> to vector<2x16xf32>
    %595 = math.tanh %594 : vector<2x16xf32>
    %596 = vector.extract_strided_slice %581 {offsets = [0, 48], sizes = [2, 16], strides = [1, 1]} : vector<2x64xf32> to vector<2x16xf32>
    %597 = arith.negf %596 : vector<2x16xf32>
    %598 = math.exp %597 : vector<2x16xf32>
    %cst_159 = arith.constant 1.000000e+00 : f32
    %599 = vector.broadcast %cst_159 : f32 to vector<2x16xf32>
    %600 = arith.addf %599, %598 : vector<2x16xf32>
    %601 = arith.divf %599, %600 : vector<2x16xf32>
    %602 = arith.mulf %593, %564 : vector<2x16xf32>
    %603 = arith.mulf %587, %595 : vector<2x16xf32>
    %604 = arith.addf %602, %603 : vector<2x16xf32>
    %605 = math.tanh %604 : vector<2x16xf32>
    %606 = arith.mulf %601, %605 : vector<2x16xf32>
    %c0_160 = arith.constant 0 : index
    %607 = arith.index_cast %572 : i32 to index
    %c0_161 = arith.constant 0 : index
    %c0_162 = arith.constant 0 : index
    %608 = vector.load %arg5[%c0_160, %607, %c0_161, %c0_162] : memref<1x15x2x16xf32, #tpu.memory_space<vmem>>, vector<1x1x2x16xf32>
    %609 = vector.shape_cast %608 : vector<1x1x2x16xf32> to vector<2x16xf32>
    %610 = vector.shape_cast %606 : vector<2x16xf32> to vector<1x1x2x16xf32>
    tpu.vector_store %arg5[%c0_160, %607, %c0_161, %c0_162], %610 {strides = array<i32>} : memref<1x15x2x16xf32, #tpu.memory_space<vmem>>, vector<1x1x2x16xf32>,
    %c15_i32 = arith.constant 15 : i32
    return
  }
  func.func @transform_0(%arg0: i32) -> (i32, i32, i32) {
    %c0_i32 = arith.constant 0 : i32
    %c0_i32_0 = arith.constant 0 : i32
    %c0_i32_1 = arith.constant 0 : i32
    %c0_i32_2 = arith.constant 0 : i32
    return %c0_i32, %c0_i32_0, %c0_i32_1 : i32, i32, i32
  }
  func.func @transform_1(%arg0: i32) -> (i32, i32, i32) {
    %c0_i32 = arith.constant 0 : i32
    %c0_i32_0 = arith.constant 0 : i32
    %c0_i32_1 = arith.constant 0 : i32
    return %arg0, %c0_i32, %c0_i32_0 : i32, i32, i32
  }
  func.func @transform_2(%arg0: i32) -> (i32, i32, i32) {
    %c0_i32 = arith.constant 0 : i32
    %c0_i32_0 = arith.constant 0 : i32
    %c0_i32_1 = arith.constant 0 : i32
    return %arg0, %c0_i32, %c0_i32_0 : i32, i32, i32
  }
  func.func @transform_3(%arg0: i32) -> (i32, i32, i32) {
    %c0_i32 = arith.constant 0 : i32
    %c0_i32_0 = arith.constant 0 : i32
    %c0_i32_1 = arith.constant 0 : i32
    return %arg0, %c0_i32, %c0_i32_0 : i32, i32, i32
  }
  func.func @transform_4(%arg0: i32) -> (i32, i32, i32, i32) {
    %c0_i32 = arith.constant 0 : i32
    %c0_i32_0 = arith.constant 0 : i32
    %c0_i32_1 = arith.constant 0 : i32
    %c0_i32_2 = arith.constant 0 : i32
    return %arg0, %c0_i32, %c0_i32_0, %c0_i32_1 : i32, i32, i32, i32
  }
}

module attributes {stable_mosaic.version = 11 : i64} {
  func.func @_mm_kernel(%arg0: i32, %arg1: memref<30x32xbf16, #tpu.memory_space<vmem>>, %arg2: memref<32x16xbf16, #tpu.memory_space<vmem>>, %arg3: memref<1x16xf32, #tpu.memory_space<vmem>>, %arg4: memref<30x16xf32, #tpu.memory_space<vmem>>) attributes {dimension_semantics = [#tpu.dimension_semantics<parallel>], iteration_bounds = array<i64: 1>, scalar_prefetch = 0 : i64, scratch_operands = 0 : i64, tpu.core_type = #tpu.core_type<tc>, window_params = [{transform_indices = @transform_0, window_bounds = array<i64: 30, 32>}, {pipeline_mode = #tpu.pipeline_mode<synchronous>, transform_indices = @transform_1, window_bounds = array<i64: 32, 16>}, {pipeline_mode = #tpu.pipeline_mode<synchronous>, transform_indices = @transform_2, window_bounds = array<i64: 1, 16>}, {transform_indices = @transform_3, window_bounds = array<i64: 30, 16>}]} {
    %c0 = arith.constant 0 : index
    %c0_0 = arith.constant 0 : index
    %0 = vector.load %arg1[%c0, %c0_0] : memref<30x32xbf16, #tpu.memory_space<vmem>>, vector<30x32xbf16>
    %c0_1 = arith.constant 0 : index
    %c0_2 = arith.constant 0 : index
    %1 = vector.load %arg2[%c0_1, %c0_2] : memref<32x16xbf16, #tpu.memory_space<vmem>>, vector<32x16xbf16>
    %cst = arith.constant dense<0.000000e+00> : vector<30x16xf32>
    %2 = tpu.matmul %0, %1, %cst {dimension_numbers = #tpu.dot_dimension_numbers<[1], [0], [0], [1], [0, 0, 1, 1], [], []>} : vector<30x32xbf16>, vector<32x16xbf16>, vector<30x16xf32> -> vector<30x16xf32>
    %c0_3 = arith.constant 0 : index
    %c0_4 = arith.constant 0 : index
    %3 = vector.load %arg3[%c0_3, %c0_4] : memref<1x16xf32, #tpu.memory_space<vmem>>, vector<1x16xf32>
    %4 = vector.broadcast %3 : vector<1x16xf32> to vector<30x16xf32>
    %5 = arith.addf %2, %4 : vector<30x16xf32>
    %c0_5 = arith.constant 0 : index
    %c0_6 = arith.constant 0 : index
    %6 = vector.load %arg4[%c0_5, %c0_6] : memref<30x16xf32, #tpu.memory_space<vmem>>, vector<30x16xf32>
    tpu.vector_store %arg4[%c0_5, %c0_6], %5 {strides = array<i32>} : memref<30x16xf32, #tpu.memory_space<vmem>>, vector<30x16xf32>,
    return
  }
  func.func @transform_0(%arg0: i32) -> (i32, i32) {
    %c0_i32 = arith.constant 0 : i32
    %c0_i32_0 = arith.constant 0 : i32
    return %arg0, %c0_i32 : i32, i32
  }
  func.func @transform_1(%arg0: i32) -> (i32, i32) {
    %c0_i32 = arith.constant 0 : i32
    %c0_i32_0 = arith.constant 0 : i32
    %c0_i32_1 = arith.constant 0 : i32
    return %c0_i32, %c0_i32_0 : i32, i32
  }
  func.func @transform_2(%arg0: i32) -> (i32, i32) {
    %c0_i32 = arith.constant 0 : i32
    %c0_i32_0 = arith.constant 0 : i32
    %c0_i32_1 = arith.constant 0 : i32
    return %c0_i32, %c0_i32_0 : i32, i32
  }
  func.func @transform_3(%arg0: i32) -> (i32, i32) {
    %c0_i32 = arith.constant 0 : i32
    %c0_i32_0 = arith.constant 0 : i32
    return %arg0, %c0_i32 : i32, i32
  }
}

module attributes {stable_mosaic.version = 11 : i64} {
  func.func @_dec_level_kernel(%arg0: i32, %arg1: memref<30x16xf32, #tpu.memory_space<vmem>>, %arg2: memref<30x16xf32, #tpu.memory_space<vmem>>, %arg3: memref<16x16xbf16, #tpu.memory_space<vmem>>, %arg4: memref<16x128xbf16, #tpu.memory_space<vmem>>, %arg5: memref<1x16xf32, #tpu.memory_space<vmem>>, %arg6: memref<30x128xf32, #tpu.memory_space<vmem>>) attributes {dimension_semantics = [#tpu.dimension_semantics<parallel>], iteration_bounds = array<i64: 1>, scalar_prefetch = 0 : i64, scratch_operands = 0 : i64, tpu.core_type = #tpu.core_type<tc>, window_params = [{transform_indices = @transform_0, window_bounds = array<i64: 30, 16>}, {transform_indices = @transform_1, window_bounds = array<i64: 30, 16>}, {pipeline_mode = #tpu.pipeline_mode<synchronous>, transform_indices = @transform_2, window_bounds = array<i64: 16, 16>}, {pipeline_mode = #tpu.pipeline_mode<synchronous>, transform_indices = @transform_3, window_bounds = array<i64: 16, 128>}, {pipeline_mode = #tpu.pipeline_mode<synchronous>, transform_indices = @transform_4, window_bounds = array<i64: 1, 16>}, {transform_indices = @transform_5, window_bounds = array<i64: 30, 128>}]} {
    %c0 = arith.constant 0 : index
    %c0_0 = arith.constant 0 : index
    %0 = vector.load %arg1[%c0, %c0_0] : memref<30x16xf32, #tpu.memory_space<vmem>>, vector<30x16xf32>
    %c0_1 = arith.constant 0 : index
    %c0_2 = arith.constant 0 : index
    %1 = vector.load %arg2[%c0_1, %c0_2] : memref<30x16xf32, #tpu.memory_space<vmem>>, vector<30x16xf32>
    %2 = arith.addf %0, %1 : vector<30x16xf32>
    %3 = arith.truncf %2 : vector<30x16xf32> to vector<30x16xbf16>
    %c0_3 = arith.constant 0 : index
    %c0_4 = arith.constant 0 : index
    %4 = vector.load %arg3[%c0_3, %c0_4] : memref<16x16xbf16, #tpu.memory_space<vmem>>, vector<16x16xbf16>
    %cst = arith.constant dense<0.000000e+00> : vector<30x16xf32>
    %5 = tpu.matmul %3, %4, %cst {dimension_numbers = #tpu.dot_dimension_numbers<[1], [0], [0], [1], [0, 0, 1, 1], [], []>} : vector<30x16xbf16>, vector<16x16xbf16>, vector<30x16xf32> -> vector<30x16xf32>
    %c0_5 = arith.constant 0 : index
    %c0_6 = arith.constant 0 : index
    %6 = vector.load %arg5[%c0_5, %c0_6] : memref<1x16xf32, #tpu.memory_space<vmem>>, vector<1x16xf32>
    %7 = vector.broadcast %6 : vector<1x16xf32> to vector<30x16xf32>
    %8 = arith.addf %5, %7 : vector<30x16xf32>
    %cst_7 = arith.constant 0.000000e+00 : f32
    %9 = vector.broadcast %cst_7 : f32 to vector<30x16xf32>
    %10 = arith.maximumf %8, %9 : vector<30x16xf32>
    %11 = arith.truncf %10 : vector<30x16xf32> to vector<30x16xbf16>
    %c0_8 = arith.constant 0 : index
    %c0_9 = arith.constant 0 : index
    %12 = vector.load %arg4[%c0_8, %c0_9] : memref<16x128xbf16, #tpu.memory_space<vmem>>, vector<16x128xbf16>
    %cst_10 = arith.constant dense<0.000000e+00> : vector<30x128xf32>
    %13 = tpu.matmul %11, %12, %cst_10 {dimension_numbers = #tpu.dot_dimension_numbers<[1], [0], [0], [1], [0, 0, 1, 1], [], []>} : vector<30x16xbf16>, vector<16x128xbf16>, vector<30x128xf32> -> vector<30x128xf32>
    %c0_11 = arith.constant 0 : index
    %c0_12 = arith.constant 0 : index
    %14 = vector.load %arg6[%c0_11, %c0_12] : memref<30x128xf32, #tpu.memory_space<vmem>>, vector<30x128xf32>
    tpu.vector_store %arg6[%c0_11, %c0_12], %13 {strides = array<i32>} : memref<30x128xf32, #tpu.memory_space<vmem>>, vector<30x128xf32>,
    return
  }
  func.func @transform_0(%arg0: i32) -> (i32, i32) {
    %c0_i32 = arith.constant 0 : i32
    %c0_i32_0 = arith.constant 0 : i32
    return %arg0, %c0_i32 : i32, i32
  }
  func.func @transform_1(%arg0: i32) -> (i32, i32) {
    %c0_i32 = arith.constant 0 : i32
    %c0_i32_0 = arith.constant 0 : i32
    return %arg0, %c0_i32 : i32, i32
  }
  func.func @transform_2(%arg0: i32) -> (i32, i32) {
    %c0_i32 = arith.constant 0 : i32
    %c0_i32_0 = arith.constant 0 : i32
    %c0_i32_1 = arith.constant 0 : i32
    return %c0_i32, %c0_i32_0 : i32, i32
  }
  func.func @transform_3(%arg0: i32) -> (i32, i32) {
    %c0_i32 = arith.constant 0 : i32
    %c0_i32_0 = arith.constant 0 : i32
    %c0_i32_1 = arith.constant 0 : i32
    return %c0_i32, %c0_i32_0 : i32, i32
  }
  func.func @transform_4(%arg0: i32) -> (i32, i32) {
    %c0_i32 = arith.constant 0 : i32
    %c0_i32_0 = arith.constant 0 : i32
    %c0_i32_1 = arith.constant 0 : i32
    return %c0_i32, %c0_i32_0 : i32, i32
  }
  func.func @transform_5(%arg0: i32) -> (i32, i32) {
    %c0_i32 = arith.constant 0 : i32
    %c0_i32_0 = arith.constant 0 : i32
    return %arg0, %c0_i32 : i32, i32
  }
}

module attributes {stable_mosaic.version = 11 : i64} {
  func.func @_dec_level_kernel(%arg0: i32, %arg1: memref<64x16xf32, #tpu.memory_space<vmem>>, %arg2: memref<64x16xf32, #tpu.memory_space<vmem>>, %arg3: memref<16x16xbf16, #tpu.memory_space<vmem>>, %arg4: memref<16x8xbf16, #tpu.memory_space<vmem>>, %arg5: memref<1x16xf32, #tpu.memory_space<vmem>>, %arg6: memref<64x8xf32, #tpu.memory_space<vmem>>) attributes {dimension_semantics = [#tpu.dimension_semantics<parallel>], iteration_bounds = array<i64: 2>, scalar_prefetch = 0 : i64, scratch_operands = 0 : i64, tpu.core_type = #tpu.core_type<tc>, window_params = [{transform_indices = @transform_0, window_bounds = array<i64: 64, 16>}, {transform_indices = @transform_1, window_bounds = array<i64: 64, 16>}, {pipeline_mode = #tpu.pipeline_mode<synchronous>, transform_indices = @transform_2, window_bounds = array<i64: 16, 16>}, {pipeline_mode = #tpu.pipeline_mode<synchronous>, transform_indices = @transform_3, window_bounds = array<i64: 16, 8>}, {pipeline_mode = #tpu.pipeline_mode<synchronous>, transform_indices = @transform_4, window_bounds = array<i64: 1, 16>}, {transform_indices = @transform_5, window_bounds = array<i64: 64, 8>}]} {
    %c0 = arith.constant 0 : index
    %c0_0 = arith.constant 0 : index
    %0 = vector.load %arg1[%c0, %c0_0] : memref<64x16xf32, #tpu.memory_space<vmem>>, vector<64x16xf32>
    %c0_1 = arith.constant 0 : index
    %c0_2 = arith.constant 0 : index
    %1 = vector.load %arg2[%c0_1, %c0_2] : memref<64x16xf32, #tpu.memory_space<vmem>>, vector<64x16xf32>
    %2 = arith.addf %0, %1 : vector<64x16xf32>
    %3 = arith.truncf %2 : vector<64x16xf32> to vector<64x16xbf16>
    %c0_3 = arith.constant 0 : index
    %c0_4 = arith.constant 0 : index
    %4 = vector.load %arg3[%c0_3, %c0_4] : memref<16x16xbf16, #tpu.memory_space<vmem>>, vector<16x16xbf16>
    %cst = arith.constant dense<0.000000e+00> : vector<64x16xf32>
    %5 = tpu.matmul %3, %4, %cst {dimension_numbers = #tpu.dot_dimension_numbers<[1], [0], [0], [1], [0, 0, 1, 1], [], []>} : vector<64x16xbf16>, vector<16x16xbf16>, vector<64x16xf32> -> vector<64x16xf32>
    %c0_5 = arith.constant 0 : index
    %c0_6 = arith.constant 0 : index
    %6 = vector.load %arg5[%c0_5, %c0_6] : memref<1x16xf32, #tpu.memory_space<vmem>>, vector<1x16xf32>
    %7 = vector.broadcast %6 : vector<1x16xf32> to vector<64x16xf32>
    %8 = arith.addf %5, %7 : vector<64x16xf32>
    %cst_7 = arith.constant 0.000000e+00 : f32
    %9 = vector.broadcast %cst_7 : f32 to vector<64x16xf32>
    %10 = arith.maximumf %8, %9 : vector<64x16xf32>
    %11 = arith.truncf %10 : vector<64x16xf32> to vector<64x16xbf16>
    %c0_8 = arith.constant 0 : index
    %c0_9 = arith.constant 0 : index
    %12 = vector.load %arg4[%c0_8, %c0_9] : memref<16x8xbf16, #tpu.memory_space<vmem>>, vector<16x8xbf16>
    %cst_10 = arith.constant dense<0.000000e+00> : vector<64x8xf32>
    %13 = tpu.matmul %11, %12, %cst_10 {dimension_numbers = #tpu.dot_dimension_numbers<[1], [0], [0], [1], [0, 0, 1, 1], [], []>} : vector<64x16xbf16>, vector<16x8xbf16>, vector<64x8xf32> -> vector<64x8xf32>
    %c0_11 = arith.constant 0 : index
    %c0_12 = arith.constant 0 : index
    %14 = vector.load %arg6[%c0_11, %c0_12] : memref<64x8xf32, #tpu.memory_space<vmem>>, vector<64x8xf32>
    tpu.vector_store %arg6[%c0_11, %c0_12], %13 {strides = array<i32>} : memref<64x8xf32, #tpu.memory_space<vmem>>, vector<64x8xf32>,
    return
  }
  func.func @transform_0(%arg0: i32) -> (i32, i32) {
    %c0_i32 = arith.constant 0 : i32
    %c0_i32_0 = arith.constant 0 : i32
    return %arg0, %c0_i32 : i32, i32
  }
  func.func @transform_1(%arg0: i32) -> (i32, i32) {
    %c0_i32 = arith.constant 0 : i32
    %c0_i32_0 = arith.constant 0 : i32
    return %arg0, %c0_i32 : i32, i32
  }
  func.func @transform_2(%arg0: i32) -> (i32, i32) {
    %c0_i32 = arith.constant 0 : i32
    %c0_i32_0 = arith.constant 0 : i32
    %c0_i32_1 = arith.constant 0 : i32
    return %c0_i32, %c0_i32_0 : i32, i32
  }
  func.func @transform_3(%arg0: i32) -> (i32, i32) {
    %c0_i32 = arith.constant 0 : i32
    %c0_i32_0 = arith.constant 0 : i32
    %c0_i32_1 = arith.constant 0 : i32
    return %c0_i32, %c0_i32_0 : i32, i32
  }
  func.func @transform_4(%arg0: i32) -> (i32, i32) {
    %c0_i32 = arith.constant 0 : i32
    %c0_i32_0 = arith.constant 0 : i32
    %c0_i32_1 = arith.constant 0 : i32
    return %c0_i32, %c0_i32_0 : i32, i32
  }
  func.func @transform_5(%arg0: i32) -> (i32, i32) {
    %c0_i32 = arith.constant 0 : i32
    %c0_i32_0 = arith.constant 0 : i32
    return %arg0, %c0_i32 : i32, i32
  }
}

</mosaic_0001>

<bundles_post_ra>
// kernel: _lambda_.9
= control target key start
LH: loop header
LB: loop body
LE: loop exit
PB: predicated region body
PF: predicated region fallthrough
CT: control target
= control target key end

     0   :  { %vm105_vm0 = vcmask 1043456   ;;  %vm80_vm1 = vcmask 64512   ;;  %v36_v11 = vlaneseq  ;;  %vm242_vm2 = vcmask 130048   ;;  %s635_s1 = inlined_call_operand.vmem [shape: bf16[8,16], index: 1, kind: input, shape index: {}]   ;;  %s636_s0 = inlined_call_operand.vmem [shape: bf16[126,8], index: 0, kind: input, shape index: {}]   ;;  %s637_s2 = inlined_call_operand.vmem [shape: bf16[16,16], index: 2, kind: input, shape index: {}]   ;;  %s638_s3 = inlined_call_operand.vmem [shape: f32[2,16], index: 3, kind: input, shape index: {}]   ;;  %s639_s4 = inlined_call_operand.vmem [shape: f32[126,16], index: 4, kind: output, shape index: {}]  }
   0x1   :  { %v35_v0 = vld [vmem:[%s635_s1] sm:$0xf]  ;;  %v482_v3 = vld [vmem:[%s636_s0 + $0x8] sm:$0xff]   ;;  %v483_v4 = vld [vmem:[%s636_s0 + $0x10] sm:$0xff]   ;;  %vm395_vm3 = vcmask 128000  }
   0x2   :  { %480 = vmatprep.subr.msk.bf16.mxu0 %vm105_vm0, %v35_v0  ;;  %v107_v1 = vsel %vm105_vm0, %v35_v0, 0  ;;  %v481_v2 = vld [vmem:[%s636_s0] sm:$0xff]   ;;  %v484_v5 = vld [vmem:[%s636_s0 + $0x18] sm:$0xff]   ;;  %v486_v7 = vld [vmem:[%s636_s0 + $0x28] sm:$0xff]   ;;  %v553_v12 = vshrl.u32 %v36_v11, 7 }
   0x3   :  { %445 = vmatpush3.bf16.msra.mxu0 %v107_v1  ;;  %446 = vmatprep.mubr.msk.bf16.mxu0 %vm80_vm1, %v481_v2  ;;  %v485_v6 = vld [vmem:[%s636_s0 + $0x20] sm:$0xff]   ;;  %v487_v8 = vld [vmem:[%s636_s0 + $0x30] sm:$0xff]   ;;  %v488_v9 = vld [vmem:[%s636_s0 + $0x38] sm:$0x7f]  }
   0x4   :  { %v489_v10 = vld [vmem:[%s637_s2] sm:$0xff]   ;;  %v38_v13 = vsub.s32 0, %v553_v12 }
   0x5   :  { %462 = vmatprep.subr.bf16.mxu1 %v489_v10  ;;  %v559_v14 = vld [vmem:[%s638_s3] sm:$0x3] }
   0x6   :  { %447 = vmatmul.mubr.msk.bf16.vlgmr.msra.gmra.mrb[0].mxu0 %vm80_vm1, %v482_v3  ;;  %463 = vmatpush3.bf16.msra.mxu1 %v489_v10  ;;  %v39_v15 = vrot.slane %v559_v14, %v38_v13 }
   0x7   :  { %450 = vmatprep.mubr.msk.bf16.mxu0 %vm80_vm1, %v483_v4 }
   0xe   :  { %451 = vmatmul.mubr.msk.bf16.gmra.mrb[4].mxu0 %vm80_vm1, %v484_v5 }
   0xf   :  { %454 = vmatprep.mubr.msk.bf16.mxu0 %vm80_vm1, %v485_v6 }
  0x16   :  { %455 = vmatmul.mubr.msk.bf16.gmra.mrb[8].mxu0 %vm80_vm1, %v486_v7 }
  0x17   :  { %458 = vmatprep.mubr.msk.bf16.mxu0 %vm80_vm1, %v487_v8  ;;  %v234_v8 = vsub.s32 1, %v553_v12 }
  0x1e   :  { %459 = vmatmul.mubr.msk.bf16.gmra.mrb[12].mxu0 %vm80_vm1, %v488_v9  ;;  %v235_v9 = vrot.slane %v559_v14, %v234_v8 }
  0xd9   :  { %v448_v16 = vpop.f32.mrb[0].mxu0 }
  0xda   :  { %v152_v17 = vadd.f32 %v448_v16, %v39_v15  ;;  %v143_v18 = vpop.f32.mrb[1].mxu0 }
  0xdb   :  { %v144_v19 = vadd.f32 %v143_v18, %v39_v15  ;;  %v449_v20 = vpop.f32.mrb[2].mxu0 }
  0xdc   :  { %v155_v21 = vadd.f32 %v449_v20, %v39_v15  ;;  %v146_v22 = vpop.f32.mrb[3].mxu0  ;;  %v208_v24 = vmax.f32 %v152_v17, 0.0 }
  0xdd   :  { %v147_v23 = vadd.f32 %v146_v22, %v39_v15  ;;  %v206_v26 = vmax.f32 %v144_v19, 0.0 }
  0xde   :  { %v209_v25 = vmax.f32 %v155_v21, 0.0 }
  0xdf   :  { %v207_v27 = vmax.f32 %v147_v23, 0.0 }
  0xe0   :  { %v223_v28 = vpack.c.bf16 %v209_v25, %v208_v24 }
  0xe1   :  { %v452_v29 = vpop.f32.mrb[4].mxu0  ;;  %v222_v30 = vpack.c.bf16 %v207_v27, %v206_v26 }
  0xe2   :  { %v168_v31 = vadd.f32 %v452_v29, %v39_v15  ;;  %v159_v32 = vpop.f32.mrb[5].mxu0 }
  0xe3   :  { %v160_v33 = vadd.f32 %v159_v32, %v39_v15  ;;  %v453_v34 = vpop.f32.mrb[6].mxu0  ;;  %464 = vmatprep.mubr.msk.bf16.mxu1 %vm242_vm2, %v222_v30 }
  0xe4   :  { %v171_v35 = vadd.f32 %v453_v34, %v39_v15  ;;  %v162_v36 = vpop.f32.mrb[7].mxu0  ;;  %465 = vmatmul.mubr.msk.bf16.vlgmr.msra.gmra.mrb[0].mxu1 %vm242_vm2, %v223_v28  ;;  %v212_v38 = vmax.f32 %v168_v31, 0.0 }
  0xe5   :  { %v163_v37 = vadd.f32 %v162_v36, %v39_v15  ;;  %v210_v40 = vmax.f32 %v160_v33, 0.0 }
  0xe6   :  { %v213_v39 = vmax.f32 %v171_v35, 0.0 }
  0xe7   :  { %v211_v41 = vmax.f32 %v163_v37, 0.0 }
  0xe8   :  { %v225_v42 = vpack.c.bf16 %v213_v39, %v212_v38 }
  0xe9   :  { %v224_v43 = vpack.c.bf16 %v211_v41, %v210_v40  ;;  %v456_v44 = vpop.f32.mrb[8].mxu0 }
  0xea   :  { %v184_v45 = vadd.f32 %v456_v44, %v39_v15  ;;  %v175_v46 = vpop.f32.mrb[9].mxu0 }
  0xeb   :  { %v176_v47 = vadd.f32 %v175_v46, %v39_v15  ;;  %v457_v48 = vpop.f32.mrb[10].mxu0  ;;  %468 = vmatprep.mubr.msk.bf16.mxu1 %vm242_vm2, %v224_v43 }
  0xec   :  { %v187_v49 = vadd.f32 %v457_v48, %v39_v15  ;;  %v178_v50 = vpop.f32.mrb[11].mxu0  ;;  %469 = vmatmul.mubr.msk.bf16.gmra.mrb[4].mxu1 %vm242_vm2, %v225_v42  ;;  %v216_v52 = vmax.f32 %v184_v45, 0.0 }
  0xed   :  { %v179_v51 = vadd.f32 %v178_v50, %v39_v15  ;;  %v214_v54 = vmax.f32 %v176_v47, 0.0 }
  0xee   :  { %v217_v53 = vmax.f32 %v187_v49, 0.0 }
  0xef   :  { %v215_v55 = vmax.f32 %v179_v51, 0.0 }
  0xf0   :  { %v227_v56 = vpack.c.bf16 %v217_v53, %v216_v52 }
  0xf1   :  { %v226_v57 = vpack.c.bf16 %v215_v55, %v214_v54  ;;  %v460_v58 = vpop.f32.mrb[12].mxu0 }
  0xf2   :  { %v200_v59 = vadd.f32 %v460_v58, %v39_v15  ;;  %v191_v60 = vpop.f32.mrb[13].mxu0 }
  0xf3   :  { %v192_v61 = vadd.f32 %v191_v60, %v39_v15  ;;  %v461_v62 = vpop.f32.mrb[14].mxu0  ;;  %472 = vmatprep.mubr.msk.bf16.mxu1 %vm242_vm2, %v226_v57 }
  0xf4   :  { %v203_v63 = vadd.f32 %v461_v62, %v39_v15  ;;  %v194_v0 = vpop.f32.mrb[15].mxu0  ;;  %473 = vmatmul.mubr.msk.bf16.gmra.mrb[8].mxu1 %vm242_vm2, %v227_v56  ;;  %v220_v2 = vmax.f32 %v200_v59, 0.0 }
  0xf5   :  { %v195_v1 = vadd.f32 %v194_v0, %v39_v15  ;;  %v218_v4 = vmax.f32 %v192_v61, 0.0 }
  0xf6   :  { %v221_v3 = vmax.f32 %v203_v63, 0.0 }
  0xf7   :  { %v219_v5 = vmax.f32 %v195_v1, 0.0 }
  0xf8   :  { %v229_v6 = vpack.c.bf16 %v221_v3, %v220_v2 }
  0xf9   :  { %v228_v7 = vpack.c.bf16 %v219_v5, %v218_v4 }
  0xfb   :  { %476 = vmatprep.mubr.msk.bf16.mxu1 %vm242_vm2, %v228_v7 }
  0xfc   :  { %477 = vmatmul.mubr.msk.bf16.gmra.mrb[12].mxu1 %vm242_vm2, %v229_v6 }
 0x1b7   :  { %v466_v10 = vpop.f32.mrb[0].mxu1 }
 0x1b8   :  { %v310_v11 = vadd.f32 %v466_v10, %v235_v9  ;;  %v301_v13 = vpop.f32.mrb[1].mxu1 }
 0x1b9   :  { %v302_v16 = vadd.f32 %v301_v13, %v235_v9  ;;  %v467_v17 = vpop.f32.mrb[2].mxu1 }
 0x1ba   :  { %v366_v15 = vmax.f32 %v310_v11, 0.0  ;;  %v313_v18 = vadd.f32 %v467_v17, %v235_v9  ;;  %v304_v19 = vpop.f32.mrb[3].mxu1 }
 0x1bb   :  { %v364_v20 = vmax.f32 %v302_v16, 0.0  ;;  %v305_v21 = vadd.f32 %v304_v19, %v235_v9 }
 0x1bc   :  { %382 = vst.msk [vmem:[%s639_s4 + $0x10] sm:$0xff] %vm242_vm2, %v366_v15  ;;  %v367_v22 = vmax.f32 %v313_v18, 0.0 }
 0x1bd   :  { %380 = vst.msk [vmem:[%s639_s4] sm:$0xff] %vm242_vm2, %v364_v20  ;;  %v365_v12 = vmax.f32 %v305_v21, 0.0 }
 0x1be   :  { %383 = vst.msk [vmem:[%s639_s4 + $0x18] sm:$0xff] %vm242_vm2, %v367_v22 }
 0x1bf   :  { %381 = vst.msk [vmem:[%s639_s4 + $0x8] sm:$0xff] %vm242_vm2, %v365_v12  ;;  %v470_v14 = vpop.f32.mrb[4].mxu1 }
 0x1c0   :  { %v326_v23 = vadd.f32 %v470_v14, %v235_v9  ;;  %v317_v24 = vpop.f32.mrb[5].mxu1 }
 0x1c1   :  { %v318_v25 = vadd.f32 %v317_v24, %v235_v9  ;;  %v471_v26 = vpop.f32.mrb[6].mxu1 }
 0x1c2   :  { %v370_v27 = vmax.f32 %v326_v23, 0.0  ;;  %v329_v28 = vadd.f32 %v471_v26, %v235_v9  ;;  %v320_v29 = vpop.f32.mrb[7].mxu1 }
 0x1c3   :  { %v368_v30 = vmax.f32 %v318_v25, 0.0  ;;  %v321_v31 = vadd.f32 %v320_v29, %v235_v9 }
 0x1c4   :  { %386 = vst.msk [vmem:[%s639_s4 + $0x30] sm:$0xff] %vm242_vm2, %v370_v27  ;;  %v371_v32 = vmax.f32 %v329_v28, 0.0 }
 0x1c5   :  { %384 = vst.msk [vmem:[%s639_s4 + $0x20] sm:$0xff] %vm242_vm2, %v368_v30  ;;  %v369_v33 = vmax.f32 %v321_v31, 0.0 }
 0x1c6   :  { %387 = vst.msk [vmem:[%s639_s4 + $0x38] sm:$0xff] %vm242_vm2, %v371_v32 }
 0x1c7   :  { %385 = vst.msk [vmem:[%s639_s4 + $0x28] sm:$0xff] %vm242_vm2, %v369_v33  ;;  %v474_v34 = vpop.f32.mrb[8].mxu1 }
 0x1c8   :  { %v342_v35 = vadd.f32 %v474_v34, %v235_v9  ;;  %v333_v36 = vpop.f32.mrb[9].mxu1 }
 0x1c9   :  { %v334_v37 = vadd.f32 %v333_v36, %v235_v9  ;;  %v475_v38 = vpop.f32.mrb[10].mxu1 }
 0x1ca   :  { %v374_v39 = vmax.f32 %v342_v35, 0.0  ;;  %v345_v40 = vadd.f32 %v475_v38, %v235_v9  ;;  %v336_v41 = vpop.f32.mrb[11].mxu1 }
 0x1cb   :  { %v372_v42 = vmax.f32 %v334_v37, 0.0  ;;  %v337_v43 = vadd.f32 %v336_v41, %v235_v9 }
 0x1cc   :  { %390 = vst.msk [vmem:[%s639_s4 + $0x50] sm:$0xff] %vm242_vm2, %v374_v39  ;;  %v375_v44 = vmax.f32 %v345_v40, 0.0 }
 0x1cd   :  { %388 = vst.msk [vmem:[%s639_s4 + $0x40] sm:$0xff] %vm242_vm2, %v372_v42  ;;  %v373_v45 = vmax.f32 %v337_v43, 0.0 }
 0x1ce   :  { %391 = vst.msk [vmem:[%s639_s4 + $0x58] sm:$0xff] %vm242_vm2, %v375_v44 }
 0x1cf   :  { %389 = vst.msk [vmem:[%s639_s4 + $0x48] sm:$0xff] %vm242_vm2, %v373_v45  ;;  %v478_v46 = vpop.f32.mrb[12].mxu1 }
 0x1d0   :  { %v358_v47 = vadd.f32 %v478_v46, %v235_v9  ;;  %v349_v48 = vpop.f32.mrb[13].mxu1 }
 0x1d1   :  { %v350_v49 = vadd.f32 %v349_v48, %v235_v9  ;;  %v479_v50 = vpop.f32.mrb[14].mxu1 }
 0x1d2   :  { %v378_v51 = vmax.f32 %v358_v47, 0.0  ;;  %v361_v52 = vadd.f32 %v479_v50, %v235_v9  ;;  %v352_v53 = vpop.f32.mrb[15].mxu1 }
 0x1d3   :  { %v376_v54 = vmax.f32 %v350_v49, 0.0  ;;  %v353_v55 = vadd.f32 %v352_v53, %v235_v9 }
 0x1d4   :  { %394 = vst.msk [vmem:[%s639_s4 + $0x70] sm:$0xff] %vm242_vm2, %v378_v51  ;;  %v379_v56 = vmax.f32 %v361_v52, 0.0 }
 0x1d5   :  { %392 = vst.msk [vmem:[%s639_s4 + $0x60] sm:$0xff] %vm242_vm2, %v376_v54  ;;  %v377_v57 = vmax.f32 %v353_v55, 0.0 }
 0x1d6   :  { %396 = vst.msk [vmem:[%s639_s4 + $0x78] sm:$0x3f] %vm395_vm3, %v379_v56 }
 0x1d7   :  { %393 = vst.msk [vmem:[%s639_s4 + $0x68] sm:$0xff] %vm242_vm2, %v377_v57 }

// kernel: _lambda_.10
= control target key start
LH: loop header
LB: loop body
LE: loop exit
PB: predicated region body
PF: predicated region fallthrough
CT: control target
= control target key end

     0   :  { %s731_s0 = inlined_call_operand.vmem [shape: bf16[128,128], index: 0, kind: input, shape index: {}]   ;;  %s732_s1 = inlined_call_operand.vmem [shape: bf16[128,16], index: 1, kind: input, shape index: {}]   ;;  %s733_s2 = inlined_call_operand.vmem [shape: f32[1,16], index: 2, kind: input, shape index: {}]   ;;  %s734_s3 = inlined_call_operand.vmem [shape: f32[2,128], index: 3, kind: input, shape index: {}]   ;;  %s735_s4 = inlined_call_operand.vmem [shape: bf16[16,4], index: 4, kind: input, shape index: {}]   ;;  %s736_s5 = inlined_call_operand.vmem [shape: f32[1,4], index: 5, kind: input, shape index: {}]   ;;  %s737_s6 = inlined_call_operand.vmem [shape: f32[2,16], index: 6, kind: output, shape index: {0}]   ;;  %s738_s7 = inlined_call_operand.hbm [shape: f32[2,4], index: 7, kind: output, shape index: {1}]  }
   0x1   :  { %v569_v0 = vld [vmem:[%s732_s1] sm:$0xff]   ;;  %v570_v1 = vld [vmem:[%s732_s1 + $0x8] sm:$0xff]   ;;  %v571_v2 = vld [vmem:[%s732_s1 + $0x10] sm:$0xff]  }
   0x2   :  { %468 = vmatprep.subr.bf16.mxu0 %v569_v0  ;;  %v572_v3 = vld [vmem:[%s732_s1 + $0x18] sm:$0xff]   ;;  %v577_v4 = vld [vmem:[%s731_s0] sm:$0xff]   ;;  %v574_v6 = vld [vmem:[%s732_s1 + $0x28] sm:$0xff]  }
   0x3   :  { %469 = vmatpush3.bf16.msra.mxu0 %v569_v0  ;;  %484 = vmatprep.mubr.bf16.mxu0 %v577_v4  ;;  %v573_v5 = vld [vmem:[%s732_s1 + $0x20] sm:$0xff]  }
   0x4   :  { %470 = vmatprep.subr.bf16.mxu0 %v570_v1 }
   0x7   :  { %471 = vmatpush3.bf16.msra.mxu0 %v570_v1 }
   0x8   :  { %472 = vmatprep.subr.bf16.mxu0 %v571_v2 }
   0xb   :  { %473 = vmatpush3.bf16.msra.mxu0 %v571_v2 }
   0xc   :  { %474 = vmatprep.subr.bf16.mxu0 %v572_v3 }
   0xf   :  { %475 = vmatpush3.bf16.msra.mxu0 %v572_v3 }
  0x10   :  { %476 = vmatprep.subr.bf16.mxu0 %v573_v5 }
  0x11   :  { %13 = vsyncpa [#allocation3], 0  ;;  %v575_v7 = vld [vmem:[%s732_s1 + $0x30] sm:$0xff]   ;;  %v576_v8 = vld [vmem:[%s732_s1 + $0x38] sm:$0xff]   ;;  %v610_v16 = vmov 0.0|0.0   ;;  %vm611_vm0 = vmmov 0  }
  0x12   :  { %v578_v9 = vld [vmem:[%s731_s0 + $0x8] sm:$0xff]   ;;  %v579_v10 = vld [vmem:[%s731_s0 + $0x10] sm:$0xff]   ;;  %v580_v11 = vld [vmem:[%s731_s0 + $0x18] sm:$0xff]   ;;  %541 = vmatprep.subr.bf16.mxu1 %v610_v16  ;;  %v612_v17 = vmov 0.0   ;;  %vm330_vm1 = vcmask 123904   ;;  %vm349_vm2 = vcmask 130048  }
  0x13   :  { %477 = vmatpush3.bf16.msra.mxu0 %v573_v5  ;;  %v581_v12 = vld [vmem:[%s731_s0 + $0x20] sm:$0xff]   ;;  %v582_v13 = vld [vmem:[%s731_s0 + $0x28] sm:$0xff]   ;;  %v583_v14 = vld [vmem:[%s731_s0 + $0x30] sm:$0xff]   ;;  %532 = vmatprep.mubr.msk.f32.mxu1 %vm611_vm0, %v612_v17  ;;  %s613_s16 = smov [#allocation2]   ;;  %vm393_vm3 = vcmask 25600  }
  0x14   :  { %478 = vmatprep.subr.bf16.mxu0 %v574_v6  ;;  %v584_v15 = vld [vmem:[%s731_s0 + $0x38] sm:$0xff]   ;;  %v413_v19 = vld [vmem:[%s733_s2] ss:$0 sm:$0xff]  ;;  %s403_s17 = sshll.u32 %s613_s16, 4  ;;  %s404_s17 = int_to_ptr.vmem [resolvable:$true] %s403_s17 }
  0x15   :  { %v259_v59 = vld [vmem:[%s734_s3] sm:$0x3]  ;;  %p591_p1 = scmp.lt.s32.totalorder %s404_s17, %s404_s17 }
  0x16   :  { %v585_v60 = vld [vmem:[%s735_s4] sm:$0xff]   ;;  %s586_s4 = scalar_lea.vmem %s404_s17, 32 }
  0x17   :  { %479 = vmatpush3.bf16.msra.mxu0 %v574_v6  ;;  %v430_v1 = vld [vmem:[%s736_s5] ss:$0 sm:$0xff]  ;;  %p587_p0 = scmp.ne.s32.totalorder %s404_s17, %s586_s4  ;;  %p592_p2 = scmp.lt.s32.totalorder %s586_s4, %s586_s4 }
  0x18   :  { %480 = vmatprep.subr.bf16.mxu0 %v575_v7 }
  0x19   :  { %p593_p3 = por %p592_p2, %p591_p1 }
  0x1b   :  { %481 = vmatpush3.bf16.msra.mxu0 %v575_v7  ;;  %p594_p4 = pnand %p593_p3, %p587_p0 }
  0x1c   :  { %482 = vmatprep.subr.bf16.mxu0 %v576_v8 }
  0x1f   :  { %483 = vmatpush3.bf16.msra.mxu0 %v576_v8 }
  0x22   :  { %485 = vmatmul.mubr.bf16.vlgmr.msra.gmra.mrb[0].mxu0 %v578_v9 }
  0x23   :  { %488 = vmatprep.mubr.bf16.mxu0 %v579_v10 }
  0x2a   :  { %489 = vmatmul.mubr.bf16.gmra.mrb[4].mxu0 %v580_v11 }
  0x2b   :  { %492 = vmatprep.mubr.bf16.mxu0 %v581_v12 }
  0x32   :  { %493 = vmatmul.mubr.bf16.gmra.mrb[8].mxu0 %v582_v13 }
  0x33   :  { %496 = vmatprep.mubr.bf16.mxu0 %v583_v14 }
  0x3a   :  { %497 = vmatmul.mubr.bf16.gmra.mrb[12].mxu0 %v584_v15 }
  0xf5   :  { %v486_v18 = vpop.f32.mrb[0].mxu0 }
  0xf6   :  { %v196_v20 = vpop.f32.mrb[1].mxu0  ;;  %v205_v22 = vadd.f32 %v486_v18, %v413_v19 }
  0xf7   :  { %v487_v21 = vpop.f32.mrb[2].mxu0  ;;  %v197_v25 = vadd.f32 %v413_v19, %v196_v20 }
  0xf8   :  { %v208_v23 = vadd.f32 %v487_v21, %v413_v19  ;;  %v199_v24 = vpop.f32.mrb[3].mxu0 }
  0xf9   :  { %v200_v26 = vadd.f32 %v413_v19, %v199_v24 }
  0xfa   :  { %v545_v27 = vpack.c.bf16 %v208_v23, %v205_v22 }
  0xfb   :  { %v542_v28 = vpack.c.bf16 %v200_v26, %v197_v25 }
  0xfd   :  { %v490_v29 = vpop.f32.mrb[4].mxu0  ;;  %543 = vmatpush3.bf16.msra.mxu1 %v542_v28 }
  0xfe   :  { %v212_v30 = vpop.f32.mrb[5].mxu0  ;;  %544 = vmatprep.subr.bf16.mxu1 %v610_v16  ;;  %v221_v32 = vadd.f32 %v490_v29, %v413_v19 }
  0xff   :  { %v491_v31 = vpop.f32.mrb[6].mxu0  ;;  %v213_v35 = vadd.f32 %v413_v19, %v212_v30 }
 0x100   :  { %v224_v33 = vadd.f32 %v491_v31, %v413_v19  ;;  %v215_v34 = vpop.f32.mrb[7].mxu0 }
 0x101   :  { %v216_v36 = vadd.f32 %v413_v19, %v215_v34  ;;  %546 = vmatpush3.bf16.msra.mxu1 %v545_v27 }
 0x102   :  { %v551_v37 = vpack.c.bf16 %v224_v33, %v221_v32  ;;  %547 = vmatprep.subr.bf16.mxu1 %v610_v16 }
 0x103   :  { %v548_v38 = vpack.c.bf16 %v216_v36, %v213_v35 }
 0x105   :  { %v494_v39 = vpop.f32.mrb[8].mxu0  ;;  %549 = vmatpush3.bf16.msra.mxu1 %v548_v38 }
 0x106   :  { %v228_v40 = vpop.f32.mrb[9].mxu0  ;;  %550 = vmatprep.subr.bf16.mxu1 %v610_v16  ;;  %v237_v42 = vadd.f32 %v494_v39, %v413_v19 }
 0x107   :  { %v495_v41 = vpop.f32.mrb[10].mxu0  ;;  %v229_v45 = vadd.f32 %v413_v19, %v228_v40 }
 0x108   :  { %v240_v43 = vadd.f32 %v495_v41, %v413_v19  ;;  %v231_v44 = vpop.f32.mrb[11].mxu0 }
 0x109   :  { %v232_v46 = vadd.f32 %v413_v19, %v231_v44  ;;  %552 = vmatpush3.bf16.msra.mxu1 %v551_v37 }
 0x10a   :  { %v557_v47 = vpack.c.bf16 %v240_v43, %v237_v42  ;;  %553 = vmatprep.subr.bf16.mxu1 %v610_v16 }
 0x10b   :  { %v554_v48 = vpack.c.bf16 %v232_v46, %v229_v45 }
 0x10d   :  { %v498_v49 = vpop.f32.mrb[12].mxu0  ;;  %555 = vmatpush3.bf16.msra.mxu1 %v554_v48 }
 0x10e   :  { %v244_v50 = vpop.f32.mrb[13].mxu0  ;;  %556 = vmatprep.subr.bf16.mxu1 %v610_v16  ;;  %v253_v52 = vadd.f32 %v498_v49, %v413_v19 }
 0x10f   :  { %v499_v51 = vpop.f32.mrb[14].mxu0  ;;  %v245_v55 = vadd.f32 %v413_v19, %v244_v50 }
 0x110   :  { %v256_v53 = vadd.f32 %v499_v51, %v413_v19  ;;  %v247_v54 = vpop.f32.mrb[15].mxu0 }
 0x111   :  { %v248_v56 = vadd.f32 %v413_v19, %v247_v54  ;;  %558 = vmatpush3.bf16.msra.mxu1 %v557_v47 }
 0x112   :  { %v563_v57 = vpack.c.bf16 %v256_v53, %v253_v52  ;;  %559 = vmatprep.subr.bf16.mxu1 %v610_v16 }
 0x113   :  { %v560_v58 = vpack.c.bf16 %v248_v56, %v245_v55 }
 0x115   :  { %561 = vmatpush3.bf16.msra.mxu1 %v560_v58 }
 0x116   :  { %562 = vmatprep.subr.bf16.mxu1 %v610_v16 }
 0x119   :  { %564 = vmatpush3.bf16.msra.mxu1 %v563_v57 }
 0x11a   :  { %535 = vmatprep.subr.bf16.mxu1 %v612_v17 }
 0x11c   :  { %533 = vmatmul.mubr.f32.vlgmr.msra.gmra.mrb[0].mxu1 %v259_v59 }
 0x11d   :  { %537 = vmatprep.mubr.msk.bf16.mxu1 %vm611_vm0, %v612_v17  ;;  %536 = vmatpush3.bf16.msra.mxu1 %v585_v60 }
 0x1ef   :  { %v326_v61 = vpop.f32.mrb[0].mxu1 }
 0x1f0   :  { %331 = vst.msk [vmem:[%s737_s6] sm:$0x3] %vm330_vm1, %v326_v61  ;;  %v332_v62 = vmax.f32 %v326_v61, 0.0  ;;  %v534_v63 = vpop.f32.mrb[1].mxu1 }
 0x1f2   :  { %v333_v0 = vpack.c.bf16 %v332_v62, %v332_v62 }
 0x1f4   :  { %538 = vmatmul.mubr.msk.bf16.vlgmr.msra.gmra.mrb[4].mxu1 %vm349_vm2, %v333_v0 }
 0x2c7   :  { %v387_v2 = vpop.f32.mrb[4].mxu1 }
 0x2c8   :  { %v388_v3 = vadd.f32 %v430_v1, %v387_v2  ;;  %v539_v4 = vpop.f32.mrb[5].mxu1 }
 0x2c9   :  { %v390_v5 = vpop.f32.mrb[6].mxu1 }
 0x2ca   :  { %v540_v6 = vpop.f32.mrb[7].mxu1  ;;  %394 = vst.msk [vmem:[#allocation2] sm:$0x3] %vm393_vm3, %v388_v3 }
 0x2cb   :  { %597 = shalt.err (!%p594_p4)
}
 0x2cc   :  { %s598_s5 = scalar_lea.hbm %s738_s7, 32 }
 0x2cd   :  { %p599_p5 = scmp.ne.s32.totalorder %s738_s7, %s598_s5  ;;  %p602_p6 = scmp.lt.u32.totalorder %s598_s5, %s738_s7 }
 0x2cf   :  { %p604_p7 = pnand %p602_p6, %p599_p5 }
 0x2d1   :  { %607 = shalt.err (!%p604_p7)
}
 0x2d2   :  { %406 = dma.vmem_to_hbm [thread:$0]  %s404_s17, 32, %s738_s7, [#allocation3]  }
 0x2d3   :  { %608 = dma.done.wait [#allocation3], 32  }
 0x2d4   :  { %609 = vsyncadd [#allocation3], 4294967264 }
 0x2d5   :  { %412 = vsyncpa [#allocation3], 1 }

// kernel: _lambda_.11
= control target key start
LH: loop header
LB: loop body
LE: loop exit
PB: predicated region body
PF: predicated region fallthrough
CT: control target
= control target key end

     0   :  { %s1352_s24 = smov 0   ;;  %s1608_s0 = inlined_call_operand.vmem [shape: bf16[128,8], index: 0, kind: input, shape index: {}]   ;;  %s1609_s1 = inlined_call_operand.vmem [shape: bf16[128,16], index: 1, kind: input, shape index: {}]   ;;  %s1610_s2 = inlined_call_operand.vmem [shape: bf16[8,16], index: 2, kind: input, shape index: {}]   ;;  %s1611_s3 = inlined_call_operand.vmem [shape: bf16[16,16], index: 3, kind: input, shape index: {}]   ;;  %s1612_s4 = inlined_call_operand.vmem [shape: bf16[16,16], index: 4, kind: input, shape index: {}]   ;;  %s1613_s5 = inlined_call_operand.vmem [shape: bf16[16,16], index: 5, kind: input, shape index: {}]   ;;  %s1614_s6 = inlined_call_operand.vmem [shape: f32[9,16], index: 6, kind: input, shape index: {}]   ;;  %s1615_s7 = inlined_call_operand.vmem [shape: f32[128,16], index: 7, kind: output, shape index: {}]  }
   0x1 LB: > { %s1143_s25 = sadd.s32 4294967295, %s1310_s24   ;;  %p1147_p0 = scmp.ge.s32.totalorder %s1310_s24, 1  ;;  %s1310_s24 = sphi %s1352_s24, %s17_s24  }
   0x2   : > { %p249_p1 = scmp.lt.s32.totalorder %s1310_s24, 3 }
   0x4   : > { %p250_p2 = pnand %p1147_p0, %p249_p1 }
   0x5   : > { %v315_v0 = vld [vmem:[%s1610_s2] sm:$0xf] (!%p250_p2)  ;;  %vm353_vm0 = vcmask (!%p250_p2), 1043456   ;;  %s1148_s28 = sshll.u32 (!%p250_p2), %s1143_s25, 3  ;;  %vm340_vm1 = vcmask (!%p250_p2), 64512   ;;  %v316_v7 = vlaneseq (!%p250_p2)  ;;  %vm446_vm2 = vcmask (!%p250_p2), 130048  }
   0x6   : > { %253 = sbr.rel (%p250_p2) target bundleno = 1331 (0x533), region = 48  ;;  %v1265_v1 = vld [vmem:[%s1611_s3] sm:$0xff] (!%p250_p2)   ;;  %1252 = vmatprep.subr.msk.bf16.mxu1 (!%p250_p2), %vm353_vm0, %v315_v0  ;;  %v355_v2 = vsel (!%p250_p2), %vm353_vm0, %v315_v0, 0  ;;  %p287_p3 = scmp.lt.s32.totalorder (!%p250_p2), %s1148_s28, 15 }
   0x7   : > { %1205 = vmatpush3.bf16.msra.mxu1 (!%p250_p2), %v355_v2  ;;  %v1374_v8 = vshrl.u32 (!%p250_p2), %v316_v7, 7  ;;  %v1380_v10 = vld [vmem:[%s1614_s6] sm:$0xff] (!%p250_p2) }
   0x8   : > { %1214 = vmatprep.subr.bf16.mxu1 (!%p250_p2), %v1265_v1 }
   0x9   : > { %v318_v9 = vsub.s32 (!%p250_p2), 0, %v1374_v8  ;;  %v438_v40 = vsub.s32 (!%p250_p2), 1, %v1374_v8  ;;  %v542_v42 = vsub.s32 (!%p250_p2), 2, %v1374_v8 }
   0xb   : > { %v319_v11 = vrot.slane (!%p250_p2), %v1380_v10, %v318_v9  ;;  %v439_v41 = vrot.slane (!%p250_p2), %v1380_v10, %v438_v40  ;;  %v543_v46 = vrot.slane (!%p250_p2), %v1380_v10, %v542_v42 }
   0xd   : > { %s1617_s28 = smov (!%p287_p3, %s1148_s28), 15 }
   0xe   : > { %s1149_s8 = sshll.u32 %s1617_s28, 2  ;;  %s1153_s23 = sshll.u32 %s1617_s28, 3 }
   0xf   : > { %s290_s11 = scalar_lea.vmem %s1608_s0, %s1149_s8  ;;  %s296_s18 = scalar_lea.vmem %s1609_s1, %s1149_s8 }
  0x10   : > { %v1261_v3 = vld [vmem:[%s290_s11] sm:$0xff]   ;;  %v1262_v4 = vld [vmem:[%s290_s11 + $0x8] sm:$0xff]   ;;  %v1263_v5 = vld [vmem:[%s290_s11 + $0x10] sm:$0xff]   ;;  %s1574_s27 = scalar_lea.vmem %s1615_s7, %s1153_s23 }
  0x11   : > { %1206 = vmatprep.mubr.msk.bf16.mxu1 %vm340_vm1, %v1261_v3  ;;  %v1264_v6 = vld [vmem:[%s290_s11 + $0x18] sm:$0xff]  }
  0x12   : > { %1207 = vmatmul.mubr.msk.bf16.vlgmr.msra.gmra.mrb[0].mxu1 %vm340_vm1, %v1262_v4 }
  0x13   : > { %1210 = vmatprep.mubr.msk.bf16.mxu1 %vm340_vm1, %v1263_v5  ;;  %1215 = vmatpush3.bf16.msra.mxu1 %v1265_v1 }
  0x1a   : > { %1211 = vmatmul.mubr.msk.bf16.gmra.mrb[4].mxu1 %vm340_vm1, %v1264_v6 }
  0xe5   : > { %v1208_v12 = vpop.f32.mrb[0].mxu1 }
  0xe6   : > { %v400_v13 = vadd.f32 %v1208_v12, %v319_v11  ;;  %v391_v14 = vpop.f32.mrb[1].mxu1 }
  0xe7   : > { %v392_v15 = vadd.f32 %v391_v14, %v319_v11  ;;  %v1209_v16 = vpop.f32.mrb[2].mxu1 }
  0xe8   : > { %v403_v17 = vadd.f32 %v1209_v16, %v319_v11  ;;  %v394_v18 = vpop.f32.mrb[3].mxu1  ;;  %v424_v20 = vmax.f32 %v400_v13, 0.0 }
  0xe9   : > { %v395_v19 = vadd.f32 %v394_v18, %v319_v11  ;;  %v422_v22 = vmax.f32 %v392_v15, 0.0 }
  0xea   : > { %v425_v21 = vmax.f32 %v403_v17, 0.0 }
  0xeb   : > { %v423_v23 = vmax.f32 %v395_v19, 0.0 }
  0xec   : > { %v431_v24 = vpack.c.bf16 %v425_v21, %v424_v20 }
  0xed   : > { %v430_v25 = vpack.c.bf16 %v423_v23, %v422_v22  ;;  %v1212_v26 = vpop.f32.mrb[4].mxu1 }
  0xee   : > { %v416_v27 = vadd.f32 %v1212_v26, %v319_v11  ;;  %v407_v28 = vpop.f32.mrb[5].mxu1 }
  0xef   : > { %v408_v29 = vadd.f32 %v407_v28, %v319_v11  ;;  %v1213_v30 = vpop.f32.mrb[6].mxu1  ;;  %1216 = vmatprep.mubr.msk.bf16.mxu1 %vm446_vm2, %v430_v25 }
  0xf0   : > { %v428_v31 = vmax.f32 %v416_v27, 0.0  ;;  %v419_v32 = vadd.f32 %v1213_v30, %v319_v11  ;;  %v410_v33 = vpop.f32.mrb[7].mxu1  ;;  %1217 = vmatmul.mubr.msk.bf16.vlgmr.msra.gmra.mrb[8].mxu1 %vm446_vm2, %v431_v24 }
  0xf1   : > { %v426_v34 = vmax.f32 %v408_v29, 0.0  ;;  %v411_v35 = vadd.f32 %v410_v33, %v319_v11 }
  0xf2   : > { %v429_v36 = vmax.f32 %v419_v32, 0.0 }
  0xf3   : > { %v427_v37 = vmax.f32 %v411_v35, 0.0 }
  0xf4   : > { %v433_v38 = vpack.c.bf16 %v429_v36, %v428_v31 }
  0xf5   : > { %v432_v39 = vpack.c.bf16 %v427_v37, %v426_v34 }
  0xf7   : > { %1220 = vmatprep.mubr.msk.bf16.mxu1 %vm446_vm2, %v432_v39 }
  0xf8   : > { %1221 = vmatmul.mubr.msk.bf16.gmra.mrb[12].mxu1 %vm446_vm2, %v433_v38 }
 0x1c3   : > { %v1218_v43 = vpop.f32.mrb[8].mxu1 }
 0x1c4   : > { %v502_v44 = vadd.f32 %v1218_v43, %v439_v41  ;;  %v493_v45 = vpop.f32.mrb[9].mxu1 }
 0x1c5   : > { %v494_v47 = vadd.f32 %v493_v45, %v439_v41  ;;  %v1219_v48 = vpop.f32.mrb[10].mxu1 }
 0x1c6   : > { %v1391_v49 = vmax.f32 %v502_v44, 0.0  ;;  %v505_v50 = vadd.f32 %v1219_v48, %v439_v41  ;;  %v496_v51 = vpop.f32.mrb[11].mxu1 }
 0x1c7   : > { %v1393_v52 = vmax.f32 %v494_v47, 0.0  ;;  %v497_v53 = vadd.f32 %v496_v51, %v439_v41 }
 0x1c8   : > { %v1395_v54 = vmax.f32 %v505_v50, 0.0  ;;  %vm534_vm3 = vcmp.ge.f32.partialorder %v1391_v49, 0.0  ;;  %v546_v55 = vmul.f32 %v543_v46, %v1391_v49 }
 0x1c9   : > { %v1399_v56 = vmax.f32 %v497_v53, 0.0  ;;  %vm532_vm4 = vcmp.ge.f32.partialorder %v1393_v52, 0.0  ;;  %v544_v57 = vmul.f32 %v543_v46, %v1393_v52 }
 0x1ca   : > { %v554_v58 = vsel %vm534_vm3, %v1391_v49, %v546_v55  ;;  %vm535_vm5 = vcmp.ge.f32.partialorder %v1395_v54, 0.0  ;;  %v547_v59 = vmul.f32 %v543_v46, %v1395_v54 }
 0x1cb   : > { %v1222_v60 = vpop.f32.mrb[12].mxu1  ;;  %v566_v61 = vsel %vm446_vm2, %v554_v58, 0.0  ;;  %v552_v62 = vsel %vm532_vm4, %v1393_v52, %v544_v57  ;;  %vm533_vm6 = vcmp.ge.f32.partialorder %v1399_v56, 0.0  ;;  %v545_v63 = vmul.f32 %v543_v46, %v1399_v56 }
 0x1cc   : > { %v518_v0 = vadd.f32 %v1222_v60, %v439_v41  ;;  %567 = vadd.xlane.f32.xlu1 %v566_v61  ;;  %v509_v1 = vpop.f32.mrb[13].mxu1  ;;  %v560_v2 = vsel %vm446_vm2, %v552_v62, 0.0  ;;  %v555_v3 = vsel %vm535_vm5, %v1395_v54, %v547_v59 }
 0x1cd   : > { %v510_v4 = vadd.f32 %v509_v1, %v439_v41  ;;  %v1223_v5 = vpop.f32.mrb[14].mxu1  ;;  %561 = vadd.xlane.f32.xlu0 %v560_v2  ;;  %v553_v6 = vsel %vm533_vm6, %v1399_v56, %v545_v63  ;;  %v569_v14 = vsel %vm446_vm2, %v555_v3, 0.0 }
 0x1ce   : > { %v1413_v7 = vmax.f32 %v518_v0, 0.0  ;;  %v521_v9 = vadd.f32 %v1223_v5, %v439_v41  ;;  %v512_v11 = vpop.f32.mrb[15].mxu1  ;;  %v563_v16 = vsel %vm446_vm2, %v553_v6, 0.0 }
 0x1cf   : > { %v1415_v12 = vmax.f32 %v510_v4, 0.0  ;;  %v513_v13 = vadd.f32 %v512_v11, %v439_v41 }
 0x1d0   : > { %v1418_v15 = vmax.f32 %v521_v9, 0.0  ;;  %570 = vadd.xlane.f32.xlu1 %v569_v14  ;;  %v550_v19 = vmul.f32 %v543_v46, %v1413_v7  ;;  %vm538_vm8 = vcmp.ge.f32.partialorder %v1413_v7, 0.0  ;;  %v1266_v14 = vld [vmem:[%s1613_s5] sm:$0xff]  }
 0x1d1   : > { %v1421_v17 = vmax.f32 %v513_v13, 0.0  ;;  %564 = vadd.xlane.f32.xlu0 %v563_v16  ;;  %vm536_vm7 = vcmp.ge.f32.partialorder %v1415_v12, 0.0  ;;  %v548_v18 = vmul.f32 %v543_v46, %v1415_v12  ;;  %1224 = vmatprep.subr.bf16.mxu0 %v1266_v14  ;;  %v1267_v16 = vld [vmem:[%s296_s18] sm:$0xff]  }
 0x1d2   : > { %v551_v22 = vmul.f32 %v543_v46, %v1418_v15  ;;  %vm539_vm10 = vcmp.ge.f32.partialorder %v1418_v15, 0.0  ;;  %v558_v25 = vsel %vm538_vm8, %v1413_v7, %v550_v19  ;;  %1225 = vmatpush3.bf16.msra.mxu0 %v1266_v14  ;;  %1226 = vmatprep.mubr.msk.bf16.mxu0 %vm446_vm2, %v1267_v16  ;;  %v1270_v19 = vld [vmem:[%s296_s18 + $0x10] sm:$0xff]  }
 0x1d3   : > { %v556_v20 = vsel %vm536_vm7, %v1415_v12, %v548_v18  ;;  %vm537_vm9 = vcmp.ge.f32.partialorder %v1421_v17, 0.0  ;;  %v549_v21 = vmul.f32 %v543_v46, %v1421_v17  ;;  %v578_v28 = vsel %vm446_vm2, %v558_v25, 0.0  ;;  %v1269_v18 = vld [vmem:[%s296_s18 + $0x8] sm:$0xff]  }
 0x1d4   : > { %v572_v23 = vsel %vm446_vm2, %v556_v20, 0.0  ;;  %v559_v27 = vsel %vm539_vm10, %v1418_v15, %v551_v22 }
 0x1d5   : > { %573 = vadd.xlane.f32.xlu0 %v572_v23  ;;  %v557_v24 = vsel %vm537_vm9, %v1421_v17, %v549_v21  ;;  %v581_v29 = vsel %vm446_vm2, %v559_v27, 0.0  ;;  %1227 = vmatmul.mubr.msk.bf16.vlgmr.msra.gmra.mrb[0].mxu0 %vm446_vm2, %v1269_v18  ;;  %v1268_v21 = vld [vmem:[%s1612_s4] sm:$0xff]  }
 0x1d6   : > { %v575_v26 = vsel %vm446_vm2, %v557_v24, 0.0  ;;  %1230 = vmatprep.mubr.msk.bf16.mxu0 %vm446_vm2, %v1270_v19  ;;  %1234 = vmatprep.subr.bf16.mxu0 %v1268_v21 }
 0x1d7   : > { %576 = vadd.xlane.f32.xlu1 %v575_v26  ;;  %1235 = vmatpush3.bf16.msra.mxu0 %v1268_v21 }
 0x1d9   : > { %579 = vadd.xlane.f32.xlu0 %v578_v28 }
 0x1db   : > { %582 = vadd.xlane.f32.xlu1 %v581_v29 }
 0x259   : > { %v568_v30 = vpop.xlane.xlu1 %567 }
 0x25a   : > { %v587_v31 = vmul.f32 0.0625, %v568_v30  ;;  %v562_v32 = vpop.xlane.xlu0 %561 }
 0x25b   : > { %v585_v33 = vmul.f32 0.0625, %v562_v32 }
 0x25c   : > { %v1439_v34 = vsub.f32 %v554_v58, %v587_v31 }
 0x25d   : > { %v1441_v35 = vsub.f32 %v552_v62, %v585_v33  ;;  %v571_v36 = vpop.xlane.xlu1 %570 }
 0x25e   : > { %v588_v37 = vmul.f32 0.0625, %v571_v36  ;;  %v565_v38 = vpop.xlane.xlu0 %564  ;;  %v603_v44 = vmul.f32 %v1439_v34, %v1439_v34 }
 0x25f   : > { %v586_v39 = vmul.f32 0.0625, %v565_v38  ;;  %v601_v40 = vmul.f32 %v1441_v35, %v1441_v35 }
 0x260   : > { %v1445_v41 = vsub.f32 %v555_v3, %v588_v37  ;;  %v615_v55 = vsel %vm446_vm2, %v603_v44, 0.0 }
 0x261   : > { %v1447_v42 = vsub.f32 %v553_v6, %v586_v39  ;;  %v609_v43 = vsel %vm446_vm2, %v601_v40, 0.0  ;;  %v667_v39 = vsub.s32 3, %v1374_v8 }
 0x262   : > { %610 = vadd.xlane.f32.xlu0 %v609_v43  ;;  %v574_v45 = vpop.xlane.xlu0 %573  ;;  %v604_v50 = vmul.f32 %v1445_v41, %v1445_v41 }
 0x263   : > { %v589_v46 = vmul.f32 0.0625, %v574_v45  ;;  %v602_v47 = vmul.f32 %v1447_v42, %v1447_v42 }
 0x264   : > { %v577_v48 = vpop.xlane.xlu1 %576  ;;  %v618_v63 = vsel %vm446_vm2, %v604_v50, 0.0 }
 0x265   : > { %v1456_v51 = vsub.f32 %v556_v20, %v589_v46  ;;  %v590_v53 = vmul.f32 0.0625, %v577_v48  ;;  %v612_v57 = vsel %vm446_vm2, %v602_v47, 0.0  ;;  %v1271_v20 = vld [vmem:[%s296_s18 + $0x18] sm:$0xff]  }
 0x266   : > { %616 = vadd.xlane.f32.xlu0 %v615_v55  ;;  %613 = vadd.xlane.f32.xlu1 %v612_v57  ;;  %v580_v58 = vpop.xlane.xlu0 %579  ;;  %v679_v55 = vsub.s32 4, %v1374_v8 }
 0x267   : > { %v1460_v59 = vsub.f32 %v557_v24, %v590_v53  ;;  %v591_v60 = vmul.f32 0.0625, %v580_v58  ;;  %v605_v61 = vmul.f32 %v1456_v51, %v1456_v51  ;;  %1231 = vmatmul.mubr.msk.bf16.gmra.mrb[4].mxu0 %vm446_vm2, %v1271_v20  ;;  %v668_v53 = vrot.slane %v1380_v10, %v667_v39 }
 0x268   : > { %v583_v62 = vpop.xlane.xlu1 %582 }
 0x269   : > { %v1465_v0 = vsub.f32 %v558_v25, %v591_v60  ;;  %v592_v1 = vmul.f32 0.0625, %v583_v62  ;;  %v621_v2 = vsel %vm446_vm2, %v605_v61, 0.0  ;;  %v606_v3 = vmul.f32 %v1460_v59, %v1460_v59 }
 0x26a   : > { %619 = vadd.xlane.f32.xlu1 %v618_v63  ;;  %622 = vadd.xlane.f32.xlu0 %v621_v2 }
 0x26b   : > { %v1470_v4 = vsub.f32 %v559_v27, %v592_v1  ;;  %v607_v5 = vmul.f32 %v1465_v0, %v1465_v0  ;;  %v624_v6 = vsel %vm446_vm2, %v606_v3, 0.0  ;;  %v680_v1 = vrot.slane %v1380_v10, %v679_v55 }
 0x26d   : > { %v627_v9 = vsel %vm446_vm2, %v607_v5, 0.0  ;;  %v608_v11 = vmul.f32 %v1470_v4, %v1470_v4 }
 0x26e   : > { %625 = vadd.xlane.f32.xlu1 %v624_v6  ;;  %628 = vadd.xlane.f32.xlu0 %v627_v9 }
 0x26f   : > { %v630_v13 = vsel %vm446_vm2, %v608_v11, 0.0 }
 0x272   : > { %631 = vadd.xlane.f32.xlu1 %v630_v13 }
 0x2ef   : > { %v611_v22 = vpop.xlane.xlu0 %610 }
 0x2f0   : > { %v633_v23 = vmul.f32 0.0625, %v611_v22 }
 0x2f2   : > { %v641_v24 = vadd.f32 1e-08, %v633_v23 }
 0x2f3   : > { %v614_v25 = vpop.xlane.xlu1 %613  ;;  %v617_v26 = vpop.xlane.xlu0 %616 }
 0x2f4   : > { %1272 = vrsqrt.f32 %v641_v24  ;;  %v634_v27 = vmul.f32 0.0625, %v614_v25  ;;  %v635_v28 = vmul.f32 0.0625, %v617_v26 }
 0x2f6   : > { %v642_v29 = vadd.f32 1e-08, %v634_v27  ;;  %v643_v30 = vadd.f32 1e-08, %v635_v28 }
 0x2f7   : > { %v620_v31 = vpop.xlane.xlu1 %619  ;;  %v623_v32 = vpop.xlane.xlu0 %622 }
 0x2f8   : > { %1274 = vrsqrt.f32 %v642_v29  ;;  %v636_v33 = vmul.f32 0.0625, %v620_v31  ;;  %v637_v36 = vmul.f32 0.0625, %v623_v32 }
 0x2f9   : > { %1276 = vrsqrt.f32 %v643_v30 }
 0x2fa   : > { %v644_v37 = vadd.f32 1e-08, %v636_v33  ;;  %v645_v38 = vadd.f32 1e-08, %v637_v36  ;;  %v913_v36 = vsub.s32 6, %v1374_v8 }
 0x2fb   : > { %v626_v40 = vpop.xlane.xlu1 %625  ;;  %v629_v43 = vpop.xlane.xlu0 %628 }
 0x2fc   : > { %1278 = vrsqrt.f32 %v644_v37  ;;  %v638_v44 = vmul.f32 0.0625, %v626_v40  ;;  %v639_v45 = vmul.f32 0.0625, %v629_v43  ;;  %v914_v37 = vrot.slane %v1380_v10, %v913_v36 }
 0x2fd   : > { %1280 = vrsqrt.f32 %v645_v38 }
 0x2fe   : > { %v1273_v46 = vpop.eup %1272  ;;  %v646_v47 = vadd.f32 1e-08, %v638_v44  ;;  %v647_v48 = vadd.f32 1e-08, %v639_v45 }
 0x2ff   : > { %v657_v50 = vmul.f32 %v1273_v46, %v1441_v35  ;;  %v632_v57 = vpop.xlane.xlu1 %631 }
 0x300   : > { %1282 = vrsqrt.f32 %v646_v47  ;;  %v640_v58 = vmul.f32 0.0625, %v632_v57 }
 0x301   : > { %1284 = vrsqrt.f32 %v647_v48  ;;  %v669_v2 = vmul.f32 %v668_v53, %v657_v50 }
 0x302   : > { %v1275_v60 = vpop.eup %1274  ;;  %v648_v61 = vadd.f32 1e-08, %v640_v58 }
 0x303   : > { %v1277_v62 = vpop.eup %1276  ;;  %v658_v63 = vmul.f32 %v1275_v60, %v1447_v42  ;;  %v681_v13 = vadd.f32 %v680_v1, %v669_v2 }
 0x304   : > { %v659_v3 = vmul.f32 %v1277_v62, %v1439_v34  ;;  %1286 = vrsqrt.f32 %v648_v61 }
 0x305   : > { %v670_v35 = vmul.f32 %v668_v53, %v658_v63 }
 0x306   : > { %v1279_v5 = vpop.eup %1278  ;;  %v671_v9 = vmul.f32 %v668_v53, %v659_v3 }
 0x307   : > { %v1281_v6 = vpop.eup %1280  ;;  %v660_v11 = vmul.f32 %v1279_v5, %v1445_v41  ;;  %v682_v14 = vadd.f32 %v680_v1, %v670_v35 }
 0x308   : > { %v661_v16 = vmul.f32 %v1281_v6, %v1456_v51  ;;  %v683_v21 = vadd.f32 %v680_v1, %v671_v9 }
 0x309   : > { %v672_v18 = vmul.f32 %v668_v53, %v660_v11  ;;  %v689_v19 = vpack.c.bf16 %v682_v14, %v681_v13 }
 0x30a   : > { %v1283_v20 = vpop.eup %1282  ;;  %v673_v34 = vmul.f32 %v668_v53, %v661_v16 }
 0x30b   : > { %v1285_v42 = vpop.eup %1284  ;;  %v684_v22 = vadd.f32 %v680_v1, %v672_v18  ;;  %v662_v23 = vmul.f32 %v1283_v20, %v1460_v59  ;;  %1236 = vmatprep.mubr.msk.bf16.mxu0 %vm446_vm2, %v689_v19 }
 0x30c   : > { %v663_v24 = vmul.f32 %v1285_v42, %v1465_v0  ;;  %v685_v51 = vadd.f32 %v680_v1, %v673_v34  ;;  %v893_v0 = vsub.s32 5, %v1374_v8 }
 0x30d   : > { %v690_v25 = vpack.c.bf16 %v684_v22, %v683_v21  ;;  %v674_v26 = vmul.f32 %v668_v53, %v662_v23 }
 0x30e   : > { %v1287_v41 = vpop.eup %1286  ;;  %v675_v29 = vmul.f32 %v668_v53, %v663_v24 }
 0x30f   : > { %v664_v27 = vmul.f32 %v1287_v41, %v1470_v4  ;;  %1237 = vmatmul.mubr.msk.bf16.vlgmr.msra.gmra.mrb[0].mxu0 %vm446_vm2, %v690_v25  ;;  %v686_v28 = vadd.f32 %v680_v1, %v674_v26  ;;  %v894_v4 = vrot.slane %v1380_v10, %v893_v0 }
 0x310   : > { %v687_v59 = vadd.f32 %v680_v1, %v675_v29 }
 0x311   : > { %v691_v30 = vpack.c.bf16 %v686_v28, %v685_v51  ;;  %v676_v31 = vmul.f32 %v668_v53, %v664_v27 }
 0x313   : > { %1240 = vmatprep.mubr.msk.bf16.mxu0 %vm446_vm2, %v691_v30  ;;  %v688_v32 = vadd.f32 %v680_v1, %v676_v31 }
 0x315   : > { %v692_v33 = vpack.c.bf16 %v688_v32, %v687_v59 }
 0x317   : > { %1241 = vmatmul.mubr.msk.bf16.gmra.mrb[4].mxu0 %vm446_vm2, %v692_v33 }
 0x3e2   : > { %v1238_v38 = vpop.f32.mrb[0].mxu0 }
 0x3e3   : > { %v897_v39 = vadd.f32 %v1238_v38, %v894_v4  ;;  %v860_v40 = vpop.f32.mrb[1].mxu0 }
 0x3e4   : > { %v895_v43 = vadd.f32 %v894_v4, %v860_v40  ;;  %v1239_v44 = vpop.f32.mrb[2].mxu0 }
 0x3e5   : > { %v917_v45 = vmul.f32 %v914_v37, %v897_v39  ;;  %v898_v46 = vadd.f32 %v1239_v44, %v894_v4  ;;  %v863_v47 = vpop.f32.mrb[3].mxu0  ;;  %vm905_vm11 = vcmp.ge.f32.partialorder %v897_v39, 0.0 }
 0x3e6   : > { %v915_v48 = vmul.f32 %v914_v37, %v895_v43  ;;  %v896_v50 = vadd.f32 %v894_v4, %v863_v47  ;;  %vm903_vm12 = vcmp.ge.f32.partialorder %v895_v43, 0.0 }
 0x3e7   : > { %v918_v53 = vmul.f32 %v914_v37, %v898_v46  ;;  %v925_v55 = vsel %vm905_vm11, %v897_v39, %v917_v45  ;;  %vm906_vm13 = vcmp.ge.f32.partialorder %v898_v46, 0.0 }
 0x3e8   : > { %v916_v57 = vmul.f32 %v914_v37, %v896_v50  ;;  %v937_v58 = vsel %vm446_vm2, %v925_v55, 0.0  ;;  %vm904_vm14 = vcmp.ge.f32.partialorder %v896_v50, 0.0  ;;  %v923_v61 = vsel %vm903_vm12, %v895_v43, %v915_v48 }
 0x3e9   : > { %938 = vadd.xlane.f32.xlu0 %v937_v58  ;;  %v926_v60 = vsel %vm906_vm13, %v898_v46, %v918_v53  ;;  %v931_v6 = vsel %vm446_vm2, %v923_v61, 0.0 }
 0x3ea   : > { %v1242_v62 = vpop.f32.mrb[4].mxu0  ;;  %v940_v63 = vsel %vm446_vm2, %v926_v60, 0.0  ;;  %v924_v1 = vsel %vm904_vm14, %v896_v50, %v916_v57 }
 0x3eb   : > { %v901_v2 = vadd.f32 %v1242_v62, %v894_v4  ;;  %941 = vadd.xlane.f32.xlu1 %v940_v63  ;;  %v876_v3 = vpop.f32.mrb[5].mxu0  ;;  %v934_v13 = vsel %vm446_vm2, %v924_v1, 0.0 }
 0x3ec   : > { %v899_v35 = vadd.f32 %v894_v4, %v876_v3  ;;  %v1243_v5 = vpop.f32.mrb[6].mxu0 }
 0x3ed   : > { %v902_v9 = vadd.f32 %v1243_v5, %v894_v4  ;;  %932 = vadd.xlane.f32.xlu0 %v931_v6  ;;  %v879_v11 = vpop.f32.mrb[7].mxu0  ;;  %v921_v14 = vmul.f32 %v914_v37, %v901_v2  ;;  %vm909_vm0 = vcmp.ge.f32.partialorder %v901_v2, 0.0 }
 0x3ee   : > { %v919_v16 = vmul.f32 %v914_v37, %v899_v35  ;;  %v900_v18 = vadd.f32 %v894_v4, %v879_v11  ;;  %vm907_vm15 = vcmp.ge.f32.partialorder %v899_v35, 0.0 }
 0x3ef   : > { %935 = vadd.xlane.f32.xlu1 %v934_v13  ;;  %v922_v19 = vmul.f32 %v914_v37, %v902_v9  ;;  %vm910_vm3 = vcmp.ge.f32.partialorder %v902_v9, 0.0  ;;  %v929_v23 = vsel %vm909_vm0, %v901_v2, %v921_v14 }
 0x3f0   : > { %v920_v20 = vmul.f32 %v914_v37, %v900_v18  ;;  %v927_v42 = vsel %vm907_vm15, %v899_v35, %v919_v16  ;;  %vm908_vm1 = vcmp.ge.f32.partialorder %v900_v18, 0.0  ;;  %v949_v25 = vsel %vm446_vm2, %v929_v23, 0.0 }
 0x3f1   : > { %v943_v21 = vsel %vm446_vm2, %v927_v42, 0.0  ;;  %v930_v24 = vsel %vm910_vm3, %v902_v9, %v922_v19 }
 0x3f2   : > { %944 = vadd.xlane.f32.xlu0 %v943_v21  ;;  %v928_v22 = vsel %vm908_vm1, %v900_v18, %v920_v20  ;;  %v952_v26 = vsel %vm446_vm2, %v930_v24, 0.0 }
 0x3f3   : > { %v946_v34 = vsel %vm446_vm2, %v928_v22, 0.0 }
 0x3f4   : > { %947 = vadd.xlane.f32.xlu1 %v946_v34 }
 0x3f6   : > { %950 = vadd.xlane.f32.xlu0 %v949_v25 }
 0x3f8   : > { %953 = vadd.xlane.f32.xlu1 %v952_v26  ;;  %v1037_v26 = vsub.s32 7, %v1374_v8 }
 0x476   : > { %v939_v41 = vpop.xlane.xlu0 %938 }
 0x477   : > { %v957_v27 = vmul.f32 0.0625, %v939_v41 }
 0x478   : > { %v942_v51 = vpop.xlane.xlu1 %941 }
 0x479   : > { %v1522_v28 = vsub.f32 %v925_v55, %v957_v27  ;;  %v958_v29 = vmul.f32 0.0625, %v942_v51 }
 0x47a   : > { %v933_v30 = vpop.xlane.xlu0 %932 }
 0x47b   : > { %v1524_v31 = vsub.f32 %v926_v60, %v958_v29  ;;  %v955_v59 = vmul.f32 0.0625, %v933_v30  ;;  %v973_v32 = vmul.f32 %v1522_v28, %v1522_v28 }
 0x47c   : > { %v936_v33 = vpop.xlane.xlu1 %935 }
 0x47d   : > { %v1528_v0 = vsub.f32 %v923_v61, %v955_v59  ;;  %v956_v36 = vmul.f32 0.0625, %v936_v33  ;;  %v985_v4 = vsel %vm446_vm2, %v973_v32, 0.0  ;;  %v974_v37 = vmul.f32 %v1524_v31, %v1524_v31 }
 0x47e   : > { %986 = vadd.xlane.f32.xlu0 %v985_v4  ;;  %v1038_v59 = vrot.slane %v1380_v10, %v1037_v26 }
 0x47f   : > { %v1533_v38 = vsub.f32 %v924_v1, %v956_v36  ;;  %v945_v39 = vpop.xlane.xlu0 %944  ;;  %v988_v40 = vsel %vm446_vm2, %v974_v37, 0.0  ;;  %v971_v43 = vmul.f32 %v1528_v0, %v1528_v0 }
 0x480   : > { %v959_v44 = vmul.f32 0.0625, %v945_v39  ;;  %989 = vadd.xlane.f32.xlu1 %v988_v40 }
 0x481   : > { %v948_v45 = vpop.xlane.xlu1 %947  ;;  %v979_v46 = vsel %vm446_vm2, %v971_v43, 0.0  ;;  %v972_v47 = vmul.f32 %v1533_v38, %v1533_v38  ;;  %v1181_v43 = vld [vmem:[%s1614_s6 + $0x8] ss:$0 sm:$0xff] }
 0x482   : > { %v1541_v48 = vsub.f32 %v927_v42, %v959_v44  ;;  %v960_v50 = vmul.f32 0.0625, %v948_v45  ;;  %980 = vadd.xlane.f32.xlu0 %v979_v46 }
 0x483   : > { %v951_v53 = vpop.xlane.xlu0 %950  ;;  %v982_v55 = vsel %vm446_vm2, %v972_v47, 0.0 }
 0x484   : > { %v1544_v57 = vsub.f32 %v928_v22, %v960_v50  ;;  %v961_v58 = vmul.f32 0.0625, %v951_v53  ;;  %983 = vadd.xlane.f32.xlu1 %v982_v55  ;;  %v975_v60 = vmul.f32 %v1541_v48, %v1541_v48 }
 0x485   : > { %v954_v61 = vpop.xlane.xlu1 %953 }
 0x486   : > { %v1548_v62 = vsub.f32 %v929_v23, %v961_v58  ;;  %v962_v63 = vmul.f32 0.0625, %v954_v61  ;;  %v991_v1 = vsel %vm446_vm2, %v975_v60, 0.0  ;;  %v976_v2 = vmul.f32 %v1544_v57, %v1544_v57 }
 0x487   : > { %992 = vadd.xlane.f32.xlu0 %v991_v1 }
 0x488   : > { %v1553_v3 = vsub.f32 %v930_v24, %v962_v63  ;;  %v994_v35 = vsel %vm446_vm2, %v976_v2, 0.0  ;;  %v977_v5 = vmul.f32 %v1548_v62, %v1548_v62 }
 0x489   : > { %995 = vadd.xlane.f32.xlu1 %v994_v35 }
 0x48a   : > { %v997_v6 = vsel %vm446_vm2, %v977_v5, 0.0  ;;  %v978_v9 = vmul.f32 %v1553_v3, %v1553_v3 }
 0x48b   : > { %998 = vadd.xlane.f32.xlu0 %v997_v6 }
 0x48c   : > { %v1000_v11 = vsel %vm446_vm2, %v978_v9, 0.0 }
 0x48d   : > { %1001 = vadd.xlane.f32.xlu1 %v1000_v11 }
 0x50b   : > { %v987_v13 = vpop.xlane.xlu0 %986 }
 0x50c   : > { %v1005_v14 = vmul.f32 0.0625, %v987_v13 }
 0x50d   : > { %v990_v16 = vpop.xlane.xlu1 %989 }
 0x50e   : > { %v1013_v18 = vadd.f32 1e-08, %v1005_v14  ;;  %v1006_v19 = vmul.f32 0.0625, %v990_v16 }
 0x50f   : > { %v981_v20 = vpop.xlane.xlu0 %980 }
 0x510   : > { %1288 = vrsqrt.f32 %v1013_v18  ;;  %v1014_v42 = vadd.f32 1e-08, %v1006_v19  ;;  %v1003_v21 = vmul.f32 0.0625, %v981_v20 }
 0x511   : > { %v984_v22 = vpop.xlane.xlu1 %983 }
 0x512   : > { %1290 = vrsqrt.f32 %v1014_v42  ;;  %v1011_v23 = vadd.f32 1e-08, %v1003_v21  ;;  %v1004_v34 = vmul.f32 0.0625, %v984_v22 }
 0x514   : > { %1292 = vrsqrt.f32 %v1011_v23  ;;  %v1012_v24 = vadd.f32 1e-08, %v1004_v34  ;;  %v993_v25 = vpop.xlane.xlu0 %992 }
 0x515   : > { %v1007_v41 = vmul.f32 0.0625, %v993_v25 }
 0x516   : > { %1294 = vrsqrt.f32 %v1012_v24  ;;  %v996_v27 = vpop.xlane.xlu1 %995 }
 0x517   : > { %v1015_v51 = vadd.f32 1e-08, %v1007_v41  ;;  %v1008_v29 = vmul.f32 0.0625, %v996_v27 }
 0x518   : > { %v999_v30 = vpop.xlane.xlu0 %998 }
 0x519   : > { %1296 = vrsqrt.f32 %v1015_v51  ;;  %v1016_v32 = vadd.f32 1e-08, %v1008_v29  ;;  %v1009_v33 = vmul.f32 0.0625, %v999_v30 }
 0x51a   : > { %v1289_v36 = vpop.eup %1288  ;;  %v1002_v4 = vpop.xlane.xlu1 %1001 }
 0x51b   : > { %v1029_v37 = vmul.f32 %v1289_v36, %v1522_v28  ;;  %1298 = vrsqrt.f32 %v1016_v32  ;;  %v1017_v39 = vadd.f32 1e-08, %v1009_v33  ;;  %v1010_v40 = vmul.f32 0.0625, %v1002_v4 }
 0x51c   : > { %v1291_v8 = vpop.eup %1290 }
 0x51d   : > { %v1041_v44 = vmul.f32 %v1038_v59, %v1029_v37  ;;  %v1030_v45 = vmul.f32 %v1291_v8, %v1524_v31  ;;  %1300 = vrsqrt.f32 %v1017_v39  ;;  %v1018_v10 = vadd.f32 1e-08, %v1010_v40 }
 0x51e   : > { %v1293_v46 = vpop.eup %1292 }
 0x51f   : > { %v1053_v47 = vadd.f32 %v1181_v43, %v1041_v44  ;;  %v1042_v50 = vmul.f32 %v1038_v59, %v1030_v45  ;;  %v1027_v53 = vmul.f32 %v1293_v46, %v1528_v0  ;;  %1302 = vrsqrt.f32 %v1018_v10 }
 0x520   : > { %v1295_v28 = vpop.eup %1294 }
 0x521   : > { %v1061_v55 = vadd.f32 %v1053_v47, %v1391_v49  ;;  %v1054_v58 = vadd.f32 %v1181_v43, %v1042_v50  ;;  %v1039_v31 = vmul.f32 %v1038_v59, %v1027_v53  ;;  %v1028_v60 = vmul.f32 %v1295_v28, %v1533_v38 }
 0x523   : > { %v1297_v61 = vpop.eup %1296  ;;  %1069 = vst.msk [vmem:[%s1574_s27 + $0x10] sm:$0xff] %vm446_vm2, %v1061_v55  ;;  %v1062_v0 = vadd.f32 %v1054_v58, %v1395_v54  ;;  %v1051_v63 = vadd.f32 %v1181_v43, %v1039_v31  ;;  %v1040_v1 = vmul.f32 %v1038_v59, %v1028_v60 }
 0x524   : > { %v1031_v2 = vmul.f32 %v1297_v61, %v1541_v48 }
 0x525   : > { %v1299_v35 = vpop.eup %1298  ;;  %1070 = vst.msk [vmem:[%s1574_s27 + $0x18] sm:$0xff] %vm446_vm2, %v1062_v0  ;;  %v1059_v49 = vadd.f32 %v1051_v63, %v1393_v52  ;;  %v1052_v5 = vadd.f32 %v1181_v43, %v1040_v1 }
 0x526   : > { %v1043_v6 = vmul.f32 %v1038_v59, %v1031_v2  ;;  %v1032_v38 = vmul.f32 %v1299_v35, %v1544_v57 }
 0x527   : > { %v1301_v9 = vpop.eup %1300  ;;  %1067 = vst.msk [vmem:[%s1574_s27] sm:$0xff] %vm446_vm2, %v1059_v49  ;;  %v1060_v54 = vadd.f32 %v1052_v5, %v1399_v56 }
 0x528   : > { %v1055_v11 = vadd.f32 %v1181_v43, %v1043_v6  ;;  %v1044_v13 = vmul.f32 %v1038_v59, %v1032_v38  ;;  %v1033_v48 = vmul.f32 %v1301_v9, %v1548_v62 }
 0x529   : > { %v1303_v14 = vpop.eup %1302  ;;  %1068 = vst.msk [vmem:[%s1574_s27 + $0x8] sm:$0xff] %vm446_vm2, %v1060_v54 }
 0x52a   : > { %v1063_v52 = vadd.f32 %v1055_v11, %v1415_v12  ;;  %v1056_v16 = vadd.f32 %v1181_v43, %v1044_v13  ;;  %v1045_v18 = vmul.f32 %v1038_v59, %v1033_v48  ;;  %v1034_v57 = vmul.f32 %v1303_v14, %v1553_v3 }
 0x52c   : > { %1071 = vst.msk [vmem:[%s1574_s27 + $0x20] sm:$0xff] %vm446_vm2, %v1063_v52  ;;  %v1064_v19 = vadd.f32 %v1056_v16, %v1421_v17  ;;  %v1057_v56 = vadd.f32 %v1181_v43, %v1045_v18  ;;  %v1046_v20 = vmul.f32 %v1038_v59, %v1034_v57 }
 0x52e   : > { %1072 = vst.msk [vmem:[%s1574_s27 + $0x28] sm:$0xff] %vm446_vm2, %v1064_v19  ;;  %v1065_v62 = vadd.f32 %v1057_v56, %v1413_v7  ;;  %v1058_v42 = vadd.f32 %v1181_v43, %v1046_v20 }
 0x530   : > { %1073 = vst.msk [vmem:[%s1574_s27 + $0x30] sm:$0xff] %vm446_vm2, %v1065_v62  ;;  %v1066_v21 = vadd.f32 %v1058_v42, %v1418_v15 }
 0x532   : > { %1074 = vst.msk [vmem:[%s1574_s27 + $0x38] sm:$0xff] %vm446_vm2, %v1066_v21 }
 0x533 PF: > { %s17_s24 = sadd.s32 1, %s1310_s24  }
 0x534   : > { %p14_p4 = scmp.ge.s32.totalorder %s17_s24, 4  }
 0x536   :  { %16 = sbr.rel (!%p14_p4) target bundleno = 1 (0x1), region = 81 }

// kernel: _lambda_.12
= control target key start
LH: loop header
LB: loop body
LE: loop exit
PB: predicated region body
PF: predicated region fallthrough
CT: control target
= control target key end

     0   :  { %v49_v11 = vlaneseq  ;;  %vm180_vm0 = vcmask 130048   ;;  %vm265_vm5 = vcmask 128000   ;;  %s859_s2 = inlined_call_operand.vmem [shape: bf16[128,16], index: 2, kind: input, shape index: {}]   ;;  %s860_s0 = inlined_call_operand.vmem [shape: bf16[30,128], index: 0, kind: input, shape index: {}]   ;;  %s861_s3 = inlined_call_operand.vmem [shape: bf16[16,16], index: 3, kind: input, shape index: {}]   ;;  %s862_s6 = inlined_call_operand.vmem [shape: f32[9,16], index: 6, kind: input, shape index: {}]   ;;  %s863_s5 = inlined_call_operand.vmem [shape: bf16[16,16], index: 5, kind: input, shape index: {}]   ;;  %s864_s1 = inlined_call_operand.vmem [shape: bf16[30,16], index: 1, kind: input, shape index: {}]   ;;  %s865_s4 = inlined_call_operand.vmem [shape: bf16[16,16], index: 4, kind: input, shape index: {}]   ;;  %s866_s7 = inlined_call_operand.vmem [shape: f32[30,16], index: 7, kind: output, shape index: {}]  }
   0x1   :  { %v655_v0 = vld [vmem:[%s859_s2] sm:$0xff]   ;;  %v656_v1 = vld [vmem:[%s859_s2 + $0x8] sm:$0xff]   ;;  %v657_v2 = vld [vmem:[%s859_s2 + $0x10] sm:$0xff]  }
   0x2   :  { %613 = vmatprep.subr.bf16.mxu0 %v655_v0  ;;  %v658_v3 = vld [vmem:[%s859_s2 + $0x18] sm:$0xff]   ;;  %v663_v4 = vld [vmem:[%s860_s0] sm:$0xff]   ;;  %v660_v6 = vld [vmem:[%s859_s2 + $0x28] sm:$0xff]   ;;  %v759_v12 = vshrl.u32 %v49_v11, 7 }
   0x3   :  { %614 = vmatpush3.bf16.msra.mxu0 %v655_v0  ;;  %629 = vmatprep.mubr.bf16.mxu0 %v663_v4  ;;  %v659_v5 = vld [vmem:[%s859_s2 + $0x20] sm:$0xff]   ;;  %v661_v7 = vld [vmem:[%s859_s2 + $0x30] sm:$0xff]   ;;  %v662_v8 = vld [vmem:[%s859_s2 + $0x38] sm:$0xff]  }
   0x4   :  { %615 = vmatprep.subr.bf16.mxu0 %v656_v1  ;;  %v664_v9 = vld [vmem:[%s860_s0 + $0x8] sm:$0x7f]   ;;  %v665_v10 = vld [vmem:[%s861_s3] sm:$0xff]   ;;  %v51_v13 = vsub.s32 0, %v759_v12  ;;  %v172_v30 = vsub.s32 1, %v759_v12  ;;  %v246_v32 = vsub.s32 2, %v759_v12 }
   0x5   :  { %633 = vmatprep.subr.bf16.mxu1 %v665_v10  ;;  %v765_v14 = vld [vmem:[%s862_s6] sm:$0xff] }
   0x6   :  { %634 = vmatpush3.bf16.msra.mxu1 %v665_v10  ;;  %v52_v15 = vrot.slane %v765_v14, %v51_v13  ;;  %v173_v31 = vrot.slane %v765_v14, %v172_v30  ;;  %v247_v36 = vrot.slane %v765_v14, %v246_v32  ;;  %v312_v32 = vsub.s32 3, %v759_v12 }
   0x7   :  { %616 = vmatpush3.bf16.msra.mxu0 %v656_v1 }
   0x8   :  { %617 = vmatprep.subr.bf16.mxu0 %v657_v2 }
   0xb   :  { %618 = vmatpush3.bf16.msra.mxu0 %v657_v2 }
   0xc   :  { %619 = vmatprep.subr.bf16.mxu0 %v658_v3 }
   0xf   :  { %620 = vmatpush3.bf16.msra.mxu0 %v658_v3 }
  0x10   :  { %621 = vmatprep.subr.bf16.mxu0 %v659_v5 }
  0x13   :  { %622 = vmatpush3.bf16.msra.mxu0 %v659_v5 }
  0x14   :  { %623 = vmatprep.subr.bf16.mxu0 %v660_v6 }
  0x17   :  { %624 = vmatpush3.bf16.msra.mxu0 %v660_v6 }
  0x18   :  { %625 = vmatprep.subr.bf16.mxu0 %v661_v7 }
  0x1b   :  { %626 = vmatpush3.bf16.msra.mxu0 %v661_v7 }
  0x1c   :  { %627 = vmatprep.subr.bf16.mxu0 %v662_v8 }
  0x1f   :  { %628 = vmatpush3.bf16.msra.mxu0 %v662_v8 }
  0x22   :  { %630 = vmatmul.mubr.bf16.vlgmr.msra.gmra.mrb[0].mxu0 %v664_v9 }
  0xf5   :  { %v631_v16 = vpop.f32.mrb[0].mxu0 }
  0xf6   :  { %v156_v17 = vadd.f32 %v631_v16, %v52_v15  ;;  %v147_v18 = vpop.f32.mrb[1].mxu0  ;;  %v666_v16 = vld [vmem:[%s863_s5] sm:$0xff]  }
  0xf7   :  { %v148_v19 = vadd.f32 %v147_v18, %v52_v15  ;;  %v632_v20 = vpop.f32.mrb[2].mxu0  ;;  %639 = vmatprep.subr.bf16.mxu1 %v666_v16  ;;  %v669_v18 = vld [vmem:[%s864_s1 + $0x8] sm:$0x7f]  }
  0xf8   :  { %v159_v21 = vadd.f32 %v632_v20, %v52_v15  ;;  %v150_v22 = vpop.f32.mrb[3].mxu0  ;;  %v164_v24 = vmax.f32 %v156_v17, 0.0  ;;  %v667_v17 = vld [vmem:[%s864_s1] sm:$0xff]  }
  0xf9   :  { %v151_v23 = vadd.f32 %v150_v22, %v52_v15  ;;  %v162_v26 = vmax.f32 %v148_v19, 0.0  ;;  %v668_v19 = vld [vmem:[%s865_s4] sm:$0xff]  }
  0xfa   :  { %v165_v25 = vmax.f32 %v159_v21, 0.0 }
  0xfb   :  { %v163_v27 = vmax.f32 %v151_v23, 0.0 }
  0xfc   :  { %v167_v28 = vpack.c.bf16 %v165_v25, %v164_v24 }
  0xfd   :  { %v166_v29 = vpack.c.bf16 %v163_v27, %v162_v26 }
  0xff   :  { %635 = vmatprep.mubr.msk.bf16.mxu1 %vm180_vm0, %v166_v29 }
 0x100   :  { %636 = vmatmul.mubr.msk.bf16.vlgmr.msra.gmra.mrb[0].mxu1 %vm180_vm0, %v167_v28 }
 0x101   :  { %640 = vmatpush3.bf16.msra.mxu1 %v666_v16  ;;  %641 = vmatprep.mubr.msk.bf16.mxu1 %vm180_vm0, %v667_v17 }
 0x102   :  { %645 = vmatprep.subr.bf16.mxu1 %v668_v19 }
 0x108   :  { %642 = vmatmul.mubr.msk.bf16.vlgmr.msra.gmra.mrb[4].mxu1 %vm180_vm0, %v669_v18 }
 0x109   :  { %646 = vmatpush3.bf16.msra.mxu1 %v668_v19 }
 0x1d3   :  { %v637_v33 = vpop.f32.mrb[0].mxu1 }
 0x1d4   :  { %v230_v34 = vadd.f32 %v637_v33, %v173_v31  ;;  %v221_v35 = vpop.f32.mrb[1].mxu1 }
 0x1d5   :  { %v222_v37 = vadd.f32 %v221_v35, %v173_v31  ;;  %v638_v38 = vpop.f32.mrb[2].mxu1  ;;  %v313_v35 = vrot.slane %v765_v14, %v312_v32 }
 0x1d6   :  { %v774_v39 = vmax.f32 %v230_v34, 0.0  ;;  %v233_v40 = vadd.f32 %v638_v38, %v173_v31  ;;  %v224_v41 = vpop.f32.mrb[3].mxu1 }
 0x1d7   :  { %v776_v42 = vmax.f32 %v222_v37, 0.0  ;;  %v225_v43 = vadd.f32 %v224_v41, %v173_v31 }
 0x1d8   :  { %v778_v44 = vmax.f32 %v233_v40, 0.0  ;;  %vm242_vm1 = vcmp.ge.f32.partialorder %v774_v39, 0.0  ;;  %v250_v45 = vmul.f32 %v247_v36, %v774_v39 }
 0x1d9   :  { %v782_v46 = vmax.f32 %v225_v43, 0.0  ;;  %vm240_vm2 = vcmp.ge.f32.partialorder %v776_v42, 0.0  ;;  %v248_v47 = vmul.f32 %v247_v36, %v776_v42 }
 0x1da   :  { %v254_v48 = vsel %vm242_vm1, %v774_v39, %v250_v45  ;;  %vm243_vm3 = vcmp.ge.f32.partialorder %v778_v44, 0.0  ;;  %v251_v49 = vmul.f32 %v247_v36, %v778_v44 }
 0x1db   :  { %v262_v50 = vsel %vm180_vm0, %v254_v48, 0.0  ;;  %v252_v51 = vsel %vm240_vm2, %v776_v42, %v248_v47  ;;  %vm241_vm4 = vcmp.ge.f32.partialorder %v782_v46, 0.0  ;;  %v249_v52 = vmul.f32 %v247_v36, %v782_v46 }
 0x1dc   :  { %263 = vadd.xlane.f32.xlu1 %v262_v50  ;;  %v256_v53 = vsel %vm180_vm0, %v252_v51, 0.0  ;;  %v255_v54 = vsel %vm243_vm3, %v778_v44, %v251_v49  ;;  %v320_v36 = vsub.s32 4, %v759_v12 }
 0x1dd   :  { %257 = vadd.xlane.f32.xlu0 %v256_v53  ;;  %v253_v55 = vsel %vm241_vm4, %v782_v46, %v249_v52  ;;  %v266_v56 = vsel %vm265_vm5, %v255_v54, 0.0 }
 0x1de   :  { %v259_v57 = vsel %vm180_vm0, %v253_v55, 0.0  ;;  %v321_v43 = vrot.slane %v765_v14, %v320_v36 }
 0x1e0   :  { %267 = vadd.xlane.f32.xlu1 %v266_v56 }
 0x1e1   :  { %260 = vadd.xlane.f32.xlu0 %v259_v57 }
 0x269   :  { %v264_v58 = vpop.xlane.xlu1 %263 }
 0x26a   :  { %v272_v59 = vmul.f32 0.0625, %v264_v58  ;;  %v258_v60 = vpop.xlane.xlu0 %257  ;;  %v470_v58 = vsub.s32 5, %v759_v12 }
 0x26b   :  { %v270_v61 = vmul.f32 0.0625, %v258_v60 }
 0x26c   :  { %v276_v62 = vsub.f32 %v254_v48, %v272_v59  ;;  %v482_v59 = vsub.s32 6, %v759_v12  ;;  %v471_v60 = vrot.slane %v765_v14, %v470_v58 }
 0x26d   :  { %v274_v63 = vsub.f32 %v252_v51, %v270_v61  ;;  %v268_v0 = vpop.xlane.xlu1 %267 }
 0x26e   :  { %v273_v1 = vmul.f32 0.0625, %v268_v0  ;;  %v261_v2 = vpop.xlane.xlu0 %260  ;;  %v280_v8 = vmul.f32 %v276_v62, %v276_v62 }
 0x26f   :  { %v271_v3 = vmul.f32 0.0625, %v261_v2  ;;  %v278_v4 = vmul.f32 %v274_v63, %v274_v63 }
 0x270   :  { %v277_v5 = vsub.f32 %v255_v54, %v273_v1  ;;  %v288_v10 = vsel %vm180_vm0, %v280_v8, 0.0 }
 0x271   :  { %v275_v6 = vsub.f32 %v253_v55, %v271_v3  ;;  %v282_v7 = vsel %vm180_vm0, %v278_v4, 0.0 }
 0x272   :  { %283 = vadd.xlane.f32.xlu0 %v282_v7  ;;  %v281_v13 = vmul.f32 %v277_v5, %v277_v5 }
 0x273   :  { %v279_v9 = vmul.f32 %v275_v6, %v275_v6 }
 0x274   :  { %v291_v15 = vsel %vm265_vm5, %v281_v13, 0.0 }
 0x275   :  { %v285_v11 = vsel %vm180_vm0, %v279_v9, 0.0 }
 0x276   :  { %289 = vadd.xlane.f32.xlu0 %v288_v10  ;;  %286 = vadd.xlane.f32.xlu1 %v285_v11 }
 0x27a   :  { %292 = vadd.xlane.f32.xlu1 %v291_v15 }
 0x2ff   :  { %v284_v20 = vpop.xlane.xlu0 %283 }
 0x300   :  { %v294_v21 = vmul.f32 0.0625, %v284_v20 }
 0x302   :  { %v298_v22 = vadd.f32 1e-08, %v294_v21 }
 0x303   :  { %v287_v23 = vpop.xlane.xlu1 %286  ;;  %v290_v24 = vpop.xlane.xlu0 %289 }
 0x304   :  { %670 = vrsqrt.f32 %v298_v22  ;;  %v295_v25 = vmul.f32 0.0625, %v287_v23  ;;  %v296_v26 = vmul.f32 0.0625, %v290_v24 }
 0x306   :  { %v299_v27 = vadd.f32 1e-08, %v295_v25  ;;  %v300_v28 = vadd.f32 1e-08, %v296_v26 }
 0x307   :  { %v293_v29 = vpop.xlane.xlu1 %292 }
 0x308   :  { %672 = vrsqrt.f32 %v299_v27  ;;  %v297_v30 = vmul.f32 0.0625, %v293_v29 }
 0x309   :  { %674 = vrsqrt.f32 %v300_v28 }
 0x30a   :  { %v301_v31 = vadd.f32 1e-08, %v297_v30 }
 0x30c   :  { %676 = vrsqrt.f32 %v301_v31 }
 0x30e   :  { %v671_v33 = vpop.eup %670 }
 0x30f   :  { %v306_v34 = vmul.f32 %v671_v33, %v274_v63 }
 0x311   :  { %v314_v41 = vmul.f32 %v313_v35, %v306_v34 }
 0x312   :  { %v673_v37 = vpop.eup %672 }
 0x313   :  { %v675_v38 = vpop.eup %674  ;;  %v307_v40 = vmul.f32 %v673_v37, %v275_v6  ;;  %v322_v51 = vadd.f32 %v321_v43, %v314_v41 }
 0x314   :  { %v308_v45 = vmul.f32 %v675_v38, %v276_v62  ;;  %v483_v62 = vrot.slane %v765_v14, %v482_v59 }
 0x315   :  { %v315_v47 = vmul.f32 %v313_v35, %v307_v40 }
 0x316   :  { %v677_v48 = vpop.eup %676  ;;  %v316_v49 = vmul.f32 %v313_v35, %v308_v45 }
 0x317   :  { %v309_v50 = vmul.f32 %v677_v48, %v277_v5  ;;  %v323_v52 = vadd.f32 %v321_v43, %v315_v47 }
 0x318   :  { %v324_v55 = vadd.f32 %v321_v43, %v316_v49 }
 0x319   :  { %v317_v53 = vmul.f32 %v313_v35, %v309_v50  ;;  %v326_v54 = vpack.c.bf16 %v323_v52, %v322_v51 }
 0x31b   :  { %647 = vmatprep.mubr.msk.bf16.mxu1 %vm180_vm0, %v326_v54  ;;  %v325_v56 = vadd.f32 %v321_v43, %v317_v53 }
 0x31d   :  { %v327_v57 = vpack.c.bf16 %v325_v56, %v324_v55  ;;  %v546_v56 = vsub.s32 7, %v759_v12 }
 0x31f   :  { %648 = vmatmul.mubr.msk.bf16.vlgmr.msra.gmra.mrb[4].mxu1 %vm180_vm0, %v327_v57  ;;  %v547_v57 = vrot.slane %v765_v14, %v546_v56 }
 0x3f2   :  { %v649_v61 = vpop.f32.mrb[4].mxu1 }
 0x3f3   :  { %v474_v63 = vadd.f32 %v649_v61, %v471_v60  ;;  %v453_v0 = vpop.f32.mrb[5].mxu1  ;;  %v593_v61 = vld [vmem:[%s862_s6 + $0x8] ss:$0 sm:$0xff] }
 0x3f4   :  { %v472_v1 = vadd.f32 %v471_v60, %v453_v0  ;;  %v650_v2 = vpop.f32.mrb[6].mxu1 }
 0x3f5   :  { %v475_v3 = vadd.f32 %v650_v2, %v471_v60  ;;  %v456_v4 = vpop.f32.mrb[7].mxu1  ;;  %v486_v5 = vmul.f32 %v483_v62, %v474_v63  ;;  %vm478_vm7 = vcmp.ge.f32.partialorder %v474_v63, 0.0 }
 0x3f6   :  { %v484_v6 = vmul.f32 %v483_v62, %v472_v1  ;;  %v473_v7 = vadd.f32 %v471_v60, %v456_v4  ;;  %vm476_vm6 = vcmp.ge.f32.partialorder %v472_v1, 0.0 }
 0x3f7   :  { %v487_v8 = vmul.f32 %v483_v62, %v475_v3  ;;  %vm479_vm9 = vcmp.ge.f32.partialorder %v475_v3, 0.0  ;;  %v490_v15 = vsel %vm478_vm7, %v474_v63, %v486_v5 }
 0x3f8   :  { %v485_v9 = vmul.f32 %v483_v62, %v473_v7  ;;  %v488_v10 = vsel %vm476_vm6, %v472_v1, %v484_v6  ;;  %vm477_vm8 = vcmp.ge.f32.partialorder %v473_v7, 0.0  ;;  %v498_v18 = vsel %vm180_vm0, %v490_v15, 0.0 }
 0x3f9   :  { %v492_v11 = vsel %vm180_vm0, %v488_v10, 0.0  ;;  %v491_v17 = vsel %vm479_vm9, %v475_v3, %v487_v8 }
 0x3fa   :  { %493 = vadd.xlane.f32.xlu0 %v492_v11  ;;  %v489_v13 = vsel %vm477_vm8, %v473_v7, %v485_v9  ;;  %v501_v19 = vsel %vm265_vm5, %v491_v17, 0.0 }
 0x3fb   :  { %v495_v16 = vsel %vm180_vm0, %v489_v13, 0.0 }
 0x3fc   :  { %496 = vadd.xlane.f32.xlu1 %v495_v16 }
 0x3fe   :  { %499 = vadd.xlane.f32.xlu0 %v498_v18 }
 0x400   :  { %502 = vadd.xlane.f32.xlu1 %v501_v19 }
 0x487   :  { %v494_v20 = vpop.xlane.xlu0 %493 }
 0x488   :  { %v504_v21 = vmul.f32 0.0625, %v494_v20 }
 0x489   :  { %v497_v22 = vpop.xlane.xlu1 %496 }
 0x48a   :  { %v508_v23 = vsub.f32 %v488_v10, %v504_v21  ;;  %v505_v24 = vmul.f32 0.0625, %v497_v22 }
 0x48b   :  { %v500_v25 = vpop.xlane.xlu0 %499 }
 0x48c   :  { %v509_v26 = vsub.f32 %v489_v13, %v505_v24  ;;  %v506_v27 = vmul.f32 0.0625, %v500_v25  ;;  %v512_v28 = vmul.f32 %v508_v23, %v508_v23 }
 0x48d   :  { %v503_v29 = vpop.xlane.xlu1 %502 }
 0x48e   :  { %v510_v30 = vsub.f32 %v490_v15, %v506_v27  ;;  %v507_v31 = vmul.f32 0.0625, %v503_v29  ;;  %v516_v32 = vsel %vm180_vm0, %v512_v28, 0.0  ;;  %v513_v33 = vmul.f32 %v509_v26, %v509_v26 }
 0x48f   :  { %517 = vadd.xlane.f32.xlu0 %v516_v32 }
 0x490   :  { %v511_v34 = vsub.f32 %v491_v17, %v507_v31  ;;  %v519_v35 = vsel %vm180_vm0, %v513_v33, 0.0  ;;  %v514_v36 = vmul.f32 %v510_v30, %v510_v30 }
 0x491   :  { %520 = vadd.xlane.f32.xlu1 %v519_v35 }
 0x492   :  { %v522_v37 = vsel %vm180_vm0, %v514_v36, 0.0  ;;  %v515_v38 = vmul.f32 %v511_v34, %v511_v34 }
 0x493   :  { %523 = vadd.xlane.f32.xlu0 %v522_v37 }
 0x494   :  { %v525_v40 = vsel %vm265_vm5, %v515_v38, 0.0 }
 0x495   :  { %526 = vadd.xlane.f32.xlu1 %v525_v40 }
 0x51c   :  { %v518_v41 = vpop.xlane.xlu0 %517 }
 0x51d   :  { %v528_v43 = vmul.f32 0.0625, %v518_v41 }
 0x51e   :  { %v521_v45 = vpop.xlane.xlu1 %520 }
 0x51f   :  { %v532_v47 = vadd.f32 1e-08, %v528_v43  ;;  %v529_v48 = vmul.f32 0.0625, %v521_v45 }
 0x520   :  { %v524_v49 = vpop.xlane.xlu0 %523 }
 0x521   :  { %678 = vrsqrt.f32 %v532_v47  ;;  %v533_v50 = vadd.f32 1e-08, %v529_v48  ;;  %v530_v51 = vmul.f32 0.0625, %v524_v49 }
 0x522   :  { %v527_v52 = vpop.xlane.xlu1 %526 }
 0x523   :  { %680 = vrsqrt.f32 %v533_v50  ;;  %v534_v53 = vadd.f32 1e-08, %v530_v51  ;;  %v531_v54 = vmul.f32 0.0625, %v527_v52 }
 0x525   :  { %682 = vrsqrt.f32 %v534_v53  ;;  %v535_v55 = vadd.f32 1e-08, %v531_v54 }
 0x527   :  { %684 = vrsqrt.f32 %v535_v55 }
 0x52b   :  { %v679_v58 = vpop.eup %678 }
 0x52c   :  { %v540_v59 = vmul.f32 %v679_v58, %v508_v23 }
 0x52d   :  { %v681_v60 = vpop.eup %680 }
 0x52e   :  { %v548_v62 = vmul.f32 %v547_v57, %v540_v59  ;;  %v541_v63 = vmul.f32 %v681_v60, %v509_v26 }
 0x52f   :  { %v683_v0 = vpop.eup %682 }
 0x530   :  { %v556_v1 = vadd.f32 %v593_v61, %v548_v62  ;;  %v549_v2 = vmul.f32 %v547_v57, %v541_v63  ;;  %v542_v3 = vmul.f32 %v683_v0, %v510_v30 }
 0x531   :  { %v685_v4 = vpop.eup %684 }
 0x532   :  { %v560_v5 = vadd.f32 %v556_v1, %v776_v42  ;;  %v557_v12 = vadd.f32 %v593_v61, %v549_v2  ;;  %v550_v6 = vmul.f32 %v547_v57, %v542_v3  ;;  %v543_v7 = vmul.f32 %v685_v4, %v511_v34 }
 0x534   :  { %564 = vst.msk [vmem:[%s866_s7] sm:$0xff] %vm180_vm0, %v560_v5  ;;  %v561_v14 = vadd.f32 %v557_v12, %v782_v46  ;;  %v558_v8 = vadd.f32 %v593_v61, %v550_v6  ;;  %v551_v9 = vmul.f32 %v547_v57, %v543_v7 }
 0x536   :  { %565 = vst.msk [vmem:[%s866_s7 + $0x8] sm:$0xff] %vm180_vm0, %v561_v14  ;;  %v562_v10 = vadd.f32 %v558_v8, %v774_v39  ;;  %v559_v42 = vadd.f32 %v593_v61, %v551_v9 }
 0x538   :  { %566 = vst.msk [vmem:[%s866_s7 + $0x10] sm:$0xff] %vm180_vm0, %v562_v10  ;;  %v563_v11 = vadd.f32 %v559_v42, %v778_v44 }
 0x53a   :  { %567 = vst.msk [vmem:[%s866_s7 + $0x18] sm:$0x3f] %vm265_vm5, %v563_v11 }

// kernel: _lambda_.15
= control target key start
LH: loop header
LB: loop body
LE: loop exit
PB: predicated region body
PF: predicated region fallthrough
CT: control target
= control target key end

     0   :  { %vm52_vm0 = vcmask 261120   ;;  %vm108_vm1 = vcmask 130048   ;;  %vm112_vm2 = vcmask 128000   ;;  %s188_s1 = inlined_call_operand.vmem [shape: bf16[32,16], index: 1, kind: input, shape index: {}]   ;;  %s189_s0 = inlined_call_operand.vmem [shape: bf16[30,32], index: 0, kind: input, shape index: {}]   ;;  %s190_s2 = inlined_call_operand.vmem [shape: f32[1,16], index: 2, kind: input, shape index: {}]   ;;  %s191_s3 = inlined_call_operand.vmem [shape: f32[30,16], index: 3, kind: output, shape index: {}]  }
   0x1   :  { %v137_v0 = vld [vmem:[%s188_s1] sm:$0xff]   ;;  %v138_v1 = vld [vmem:[%s188_s1 + $0x8] sm:$0xff]  }
   0x2   :  { %129 = vmatprep.subr.bf16.mxu0 %v137_v0  ;;  %v139_v2 = vld [vmem:[%s189_s0] sm:$0xff]   ;;  %v140_v3 = vld [vmem:[%s189_s0 + $0x8] sm:$0x7f]  }
   0x3   :  { %130 = vmatpush3.bf16.msra.mxu0 %v137_v0  ;;  %133 = vmatprep.mubr.msk.bf16.mxu0 %vm52_vm0, %v139_v2  ;;  %v118_v4 = vld [vmem:[%s190_s2] ss:$0 sm:$0xff] }
   0x4   :  { %131 = vmatprep.subr.bf16.mxu0 %v138_v1 }
   0x7   :  { %132 = vmatpush3.bf16.msra.mxu0 %v138_v1 }
   0xa   :  { %134 = vmatmul.mubr.msk.bf16.vlgmr.msra.gmra.mrb[0].mxu0 %vm52_vm0, %v140_v3 }
  0xdd   :  { %v135_v5 = vpop.f32.mrb[0].mxu0 }
  0xde   :  { %v102_v6 = vadd.f32 %v135_v5, %v118_v4  ;;  %v93_v7 = vpop.f32.mrb[1].mxu0 }
  0xdf   :  { %v94_v8 = vadd.f32 %v118_v4, %v93_v7  ;;  %v136_v9 = vpop.f32.mrb[2].mxu0 }
  0xe0   :  { %111 = vst.msk [vmem:[%s191_s3 + $0x10] sm:$0xff] %vm108_vm1, %v102_v6  ;;  %v105_v10 = vadd.f32 %v136_v9, %v118_v4  ;;  %v96_v11 = vpop.f32.mrb[3].mxu0 }
  0xe1   :  { %109 = vst.msk [vmem:[%s191_s3] sm:$0xff] %vm108_vm1, %v94_v8  ;;  %v97_v12 = vadd.f32 %v118_v4, %v96_v11 }
  0xe2   :  { %113 = vst.msk [vmem:[%s191_s3 + $0x18] sm:$0x3f] %vm112_vm2, %v105_v10 }
  0xe3   :  { %110 = vst.msk [vmem:[%s191_s3 + $0x8] sm:$0xff] %vm108_vm1, %v97_v12 }

// kernel: _lambda_.13
= control target key start
LH: loop header
LB: loop body
LE: loop exit
PB: predicated region body
PF: predicated region fallthrough
CT: control target
= control target key end

     0   :  { %s2819_s15 = smov 0   ;;  %s3346_s0 = inlined_call_operand.vmem [shape: bf16[15,2,16], index: 0, kind: input, shape index: {}]   ;;  %s3347_s1 = inlined_call_operand.vmem [shape: bf16[2,16,64], index: 1, kind: input, shape index: {}]   ;;  %s3348_s2 = inlined_call_operand.vmem [shape: bf16[2,16,64], index: 2, kind: input, shape index: {}]   ;;  %s3349_s3 = inlined_call_operand.vmem [shape: f32[2,1,64], index: 3, kind: input, shape index: {}]   ;;  %s3350_s4 = inlined_call_operand.vmem [shape: f32[2,15,2,16], index: 4, kind: output, shape index: {}]  }
   0x1 LB: > { %s2825_s16 = sadd.s32 4294967295, %s2785_s15   ;;  %p2323_p0 = scmp.ge.s32.totalorder %s2785_s15, 1  ;;  %s2785_s15 = sphi %s2819_s15, %s14_s15  }
   0x2   : > { %p180_p1 = scmp.lt.s32.totalorder %s2785_s15, 3 }
   0x4   : > { %p181_p2 = pnand %p2323_p0, %p180_p1 }
   0x5   : > { %p214_p3 = scmp.lt.s32.totalorder (!%p181_p2), %s2825_s16, 1  ;;  %p238_p4 = scmp.eq.s32.totalorder (!%p181_p2), %s2825_s16, 0  ;;  %v2787_v0 = vmov (!%p181_p2), 0.0   ;;  %vm2788_vm0 = vmmov (!%p181_p2), 0   ;;  %vm249_vm1 = vcmask (!%p181_p2), 130048   ;;  %v2789_v4 = vmov (!%p181_p2), 0  }
   0x6   : > { %184 = sbr.rel (%p181_p2) target bundleno = 10611 (0x2973), region = 36  ;;  %2458 = vmatprep.subr.bf16.mxu0 (!%p181_p2), %v2787_v0  ;;  %2464 = vmatprep.subr.bf16.mxu1 (!%p181_p2), %v2787_v0  ;;  %s2790_s6 = smov (!%p181_p2), 96   ;;  %vm379_vm2 = vcmask (!%p181_p2), 123904  }
   0x7   : > { %2460 = vmatprep.mubr.msk.bf16.mxu0 (!%p181_p2), %vm2788_vm0, %v2787_v0  ;;  %2466 = vmatprep.mubr.msk.bf16.mxu1 (!%p181_p2), %vm2788_vm0, %v2787_v0  ;;  %s2791_s7 = smov (!%p181_p2), 16   ;;  %s2792_s13 = smov (!%p181_p2), 32  }
   0x8   : > { %s2793_s14 = smov (!%p181_p2), 80  }
   0xd   : > { %s2834_s17 = scalar_select %p214_p3, %s2825_s16, 1 }
   0xe   : > { %s2842_s18 = scalar_select %p238_p4, 0, 14 }
   0xf   : > { %s2396_s19 = sshll.u32 %s2834_s17, 3  ;;  %s2882_s5 = scalar_lea.vmem %s3349_s3, %s2834_s17 }
  0x10   : > { %s2848_s22 = scalar_lea.vmem %s3348_s2, %s2396_s19  ;;  %s2853_s25 = scalar_lea.vmem %s3347_s1, %s2396_s19  ;;  %v2885_v6 = vld [vmem:[%s2882_s5] ss:$0 sm:$0xff] }
  0x11   : > { %v2856_v1 = vld [vmem:[%s2848_s22] sm:$0xff]   ;;  %s241_s28 = scalar_lea.vmem %s3346_s0, %s2842_s18 }
  0x12   : > { %v2863_v2 = vld [vmem:[%s2853_s25] sm:$0xff]   ;;  %2459 = vmatpush3.bf16.msra.mxu0 %v2856_v1  ;;  %s2892_s8 = scalar_select %p238_p4, 1, 4294967295 }
  0x13   : > { %2465 = vmatpush3.bf16.msra.mxu1 %v2863_v2  ;;  %v242_v3 = vld [vmem:[%s241_s28] sm:$0x1]  ;;  %2470 = vmatprep.subr.bf16.mxu0 %v2787_v0 }
  0x14   : > { %2476 = vmatprep.subr.bf16.mxu1 %v2787_v0  ;;  %s2896_s9 = sadd.s32 %s2892_s8, %s2842_s18  ;;  %s2339_s16 = sshll.u32 %s2892_s8, 1 }
  0x15   : > { %2461 = vmatmul.mubr.bf16.vlgmr.msra.gmra.mrb[0].mxu0 %v2789_v4  ;;  %s382_s12 = scalar_lea.vmem %s3346_s0, %s2896_s9  ;;  %s2923_s19 = sadd.s32 %s2339_s16, %s2842_s18 }
  0x16   : > { %2467 = vmatmul.mubr.msk.bf16.vlgmr.msra.gmra.mrb[0].mxu1 %vm249_vm1, %v242_v3  ;;  %2471 = vmatpush3.bf16.msra.mxu0 %v2856_v1  ;;  %v383_v26 = vld [vmem:[%s382_s12] sm:$0x1]  ;;  %s508_s23 = scalar_lea.vmem %s3346_s0, %s2923_s19  ;;  %s632_s24 = smul.u32 3, %s2892_s8 }
  0x17   : > { %2477 = vmatpush3.bf16.msra.mxu1 %v2863_v2  ;;  %2478 = vmatprep.mubr.msk.bf16.mxu1 %vm2788_vm0, %v2787_v0  ;;  %v509_v52 = vld [vmem:[%s508_s23] sm:$0x1]  ;;  %s2348_s30 = sshll.u32 %s2892_s8, 2  ;;  %s884_s20 = smul.u32 5, %s2892_s8 }
  0x18   : > { %2472 = vmatprep.mubr.msk.bf16.mxu0 %vm2788_vm0, %v2787_v0  ;;  %2482 = vmatprep.subr.bf16.mxu0 %v2787_v0  ;;  %s2950_s26 = sadd.s32 %s632_s24, %s2842_s18  ;;  %s2977_s10 = sadd.s32 %s2348_s30, %s2842_s18 }
  0x19   : > { %2488 = vmatprep.subr.bf16.mxu1 %v2787_v0  ;;  %s634_s29 = scalar_lea.vmem %s3346_s0, %s2950_s26  ;;  %s760_s16 = scalar_lea.vmem %s3346_s0, %s2977_s10 }
  0x1a   : > { %s3004_s21 = sadd.s32 %s884_s20, %s2842_s18  ;;  %s1010_s28 = smul.u32 6, %s2892_s8 }
  0x1b   : > { %s886_s27 = scalar_lea.vmem %s3346_s0, %s3004_s21  ;;  %s1388_s23 = smul.u32 9, %s2892_s8 }
  0x1d   : > { %s3112_s24 = sadd.s32 %s1388_s23, %s2842_s18 }
  0x1e   : > { %2479 = vmatmul.mubr.msk.bf16.vlgmr.msra.gmra.mrb[4].mxu1 %vm249_vm1, %v383_v26  ;;  %s1390_s11 = scalar_lea.vmem %s3346_s0, %s3112_s24 }
  0x1f   : > { %2489 = vmatpush3.bf16.msra.mxu1 %v2863_v2  ;;  %2490 = vmatprep.mubr.msk.bf16.mxu1 %vm2788_vm0, %v2787_v0 }
  0x20   : > { %2500 = vmatprep.subr.bf16.mxu1 %v2787_v0 }
  0x26   : > { %2491 = vmatmul.mubr.msk.bf16.vlgmr.msra.gmra.mrb[8].mxu1 %vm249_vm1, %v509_v52 }
  0x27   : > { %2501 = vmatpush3.bf16.msra.mxu1 %v2863_v2  ;;  %2502 = vmatprep.mubr.msk.bf16.mxu1 %vm2788_vm0, %v2787_v0 }
  0x28   : > { %2512 = vmatprep.subr.bf16.mxu1 %v2787_v0 }
  0xe8   : > { %v287_v5 = vpop.f32.mrb[0].mxu0 }
  0xe9   : > { %v336_v7 = vpop.f32.mrb[0].mxu1  ;;  %v2462_v8 = vpop.f32.mrb[1].mxu0 }
  0xea   : > { %v337_v9 = vadd.f32 %v336_v7, %v287_v5  ;;  %v2468_v10 = vpop.f32.mrb[1].mxu1  ;;  %v290_v11 = vpop.f32.mrb[2].mxu0 }
  0xeb   : > { %v339_v12 = vpop.f32.mrb[2].mxu1  ;;  %v2463_v13 = vpop.f32.mrb[3].mxu0 }
  0xec   : > { %v348_v14 = vadd.f32 %v2885_v6, %v337_v9  ;;  %v2469_v15 = vpop.f32.mrb[3].mxu1 }
  0xee   : > { %2656 = vtanh.f32 %v348_v14  ;;  %v2333_v17 = vmul.f32 -1.442695, %v348_v14 }
  0xf0   : > { %2658 = vpow2.f32 %v2333_v17 }
  0xf1   : > { %v468_v31 = vpop.f32.mrb[4].mxu1 }
  0xf2   : > { %v2480_v32 = vpop.f32.mrb[5].mxu1 }
  0xf3   : > { %v471_v33 = vpop.f32.mrb[6].mxu1 }
  0xf4   : > { %v2481_v34 = vpop.f32.mrb[7].mxu1 }
  0xf8   : > { %v2657_v16 = vpop.eup %2656 }
  0xf9   : > { %358 = vrot.lane.b32.xlu0 %v2657_v16, %s2790_s6  ;;  %v594_v57 = vpop.f32.mrb[8].mxu1 }
  0xfa   : > { %v2659_v18 = vpop.eup %2658  ;;  %v2492_v58 = vpop.f32.mrb[9].mxu1 }
  0xfb   : > { %v352_v19 = vadd.f32 1.0, %v2659_v18  ;;  %v597_v59 = vpop.f32.mrb[10].mxu1  ;;  %v635_v18 = vld [vmem:[%s634_s29] sm:$0x1]  ;;  %s3031_s29 = sadd.s32 %s1010_s28, %s2842_s18  ;;  %s2365_s28 = sshll.u32 %s2892_s8, 3 }
  0xfc   : > { %v2493_v60 = vpop.f32.mrb[11].mxu1  ;;  %2503 = vmatmul.mubr.msk.bf16.vlgmr.msra.gmra.mrb[12].mxu1 %vm249_vm1, %v635_v18  ;;  %s1012_s12 = scalar_lea.vmem %s3346_s0, %s3031_s29  ;;  %s3085_s30 = sadd.s32 %s2365_s28, %s2842_s18 }
  0xfd   : > { %2660 = vrcp.f32 %v352_v19  ;;  %2513 = vmatpush3.bf16.msra.mxu1 %v2863_v2  ;;  %2514 = vmatprep.mubr.msk.bf16.mxu1 %vm2788_vm0, %v2787_v0 }
  0xfe   : > { %2524 = vmatprep.subr.bf16.mxu1 %v2787_v0 }
 0x107   : > { %v2661_v20 = vpop.eup %2660 }
 0x108   : > { %v356_v23 = vmul.f32 0.0, %v2661_v20 }
 0x16b   : > { %v359_v21 = vpop.permute.xlu0 %358 }
 0x16c   : > { %v361_v22 = vmul.f32 %v2661_v20, %v359_v21 }
 0x16e   : > { %363 = vrot.lane.b32.xlu0 %v361_v22, %s2791_s7 }
 0x1e0   : > { %v364_v24 = vpop.permute.xlu0 %363 }
 0x1e1   : > { %v366_v25 = vadd.f32 %v364_v24, %v356_v23  ;;  %v720_v23 = vpop.f32.mrb[12].mxu1 }
 0x1e2   : > { %v2504_v24 = vpop.f32.mrb[13].mxu1 }
 0x1e3   : > { %2662 = vtanh.f32 %v366_v25 }
 0x1ed   : > { %v2663_v27 = vpop.eup %2662 }
 0x1ee   : > { %369 = vrot.lane.b32.xlu1 %v2663_v27, %s2792_s13 }
 0x260   : > { %v370_v28 = vpop.permute.xlu1 %369 }
 0x261   : > { %v2908_v29 = vmul.f32 %v2661_v20, %v370_v28 }
 0x263   : > { %v384_v30 = vpack.c.bf16 %v2908_v29, %v2908_v29 }
 0x265   : > { %386 = vrot.lane.b32.xlu1 %v384_v30, %s2793_s14 }
 0x2d7   : > { %v387_v35 = vpop.permute.xlu1 %386 }
 0x2d8   : > { %2473 = vmatmul.mubr.msk.bf16.vlgmr.msra.gmra.mrb[4].mxu0 %vm249_vm1, %v387_v35 }
 0x2d9   : > { %2483 = vmatpush3.bf16.msra.mxu0 %v2856_v1  ;;  %2484 = vmatprep.mubr.msk.bf16.mxu0 %vm2788_vm0, %v2787_v0 }
 0x2da   : > { %2494 = vmatprep.subr.bf16.mxu0 %v2787_v0 }
 0x3ab   : > { %v425_v36 = vpop.f32.mrb[4].mxu0 }
 0x3ac   : > { %v469_v37 = vadd.f32 %v468_v31, %v425_v36  ;;  %v2474_v38 = vpop.f32.mrb[5].mxu0 }
 0x3ad   : > { %v428_v39 = vpop.f32.mrb[6].mxu0 }
 0x3ae   : > { %v474_v40 = vadd.f32 %v2885_v6, %v469_v37  ;;  %v2475_v41 = vpop.f32.mrb[7].mxu0 }
 0x3b0   : > { %2664 = vtanh.f32 %v474_v40  ;;  %v2337_v43 = vmul.f32 -1.442695, %v474_v40 }
 0x3b2   : > { %2666 = vpow2.f32 %v2337_v43 }
 0x3ba   : > { %v2665_v42 = vpop.eup %2664 }
 0x3bb   : > { %484 = vrot.lane.b32.xlu0 %v2665_v42, %s2790_s6 }
 0x3bc   : > { %v2667_v44 = vpop.eup %2666 }
 0x3bd   : > { %v478_v45 = vadd.f32 1.0, %v2667_v44 }
 0x3bf   : > { %2668 = vrcp.f32 %v478_v45  ;;  %v761_v45 = vld [vmem:[%s760_s16] sm:$0x1]  ;;  %s1136_s16 = smul.u32 7, %s2892_s8 }
 0x3c0   : > { %2515 = vmatmul.mubr.msk.bf16.vlgmr.msra.gmra.mrb[16].mxu1 %vm249_vm1, %v761_v45 }
 0x3c1   : > { %2525 = vmatpush3.bf16.msra.mxu1 %v2863_v2  ;;  %2526 = vmatprep.mubr.msk.bf16.mxu1 %vm2788_vm0, %v2787_v0  ;;  %s3058_s20 = sadd.s32 %s1136_s16, %s2842_s18  ;;  %s1264_s16 = scalar_lea.vmem %s3346_s0, %s3085_s30 }
 0x3c2   : > { %2536 = vmatprep.subr.bf16.mxu1 %v2787_v0 }
 0x3c9   : > { %v2669_v46 = vpop.eup %2668 }
 0x3ca   : > { %v482_v49 = vmul.f32 %v2669_v46, %v366_v25  ;;  %v723_v25 = vpop.f32.mrb[14].mxu1 }
 0x3cb   : > { %v2505_v26 = vpop.f32.mrb[15].mxu1 }
 0x42d   : > { %v485_v47 = vpop.permute.xlu0 %484 }
 0x42e   : > { %v487_v48 = vmul.f32 %v2669_v46, %v485_v47 }
 0x430   : > { %489 = vrot.lane.b32.xlu1 %v487_v48, %s2791_s7 }
 0x4a2   : > { %v490_v50 = vpop.permute.xlu1 %489 }
 0x4a3   : > { %v492_v51 = vadd.f32 %v490_v50, %v482_v49  ;;  %v846_v50 = vpop.f32.mrb[16].mxu1 }
 0x4a5   : > { %2670 = vtanh.f32 %v492_v51 }
 0x4af   : > { %v2671_v53 = vpop.eup %2670 }
 0x4b0   : > { %495 = vrot.lane.b32.xlu0 %v2671_v53, %s2792_s13 }
 0x522   : > { %v496_v54 = vpop.permute.xlu0 %495 }
 0x523   : > { %v2935_v55 = vmul.f32 %v2669_v46, %v496_v54 }
 0x525   : > { %v510_v56 = vpack.c.bf16 %v2935_v55, %v2935_v55 }
 0x527   : > { %512 = vrot.lane.b32.xlu1 %v510_v56, %s2793_s14 }
 0x599   : > { %v513_v61 = vpop.permute.xlu1 %512 }
 0x59a   : > { %2485 = vmatmul.mubr.msk.bf16.vlgmr.msra.gmra.mrb[8].mxu0 %vm249_vm1, %v513_v61 }
 0x59b   : > { %2495 = vmatpush3.bf16.msra.mxu0 %v2856_v1  ;;  %2496 = vmatprep.mubr.msk.bf16.mxu0 %vm2788_vm0, %v2787_v0 }
 0x59c   : > { %2506 = vmatprep.subr.bf16.mxu0 %v2787_v0 }
 0x66d   : > { %v551_v62 = vpop.f32.mrb[8].mxu0 }
 0x66e   : > { %v595_v63 = vadd.f32 %v594_v57, %v551_v62  ;;  %v2486_v3 = vpop.f32.mrb[9].mxu0 }
 0x66f   : > { %v554_v4 = vpop.f32.mrb[10].mxu0 }
 0x670   : > { %v600_v5 = vadd.f32 %v2885_v6, %v595_v63  ;;  %v2487_v7 = vpop.f32.mrb[11].mxu0 }
 0x672   : > { %2672 = vtanh.f32 %v600_v5  ;;  %v2342_v9 = vmul.f32 -1.442695, %v600_v5 }
 0x674   : > { %2674 = vpow2.f32 %v2342_v9 }
 0x67c   : > { %v2673_v8 = vpop.eup %2672 }
 0x67d   : > { %610 = vrot.lane.b32.xlu0 %v2673_v8, %s2790_s6 }
 0x67e   : > { %v2675_v10 = vpop.eup %2674 }
 0x67f   : > { %v604_v11 = vadd.f32 1.0, %v2675_v10 }
 0x681   : > { %2676 = vrcp.f32 %v604_v11 }
 0x68b   : > { %v2677_v12 = vpop.eup %2676 }
 0x68c   : > { %v608_v15 = vmul.f32 %v2677_v12, %v492_v51  ;;  %v2516_v51 = vpop.f32.mrb[17].mxu1 }
 0x68d   : > { %v849_v52 = vpop.f32.mrb[18].mxu1 }
 0x68e   : > { %v2517_v53 = vpop.f32.mrb[19].mxu1 }
 0x6ef   : > { %v611_v13 = vpop.permute.xlu0 %610 }
 0x6f0   : > { %v613_v14 = vmul.f32 %v2677_v12, %v611_v13 }
 0x6f2   : > { %615 = vrot.lane.b32.xlu1 %v613_v14, %s2791_s7 }
 0x764   : > { %v616_v16 = vpop.permute.xlu1 %615 }
 0x765   : > { %v618_v17 = vadd.f32 %v616_v16, %v608_v15 }
 0x767   : > { %2678 = vtanh.f32 %v618_v17 }
 0x771   : > { %v2679_v19 = vpop.eup %2678 }
 0x772   : > { %621 = vrot.lane.b32.xlu0 %v2679_v19, %s2792_s13 }
 0x7e4   : > { %v622_v20 = vpop.permute.xlu0 %621 }
 0x7e5   : > { %v2962_v21 = vmul.f32 %v2677_v12, %v622_v20  ;;  %v887_v12 = vld [vmem:[%s886_s27] sm:$0x1]  ;;  %s1138_s27 = scalar_lea.vmem %s3346_s0, %s3058_s20 }
 0x7e6   : > { %2527 = vmatmul.mubr.msk.bf16.vlgmr.msra.gmra.mrb[20].mxu1 %vm249_vm1, %v887_v12 }
 0x7e7   : > { %v636_v22 = vpack.c.bf16 %v2962_v21, %v2962_v21  ;;  %2537 = vmatpush3.bf16.msra.mxu1 %v2863_v2  ;;  %2538 = vmatprep.mubr.msk.bf16.mxu1 %vm2788_vm0, %v2787_v0 }
 0x7e8   : > { %2548 = vmatprep.subr.bf16.mxu1 %v2787_v0 }
 0x7e9   : > { %638 = vrot.lane.b32.xlu1 %v636_v22, %s2793_s14 }
 0x85b   : > { %v639_v27 = vpop.permute.xlu1 %638 }
 0x85c   : > { %2497 = vmatmul.mubr.msk.bf16.vlgmr.msra.gmra.mrb[12].mxu0 %vm249_vm1, %v639_v27 }
 0x85d   : > { %2507 = vmatpush3.bf16.msra.mxu0 %v2856_v1  ;;  %2508 = vmatprep.mubr.msk.bf16.mxu0 %vm2788_vm0, %v2787_v0 }
 0x85e   : > { %2518 = vmatprep.subr.bf16.mxu0 %v2787_v0 }
 0x92f   : > { %v677_v28 = vpop.f32.mrb[12].mxu0 }
 0x930   : > { %v721_v30 = vadd.f32 %v720_v23, %v677_v28  ;;  %v2498_v31 = vpop.f32.mrb[13].mxu0 }
 0x931   : > { %v680_v32 = vpop.f32.mrb[14].mxu0 }
 0x932   : > { %v726_v33 = vadd.f32 %v2885_v6, %v721_v30  ;;  %v2499_v34 = vpop.f32.mrb[15].mxu0 }
 0x934   : > { %2680 = vtanh.f32 %v726_v33  ;;  %v2346_v36 = vmul.f32 -1.442695, %v726_v33 }
 0x936   : > { %2682 = vpow2.f32 %v2346_v36 }
 0x93e   : > { %v2681_v35 = vpop.eup %2680 }
 0x93f   : > { %736 = vrot.lane.b32.xlu0 %v2681_v35, %s2790_s6 }
 0x940   : > { %v2683_v37 = vpop.eup %2682 }
 0x941   : > { %v730_v38 = vadd.f32 1.0, %v2683_v37 }
 0x943   : > { %2684 = vrcp.f32 %v730_v38 }
 0x94d   : > { %v2685_v39 = vpop.eup %2684 }
 0x94e   : > { %v734_v42 = vmul.f32 %v2685_v39, %v618_v17  ;;  %v972_v17 = vpop.f32.mrb[20].mxu1 }
 0x94f   : > { %v2528_v18 = vpop.f32.mrb[21].mxu1 }
 0x950   : > { %v975_v19 = vpop.f32.mrb[22].mxu1 }
 0x951   : > { %v2529_v20 = vpop.f32.mrb[23].mxu1 }
 0x9b1   : > { %v737_v40 = vpop.permute.xlu0 %736 }
 0x9b2   : > { %v739_v41 = vmul.f32 %v2685_v39, %v737_v40  ;;  %v1013_v40 = vld [vmem:[%s1012_s12] sm:$0x1]  ;;  %s1514_s12 = smul.u32 10, %s2892_s8 }
 0x9b3   : > { %2539 = vmatmul.mubr.msk.bf16.vlgmr.msra.gmra.mrb[24].mxu1 %vm249_vm1, %v1013_v40 }
 0x9b4   : > { %741 = vrot.lane.b32.xlu1 %v739_v41, %s2791_s7  ;;  %2549 = vmatpush3.bf16.msra.mxu1 %v2863_v2 }
 0x9b5   : > { %2550 = vmatprep.mubr.msk.bf16.mxu1 %vm2788_vm0, %v2787_v0  ;;  %2560 = vmatprep.subr.bf16.mxu1 %v2787_v0 }
 0xa26   : > { %v742_v43 = vpop.permute.xlu1 %741 }
 0xa27   : > { %v744_v44 = vadd.f32 %v742_v43, %v734_v42 }
 0xa29   : > { %2686 = vtanh.f32 %v744_v44 }
 0xa33   : > { %v2687_v46 = vpop.eup %2686 }
 0xa34   : > { %747 = vrot.lane.b32.xlu0 %v2687_v46, %s2792_s13 }
 0xa86   : > { %v1098_v45 = vpop.f32.mrb[24].mxu1 }
 0xa87   : > { %v2540_v46 = vpop.f32.mrb[25].mxu1 }
 0xaa6   : > { %v748_v47 = vpop.permute.xlu0 %747 }
 0xaa7   : > { %v2989_v48 = vmul.f32 %v2685_v39, %v748_v47  ;;  %v1101_v47 = vpop.f32.mrb[26].mxu1 }
 0xaa9   : > { %v762_v49 = vpack.c.bf16 %v2989_v48, %v2989_v48 }
 0xaab   : > { %764 = vrot.lane.b32.xlu1 %v762_v49, %s2793_s14  ;;  %v2541_v49 = vpop.f32.mrb[27].mxu1 }
 0xb1d   : > { %v765_v54 = vpop.permute.xlu1 %764 }
 0xb1e   : > { %2509 = vmatmul.mubr.msk.bf16.vlgmr.msra.gmra.mrb[16].mxu0 %vm249_vm1, %v765_v54 }
 0xb1f   : > { %2519 = vmatpush3.bf16.msra.mxu0 %v2856_v1  ;;  %2520 = vmatprep.mubr.msk.bf16.mxu0 %vm2788_vm0, %v2787_v0 }
 0xb20   : > { %2530 = vmatprep.subr.bf16.mxu0 %v2787_v0 }
 0xbf1   : > { %v803_v56 = vpop.f32.mrb[16].mxu0 }
 0xbf2   : > { %v847_v57 = vadd.f32 %v846_v50, %v803_v56  ;;  %v2510_v58 = vpop.f32.mrb[17].mxu0 }
 0xbf3   : > { %v806_v59 = vpop.f32.mrb[18].mxu0 }
 0xbf4   : > { %v852_v60 = vadd.f32 %v2885_v6, %v847_v57  ;;  %v2511_v61 = vpop.f32.mrb[19].mxu0 }
 0xbf6   : > { %2688 = vtanh.f32 %v852_v60  ;;  %v2351_v63 = vmul.f32 -1.442695, %v852_v60 }
 0xbf8   : > { %2690 = vpow2.f32 %v2351_v63 }
 0xc00   : > { %v2689_v62 = vpop.eup %2688 }
 0xc01   : > { %862 = vrot.lane.b32.xlu0 %v2689_v62, %s2790_s6 }
 0xc02   : > { %v2691_v3 = vpop.eup %2690 }
 0xc03   : > { %v856_v4 = vadd.f32 1.0, %v2691_v3 }
 0xc05   : > { %2692 = vrcp.f32 %v856_v4 }
 0xc0f   : > { %v2693_v5 = vpop.eup %2692 }
 0xc10   : > { %v860_v9 = vmul.f32 %v2693_v5, %v744_v44 }
 0xc73   : > { %v863_v7 = vpop.permute.xlu0 %862 }
 0xc74   : > { %v865_v8 = vmul.f32 %v2693_v5, %v863_v7 }
 0xc76   : > { %867 = vrot.lane.b32.xlu1 %v865_v8, %s2791_s7  ;;  %v1139_v8 = vld [vmem:[%s1138_s27] sm:$0x1] }
 0xc77   : > { %2551 = vmatmul.mubr.msk.bf16.vlgmr.msra.gmra.mrb[28].mxu1 %vm249_vm1, %v1139_v8 }
 0xc78   : > { %2561 = vmatpush3.bf16.msra.mxu1 %v2863_v2  ;;  %2562 = vmatprep.mubr.msk.bf16.mxu1 %vm2788_vm0, %v2787_v0 }
 0xc79   : > { %2572 = vmatprep.subr.bf16.mxu1 %v2787_v0 }
 0xce8   : > { %v868_v10 = vpop.permute.xlu1 %867 }
 0xce9   : > { %v870_v11 = vadd.f32 %v868_v10, %v860_v9 }
 0xceb   : > { %2694 = vtanh.f32 %v870_v11 }
 0xcf5   : > { %v2695_v13 = vpop.eup %2694 }
 0xcf6   : > { %873 = vrot.lane.b32.xlu0 %v2695_v13, %s2792_s13 }
 0xd4a   : > { %v1224_v13 = vpop.f32.mrb[28].mxu1 }
 0xd68   : > { %v874_v14 = vpop.permute.xlu0 %873 }
 0xd69   : > { %v3016_v15 = vmul.f32 %v2693_v5, %v874_v14  ;;  %v2552_v14 = vpop.f32.mrb[29].mxu1 }
 0xd6b   : > { %v888_v16 = vpack.c.bf16 %v3016_v15, %v3016_v15 }
 0xd6d   : > { %890 = vrot.lane.b32.xlu1 %v888_v16, %s2793_s14  ;;  %v1227_v16 = vpop.f32.mrb[30].mxu1 }
 0xddf   : > { %v891_v22 = vpop.permute.xlu1 %890 }
 0xde0   : > { %2521 = vmatmul.mubr.msk.bf16.vlgmr.msra.gmra.mrb[20].mxu0 %vm249_vm1, %v891_v22 }
 0xde1   : > { %2531 = vmatpush3.bf16.msra.mxu0 %v2856_v1  ;;  %2532 = vmatprep.mubr.msk.bf16.mxu0 %vm2788_vm0, %v2787_v0 }
 0xde2   : > { %2542 = vmatprep.subr.bf16.mxu0 %v2787_v0 }
 0xeb3   : > { %v929_v23 = vpop.f32.mrb[20].mxu0 }
 0xeb4   : > { %v973_v24 = vadd.f32 %v972_v17, %v929_v23  ;;  %v2522_v25 = vpop.f32.mrb[21].mxu0  ;;  %v2553_v17 = vpop.f32.mrb[31].mxu1 }
 0xeb5   : > { %v932_v26 = vpop.f32.mrb[22].mxu0 }
 0xeb6   : > { %v978_v27 = vadd.f32 %v2885_v6, %v973_v24  ;;  %v2523_v28 = vpop.f32.mrb[23].mxu0 }
 0xeb8   : > { %2696 = vtanh.f32 %v978_v27  ;;  %v2355_v31 = vmul.f32 -1.442695, %v978_v27 }
 0xeba   : > { %2698 = vpow2.f32 %v2355_v31 }
 0xec2   : > { %v2697_v30 = vpop.eup %2696 }
 0xec3   : > { %988 = vrot.lane.b32.xlu0 %v2697_v30, %s2790_s6 }
 0xec4   : > { %v2699_v32 = vpop.eup %2698 }
 0xec5   : > { %v982_v33 = vadd.f32 1.0, %v2699_v32 }
 0xec7   : > { %2700 = vrcp.f32 %v982_v33 }
 0xed1   : > { %v2701_v34 = vpop.eup %2700 }
 0xed2   : > { %v986_v37 = vmul.f32 %v2701_v34, %v870_v11 }
 0xf35   : > { %v989_v35 = vpop.permute.xlu0 %988 }
 0xf36   : > { %v991_v36 = vmul.f32 %v2701_v34, %v989_v35 }
 0xf38   : > { %993 = vrot.lane.b32.xlu1 %v991_v36, %s2791_s7 }
 0xfaa   : > { %v994_v38 = vpop.permute.xlu1 %993 }
 0xfab   : > { %v996_v39 = vadd.f32 %v994_v38, %v986_v37  ;;  %v1265_v37 = vld [vmem:[%s1264_s16] sm:$0x1]  ;;  %s3139_s16 = sadd.s32 %s1514_s12, %s2842_s18 }
 0xfac   : > { %2563 = vmatmul.mubr.msk.bf16.vlgmr.msra.gmra.mrb[32].mxu1 %vm249_vm1, %v1265_v37  ;;  %s1516_s28 = scalar_lea.vmem %s3346_s0, %s3139_s16 }
 0xfad   : > { %2702 = vtanh.f32 %v996_v39  ;;  %2573 = vmatpush3.bf16.msra.mxu1 %v2863_v2  ;;  %2574 = vmatprep.mubr.msk.bf16.mxu1 %vm2788_vm0, %v2787_v0 }
 0xfae   : > { %2584 = vmatprep.subr.bf16.mxu1 %v2787_v0 }
 0xfb7   : > { %v2703_v41 = vpop.eup %2702 }
 0xfb8   : > { %999 = vrot.lane.b32.xlu0 %v2703_v41, %s2792_s13 }
0x102a   : > { %v1000_v42 = vpop.permute.xlu0 %999 }
0x102b   : > { %v3043_v43 = vmul.f32 %v2701_v34, %v1000_v42 }
0x102d   : > { %v1014_v44 = vpack.c.bf16 %v3043_v43, %v3043_v43 }
0x102f   : > { %1016 = vrot.lane.b32.xlu1 %v1014_v44, %s2793_s14 }
0x107f   : > { %v1350_v42 = vpop.f32.mrb[32].mxu1 }
0x1080   : > { %v2564_v44 = vpop.f32.mrb[33].mxu1 }
0x10a1   : > { %v1017_v50 = vpop.permute.xlu1 %1016 }
0x10a2   : > { %2533 = vmatmul.mubr.msk.bf16.vlgmr.msra.gmra.mrb[24].mxu0 %vm249_vm1, %v1017_v50 }
0x10a3   : > { %2543 = vmatpush3.bf16.msra.mxu0 %v2856_v1  ;;  %2544 = vmatprep.mubr.msk.bf16.mxu0 %vm2788_vm0, %v2787_v0 }
0x10a4   : > { %2554 = vmatprep.subr.bf16.mxu0 %v2787_v0 }
0x1175   : > { %v1055_v51 = vpop.f32.mrb[24].mxu0 }
0x1176   : > { %v1099_v52 = vadd.f32 %v1098_v45, %v1055_v51  ;;  %v2534_v53 = vpop.f32.mrb[25].mxu0  ;;  %v1353_v45 = vpop.f32.mrb[34].mxu1 }
0x1177   : > { %v1058_v54 = vpop.f32.mrb[26].mxu0  ;;  %v2565_v46 = vpop.f32.mrb[35].mxu1 }
0x1178   : > { %v1104_v56 = vadd.f32 %v2885_v6, %v1099_v52  ;;  %v2535_v57 = vpop.f32.mrb[27].mxu0 }
0x117a   : > { %2704 = vtanh.f32 %v1104_v56  ;;  %v2359_v59 = vmul.f32 -1.442695, %v1104_v56 }
0x117c   : > { %2706 = vpow2.f32 %v2359_v59 }
0x1184   : > { %v2705_v58 = vpop.eup %2704 }
0x1185   : > { %1114 = vrot.lane.b32.xlu0 %v2705_v58, %s2790_s6 }
0x1186   : > { %v2707_v60 = vpop.eup %2706 }
0x1187   : > { %v1108_v61 = vadd.f32 1.0, %v2707_v60 }
0x1189   : > { %2708 = vrcp.f32 %v1108_v61 }
0x1193   : > { %v2709_v62 = vpop.eup %2708 }
0x1194   : > { %v1112_v4 = vmul.f32 %v2709_v62, %v996_v39 }
0x11f7   : > { %v1115_v63 = vpop.permute.xlu0 %1114 }
0x11f8   : > { %v1117_v3 = vmul.f32 %v2709_v62, %v1115_v63 }
0x11fa   : > { %1119 = vrot.lane.b32.xlu1 %v1117_v3, %s2791_s7 }
0x126c   : > { %v1120_v5 = vpop.permute.xlu1 %1119 }
0x126d   : > { %v1122_v7 = vadd.f32 %v1120_v5, %v1112_v4  ;;  %v1391_v5 = vld [vmem:[%s1390_s11] sm:$0x1]  ;;  %s1640_s11 = smul.u32 11, %s2892_s8 }
0x126e   : > { %2575 = vmatmul.mubr.msk.bf16.vlgmr.msra.gmra.mrb[36].mxu1 %vm249_vm1, %v1391_v5 }
0x126f   : > { %2710 = vtanh.f32 %v1122_v7  ;;  %2585 = vmatpush3.bf16.msra.mxu1 %v2863_v2  ;;  %2586 = vmatprep.mubr.msk.bf16.mxu1 %vm2788_vm0, %v2787_v0  ;;  %s3166_s12 = sadd.s32 %s1640_s11, %s2842_s18 }
0x1270   : > { %2596 = vmatprep.subr.bf16.mxu1 %v2787_v0 }
0x1279   : > { %v2711_v9 = vpop.eup %2710 }
0x127a   : > { %1125 = vrot.lane.b32.xlu0 %v2711_v9, %s2792_s13 }
0x12ec   : > { %v1126_v10 = vpop.permute.xlu0 %1125 }
0x12ed   : > { %v3070_v11 = vmul.f32 %v2709_v62, %v1126_v10 }
0x12ef   : > { %v1140_v12 = vpack.c.bf16 %v3070_v11, %v3070_v11 }
0x12f1   : > { %1142 = vrot.lane.b32.xlu1 %v1140_v12, %s2793_s14 }
0x1341   : > { %v1476_v12 = vpop.f32.mrb[36].mxu1 }
0x1363   : > { %v1143_v18 = vpop.permute.xlu1 %1142 }
0x1364   : > { %2545 = vmatmul.mubr.msk.bf16.vlgmr.msra.gmra.mrb[28].mxu0 %vm249_vm1, %v1143_v18 }
0x1365   : > { %2555 = vmatpush3.bf16.msra.mxu0 %v2856_v1  ;;  %2556 = vmatprep.mubr.msk.bf16.mxu0 %vm2788_vm0, %v2787_v0 }
0x1366   : > { %2566 = vmatprep.subr.bf16.mxu0 %v2787_v0 }
0x1437   : > { %v1181_v19 = vpop.f32.mrb[28].mxu0 }
0x1438   : > { %v1225_v20 = vadd.f32 %v1224_v13, %v1181_v19  ;;  %v2546_v22 = vpop.f32.mrb[29].mxu0  ;;  %v2576_v13 = vpop.f32.mrb[37].mxu1 }
0x1439   : > { %v1184_v23 = vpop.f32.mrb[30].mxu0  ;;  %v1479_v14 = vpop.f32.mrb[38].mxu1 }
0x143a   : > { %v1230_v24 = vadd.f32 %v2885_v6, %v1225_v20  ;;  %v2547_v25 = vpop.f32.mrb[31].mxu0  ;;  %v2577_v16 = vpop.f32.mrb[39].mxu1 }
0x143c   : > { %2712 = vtanh.f32 %v1230_v24  ;;  %v2363_v27 = vmul.f32 -1.442695, %v1230_v24 }
0x143e   : > { %2714 = vpow2.f32 %v2363_v27 }
0x1446   : > { %v2713_v26 = vpop.eup %2712 }
0x1447   : > { %1240 = vrot.lane.b32.xlu0 %v2713_v26, %s2790_s6 }
0x1448   : > { %v2715_v28 = vpop.eup %2714 }
0x1449   : > { %v1234_v30 = vadd.f32 1.0, %v2715_v28 }
0x144b   : > { %2716 = vrcp.f32 %v1234_v30 }
0x1455   : > { %v2717_v31 = vpop.eup %2716 }
0x1456   : > { %v1238_v34 = vmul.f32 %v2717_v31, %v1122_v7 }
0x14b9   : > { %v1241_v32 = vpop.permute.xlu0 %1240 }
0x14ba   : > { %v1243_v33 = vmul.f32 %v2717_v31, %v1241_v32 }
0x14bc   : > { %1245 = vrot.lane.b32.xlu1 %v1243_v33, %s2791_s7 }
0x152e   : > { %v1246_v35 = vpop.permute.xlu1 %1245 }
0x152f   : > { %v1248_v36 = vadd.f32 %v1246_v35, %v1238_v34 }
0x1531   : > { %2718 = vtanh.f32 %v1248_v36 }
0x153b   : > { %v2719_v38 = vpop.eup %2718 }
0x153c   : > { %1251 = vrot.lane.b32.xlu0 %v2719_v38, %s2792_s13 }
0x15ae   : > { %v1252_v39 = vpop.permute.xlu0 %1251 }
0x15af   : > { %v3097_v40 = vmul.f32 %v2717_v31, %v1252_v39 }
0x15b1   : > { %v1266_v41 = vpack.c.bf16 %v3097_v40, %v3097_v40 }
0x15b3   : > { %1268 = vrot.lane.b32.xlu1 %v1266_v41, %s2793_s14 }
0x1625   : > { %v1269_v47 = vpop.permute.xlu1 %1268 }
0x1626   : > { %2557 = vmatmul.mubr.msk.bf16.vlgmr.msra.gmra.mrb[32].mxu0 %vm249_vm1, %v1269_v47 }
0x1627   : > { %2567 = vmatpush3.bf16.msra.mxu0 %v2856_v1  ;;  %2568 = vmatprep.mubr.msk.bf16.mxu0 %vm2788_vm0, %v2787_v0 }
0x1628   : > { %2578 = vmatprep.subr.bf16.mxu0 %v2787_v0 }
0x16f9   : > { %v1307_v49 = vpop.f32.mrb[32].mxu0 }
0x16fa   : > { %v1351_v50 = vadd.f32 %v1350_v42, %v1307_v49  ;;  %v2558_v51 = vpop.f32.mrb[33].mxu0 }
0x16fb   : > { %v1310_v52 = vpop.f32.mrb[34].mxu0 }
0x16fc   : > { %v1356_v53 = vadd.f32 %v2885_v6, %v1351_v50  ;;  %v2559_v54 = vpop.f32.mrb[35].mxu0 }
0x16fe   : > { %2720 = vtanh.f32 %v1356_v53  ;;  %v2368_v57 = vmul.f32 -1.442695, %v1356_v53 }
0x1700   : > { %2722 = vpow2.f32 %v2368_v57 }
0x1708   : > { %v2721_v56 = vpop.eup %2720 }
0x1709   : > { %1366 = vrot.lane.b32.xlu0 %v2721_v56, %s2790_s6 }
0x170a   : > { %v2723_v58 = vpop.eup %2722 }
0x170b   : > { %v1360_v59 = vadd.f32 1.0, %v2723_v58 }
0x170d   : > { %2724 = vrcp.f32 %v1360_v59 }
0x1717   : > { %v2725_v60 = vpop.eup %2724 }
0x1718   : > { %v1364_v63 = vmul.f32 %v2725_v60, %v1248_v36  ;;  %v1517_v36 = vld [vmem:[%s1516_s28] sm:$0x1]  ;;  %s1642_s28 = scalar_lea.vmem %s3346_s0, %s3166_s12 }
0x1719   : > { %2587 = vmatmul.mubr.msk.bf16.vlgmr.msra.gmra.mrb[40].mxu1 %vm249_vm1, %v1517_v36  ;;  %v2777_v36 = vld [vmem:[%s2853_s25] sm:$0xff]   ;;  %s1892_s25 = smul.u32 13, %s2892_s8 }
0x171a   : > { %2597 = vmatpush3.bf16.msra.mxu1 %v2863_v2  ;;  %2598 = vmatprep.mubr.msk.bf16.mxu1 %vm2788_vm0, %v2787_v0 }
0x171b   : > { %2608 = vmatprep.subr.bf16.mxu1 %v2787_v0 }
0x177b   : > { %v1367_v61 = vpop.permute.xlu0 %1366 }
0x177c   : > { %v1369_v62 = vmul.f32 %v2725_v60, %v1367_v61 }
0x177e   : > { %1371 = vrot.lane.b32.xlu1 %v1369_v62, %s2791_s7 }
0x17ec   : > { %v1602_v42 = vpop.f32.mrb[40].mxu1 }
0x17ed   : > { %v2588_v44 = vpop.f32.mrb[41].mxu1 }
0x17ee   : > { %v1605_v45 = vpop.f32.mrb[42].mxu1 }
0x17ef   : > { %v2589_v46 = vpop.f32.mrb[43].mxu1 }
0x17f0   : > { %v1372_v3 = vpop.permute.xlu1 %1371 }
0x17f1   : > { %v1374_v4 = vadd.f32 %v1372_v3, %v1364_v63 }
0x17f3   : > { %2726 = vtanh.f32 %v1374_v4 }
0x17fd   : > { %v2727_v7 = vpop.eup %2726 }
0x17fe   : > { %1377 = vrot.lane.b32.xlu0 %v2727_v7, %s2792_s13 }
0x1870   : > { %v1378_v8 = vpop.permute.xlu0 %1377 }
0x1871   : > { %v3124_v9 = vmul.f32 %v2725_v60, %v1378_v8 }
0x1873   : > { %v1392_v10 = vpack.c.bf16 %v3124_v9, %v3124_v9 }
0x1875   : > { %1394 = vrot.lane.b32.xlu1 %v1392_v10, %s2793_s14 }
0x18e7   : > { %v1395_v17 = vpop.permute.xlu1 %1394 }
0x18e8   : > { %2569 = vmatmul.mubr.msk.bf16.vlgmr.msra.gmra.mrb[36].mxu0 %vm249_vm1, %v1395_v17  ;;  %v3185_v17 = vld [vmem:[%s2848_s22] sm:$0xff]   ;;  %s1766_s22 = smul.u32 12, %s2892_s8 }
0x18e9   : > { %2579 = vmatpush3.bf16.msra.mxu0 %v2856_v1  ;;  %2580 = vmatprep.mubr.msk.bf16.mxu0 %vm2788_vm0, %v2787_v0 }
0x18ea   : > { %2590 = vmatprep.subr.bf16.mxu0 %v2787_v0  ;;  %s3196_s11 = sadd.s32 %s1766_s22, %s2842_s18  ;;  %s2334_s22 = sshll.u32 %s2842_s18, 1 }
0x19bb   : > { %v1433_v18 = vpop.f32.mrb[36].mxu0 }
0x19bc   : > { %v1477_v19 = vadd.f32 %v1476_v12, %v1433_v18  ;;  %v2570_v20 = vpop.f32.mrb[37].mxu0 }
0x19bd   : > { %v1436_v22 = vpop.f32.mrb[38].mxu0 }
0x19be   : > { %v1482_v23 = vadd.f32 %v2885_v6, %v1477_v19  ;;  %v2571_v24 = vpop.f32.mrb[39].mxu0 }
0x19c0   : > { %2728 = vtanh.f32 %v1482_v23  ;;  %v2372_v26 = vmul.f32 -1.442695, %v1482_v23 }
0x19c2   : > { %2730 = vpow2.f32 %v2372_v26 }
0x19ca   : > { %v2729_v25 = vpop.eup %2728 }
0x19cb   : > { %1492 = vrot.lane.b32.xlu0 %v2729_v25, %s2790_s6 }
0x19cc   : > { %v2731_v27 = vpop.eup %2730 }
0x19cd   : > { %v1486_v28 = vadd.f32 1.0, %v2731_v27 }
0x19cf   : > { %2732 = vrcp.f32 %v1486_v28 }
0x19d9   : > { %v2733_v30 = vpop.eup %2732 }
0x19da   : > { %v1490_v33 = vmul.f32 %v2733_v30, %v1374_v4  ;;  %v1643_v4 = vld [vmem:[%s1642_s28] sm:$0x1]  ;;  %s1768_s28 = scalar_lea.vmem %s3346_s0, %s3196_s11 }
0x19db   : > { %2599 = vmatmul.mubr.msk.bf16.vlgmr.msra.gmra.mrb[44].mxu1 %vm249_vm1, %v1643_v4 }
0x19dc   : > { %2609 = vmatpush3.bf16.msra.mxu1 %v2863_v2  ;;  %2610 = vmatprep.mubr.msk.bf16.mxu1 %vm2788_vm0, %v2787_v0 }
0x19dd   : > { %2620 = vmatprep.subr.bf16.mxu1 %v2787_v0 }
0x1a3d   : > { %v1493_v31 = vpop.permute.xlu0 %1492 }
0x1a3e   : > { %v1495_v32 = vmul.f32 %v2733_v30, %v1493_v31 }
0x1a40   : > { %1497 = vrot.lane.b32.xlu1 %v1495_v32, %s2791_s7 }
0x1aae   : > { %v1728_v12 = vpop.f32.mrb[44].mxu1 }
0x1aaf   : > { %v2600_v13 = vpop.f32.mrb[45].mxu1 }
0x1ab0   : > { %v1731_v14 = vpop.f32.mrb[46].mxu1 }
0x1ab1   : > { %v2601_v2 = vpop.f32.mrb[47].mxu1 }
0x1ab2   : > { %v1498_v34 = vpop.permute.xlu1 %1497 }
0x1ab3   : > { %v1500_v35 = vadd.f32 %v1498_v34, %v1490_v33 }
0x1ab5   : > { %2734 = vtanh.f32 %v1500_v35 }
0x1abf   : > { %v2735_v37 = vpop.eup %2734 }
0x1ac0   : > { %1503 = vrot.lane.b32.xlu0 %v2735_v37, %s2792_s13 }
0x1b32   : > { %v1504_v38 = vpop.permute.xlu0 %1503 }
0x1b33   : > { %v3151_v39 = vmul.f32 %v2733_v30, %v1504_v38 }
0x1b35   : > { %v1518_v41 = vpack.c.bf16 %v3151_v39, %v3151_v39 }
0x1b37   : > { %1520 = vrot.lane.b32.xlu1 %v1518_v41, %s2793_s14 }
0x1ba9   : > { %v1521_v47 = vpop.permute.xlu1 %1520 }
0x1baa   : > { %2581 = vmatmul.mubr.msk.bf16.vlgmr.msra.gmra.mrb[40].mxu0 %vm249_vm1, %v1521_v47 }
0x1bab   : > { %2591 = vmatpush3.bf16.msra.mxu0 %v2856_v1  ;;  %2592 = vmatprep.mubr.msk.bf16.mxu0 %vm2788_vm0, %v2787_v0 }
0x1bac   : > { %2602 = vmatprep.subr.bf16.mxu0 %v2787_v0 }
0x1c7d   : > { %v1559_v49 = vpop.f32.mrb[40].mxu0 }
0x1c7e   : > { %v1603_v50 = vadd.f32 %v1602_v42, %v1559_v49  ;;  %v2582_v51 = vpop.f32.mrb[41].mxu0 }
0x1c7f   : > { %v1562_v52 = vpop.f32.mrb[42].mxu0 }
0x1c80   : > { %v1608_v53 = vadd.f32 %v2885_v6, %v1603_v50  ;;  %v2583_v54 = vpop.f32.mrb[43].mxu0 }
0x1c81   : > { %v3219_v54 = vld [vmem:[%s2882_s5] ss:$0 sm:$0xff]  ;;  %s3226_s5 = sadd.s32 %s1892_s25, %s2842_s18 }
0x1c82   : > { %2736 = vtanh.f32 %v1608_v53  ;;  %v2376_v57 = vmul.f32 -1.442695, %v1608_v53  ;;  %s1894_s27 = scalar_lea.vmem %s3346_s0, %s3226_s5 }
0x1c84   : > { %2738 = vpow2.f32 %v2376_v57 }
0x1c8c   : > { %v2737_v56 = vpop.eup %2736 }
0x1c8d   : > { %1618 = vrot.lane.b32.xlu0 %v2737_v56, %s2790_s6 }
0x1c8e   : > { %v2739_v1 = vpop.eup %2738 }
0x1c8f   : > { %v1612_v58 = vadd.f32 1.0, %v2739_v1 }
0x1c91   : > { %2740 = vrcp.f32 %v1612_v58 }
0x1c9b   : > { %v2741_v59 = vpop.eup %2740 }
0x1c9c   : > { %v1616_v62 = vmul.f32 %v2741_v59, %v1500_v35  ;;  %v1769_v35 = vld [vmem:[%s1768_s28] sm:$0x1]  ;;  %s2018_s28 = smul.u32 14, %s2892_s8 }
0x1c9d   : > { %2611 = vmatmul.mubr.msk.bf16.vlgmr.msra.gmra.mrb[48].mxu1 %vm249_vm1, %v1769_v35 }
0x1c9e   : > { %2621 = vmatpush3.bf16.msra.mxu1 %v2777_v36  ;;  %2622 = vmatprep.mubr.msk.bf16.mxu1 %vm2788_vm0, %v2787_v0  ;;  %s3250_s25 = sadd.s32 %s2018_s28, %s2842_s18  ;;  %s2343_s18 = sshll.u32 %s2923_s19, 1 }
0x1c9f   : > { %2632 = vmatprep.subr.bf16.mxu1 %v2787_v0  ;;  %s2356_s19 = sshll.u32 %s3004_s21, 1 }
0x1cff   : > { %v1619_v60 = vpop.permute.xlu0 %1618 }
0x1d00   : > { %v1621_v61 = vmul.f32 %v2741_v59, %v1619_v60 }
0x1d02   : > { %1623 = vrot.lane.b32.xlu1 %v1621_v61, %s2791_s7 }
0x1d70   : > { %v1854_v44 = vpop.f32.mrb[48].mxu1 }
0x1d71   : > { %v2612_v45 = vpop.f32.mrb[49].mxu1 }
0x1d72   : > { %v1857_v46 = vpop.f32.mrb[50].mxu1 }
0x1d73   : > { %v2613_v47 = vpop.f32.mrb[51].mxu1 }
0x1d74   : > { %v1624_v63 = vpop.permute.xlu1 %1623 }
0x1d75   : > { %v1626_v3 = vadd.f32 %v1624_v63, %v1616_v62 }
0x1d77   : > { %2742 = vtanh.f32 %v1626_v3 }
0x1d81   : > { %v2743_v5 = vpop.eup %2742 }
0x1d82   : > { %1629 = vrot.lane.b32.xlu0 %v2743_v5, %s2792_s13 }
0x1df4   : > { %v1630_v7 = vpop.permute.xlu0 %1629 }
0x1df5   : > { %v3178_v8 = vmul.f32 %v2741_v59, %v1630_v7  ;;  %v1895_v7 = vld [vmem:[%s1894_s27] sm:$0x1]  ;;  %s2020_s27 = scalar_lea.vmem %s3346_s0, %s3250_s25 }
0x1df6   : > { %2623 = vmatmul.mubr.msk.bf16.vlgmr.msra.gmra.mrb[52].mxu1 %vm249_vm1, %v1895_v7 }
0x1df7   : > { %v1644_v10 = vpack.c.bf16 %v3178_v8, %v3178_v8  ;;  %2633 = vmatpush3.bf16.msra.mxu1 %v2777_v36  ;;  %2634 = vmatprep.mubr.msk.bf16.mxu1 %vm2788_vm0, %v2787_v0  ;;  %v2021_v36 = vld [vmem:[%s2020_s27] sm:$0x1] }
0x1df9   : > { %1646 = vrot.lane.b32.xlu1 %v1644_v10, %s2793_s14 }
0x1dfe   : > { %2635 = vmatmul.mubr.msk.bf16.vlgmr.msra.gmra.mrb[56].mxu1 %vm249_vm1, %v2021_v36 }
0x1e6b   : > { %v1647_v16 = vpop.permute.xlu1 %1646 }
0x1e6c   : > { %2593 = vmatmul.mubr.msk.bf16.vlgmr.msra.gmra.mrb[44].mxu0 %vm249_vm1, %v1647_v16 }
0x1e6d   : > { %2603 = vmatpush3.bf16.msra.mxu0 %v3185_v17  ;;  %2604 = vmatprep.mubr.msk.bf16.mxu0 %vm2788_vm0, %v2787_v0 }
0x1e6e   : > { %2614 = vmatprep.subr.bf16.mxu0 %v2787_v0 }
0x1ec9   : > { %v1980_v2 = vpop.f32.mrb[52].mxu1 }
0x1eca   : > { %v2624_v16 = vpop.f32.mrb[53].mxu1 }
0x1f3f   : > { %v1685_v18 = vpop.f32.mrb[44].mxu0 }
0x1f40   : > { %v1729_v19 = vadd.f32 %v1728_v12, %v1685_v18  ;;  %v2594_v20 = vpop.f32.mrb[45].mxu0  ;;  %v1983_v18 = vpop.f32.mrb[54].mxu1 }
0x1f41   : > { %v1688_v22 = vpop.f32.mrb[46].mxu0 }
0x1f42   : > { %v1734_v23 = vadd.f32 %v2885_v6, %v1729_v19  ;;  %v2595_v24 = vpop.f32.mrb[47].mxu0  ;;  %v2625_v19 = vpop.f32.mrb[55].mxu1 }
0x1f43   : > { %v2106_v45 = vpop.f32.mrb[56].mxu1 }
0x1f44   : > { %2744 = vtanh.f32 %v1734_v23  ;;  %v2380_v26 = vmul.f32 -1.442695, %v1734_v23  ;;  %v2636_v46 = vpop.f32.mrb[57].mxu1 }
0x1f45   : > { %v2109_v47 = vpop.f32.mrb[58].mxu1 }
0x1f46   : > { %2746 = vpow2.f32 %v2380_v26 }
0x1f4e   : > { %v2745_v25 = vpop.eup %2744 }
0x1f4f   : > { %1744 = vrot.lane.b32.xlu0 %v2745_v25, %s2790_s6 }
0x1f50   : > { %v2747_v27 = vpop.eup %2746 }
0x1f51   : > { %v1738_v28 = vadd.f32 1.0, %v2747_v27 }
0x1f53   : > { %2748 = vrcp.f32 %v1738_v28 }
0x1f5d   : > { %v2749_v30 = vpop.eup %2748 }
0x1f5e   : > { %v1742_v33 = vmul.f32 %v2749_v30, %v1626_v3 }
0x1fc1   : > { %v1745_v31 = vpop.permute.xlu0 %1744 }
0x1fc2   : > { %v1747_v32 = vmul.f32 %v2749_v30, %v1745_v31 }
0x1fc4   : > { %1749 = vrot.lane.b32.xlu1 %v1747_v32, %s2791_s7 }
0x2036   : > { %v1750_v6 = vpop.permute.xlu1 %1749 }
0x2037   : > { %v1752_v34 = vadd.f32 %v1750_v6, %v1742_v33 }
0x2039   : > { %2750 = vtanh.f32 %v1752_v34 }
0x2043   : > { %v2751_v37 = vpop.eup %2750 }
0x2044   : > { %1755 = vrot.lane.b32.xlu0 %v2751_v37, %s2792_s13 }
0x20b6   : > { %v1756_v38 = vpop.permute.xlu0 %1755 }
0x20b7   : > { %v3208_v41 = vmul.f32 %v2749_v30, %v1756_v38 }
0x20b9   : > { %v1770_v42 = vpack.c.bf16 %v3208_v41, %v3208_v41 }
0x20bb   : > { %1772 = vrot.lane.b32.xlu1 %v1770_v42, %s2793_s14 }
0x212d   : > { %v1773_v49 = vpop.permute.xlu1 %1772 }
0x212e   : > { %2605 = vmatmul.mubr.msk.bf16.vlgmr.msra.gmra.mrb[48].mxu0 %vm249_vm1, %v1773_v49  ;;  %v2637_v49 = vpop.f32.mrb[59].mxu1 }
0x212f   : > { %2615 = vmatpush3.bf16.msra.mxu0 %v3185_v17  ;;  %2616 = vmatprep.mubr.msk.bf16.mxu0 %vm2788_vm0, %v2787_v0 }
0x2130   : > { %2626 = vmatprep.subr.bf16.mxu0 %v2787_v0 }
0x2201   : > { %v1811_v50 = vpop.f32.mrb[48].mxu0 }
0x2202   : > { %v1855_v51 = vadd.f32 %v1854_v44, %v1811_v50  ;;  %v2606_v52 = vpop.f32.mrb[49].mxu0 }
0x2203   : > { %v1814_v53 = vpop.f32.mrb[50].mxu0 }
0x2204   : > { %v1860_v56 = vadd.f32 %v3219_v54, %v1855_v51  ;;  %v2607_v57 = vpop.f32.mrb[51].mxu0 }
0x2206   : > { %2752 = vtanh.f32 %v1860_v56  ;;  %v2384_v58 = vmul.f32 -1.442695, %v1860_v56 }
0x2208   : > { %2754 = vpow2.f32 %v2384_v58 }
0x2210   : > { %v2753_v1 = vpop.eup %2752 }
0x2211   : > { %1870 = vrot.lane.b32.xlu0 %v2753_v1, %s2790_s6 }
0x2212   : > { %v2755_v59 = vpop.eup %2754 }
0x2213   : > { %v1864_v60 = vadd.f32 1.0, %v2755_v59 }
0x2215   : > { %2756 = vrcp.f32 %v1864_v60 }
0x221f   : > { %v2757_v61 = vpop.eup %2756 }
0x2220   : > { %v1868_v3 = vmul.f32 %v2757_v61, %v1752_v34 }
0x2283   : > { %v1871_v62 = vpop.permute.xlu0 %1870 }
0x2284   : > { %v1873_v63 = vmul.f32 %v2757_v61, %v1871_v62 }
0x2286   : > { %1875 = vrot.lane.b32.xlu1 %v1873_v63, %s2791_s7 }
0x22f8   : > { %v1876_v4 = vpop.permute.xlu1 %1875 }
0x22f9   : > { %v1878_v5 = vadd.f32 %v1876_v4, %v1868_v3 }
0x22fb   : > { %2758 = vtanh.f32 %v1878_v5 }
0x2305   : > { %v2759_v10 = vpop.eup %2758 }
0x2306   : > { %1881 = vrot.lane.b32.xlu0 %v2759_v10, %s2792_s13 }
0x2378   : > { %v1882_v12 = vpop.permute.xlu0 %1881 }
0x2379   : > { %v3236_v13 = vmul.f32 %v2757_v61, %v1882_v12 }
0x237b   : > { %v1896_v14 = vpack.c.bf16 %v3236_v13, %v3236_v13 }
0x237d   : > { %1898 = vrot.lane.b32.xlu1 %v1896_v14, %s2793_s14 }
0x23ef   : > { %v1899_v20 = vpop.permute.xlu1 %1898 }
0x23f0   : > { %2617 = vmatmul.mubr.msk.bf16.vlgmr.msra.gmra.mrb[52].mxu0 %vm249_vm1, %v1899_v20 }
0x23f1   : > { %2627 = vmatpush3.bf16.msra.mxu0 %v3185_v17  ;;  %2628 = vmatprep.mubr.msk.bf16.mxu0 %vm2788_vm0, %v2787_v0 }
0x24c3   : > { %v1937_v22 = vpop.f32.mrb[52].mxu0 }
0x24c4   : > { %v1981_v23 = vadd.f32 %v1980_v2, %v1937_v22  ;;  %v2618_v24 = vpop.f32.mrb[53].mxu0 }
0x24c5   : > { %v1940_v25 = vpop.f32.mrb[54].mxu0 }
0x24c6   : > { %v1986_v26 = vadd.f32 %v3219_v54, %v1981_v23  ;;  %v2619_v27 = vpop.f32.mrb[55].mxu0 }
0x24c8   : > { %2760 = vtanh.f32 %v1986_v26  ;;  %v2388_v30 = vmul.f32 -1.442695, %v1986_v26 }
0x24ca   : > { %2762 = vpow2.f32 %v2388_v30 }
0x24d2   : > { %v2761_v28 = vpop.eup %2760 }
0x24d3   : > { %1996 = vrot.lane.b32.xlu0 %v2761_v28, %s2790_s6 }
0x24d4   : > { %v2763_v31 = vpop.eup %2762 }
0x24d5   : > { %v1990_v17 = vadd.f32 1.0, %v2763_v31 }
0x24d7   : > { %2764 = vrcp.f32 %v1990_v17 }
0x24e1   : > { %v2765_v32 = vpop.eup %2764 }
0x24e2   : > { %v1994_v6 = vmul.f32 %v2765_v32, %v1878_v5 }
0x2545   : > { %v1997_v0 = vpop.permute.xlu0 %1996 }
0x2546   : > { %v1999_v33 = vmul.f32 %v2765_v32, %v1997_v0 }
0x2548   : > { %2001 = vrot.lane.b32.xlu1 %v1999_v33, %s2791_s7 }
0x25ba   : > { %v2002_v34 = vpop.permute.xlu1 %2001 }
0x25bb   : > { %v2004_v35 = vadd.f32 %v2002_v34, %v1994_v6 }
0x25bd   : > { %2766 = vtanh.f32 %v2004_v35 }
0x25c7   : > { %v2767_v37 = vpop.eup %2766 }
0x25c8   : > { %2007 = vrot.lane.b32.xlu0 %v2767_v37, %s2792_s13 }
0x263a   : > { %v2008_v38 = vpop.permute.xlu0 %2007 }
0x263b   : > { %v2010_v42 = vmul.f32 %v2765_v32, %v2008_v38 }
0x263d   : > { %v2022_v44 = vpack.c.bf16 %v2010_v42, %v2010_v42 }
0x263f   : > { %2024 = vrot.lane.b32.xlu1 %v2022_v44, %s2793_s14 }
0x26b1   : > { %v2025_v50 = vpop.permute.xlu1 %2024 }
0x26b2   : > { %2629 = vmatmul.mubr.msk.bf16.vlgmr.msra.gmra.mrb[56].mxu0 %vm249_vm1, %v2025_v50 }
0x2785   : > { %v2063_v51 = vpop.f32.mrb[56].mxu0 }
0x2786   : > { %v2107_v52 = vadd.f32 %v2106_v45, %v2063_v51  ;;  %v2630_v53 = vpop.f32.mrb[57].mxu0 }
0x2787   : > { %v2066_v56 = vpop.f32.mrb[58].mxu0 }
0x2788   : > { %v2112_v57 = vadd.f32 %v3219_v54, %v2107_v52  ;;  %v2631_v1 = vpop.f32.mrb[59].mxu0 }
0x278a   : > { %2768 = vtanh.f32 %v2112_v57  ;;  %v2392_v59 = vmul.f32 -1.442695, %v2112_v57 }
0x278c   : > { %2770 = vpow2.f32 %v2392_v59 }
0x2794   : > { %v2769_v58 = vpop.eup %2768 }
0x2795   : > { %2122 = vrot.lane.b32.xlu0 %v2769_v58, %s2790_s6  ;;  %s2638_s6 = smul.u32 30, %s2834_s17  ;;  %s2338_s17 = sshll.u32 %s2896_s9, 1 }
0x2796   : > { %v2771_v60 = vpop.eup %2770 }
0x2797   : > { %v2116_v61 = vadd.f32 1.0, %v2771_v60  ;;  %s3281_s28 = scalar_lea.vmem %s3350_s4, %s2638_s6  ;;  %s2347_s6 = sshll.u32 %s2950_s26, 1 }
0x2798   : > { %s378_s23 = scalar_lea.vmem %s3281_s28, %s2334_s22  ;;  %s630_s27 = scalar_lea.vmem %s3281_s28, %s2343_s18 }
0x2799   : > { %2772 = vrcp.f32 %v2116_v61  ;;  %s756_s8 = scalar_lea.vmem %s3281_s28, %s2347_s6  ;;  %s2360_s22 = sshll.u32 %s3031_s29, 1 }
0x279a   : > { %s1134_s26 = scalar_lea.vmem %s3281_s28, %s2360_s22  ;;  %s2377_s18 = sshll.u32 %s3139_s16, 1 }
0x279b   : > { %s2389_s16 = sshll.u32 %s3226_s5, 1 }
0x27a3   : > { %v2773_v62 = vpop.eup %2772 }
0x2807   : > { %v2123_v63 = vpop.permute.xlu0 %2122 }
0x2808   : > { %v2125_v3 = vmul.f32 %v2773_v62, %v2123_v63 }
0x280a   : > { %2127 = vrot.lane.b32.xlu1 %v2125_v3, %s2791_s7  ;;  %s2352_s7 = sshll.u32 %s2977_s10, 1  ;;  %s2364_s10 = sshll.u32 %s3058_s20, 1 }
0x280b   : > { %s882_s9 = scalar_lea.vmem %s3281_s28, %s2352_s7  ;;  %s1260_s21 = scalar_lea.vmem %s3281_s28, %s2364_s10 }
0x280c   : > { %s2016_s7 = scalar_lea.vmem %s3281_s28, %s2389_s16 }
0x280e   : > { %374 = vrot.lane.b32.xlu1 %v2908_v29, %s2793_s14  ;;  %v2120_v29 = vmul.f32 %v2773_v62, %v2004_v35 }
0x2812   : > { %626 = vrot.lane.b32.xlu1 %v2962_v21, %s2793_s14 }
0x2816   : > { %878 = vrot.lane.b32.xlu1 %v3016_v15, %s2793_s14 }
0x281a   : > { %1130 = vrot.lane.b32.xlu1 %v3070_v11, %s2793_s14 }
0x281e   : > { %1382 = vrot.lane.b32.xlu1 %v3124_v9, %s2793_s14 }
0x2822   : > { %1634 = vrot.lane.b32.xlu1 %v3178_v8, %s2793_s14 }
0x2826   : > { %1886 = vrot.lane.b32.xlu1 %v3236_v13, %s2793_s14 }
0x287c   : > { %v2128_v21 = vpop.permute.xlu1 %2127 }
0x287d   : > { %v2130_v15 = vadd.f32 %v2128_v21, %v2120_v29 }
0x287f   : > { %2774 = vtanh.f32 %v2130_v15 }
0x2880   : > { %v375_v11 = vpop.permute.xlu1 %374 }
0x2881   : > { %380 = vst.msk [vmem:[%s378_s23] sm:$0x3] %vm379_vm2, %v375_v11  ;;  %s2369_s23 = sshll.u32 %s3085_s30, 1  ;;  %s1638_s30 = scalar_lea.vmem %s3281_s28, %s2377_s18 }
0x2882   : > { %s1386_s29 = scalar_lea.vmem %s3281_s28, %s2369_s23 }
0x2889   : > { %v2775_v9 = vpop.eup %2774 }
0x288a   : > { %2133 = vrot.lane.b32.xlu0 %v2775_v9, %s2792_s13  ;;  %s504_s13 = scalar_lea.vmem %s3281_s28, %s2338_s17  ;;  %s2373_s17 = sshll.u32 %s3112_s24, 1 }
0x288b   : > { %s1512_s20 = scalar_lea.vmem %s3281_s28, %s2373_s17 }
0x288e   : > { %500 = vrot.lane.b32.xlu0 %v2935_v55, %s2793_s14  ;;  %v627_v55 = vpop.permute.xlu1 %626 }
0x2892   : > { %752 = vrot.lane.b32.xlu0 %v2989_v48, %s2793_s14 }
0x2896   : > { %1004 = vrot.lane.b32.xlu0 %v3043_v43, %s2793_s14  ;;  %v879_v43 = vpop.permute.xlu1 %878 }
0x289a   : > { %1256 = vrot.lane.b32.xlu0 %v3097_v40, %s2793_s14 }
0x289e   : > { %1508 = vrot.lane.b32.xlu0 %v3151_v39, %s2793_s14  ;;  %v1131_v39 = vpop.permute.xlu1 %1130 }
0x28a2   : > { %1760 = vrot.lane.b32.xlu0 %v3208_v41, %s2793_s14  ;;  %v1383_v4 = vpop.permute.xlu1 %1382 }
0x28a6   : > { %2012 = vrot.lane.b32.xlu0 %v2010_v42, %s2793_s14  ;;  %v1635_v7 = vpop.permute.xlu1 %1634 }
0x28aa   : > { %v1887_v13 = vpop.permute.xlu1 %1886 }
0x28fc   : > { %v2134_v48 = vpop.permute.xlu0 %2133 }
0x28fd   : > { %v2136_v8 = vmul.f32 %v2773_v62, %v2134_v48 }
0x28ff   : > { %2138 = vrot.lane.b32.xlu1 %v2136_v8, %s2793_s14  ;;  %s1008_s14 = scalar_lea.vmem %s3281_s28, %s2356_s19 }
0x2900   : > { %v501_v40 = vpop.permute.xlu0 %500 }
0x2901   : > { %505 = vst.msk [vmem:[%s504_s13] sm:$0x3] %vm379_vm2, %v501_v40  ;;  %s2381_s13 = sshll.u32 %s3166_s12, 1  ;;  %s2393_s12 = sshll.u32 %s3250_s25, 1 }
0x2902   : > { %631 = vst.msk [vmem:[%s630_s27] sm:$0x3] %vm379_vm2, %v627_v55  ;;  %s2385_s27 = sshll.u32 %s3196_s11, 1  ;;  %s1764_s6 = scalar_lea.vmem %s3281_s28, %s2381_s13 }
0x2903   : > { %s1890_s24 = scalar_lea.vmem %s3281_s28, %s2385_s27  ;;  %s2142_s11 = scalar_lea.vmem %s3281_s28, %s2393_s12 }
0x2904   : > { %v753_v41 = vpop.permute.xlu0 %752 }
0x2905   : > { %757 = vst.msk [vmem:[%s756_s8] sm:$0x3] %vm379_vm2, %v753_v41 }
0x2906   : > { %883 = vst.msk [vmem:[%s882_s9] sm:$0x3] %vm379_vm2, %v879_v43 }
0x2908   : > { %v1005_v54 = vpop.permute.xlu0 %1004 }
0x2909   : > { %1009 = vst.msk [vmem:[%s1008_s14] sm:$0x3] %vm379_vm2, %v1005_v54 }
0x290a   : > { %1135 = vst.msk [vmem:[%s1134_s26] sm:$0x3] %vm379_vm2, %v1131_v39 }
0x290c   : > { %v1257_v5 = vpop.permute.xlu0 %1256 }
0x290d   : > { %1261 = vst.msk [vmem:[%s1260_s21] sm:$0x3] %vm379_vm2, %v1257_v5 }
0x290e   : > { %1387 = vst.msk [vmem:[%s1386_s29] sm:$0x3] %vm379_vm2, %v1383_v4 }
0x2910   : > { %v1509_v10 = vpop.permute.xlu0 %1508 }
0x2911   : > { %1513 = vst.msk [vmem:[%s1512_s20] sm:$0x3] %vm379_vm2, %v1509_v10 }
0x2912   : > { %1639 = vst.msk [vmem:[%s1638_s30] sm:$0x3] %vm379_vm2, %v1635_v7 }
0x2914   : > { %v1761_v12 = vpop.permute.xlu0 %1760 }
0x2915   : > { %1765 = vst.msk [vmem:[%s1764_s6] sm:$0x3] %vm379_vm2, %v1761_v12 }
0x2916   : > { %1891 = vst.msk [vmem:[%s1890_s24] sm:$0x3] %vm379_vm2, %v1887_v13 }
0x2918   : > { %v2013_v14 = vpop.permute.xlu0 %2012 }
0x2919   : > { %2017 = vst.msk [vmem:[%s2016_s7] sm:$0x3] %vm379_vm2, %v2013_v14 }
0x2971   : > { %v2139_v2 = vpop.permute.xlu1 %2138 }
0x2972   : > { %2143 = vst.msk [vmem:[%s2142_s11] sm:$0x3] %vm379_vm2, %v2139_v2 }
0x2973 PF: > { %s14_s15 = sadd.s32 1, %s2785_s15  }
0x2974   : > { %p11_p5 = scmp.ge.s32.totalorder %s14_s15, 4  }
0x2976   :  { %13 = sbr.rel (!%p11_p5) target bundleno = 1 (0x1), region = 102 }

// kernel: _lambda_.16
= control target key start
LH: loop header
LB: loop body
LE: loop exit
PB: predicated region body
PF: predicated region fallthrough
CT: control target
= control target key end

     0   :  { %vm50_vm0 = vcmask 130048   ;;  %s289_s2 = inlined_call_operand.vmem [shape: bf16[16,16], index: 2, kind: input, shape index: {}]   ;;  %s290_s0 = inlined_call_operand.vmem [shape: f32[30,16], index: 0, kind: input, shape index: {}]   ;;  %s291_s1 = inlined_call_operand.vmem [shape: f32[30,16], index: 1, kind: input, shape index: {}]   ;;  %s292_s3 = inlined_call_operand.vmem [shape: bf16[16,128], index: 3, kind: input, shape index: {}]   ;;  %s293_s4 = inlined_call_operand.vmem [shape: f32[1,16], index: 4, kind: input, shape index: {}]   ;;  %s294_s5 = inlined_call_operand.vmem [shape: f32[30,128], index: 5, kind: output, shape index: {}]  }
   0x1   :  { %v208_v0 = vld [vmem:[%s289_s2] sm:$0xff]   ;;  %v22_v2 = vld [vmem:[%s290_s0 + $0x8] sm:$0xff]  ;;  %v23_v6 = vld [vmem:[%s290_s0 + $0x10] sm:$0xff] }
   0x2   :  { %v21_v1 = vld [vmem:[%s290_s0] sm:$0xff]  ;;  %196 = vmatprep.subr.bf16.mxu0 %v208_v0  ;;  %v26_v4 = vld [vmem:[%s291_s1 + $0x8] sm:$0xff]  ;;  %v24_v7 = vld [vmem:[%s290_s0 + $0x18] sm:$0x3f] }
   0x3   :  { %v25_v3 = vld [vmem:[%s291_s1] sm:$0xff]  ;;  %197 = vmatpush3.bf16.msra.mxu0 %v208_v0  ;;  %v30_v8 = vadd.f32 %v26_v4, %v22_v2  ;;  %v27_v9 = vld [vmem:[%s291_s1 + $0x10] sm:$0xff]  ;;  %v28_v10 = vld [vmem:[%s291_s1 + $0x18] sm:$0x3f] }
   0x4   :  { %v29_v5 = vadd.f32 %v25_v3, %v21_v1  ;;  %v31_v11 = vadd.f32 %v27_v9, %v23_v6  ;;  %v32_v12 = vadd.f32 %v28_v10, %v24_v7  ;;  %v209_v15 = vld [vmem:[%s292_s3] sm:$0xff]  }
   0x5   :  { %202 = vmatprep.subr.bf16.mxu1 %v209_v15  ;;  %v183_v16 = vld [vmem:[%s293_s4] ss:$0 sm:$0xff] }
   0x6   :  { %v33_v13 = vpack.c.bf16 %v30_v8, %v29_v5  ;;  %v34_v14 = vpack.c.bf16 %v32_v12, %v31_v11  ;;  %203 = vmatpush3.bf16.msra.mxu1 %v209_v15 }
   0x8   :  { %198 = vmatprep.mubr.msk.bf16.mxu0 %vm50_vm0, %v33_v13 }
   0x9   :  { %199 = vmatmul.mubr.msk.bf16.vlgmr.msra.gmra.mrb[0].mxu0 %vm50_vm0, %v34_v14 }
  0xdc   :  { %v200_v17 = vpop.f32.mrb[0].mxu0 }
  0xdd   :  { %v100_v18 = vadd.f32 %v200_v17, %v183_v16  ;;  %v91_v19 = vpop.f32.mrb[1].mxu0 }
  0xde   :  { %v92_v20 = vadd.f32 %v183_v16, %v91_v19  ;;  %v201_v21 = vpop.f32.mrb[2].mxu0 }
  0xdf   :  { %v103_v22 = vadd.f32 %v201_v21, %v183_v16  ;;  %v94_v23 = vpop.f32.mrb[3].mxu0  ;;  %v108_v25 = vmax.f32 %v100_v18, 0.0 }
  0xe0   :  { %v95_v24 = vadd.f32 %v183_v16, %v94_v23  ;;  %v106_v27 = vmax.f32 %v92_v20, 0.0 }
  0xe1   :  { %v109_v26 = vmax.f32 %v103_v22, 0.0 }
  0xe2   :  { %v107_v28 = vmax.f32 %v95_v24, 0.0 }
  0xe3   :  { %v111_v29 = vpack.c.bf16 %v109_v26, %v108_v25 }
  0xe4   :  { %v110_v30 = vpack.c.bf16 %v107_v28, %v106_v27 }
  0xe6   :  { %204 = vmatprep.mubr.msk.bf16.mxu1 %vm50_vm0, %v110_v30 }
  0xe7   :  { %205 = vmatmul.mubr.msk.bf16.vlgmr.msra.gmra.mrb[0].mxu1 %vm50_vm0, %v111_v29 }
 0x1ba   :  { %v206_v31 = vpop.f32.mrb[0].mxu1 }
 0x1bb   :  { %177 = vst [vmem:[%s294_s5 + $0x10] sm:$0xff] %v206_v31  ;;  %v160_v32 = vpop.f32.mrb[1].mxu1 }
 0x1bc   :  { %175 = vst [vmem:[%s294_s5] sm:$0xff] %v160_v32  ;;  %v207_v33 = vpop.f32.mrb[2].mxu1 }
 0x1bd   :  { %178 = vst [vmem:[%s294_s5 + $0x18] sm:$0x3f] %v207_v33  ;;  %v163_v34 = vpop.f32.mrb[3].mxu1 }
 0x1be   :  { %176 = vst [vmem:[%s294_s5 + $0x8] sm:$0xff] %v163_v34 }

// kernel: _lambda_.14
= control target key start
LH: loop header
LB: loop body
LE: loop exit
PB: predicated region body
PF: predicated region fallthrough
CT: control target
= control target key end

     0   :  { %s2876_s15 = smov 0   ;;  %s3444_s0 = inlined_call_operand.vmem [shape: bf16[15,2,32], index: 0, kind: input, shape index: {}]   ;;  %s3445_s1 = inlined_call_operand.vmem [shape: bf16[2,32,64], index: 1, kind: input, shape index: {}]   ;;  %s3446_s2 = inlined_call_operand.vmem [shape: bf16[2,16,64], index: 2, kind: input, shape index: {}]   ;;  %s3447_s3 = inlined_call_operand.vmem [shape: f32[2,1,64], index: 3, kind: input, shape index: {}]   ;;  %s3448_s4 = inlined_call_operand.vmem [shape: f32[2,15,2,16], index: 4, kind: output, shape index: {}]  }
   0x1 LB: > { %s2882_s16 = sadd.s32 4294967295, %s2842_s15   ;;  %p2332_p0 = scmp.ge.s32.totalorder %s2842_s15, 1  ;;  %s2842_s15 = sphi %s2876_s15, %s14_s15  }
   0x2   : > { %p180_p1 = scmp.lt.s32.totalorder %s2842_s15, 3 }
   0x4   : > { %p181_p2 = pnand %p2332_p0, %p180_p1 }
   0x5   : > { %p214_p3 = scmp.lt.s32.totalorder (!%p181_p2), %s2882_s16, 1  ;;  %p240_p4 = scmp.eq.s32.totalorder (!%p181_p2), %s2882_s16, 0  ;;  %v2844_v0 = vmov (!%p181_p2), 0.0   ;;  %vm2845_vm0 = vmmov (!%p181_p2), 0   ;;  %v2846_v4 = vmov (!%p181_p2), 0   ;;  %vm307_vm1 = vcmask (!%p181_p2), 261120  }
   0x6   : > { %184 = sbr.rel (%p181_p2) target bundleno = 10614 (0x2976), region = 36  ;;  %2489 = vmatprep.subr.bf16.mxu1 (!%p181_p2), %v2844_v0  ;;  %2483 = vmatprep.subr.bf16.mxu0 (!%p181_p2), %v2844_v0  ;;  %s2847_s7 = smov (!%p181_p2), 96   ;;  %vm251_vm2 = vcmask (!%p181_p2), 130048   ;;  %vm388_vm3 = vcmask (!%p181_p2), 123904  }
   0x7   : > { %2485 = vmatprep.mubr.msk.bf16.mxu0 (!%p181_p2), %vm2845_vm0, %v2844_v0  ;;  %2493 = vmatprep.mubr.msk.bf16.mxu1 (!%p181_p2), %vm2845_vm0, %v2844_v0  ;;  %s2848_s8 = smov (!%p181_p2), 16   ;;  %s2849_s14 = smov (!%p181_p2), 32  }
   0xd   : > { %s2891_s17 = scalar_select %p214_p3, %s2882_s16, 1 }
   0xe   : > { %s2899_s18 = scalar_select %p240_p4, 0, 14 }
   0xf   : > { %s2406_s19 = sshll.u32 %s2891_s17, 4  ;;  %s2407_s20 = sshll.u32 %s2891_s17, 3 }
  0x10   : > { %s2906_s23 = scalar_lea.vmem %s3445_s1, %s2406_s19  ;;  %s2911_s26 = scalar_lea.vmem %s3446_s2, %s2407_s20 }
  0x11   : > { %v2914_v1 = vld [vmem:[%s2906_s23] sm:$0xff]   ;;  %v2921_v3 = vld [vmem:[%s2906_s23 + $0x8] sm:$0xff]   ;;  %s243_s29 = scalar_lea.vmem %s3444_s0, %s2899_s18  ;;  %s2947_s6 = scalar_lea.vmem %s3447_s3, %s2891_s17 }
  0x12   : > { %v2917_v2 = vld [vmem:[%s2911_s26] sm:$0xff]   ;;  %2490 = vmatpush3.bf16.msra.mxu1 %v2914_v1  ;;  %s2957_s9 = scalar_select %p240_p4, 1, 4294967295 }
  0x13   : > { %2484 = vmatpush3.bf16.msra.mxu0 %v2917_v2  ;;  %2491 = vmatprep.subr.bf16.mxu1 %v2844_v0  ;;  %v244_v5 = vld [vmem:[%s243_s29] sm:$0x1]  ;;  %s2850_s16 = smov 80  }
  0x14   : > { %2497 = vmatprep.subr.bf16.mxu0 %v2844_v0  ;;  %v2950_v10 = vld [vmem:[%s2947_s6] ss:$0 sm:$0xff]  ;;  %s2961_s10 = sadd.s32 %s2957_s9, %s2899_s18  ;;  %s2349_s19 = sshll.u32 %s2957_s9, 1 }
  0x15   : > { %s391_s13 = scalar_lea.vmem %s3444_s0, %s2961_s10  ;;  %s2990_s20 = sadd.s32 %s2349_s19, %s2899_s18 }
  0x16   : > { %2486 = vmatmul.mubr.bf16.vlgmr.msra.gmra.mrb[0].mxu0 %v2846_v4  ;;  %2492 = vmatpush3.bf16.msra.mxu1 %v2921_v3  ;;  %v392_v27 = vld [vmem:[%s391_s13] sm:$0x1]  ;;  %s517_s24 = scalar_lea.vmem %s3444_s0, %s2990_s20  ;;  %s641_s25 = smul.u32 3, %s2957_s9 }
  0x17   : > { %2503 = vmatprep.subr.bf16.mxu1 %v2844_v0  ;;  %2498 = vmatpush3.bf16.msra.mxu0 %v2917_v2  ;;  %v518_v53 = vld [vmem:[%s517_s24] sm:$0x1]  ;;  %s2358_s5 = sshll.u32 %s2957_s9, 2  ;;  %s893_s21 = smul.u32 5, %s2957_s9 }
  0x18   : > { %2499 = vmatprep.mubr.msk.bf16.mxu0 %vm2845_vm0, %v2844_v0  ;;  %2511 = vmatprep.subr.bf16.mxu0 %v2844_v0  ;;  %s3019_s27 = sadd.s32 %s641_s25, %s2899_s18  ;;  %s3048_s11 = sadd.s32 %s2358_s5, %s2899_s18 }
  0x19   : > { %2494 = vmatmul.mubr.msk.bf16.vlgmr.msra.gmra.mrb[0].mxu1 %vm307_vm1, %v244_v5  ;;  %s643_s30 = scalar_lea.vmem %s3444_s0, %s3019_s27  ;;  %s769_s19 = scalar_lea.vmem %s3444_s0, %s3048_s11 }
  0x1a   : > { %2504 = vmatpush3.bf16.msra.mxu1 %v2914_v1  ;;  %2507 = vmatprep.mubr.msk.bf16.mxu1 %vm2845_vm0, %v2844_v0  ;;  %s3077_s22 = sadd.s32 %s893_s21, %s2899_s18  ;;  %s1019_s29 = smul.u32 6, %s2957_s9 }
  0x1b   : > { %2505 = vmatprep.subr.bf16.mxu1 %v2844_v0  ;;  %s895_s28 = scalar_lea.vmem %s3444_s0, %s3077_s22  ;;  %s1397_s24 = smul.u32 9, %s2957_s9 }
  0x1d   : > { %s3193_s25 = sadd.s32 %s1397_s24, %s2899_s18 }
  0x1e   : > { %2506 = vmatpush3.bf16.msra.mxu1 %v2921_v3  ;;  %s1399_s12 = scalar_lea.vmem %s3444_s0, %s3193_s25 }
  0x1f   : > { %2517 = vmatprep.subr.bf16.mxu1 %v2844_v0 }
  0x21   : > { %2508 = vmatmul.mubr.msk.bf16.vlgmr.msra.gmra.mrb[4].mxu1 %vm307_vm1, %v392_v27 }
  0x22   : > { %2518 = vmatpush3.bf16.msra.mxu1 %v2914_v1  ;;  %2521 = vmatprep.mubr.msk.bf16.mxu1 %vm2845_vm0, %v2844_v0 }
  0x23   : > { %2519 = vmatprep.subr.bf16.mxu1 %v2844_v0 }
  0x26   : > { %2520 = vmatpush3.bf16.msra.mxu1 %v2921_v3 }
  0x27   : > { %2531 = vmatprep.subr.bf16.mxu1 %v2844_v0 }
  0x29   : > { %2522 = vmatmul.mubr.msk.bf16.vlgmr.msra.gmra.mrb[8].mxu1 %vm307_vm1, %v518_v53 }
  0x2a   : > { %2532 = vmatpush3.bf16.msra.mxu1 %v2914_v1  ;;  %2535 = vmatprep.mubr.msk.bf16.mxu1 %vm2845_vm0, %v2844_v0 }
  0x2b   : > { %2533 = vmatprep.subr.bf16.mxu1 %v2844_v0 }
  0x2e   : > { %2534 = vmatpush3.bf16.msra.mxu1 %v2921_v3 }
  0x2f   : > { %2545 = vmatprep.subr.bf16.mxu1 %v2844_v0 }
  0xe9   : > { %v289_v6 = vpop.f32.mrb[0].mxu0 }
  0xea   : > { %v2487_v7 = vpop.f32.mrb[1].mxu0 }
  0xeb   : > { %v292_v8 = vpop.f32.mrb[2].mxu0 }
  0xec   : > { %v2488_v9 = vpop.f32.mrb[3].mxu0  ;;  %v345_v11 = vpop.f32.mrb[0].mxu1 }
  0xed   : > { %v346_v12 = vadd.f32 %v345_v11, %v289_v6  ;;  %v2495_v13 = vpop.f32.mrb[1].mxu1 }
  0xee   : > { %v348_v14 = vpop.f32.mrb[2].mxu1 }
  0xef   : > { %v357_v15 = vadd.f32 %v2950_v10, %v346_v12  ;;  %v2496_v16 = vpop.f32.mrb[3].mxu1 }
  0xf1   : > { %2712 = vtanh.f32 %v357_v15  ;;  %v2343_v18 = vmul.f32 -1.442695, %v357_v15 }
  0xf3   : > { %2714 = vpow2.f32 %v2343_v18 }
  0xf4   : > { %v477_v32 = vpop.f32.mrb[4].mxu1 }
  0xf5   : > { %v2509_v33 = vpop.f32.mrb[5].mxu1 }
  0xf6   : > { %v480_v34 = vpop.f32.mrb[6].mxu1 }
  0xf7   : > { %v2510_v35 = vpop.f32.mrb[7].mxu1 }
  0xfb   : > { %v2713_v17 = vpop.eup %2712 }
  0xfc   : > { %367 = vrot.lane.b32.xlu0 %v2713_v17, %s2847_s7  ;;  %v603_v58 = vpop.f32.mrb[8].mxu1 }
  0xfd   : > { %v2715_v19 = vpop.eup %2714  ;;  %v2523_v59 = vpop.f32.mrb[9].mxu1 }
  0xfe   : > { %v361_v20 = vadd.f32 1.0, %v2715_v19  ;;  %v606_v60 = vpop.f32.mrb[10].mxu1 }
  0xff   : > { %v2524_v61 = vpop.f32.mrb[11].mxu1 }
 0x100   : > { %2716 = vrcp.f32 %v361_v20  ;;  %v644_v20 = vld [vmem:[%s643_s30] sm:$0x1]  ;;  %s3106_s30 = sadd.s32 %s1019_s29, %s2899_s18  ;;  %s2375_s29 = sshll.u32 %s2957_s9, 3 }
 0x101   : > { %2536 = vmatmul.mubr.msk.bf16.vlgmr.msra.gmra.mrb[12].mxu1 %vm307_vm1, %v644_v20  ;;  %s1021_s13 = scalar_lea.vmem %s3444_s0, %s3106_s30  ;;  %s3164_s5 = sadd.s32 %s2375_s29, %s2899_s18 }
 0x102   : > { %2546 = vmatpush3.bf16.msra.mxu1 %v2914_v1  ;;  %2549 = vmatprep.mubr.msk.bf16.mxu1 %vm2845_vm0, %v2844_v0 }
 0x103   : > { %2547 = vmatprep.subr.bf16.mxu1 %v2844_v0 }
 0x106   : > { %2548 = vmatpush3.bf16.msra.mxu1 %v2921_v3 }
 0x107   : > { %2559 = vmatprep.subr.bf16.mxu1 %v2844_v0 }
 0x10a   : > { %v2717_v21 = vpop.eup %2716 }
 0x10b   : > { %v365_v24 = vmul.f32 0.0, %v2717_v21 }
 0x16e   : > { %v368_v22 = vpop.permute.xlu0 %367 }
 0x16f   : > { %v370_v23 = vmul.f32 %v2717_v21, %v368_v22 }
 0x171   : > { %372 = vrot.lane.b32.xlu0 %v370_v23, %s2848_s8 }
 0x1e3   : > { %v373_v25 = vpop.permute.xlu0 %372 }
 0x1e4   : > { %v375_v26 = vadd.f32 %v373_v25, %v365_v24  ;;  %v729_v25 = vpop.f32.mrb[12].mxu1 }
 0x1e6   : > { %2718 = vtanh.f32 %v375_v26 }
 0x1f0   : > { %v2719_v28 = vpop.eup %2718 }
 0x1f1   : > { %378 = vrot.lane.b32.xlu1 %v2719_v28, %s2849_s14 }
 0x263   : > { %v379_v29 = vpop.permute.xlu1 %378 }
 0x264   : > { %v2975_v30 = vmul.f32 %v2717_v21, %v379_v29 }
 0x266   : > { %v393_v31 = vpack.c.bf16 %v2975_v30, %v2975_v30 }
 0x268   : > { %395 = vrot.lane.b32.xlu1 %v393_v31, %s2850_s16 }
 0x2da   : > { %v396_v36 = vpop.permute.xlu1 %395 }
 0x2db   : > { %2500 = vmatmul.mubr.msk.bf16.vlgmr.msra.gmra.mrb[4].mxu0 %vm251_vm2, %v396_v36 }
 0x2dc   : > { %2512 = vmatpush3.bf16.msra.mxu0 %v2917_v2  ;;  %2513 = vmatprep.mubr.msk.bf16.mxu0 %vm2845_vm0, %v2844_v0 }
 0x2dd   : > { %2525 = vmatprep.subr.bf16.mxu0 %v2844_v0 }
 0x3ae   : > { %v434_v37 = vpop.f32.mrb[4].mxu0 }
 0x3af   : > { %v478_v38 = vadd.f32 %v477_v32, %v434_v37  ;;  %v2501_v39 = vpop.f32.mrb[5].mxu0 }
 0x3b0   : > { %v437_v40 = vpop.f32.mrb[6].mxu0 }
 0x3b1   : > { %v483_v41 = vadd.f32 %v2950_v10, %v478_v38  ;;  %v2502_v42 = vpop.f32.mrb[7].mxu0 }
 0x3b3   : > { %2720 = vtanh.f32 %v483_v41  ;;  %v2347_v44 = vmul.f32 -1.442695, %v483_v41 }
 0x3b5   : > { %2722 = vpow2.f32 %v2347_v44 }
 0x3bd   : > { %v2721_v43 = vpop.eup %2720 }
 0x3be   : > { %493 = vrot.lane.b32.xlu0 %v2721_v43, %s2847_s7 }
 0x3bf   : > { %v2723_v45 = vpop.eup %2722 }
 0x3c0   : > { %v487_v46 = vadd.f32 1.0, %v2723_v45 }
 0x3c2   : > { %2724 = vrcp.f32 %v487_v46 }
 0x3cc   : > { %v2725_v47 = vpop.eup %2724 }
 0x3cd   : > { %v491_v50 = vmul.f32 %v2725_v47, %v375_v26  ;;  %v2537_v26 = vpop.f32.mrb[13].mxu1 }
 0x3ce   : > { %v732_v27 = vpop.f32.mrb[14].mxu1 }
 0x3cf   : > { %v2538_v28 = vpop.f32.mrb[15].mxu1 }
 0x430   : > { %v494_v48 = vpop.permute.xlu0 %493 }
 0x431   : > { %v496_v49 = vmul.f32 %v2725_v47, %v494_v48 }
 0x433   : > { %498 = vrot.lane.b32.xlu1 %v496_v49, %s2848_s8 }
 0x4a5   : > { %v499_v51 = vpop.permute.xlu1 %498 }
 0x4a6   : > { %v501_v52 = vadd.f32 %v499_v51, %v491_v50 }
 0x4a8   : > { %2726 = vtanh.f32 %v501_v52 }
 0x4b2   : > { %v2727_v54 = vpop.eup %2726 }
 0x4b3   : > { %504 = vrot.lane.b32.xlu0 %v2727_v54, %s2849_s14 }
 0x525   : > { %v505_v55 = vpop.permute.xlu0 %504 }
 0x526   : > { %v3004_v56 = vmul.f32 %v2725_v47, %v505_v55  ;;  %v770_v47 = vld [vmem:[%s769_s19] sm:$0x1]  ;;  %s1145_s19 = smul.u32 7, %s2957_s9 }
 0x527   : > { %2550 = vmatmul.mubr.msk.bf16.vlgmr.msra.gmra.mrb[16].mxu1 %vm307_vm1, %v770_v47 }
 0x528   : > { %v519_v57 = vpack.c.bf16 %v3004_v56, %v3004_v56  ;;  %2560 = vmatpush3.bf16.msra.mxu1 %v2914_v1  ;;  %2563 = vmatprep.mubr.msk.bf16.mxu1 %vm2845_vm0, %v2844_v0  ;;  %s3135_s21 = sadd.s32 %s1145_s19, %s2899_s18  ;;  %s1273_s19 = scalar_lea.vmem %s3444_s0, %s3164_s5 }
 0x529   : > { %2561 = vmatprep.subr.bf16.mxu1 %v2844_v0 }
 0x52a   : > { %521 = vrot.lane.b32.xlu1 %v519_v57, %s2850_s16 }
 0x52c   : > { %2562 = vmatpush3.bf16.msra.mxu1 %v2921_v3 }
 0x52d   : > { %2573 = vmatprep.subr.bf16.mxu1 %v2844_v0 }
 0x59c   : > { %v522_v62 = vpop.permute.xlu1 %521 }
 0x59d   : > { %2514 = vmatmul.mubr.msk.bf16.vlgmr.msra.gmra.mrb[8].mxu0 %vm251_vm2, %v522_v62 }
 0x59e   : > { %2526 = vmatpush3.bf16.msra.mxu0 %v2917_v2  ;;  %2527 = vmatprep.mubr.msk.bf16.mxu0 %vm2845_vm0, %v2844_v0 }
 0x59f   : > { %2539 = vmatprep.subr.bf16.mxu0 %v2844_v0 }
 0x670   : > { %v560_v63 = vpop.f32.mrb[8].mxu0 }
 0x671   : > { %v604_v4 = vadd.f32 %v603_v58, %v560_v63  ;;  %v2515_v5 = vpop.f32.mrb[9].mxu0 }
 0x672   : > { %v563_v6 = vpop.f32.mrb[10].mxu0 }
 0x673   : > { %v609_v7 = vadd.f32 %v2950_v10, %v604_v4  ;;  %v2516_v8 = vpop.f32.mrb[11].mxu0 }
 0x675   : > { %2728 = vtanh.f32 %v609_v7  ;;  %v2352_v11 = vmul.f32 -1.442695, %v609_v7 }
 0x677   : > { %2730 = vpow2.f32 %v2352_v11 }
 0x67f   : > { %v2729_v9 = vpop.eup %2728 }
 0x680   : > { %619 = vrot.lane.b32.xlu0 %v2729_v9, %s2847_s7 }
 0x681   : > { %v2731_v12 = vpop.eup %2730 }
 0x682   : > { %v613_v13 = vadd.f32 1.0, %v2731_v12 }
 0x684   : > { %2732 = vrcp.f32 %v613_v13 }
 0x68e   : > { %v2733_v14 = vpop.eup %2732 }
 0x68f   : > { %v617_v17 = vmul.f32 %v2733_v14, %v501_v52  ;;  %v855_v52 = vpop.f32.mrb[16].mxu1 }
 0x690   : > { %v2551_v53 = vpop.f32.mrb[17].mxu1 }
 0x691   : > { %v858_v54 = vpop.f32.mrb[18].mxu1 }
 0x692   : > { %v2552_v55 = vpop.f32.mrb[19].mxu1 }
 0x6f2   : > { %v620_v15 = vpop.permute.xlu0 %619 }
 0x6f3   : > { %v622_v16 = vmul.f32 %v2733_v14, %v620_v15  ;;  %v896_v15 = vld [vmem:[%s895_s28] sm:$0x1]  ;;  %s1147_s28 = scalar_lea.vmem %s3444_s0, %s3135_s21 }
 0x6f4   : > { %2564 = vmatmul.mubr.msk.bf16.vlgmr.msra.gmra.mrb[20].mxu1 %vm307_vm1, %v896_v15 }
 0x6f5   : > { %624 = vrot.lane.b32.xlu1 %v622_v16, %s2848_s8  ;;  %2574 = vmatpush3.bf16.msra.mxu1 %v2914_v1 }
 0x6f6   : > { %2577 = vmatprep.mubr.msk.bf16.mxu1 %vm2845_vm0, %v2844_v0  ;;  %2575 = vmatprep.subr.bf16.mxu1 %v2844_v0 }
 0x6f9   : > { %2576 = vmatpush3.bf16.msra.mxu1 %v2921_v3 }
 0x6fa   : > { %2587 = vmatprep.subr.bf16.mxu1 %v2844_v0 }
 0x767   : > { %v625_v18 = vpop.permute.xlu1 %624 }
 0x768   : > { %v627_v19 = vadd.f32 %v625_v18, %v617_v17 }
 0x76a   : > { %2734 = vtanh.f32 %v627_v19 }
 0x774   : > { %v2735_v21 = vpop.eup %2734 }
 0x775   : > { %630 = vrot.lane.b32.xlu0 %v2735_v21, %s2849_s14 }
 0x7c7   : > { %v981_v20 = vpop.f32.mrb[20].mxu1 }
 0x7c8   : > { %v2565_v21 = vpop.f32.mrb[21].mxu1 }
 0x7e7   : > { %v631_v22 = vpop.permute.xlu0 %630 }
 0x7e8   : > { %v3033_v23 = vmul.f32 %v2733_v14, %v631_v22  ;;  %v984_v22 = vpop.f32.mrb[22].mxu1 }
 0x7ea   : > { %v645_v24 = vpack.c.bf16 %v3033_v23, %v3033_v23 }
 0x7ec   : > { %647 = vrot.lane.b32.xlu1 %v645_v24, %s2850_s16  ;;  %v2566_v24 = vpop.f32.mrb[23].mxu1 }
 0x85e   : > { %v648_v29 = vpop.permute.xlu1 %647 }
 0x85f   : > { %2528 = vmatmul.mubr.msk.bf16.vlgmr.msra.gmra.mrb[12].mxu0 %vm251_vm2, %v648_v29 }
 0x860   : > { %2540 = vmatpush3.bf16.msra.mxu0 %v2917_v2  ;;  %2541 = vmatprep.mubr.msk.bf16.mxu0 %vm2845_vm0, %v2844_v0 }
 0x861   : > { %2553 = vmatprep.subr.bf16.mxu0 %v2844_v0 }
 0x932   : > { %v686_v31 = vpop.f32.mrb[12].mxu0 }
 0x933   : > { %v730_v32 = vadd.f32 %v729_v25, %v686_v31  ;;  %v2529_v33 = vpop.f32.mrb[13].mxu0 }
 0x934   : > { %v689_v34 = vpop.f32.mrb[14].mxu0 }
 0x935   : > { %v735_v35 = vadd.f32 %v2950_v10, %v730_v32  ;;  %v2530_v36 = vpop.f32.mrb[15].mxu0 }
 0x937   : > { %2736 = vtanh.f32 %v735_v35  ;;  %v2356_v38 = vmul.f32 -1.442695, %v735_v35 }
 0x939   : > { %2738 = vpow2.f32 %v2356_v38 }
 0x941   : > { %v2737_v37 = vpop.eup %2736 }
 0x942   : > { %745 = vrot.lane.b32.xlu0 %v2737_v37, %s2847_s7 }
 0x943   : > { %v2739_v39 = vpop.eup %2738 }
 0x944   : > { %v739_v40 = vadd.f32 1.0, %v2739_v39 }
 0x946   : > { %2740 = vrcp.f32 %v739_v40 }
 0x950   : > { %v2741_v41 = vpop.eup %2740 }
 0x951   : > { %v743_v44 = vmul.f32 %v2741_v41, %v627_v19 }
 0x9b4   : > { %v746_v42 = vpop.permute.xlu0 %745 }
 0x9b5   : > { %v748_v43 = vmul.f32 %v2741_v41, %v746_v42 }
 0x9b7   : > { %750 = vrot.lane.b32.xlu1 %v748_v43, %s2848_s8  ;;  %v1022_v43 = vld [vmem:[%s1021_s13] sm:$0x1]  ;;  %s1523_s13 = smul.u32 10, %s2957_s9 }
 0x9b8   : > { %2578 = vmatmul.mubr.msk.bf16.vlgmr.msra.gmra.mrb[24].mxu1 %vm307_vm1, %v1022_v43 }
 0x9b9   : > { %2588 = vmatpush3.bf16.msra.mxu1 %v2914_v1  ;;  %2591 = vmatprep.mubr.msk.bf16.mxu1 %vm2845_vm0, %v2844_v0 }
 0x9ba   : > { %2589 = vmatprep.subr.bf16.mxu1 %v2844_v0 }
 0x9bd   : > { %2590 = vmatpush3.bf16.msra.mxu1 %v2921_v3 }
 0x9be   : > { %2601 = vmatprep.subr.bf16.mxu1 %v2844_v0 }
 0xa29   : > { %v751_v45 = vpop.permute.xlu1 %750 }
 0xa2a   : > { %v753_v46 = vadd.f32 %v751_v45, %v743_v44 }
 0xa2c   : > { %2742 = vtanh.f32 %v753_v46 }
 0xa36   : > { %v2743_v48 = vpop.eup %2742 }
 0xa37   : > { %756 = vrot.lane.b32.xlu0 %v2743_v48, %s2849_s14 }
 0xa8b   : > { %v1107_v48 = vpop.f32.mrb[24].mxu1 }
 0xaa9   : > { %v757_v49 = vpop.permute.xlu0 %756 }
 0xaaa   : > { %v3062_v50 = vmul.f32 %v2741_v41, %v757_v49  ;;  %v2579_v49 = vpop.f32.mrb[25].mxu1 }
 0xaac   : > { %v771_v51 = vpack.c.bf16 %v3062_v50, %v3062_v50 }
 0xaae   : > { %773 = vrot.lane.b32.xlu1 %v771_v51, %s2850_s16  ;;  %v1110_v51 = vpop.f32.mrb[26].mxu1 }
 0xb20   : > { %v774_v57 = vpop.permute.xlu1 %773 }
 0xb21   : > { %2542 = vmatmul.mubr.msk.bf16.vlgmr.msra.gmra.mrb[16].mxu0 %vm251_vm2, %v774_v57 }
 0xb22   : > { %2554 = vmatpush3.bf16.msra.mxu0 %v2917_v2  ;;  %2555 = vmatprep.mubr.msk.bf16.mxu0 %vm2845_vm0, %v2844_v0 }
 0xb23   : > { %2567 = vmatprep.subr.bf16.mxu0 %v2844_v0 }
 0xbf4   : > { %v812_v58 = vpop.f32.mrb[16].mxu0 }
 0xbf5   : > { %v856_v59 = vadd.f32 %v855_v52, %v812_v58  ;;  %v2543_v60 = vpop.f32.mrb[17].mxu0  ;;  %v2580_v52 = vpop.f32.mrb[27].mxu1 }
 0xbf6   : > { %v815_v61 = vpop.f32.mrb[18].mxu0 }
 0xbf7   : > { %v861_v62 = vadd.f32 %v2950_v10, %v856_v59  ;;  %v2544_v63 = vpop.f32.mrb[19].mxu0 }
 0xbf9   : > { %2744 = vtanh.f32 %v861_v62  ;;  %v2361_v5 = vmul.f32 -1.442695, %v861_v62 }
 0xbfb   : > { %2746 = vpow2.f32 %v2361_v5 }
 0xc03   : > { %v2745_v4 = vpop.eup %2744 }
 0xc04   : > { %871 = vrot.lane.b32.xlu0 %v2745_v4, %s2847_s7 }
 0xc05   : > { %v2747_v6 = vpop.eup %2746 }
 0xc06   : > { %v865_v7 = vadd.f32 1.0, %v2747_v6 }
 0xc08   : > { %2748 = vrcp.f32 %v865_v7 }
 0xc12   : > { %v2749_v8 = vpop.eup %2748 }
 0xc13   : > { %v869_v12 = vmul.f32 %v2749_v8, %v753_v46 }
 0xc76   : > { %v872_v9 = vpop.permute.xlu0 %871 }
 0xc77   : > { %v874_v11 = vmul.f32 %v2749_v8, %v872_v9 }
 0xc79   : > { %876 = vrot.lane.b32.xlu1 %v874_v11, %s2848_s8 }
 0xceb   : > { %v877_v13 = vpop.permute.xlu1 %876 }
 0xcec   : > { %v879_v14 = vadd.f32 %v877_v13, %v869_v12  ;;  %v1148_v12 = vld [vmem:[%s1147_s28] sm:$0x1]  ;;  %s1901_s28 = smul.u32 13, %s2957_s9 }
 0xced   : > { %2592 = vmatmul.mubr.msk.bf16.vlgmr.msra.gmra.mrb[28].mxu1 %vm307_vm1, %v1148_v12 }
 0xcee   : > { %2750 = vtanh.f32 %v879_v14  ;;  %2602 = vmatpush3.bf16.msra.mxu1 %v2914_v1  ;;  %2605 = vmatprep.mubr.msk.bf16.mxu1 %vm2845_vm0, %v2844_v0 }
 0xcef   : > { %2603 = vmatprep.subr.bf16.mxu1 %v2844_v0 }
 0xcf2   : > { %2604 = vmatpush3.bf16.msra.mxu1 %v2921_v3 }
 0xcf3   : > { %2615 = vmatprep.subr.bf16.mxu1 %v2844_v0 }
 0xcf8   : > { %v2751_v16 = vpop.eup %2750 }
 0xcf9   : > { %882 = vrot.lane.b32.xlu0 %v2751_v16, %s2849_s14 }
 0xd6b   : > { %v883_v17 = vpop.permute.xlu0 %882 }
 0xd6c   : > { %v3091_v18 = vmul.f32 %v2749_v8, %v883_v17 }
 0xd6e   : > { %v897_v19 = vpack.c.bf16 %v3091_v18, %v3091_v18 }
 0xd70   : > { %899 = vrot.lane.b32.xlu1 %v897_v19, %s2850_s16 }
 0xdc0   : > { %v1233_v17 = vpop.f32.mrb[28].mxu1 }
 0xdc1   : > { %v2593_v19 = vpop.f32.mrb[29].mxu1 }
 0xde2   : > { %v900_v25 = vpop.permute.xlu1 %899 }
 0xde3   : > { %2556 = vmatmul.mubr.msk.bf16.vlgmr.msra.gmra.mrb[20].mxu0 %vm251_vm2, %v900_v25 }
 0xde4   : > { %2568 = vmatpush3.bf16.msra.mxu0 %v2917_v2  ;;  %2569 = vmatprep.mubr.msk.bf16.mxu0 %vm2845_vm0, %v2844_v0 }
 0xde5   : > { %2581 = vmatprep.subr.bf16.mxu0 %v2844_v0 }
 0xeb6   : > { %v938_v26 = vpop.f32.mrb[20].mxu0 }
 0xeb7   : > { %v982_v27 = vadd.f32 %v981_v20, %v938_v26  ;;  %v2557_v28 = vpop.f32.mrb[21].mxu0  ;;  %v1236_v20 = vpop.f32.mrb[30].mxu1 }
 0xeb8   : > { %v941_v29 = vpop.f32.mrb[22].mxu0  ;;  %v2594_v21 = vpop.f32.mrb[31].mxu1 }
 0xeb9   : > { %v987_v31 = vadd.f32 %v2950_v10, %v982_v27  ;;  %v2558_v32 = vpop.f32.mrb[23].mxu0 }
 0xebb   : > { %2752 = vtanh.f32 %v987_v31  ;;  %v2365_v34 = vmul.f32 -1.442695, %v987_v31 }
 0xebd   : > { %2754 = vpow2.f32 %v2365_v34 }
 0xec5   : > { %v2753_v33 = vpop.eup %2752 }
 0xec6   : > { %997 = vrot.lane.b32.xlu0 %v2753_v33, %s2847_s7 }
 0xec7   : > { %v2755_v35 = vpop.eup %2754 }
 0xec8   : > { %v991_v36 = vadd.f32 1.0, %v2755_v35 }
 0xeca   : > { %2756 = vrcp.f32 %v991_v36 }
 0xed4   : > { %v2757_v37 = vpop.eup %2756 }
 0xed5   : > { %v995_v40 = vmul.f32 %v2757_v37, %v879_v14 }
 0xf38   : > { %v998_v38 = vpop.permute.xlu0 %997 }
 0xf39   : > { %v1000_v39 = vmul.f32 %v2757_v37, %v998_v38 }
 0xf3b   : > { %1002 = vrot.lane.b32.xlu1 %v1000_v39, %s2848_s8 }
 0xfad   : > { %v1003_v41 = vpop.permute.xlu1 %1002 }
 0xfae   : > { %v1005_v42 = vadd.f32 %v1003_v41, %v995_v40  ;;  %v1274_v41 = vld [vmem:[%s1273_s19] sm:$0x1]  ;;  %s3222_s19 = sadd.s32 %s1523_s13, %s2899_s18 }
 0xfaf   : > { %2606 = vmatmul.mubr.msk.bf16.vlgmr.msra.gmra.mrb[32].mxu1 %vm307_vm1, %v1274_v41  ;;  %s1525_s29 = scalar_lea.vmem %s3444_s0, %s3222_s19 }
 0xfb0   : > { %2758 = vtanh.f32 %v1005_v42  ;;  %2616 = vmatpush3.bf16.msra.mxu1 %v2914_v1  ;;  %2619 = vmatprep.mubr.msk.bf16.mxu1 %vm2845_vm0, %v2844_v0  ;;  %v1526_v41 = vld [vmem:[%s1525_s29] sm:$0x1] }
 0xfb1   : > { %2617 = vmatprep.subr.bf16.mxu1 %v2844_v0 }
 0xfb4   : > { %2618 = vmatpush3.bf16.msra.mxu1 %v2921_v3 }
 0xfb5   : > { %2629 = vmatprep.subr.bf16.mxu1 %v2844_v0 }
 0xfba   : > { %v2759_v44 = vpop.eup %2758 }
 0xfbb   : > { %1008 = vrot.lane.b32.xlu0 %v2759_v44, %s2849_s14 }
0x102d   : > { %v1009_v45 = vpop.permute.xlu0 %1008 }
0x102e   : > { %v3120_v46 = vmul.f32 %v2757_v37, %v1009_v45 }
0x1030   : > { %v1023_v47 = vpack.c.bf16 %v3120_v46, %v3120_v46 }
0x1032   : > { %1025 = vrot.lane.b32.xlu1 %v1023_v47, %s2850_s16 }
0x1082   : > { %v1359_v47 = vpop.f32.mrb[32].mxu1 }
0x10a4   : > { %v1026_v53 = vpop.permute.xlu1 %1025 }
0x10a5   : > { %2570 = vmatmul.mubr.msk.bf16.vlgmr.msra.gmra.mrb[24].mxu0 %vm251_vm2, %v1026_v53 }
0x10a6   : > { %2582 = vmatpush3.bf16.msra.mxu0 %v2917_v2  ;;  %2583 = vmatprep.mubr.msk.bf16.mxu0 %vm2845_vm0, %v2844_v0 }
0x10a7   : > { %2595 = vmatprep.subr.bf16.mxu0 %v2844_v0 }
0x1178   : > { %v1064_v54 = vpop.f32.mrb[24].mxu0 }
0x1179   : > { %v1108_v55 = vadd.f32 %v1107_v48, %v1064_v54  ;;  %v2571_v57 = vpop.f32.mrb[25].mxu0  ;;  %v2607_v48 = vpop.f32.mrb[33].mxu1 }
0x117a   : > { %v1067_v58 = vpop.f32.mrb[26].mxu0  ;;  %v1362_v49 = vpop.f32.mrb[34].mxu1 }
0x117b   : > { %v1113_v59 = vadd.f32 %v2950_v10, %v1108_v55  ;;  %v2572_v60 = vpop.f32.mrb[27].mxu0  ;;  %v2608_v51 = vpop.f32.mrb[35].mxu1 }
0x117d   : > { %2760 = vtanh.f32 %v1113_v59  ;;  %v2369_v62 = vmul.f32 -1.442695, %v1113_v59 }
0x117f   : > { %2762 = vpow2.f32 %v2369_v62 }
0x1187   : > { %v2761_v61 = vpop.eup %2760 }
0x1188   : > { %1123 = vrot.lane.b32.xlu0 %v2761_v61, %s2847_s7 }
0x1189   : > { %v2763_v63 = vpop.eup %2762 }
0x118a   : > { %v1117_v4 = vadd.f32 1.0, %v2763_v63 }
0x118c   : > { %2764 = vrcp.f32 %v1117_v4 }
0x1196   : > { %v2765_v5 = vpop.eup %2764 }
0x1197   : > { %v1121_v8 = vmul.f32 %v2765_v5, %v1005_v42 }
0x11fa   : > { %v1124_v6 = vpop.permute.xlu0 %1123 }
0x11fb   : > { %v1126_v7 = vmul.f32 %v2765_v5, %v1124_v6 }
0x11fd   : > { %1128 = vrot.lane.b32.xlu1 %v1126_v7, %s2848_s8 }
0x126f   : > { %v1129_v9 = vpop.permute.xlu1 %1128 }
0x1270   : > { %v1131_v11 = vadd.f32 %v1129_v9, %v1121_v8 }
0x1272   : > { %2766 = vtanh.f32 %v1131_v11 }
0x127c   : > { %v2767_v13 = vpop.eup %2766 }
0x127d   : > { %1134 = vrot.lane.b32.xlu0 %v2767_v13, %s2849_s14 }
0x12ef   : > { %v1135_v14 = vpop.permute.xlu0 %1134 }
0x12f0   : > { %v3149_v15 = vmul.f32 %v2765_v5, %v1135_v14 }
0x12f2   : > { %v1149_v16 = vpack.c.bf16 %v3149_v15, %v3149_v15 }
0x12f4   : > { %1151 = vrot.lane.b32.xlu1 %v1149_v16, %s2850_s16 }
0x1366   : > { %v1152_v22 = vpop.permute.xlu1 %1151 }
0x1367   : > { %2584 = vmatmul.mubr.msk.bf16.vlgmr.msra.gmra.mrb[28].mxu0 %vm251_vm2, %v1152_v22 }
0x1368   : > { %2596 = vmatpush3.bf16.msra.mxu0 %v2917_v2  ;;  %2597 = vmatprep.mubr.msk.bf16.mxu0 %vm2845_vm0, %v2844_v0 }
0x1369   : > { %2609 = vmatprep.subr.bf16.mxu0 %v2844_v0 }
0x143a   : > { %v1190_v24 = vpop.f32.mrb[28].mxu0 }
0x143b   : > { %v1234_v25 = vadd.f32 %v1233_v17, %v1190_v24  ;;  %v2585_v26 = vpop.f32.mrb[29].mxu0 }
0x143c   : > { %v1193_v27 = vpop.f32.mrb[30].mxu0 }
0x143d   : > { %v1239_v28 = vadd.f32 %v2950_v10, %v1234_v25  ;;  %v2586_v29 = vpop.f32.mrb[31].mxu0 }
0x143f   : > { %2768 = vtanh.f32 %v1239_v28  ;;  %v2373_v32 = vmul.f32 -1.442695, %v1239_v28 }
0x1441   : > { %2770 = vpow2.f32 %v2373_v32 }
0x1449   : > { %v2769_v31 = vpop.eup %2768 }
0x144a   : > { %1249 = vrot.lane.b32.xlu0 %v2769_v31, %s2847_s7 }
0x144b   : > { %v2771_v33 = vpop.eup %2770 }
0x144c   : > { %v1243_v34 = vadd.f32 1.0, %v2771_v33 }
0x144e   : > { %2772 = vrcp.f32 %v1243_v34 }
0x1458   : > { %v2773_v35 = vpop.eup %2772 }
0x1459   : > { %v1247_v38 = vmul.f32 %v2773_v35, %v1131_v11  ;;  %v1400_v11 = vld [vmem:[%s1399_s12] sm:$0x1]  ;;  %s1649_s12 = smul.u32 11, %s2957_s9 }
0x145a   : > { %2620 = vmatmul.mubr.msk.bf16.vlgmr.msra.gmra.mrb[36].mxu1 %vm307_vm1, %v1400_v11  ;;  %v3267_v11 = vld [vmem:[%s2906_s23 + $0x8] sm:$0xff]  }
0x145b   : > { %2630 = vmatpush3.bf16.msra.mxu1 %v2914_v1  ;;  %2633 = vmatprep.mubr.msk.bf16.mxu1 %vm2845_vm0, %v2844_v0  ;;  %s3251_s13 = sadd.s32 %s1649_s12, %s2899_s18 }
0x145c   : > { %2631 = vmatprep.subr.bf16.mxu1 %v2844_v0  ;;  %s1651_s29 = scalar_lea.vmem %s3444_s0, %s3251_s13 }
0x145f   : > { %2632 = vmatpush3.bf16.msra.mxu1 %v2921_v3 }
0x1460   : > { %2643 = vmatprep.subr.bf16.mxu1 %v2844_v0 }
0x1462   : > { %2634 = vmatmul.mubr.msk.bf16.vlgmr.msra.gmra.mrb[40].mxu1 %vm307_vm1, %v1526_v41 }
0x1463   : > { %2644 = vmatpush3.bf16.msra.mxu1 %v2914_v1  ;;  %2647 = vmatprep.mubr.msk.bf16.mxu1 %vm2845_vm0, %v2844_v0 }
0x1464   : > { %2645 = vmatprep.subr.bf16.mxu1 %v2844_v0 }
0x1467   : > { %2646 = vmatpush3.bf16.msra.mxu1 %v2921_v3 }
0x1468   : > { %2657 = vmatprep.subr.bf16.mxu1 %v2844_v0 }
0x14bc   : > { %v1250_v36 = vpop.permute.xlu0 %1249 }
0x14bd   : > { %v1252_v37 = vmul.f32 %v2773_v35, %v1250_v36 }
0x14bf   : > { %1254 = vrot.lane.b32.xlu1 %v1252_v37, %s2848_s8 }
0x152d   : > { %v1485_v17 = vpop.f32.mrb[36].mxu1 }
0x152e   : > { %v2621_v19 = vpop.f32.mrb[37].mxu1 }
0x152f   : > { %v1488_v20 = vpop.f32.mrb[38].mxu1 }
0x1530   : > { %v2622_v21 = vpop.f32.mrb[39].mxu1 }
0x1531   : > { %v1255_v39 = vpop.permute.xlu1 %1254 }
0x1532   : > { %v1257_v40 = vadd.f32 %v1255_v39, %v1247_v38 }
0x1534   : > { %2774 = vtanh.f32 %v1257_v40 }
0x1535   : > { %v1611_v1 = vpop.f32.mrb[40].mxu1 }
0x1536   : > { %v2635_v48 = vpop.f32.mrb[41].mxu1 }
0x1537   : > { %v1614_v49 = vpop.f32.mrb[42].mxu1 }
0x1538   : > { %v2636_v51 = vpop.f32.mrb[43].mxu1 }
0x153e   : > { %v2775_v42 = vpop.eup %2774 }
0x153f   : > { %1260 = vrot.lane.b32.xlu0 %v2775_v42, %s2849_s14 }
0x15b1   : > { %v1261_v43 = vpop.permute.xlu0 %1260 }
0x15b2   : > { %v3178_v44 = vmul.f32 %v2773_v35, %v1261_v43 }
0x15b4   : > { %v1275_v45 = vpack.c.bf16 %v3178_v44, %v3178_v44 }
0x15b6   : > { %1277 = vrot.lane.b32.xlu1 %v1275_v45, %s2850_s16 }
0x1628   : > { %v1278_v52 = vpop.permute.xlu1 %1277 }
0x1629   : > { %2598 = vmatmul.mubr.msk.bf16.vlgmr.msra.gmra.mrb[32].mxu0 %vm251_vm2, %v1278_v52 }
0x162a   : > { %2610 = vmatpush3.bf16.msra.mxu0 %v2917_v2  ;;  %2611 = vmatprep.mubr.msk.bf16.mxu0 %vm2845_vm0, %v2844_v0 }
0x162b   : > { %2623 = vmatprep.subr.bf16.mxu0 %v2844_v0 }
0x16fc   : > { %v1316_v53 = vpop.f32.mrb[32].mxu0 }
0x16fd   : > { %v1360_v54 = vadd.f32 %v1359_v47, %v1316_v53  ;;  %v2599_v55 = vpop.f32.mrb[33].mxu0 }
0x16fe   : > { %v1319_v57 = vpop.f32.mrb[34].mxu0 }
0x16ff   : > { %v1365_v58 = vadd.f32 %v2950_v10, %v1360_v54  ;;  %v2600_v59 = vpop.f32.mrb[35].mxu0 }
0x1701   : > { %2776 = vtanh.f32 %v1365_v58  ;;  %v2378_v61 = vmul.f32 -1.442695, %v1365_v58 }
0x1703   : > { %2778 = vpow2.f32 %v2378_v61 }
0x170b   : > { %v2777_v60 = vpop.eup %2776 }
0x170c   : > { %1375 = vrot.lane.b32.xlu0 %v2777_v60, %s2847_s7 }
0x170d   : > { %v2779_v62 = vpop.eup %2778 }
0x170e   : > { %v1369_v63 = vadd.f32 1.0, %v2779_v62 }
0x1710   : > { %2780 = vrcp.f32 %v1369_v63 }
0x171a   : > { %v2781_v4 = vpop.eup %2780 }
0x171b   : > { %v1373_v7 = vmul.f32 %v2781_v4, %v1257_v40 }
0x177e   : > { %v1376_v5 = vpop.permute.xlu0 %1375 }
0x177f   : > { %v1378_v6 = vmul.f32 %v2781_v4, %v1376_v5 }
0x1781   : > { %1380 = vrot.lane.b32.xlu1 %v1378_v6, %s2848_s8 }
0x17f3   : > { %v1381_v8 = vpop.permute.xlu1 %1380 }
0x17f4   : > { %v1383_v9 = vadd.f32 %v1381_v8, %v1373_v7  ;;  %v1652_v7 = vld [vmem:[%s1651_s29] sm:$0x1]  ;;  %s3321_s29 = sadd.s32 %s1901_s28, %s2899_s18 }
0x17f5   : > { %2648 = vmatmul.mubr.msk.bf16.vlgmr.msra.gmra.mrb[44].mxu1 %vm307_vm1, %v1652_v7  ;;  %v3259_v8 = vld [vmem:[%s2906_s23] sm:$0xff]   ;;  %s1775_s23 = smul.u32 12, %s2957_s9  ;;  %s1903_s12 = scalar_lea.vmem %s3444_s0, %s3321_s29 }
0x17f6   : > { %2782 = vtanh.f32 %v1383_v9  ;;  %2658 = vmatpush3.bf16.msra.mxu1 %v3259_v8  ;;  %2661 = vmatprep.mubr.msk.bf16.mxu1 %vm2845_vm0, %v2844_v0 }
0x17f7   : > { %2659 = vmatprep.subr.bf16.mxu1 %v2844_v0 }
0x17fa   : > { %2660 = vmatpush3.bf16.msra.mxu1 %v3267_v11 }
0x17fb   : > { %2671 = vmatprep.subr.bf16.mxu1 %v2844_v0 }
0x1800   : > { %v2783_v12 = vpop.eup %2782 }
0x1801   : > { %1386 = vrot.lane.b32.xlu0 %v2783_v12, %s2849_s14 }
0x1873   : > { %v1387_v13 = vpop.permute.xlu0 %1386 }
0x1874   : > { %v3207_v14 = vmul.f32 %v2781_v4, %v1387_v13 }
0x1876   : > { %v1401_v16 = vpack.c.bf16 %v3207_v14, %v3207_v14 }
0x1878   : > { %1403 = vrot.lane.b32.xlu1 %v1401_v16, %s2850_s16 }
0x18ea   : > { %v1404_v22 = vpop.permute.xlu1 %1403 }
0x18eb   : > { %2612 = vmatmul.mubr.msk.bf16.vlgmr.msra.gmra.mrb[36].mxu0 %vm251_vm2, %v1404_v22 }
0x18ec   : > { %2624 = vmatpush3.bf16.msra.mxu0 %v2917_v2  ;;  %2625 = vmatprep.mubr.msk.bf16.mxu0 %vm2845_vm0, %v2844_v0 }
0x18ed   : > { %2637 = vmatprep.subr.bf16.mxu0 %v2844_v0 }
0x19be   : > { %v1442_v24 = vpop.f32.mrb[36].mxu0 }
0x19bf   : > { %v1486_v25 = vadd.f32 %v1485_v17, %v1442_v24  ;;  %v2613_v26 = vpop.f32.mrb[37].mxu0  ;;  %v1737_v17 = vpop.f32.mrb[44].mxu1  ;;  %v3278_v24 = vld [vmem:[%s2911_s26] sm:$0xff]   ;;  %s3292_s26 = sadd.s32 %s1775_s23, %s2899_s18  ;;  %s2344_s23 = sshll.u32 %s2899_s18, 1 }
0x19c0   : > { %v1445_v27 = vpop.f32.mrb[38].mxu0  ;;  %v2649_v19 = vpop.f32.mrb[45].mxu1  ;;  %s1777_s24 = scalar_lea.vmem %s3444_s0, %s3292_s26 }
0x19c1   : > { %v1491_v28 = vadd.f32 %v2950_v10, %v1486_v25  ;;  %v2614_v29 = vpop.f32.mrb[39].mxu0  ;;  %v1740_v20 = vpop.f32.mrb[46].mxu1 }
0x19c2   : > { %v2650_v21 = vpop.f32.mrb[47].mxu1  ;;  %v3285_v29 = vld [vmem:[%s2947_s6] ss:$0 sm:$0xff] }
0x19c3   : > { %2784 = vtanh.f32 %v1491_v28  ;;  %v2382_v32 = vmul.f32 -1.442695, %v1491_v28 }
0x19c5   : > { %2786 = vpow2.f32 %v2382_v32 }
0x19cd   : > { %v2785_v31 = vpop.eup %2784 }
0x19ce   : > { %1501 = vrot.lane.b32.xlu0 %v2785_v31, %s2847_s7 }
0x19cf   : > { %v2787_v33 = vpop.eup %2786 }
0x19d0   : > { %v1495_v34 = vadd.f32 1.0, %v2787_v33 }
0x19d2   : > { %2788 = vrcp.f32 %v1495_v34 }
0x19dc   : > { %v2789_v35 = vpop.eup %2788 }
0x19dd   : > { %v1499_v38 = vmul.f32 %v2789_v35, %v1383_v9 }
0x1a40   : > { %v1502_v36 = vpop.permute.xlu0 %1501 }
0x1a41   : > { %v1504_v37 = vmul.f32 %v2789_v35, %v1502_v36 }
0x1a43   : > { %1506 = vrot.lane.b32.xlu1 %v1504_v37, %s2848_s8 }
0x1ab5   : > { %v1507_v39 = vpop.permute.xlu1 %1506 }
0x1ab6   : > { %v1509_v40 = vadd.f32 %v1507_v39, %v1499_v38 }
0x1ab8   : > { %2790 = vtanh.f32 %v1509_v40 }
0x1ac2   : > { %v2791_v42 = vpop.eup %2790 }
0x1ac3   : > { %1512 = vrot.lane.b32.xlu0 %v2791_v42, %s2849_s14 }
0x1b35   : > { %v1513_v43 = vpop.permute.xlu0 %1512 }
0x1b36   : > { %v3236_v45 = vmul.f32 %v2789_v35, %v1513_v43  ;;  %v1778_v43 = vld [vmem:[%s1777_s24] sm:$0x1]  ;;  %s2027_s24 = smul.u32 14, %s2957_s9 }
0x1b37   : > { %2662 = vmatmul.mubr.msk.bf16.vlgmr.msra.gmra.mrb[48].mxu1 %vm307_vm1, %v1778_v43 }
0x1b38   : > { %v1527_v47 = vpack.c.bf16 %v3236_v45, %v3236_v45  ;;  %2672 = vmatpush3.bf16.msra.mxu1 %v3259_v8  ;;  %2675 = vmatprep.mubr.msk.bf16.mxu1 %vm2845_vm0, %v2844_v0  ;;  %s3348_s28 = sadd.s32 %s2027_s24, %s2899_s18  ;;  %s2353_s18 = sshll.u32 %s2990_s20, 1 }
0x1b39   : > { %2673 = vmatprep.subr.bf16.mxu1 %v2844_v0  ;;  %s2366_s20 = sshll.u32 %s3077_s22, 1 }
0x1b3a   : > { %1529 = vrot.lane.b32.xlu1 %v1527_v47, %s2850_s16 }
0x1b3c   : > { %2674 = vmatpush3.bf16.msra.mxu1 %v3267_v11 }
0x1b3d   : > { %2685 = vmatprep.subr.bf16.mxu1 %v2844_v0 }
0x1bac   : > { %v1530_v52 = vpop.permute.xlu1 %1529 }
0x1bad   : > { %2626 = vmatmul.mubr.msk.bf16.vlgmr.msra.gmra.mrb[40].mxu0 %vm251_vm2, %v1530_v52 }
0x1bae   : > { %2638 = vmatpush3.bf16.msra.mxu0 %v2917_v2  ;;  %2639 = vmatprep.mubr.msk.bf16.mxu0 %vm2845_vm0, %v2844_v0 }
0x1baf   : > { %2651 = vmatprep.subr.bf16.mxu0 %v2844_v0 }
0x1c0a   : > { %v1863_v51 = vpop.f32.mrb[48].mxu1 }
0x1c0b   : > { %v2663_v52 = vpop.f32.mrb[49].mxu1 }
0x1c80   : > { %v1568_v3 = vpop.f32.mrb[40].mxu0 }
0x1c81   : > { %v1612_v53 = vadd.f32 %v1611_v1, %v1568_v3  ;;  %v2627_v54 = vpop.f32.mrb[41].mxu0  ;;  %v1866_v3 = vpop.f32.mrb[50].mxu1 }
0x1c82   : > { %v1571_v55 = vpop.f32.mrb[42].mxu0 }
0x1c83   : > { %v1617_v57 = vadd.f32 %v2950_v10, %v1612_v53  ;;  %v2628_v58 = vpop.f32.mrb[43].mxu0  ;;  %v2664_v53 = vpop.f32.mrb[51].mxu1 }
0x1c85   : > { %2792 = vtanh.f32 %v1617_v57  ;;  %v2386_v60 = vmul.f32 -1.442695, %v1617_v57 }
0x1c87   : > { %2794 = vpow2.f32 %v2386_v60 }
0x1c8f   : > { %v2793_v59 = vpop.eup %2792 }
0x1c90   : > { %1627 = vrot.lane.b32.xlu0 %v2793_v59, %s2847_s7 }
0x1c91   : > { %v2795_v2 = vpop.eup %2794 }
0x1c92   : > { %v1621_v61 = vadd.f32 1.0, %v2795_v2 }
0x1c94   : > { %2796 = vrcp.f32 %v1621_v61 }
0x1c9e   : > { %v2797_v62 = vpop.eup %2796 }
0x1c9f   : > { %v1625_v10 = vmul.f32 %v2797_v62, %v1509_v40 }
0x1d02   : > { %v1628_v63 = vpop.permute.xlu0 %1627 }
0x1d03   : > { %v1630_v4 = vmul.f32 %v2797_v62, %v1628_v63 }
0x1d05   : > { %1632 = vrot.lane.b32.xlu1 %v1630_v4, %s2848_s8 }
0x1d77   : > { %v1633_v5 = vpop.permute.xlu1 %1632 }
0x1d78   : > { %v1635_v6 = vadd.f32 %v1633_v5, %v1625_v10 }
0x1d7a   : > { %2798 = vtanh.f32 %v1635_v6 }
0x1d84   : > { %v2799_v9 = vpop.eup %2798 }
0x1d85   : > { %1638 = vrot.lane.b32.xlu0 %v2799_v9, %s2849_s14 }
0x1df7   : > { %v1639_v12 = vpop.permute.xlu0 %1638 }
0x1df8   : > { %v3271_v13 = vmul.f32 %v2797_v62, %v1639_v12 }
0x1dfa   : > { %v1653_v16 = vpack.c.bf16 %v3271_v13, %v3271_v13 }
0x1dfc   : > { %1655 = vrot.lane.b32.xlu1 %v1653_v16, %s2850_s16  ;;  %v1904_v16 = vld [vmem:[%s1903_s12] sm:$0x1]  ;;  %s2029_s12 = scalar_lea.vmem %s3444_s0, %s3348_s28 }
0x1dfd   : > { %2676 = vmatmul.mubr.msk.bf16.vlgmr.msra.gmra.mrb[52].mxu1 %vm307_vm1, %v1904_v16  ;;  %v2030_v43 = vld [vmem:[%s2029_s12] sm:$0x1] }
0x1dfe   : > { %2686 = vmatpush3.bf16.msra.mxu1 %v3259_v8  ;;  %2689 = vmatprep.mubr.msk.bf16.mxu1 %vm2845_vm0, %v2844_v0 }
0x1dff   : > { %2687 = vmatprep.subr.bf16.mxu1 %v2844_v0 }
0x1e02   : > { %2688 = vmatpush3.bf16.msra.mxu1 %v3267_v11 }
0x1e05   : > { %2690 = vmatmul.mubr.msk.bf16.vlgmr.msra.gmra.mrb[56].mxu1 %vm307_vm1, %v2030_v43 }
0x1e6e   : > { %v1656_v22 = vpop.permute.xlu1 %1655 }
0x1e6f   : > { %2640 = vmatmul.mubr.msk.bf16.vlgmr.msra.gmra.mrb[44].mxu0 %vm251_vm2, %v1656_v22 }
0x1e70   : > { %2652 = vmatpush3.bf16.msra.mxu0 %v3278_v24  ;;  %2653 = vmatprep.mubr.msk.bf16.mxu0 %vm2845_vm0, %v2844_v0 }
0x1e71   : > { %2665 = vmatprep.subr.bf16.mxu0 %v2844_v0 }
0x1ed0   : > { %v1989_v22 = vpop.f32.mrb[52].mxu1 }
0x1ed1   : > { %v2677_v8 = vpop.f32.mrb[53].mxu1 }
0x1f42   : > { %v1694_v25 = vpop.f32.mrb[44].mxu0 }
0x1f43   : > { %v1738_v26 = vadd.f32 %v1737_v17, %v1694_v25  ;;  %v2641_v27 = vpop.f32.mrb[45].mxu0  ;;  %v1992_v25 = vpop.f32.mrb[54].mxu1 }
0x1f44   : > { %v1697_v28 = vpop.f32.mrb[46].mxu0 }
0x1f45   : > { %v1743_v31 = vadd.f32 %v3285_v29, %v1738_v26  ;;  %v2642_v32 = vpop.f32.mrb[47].mxu0  ;;  %v2678_v26 = vpop.f32.mrb[55].mxu1 }
0x1f46   : > { %v2115_v52 = vpop.f32.mrb[56].mxu1 }
0x1f47   : > { %2800 = vtanh.f32 %v1743_v31  ;;  %v2390_v34 = vmul.f32 -1.442695, %v1743_v31  ;;  %v2691_v3 = vpop.f32.mrb[57].mxu1 }
0x1f48   : > { %v2118_v53 = vpop.f32.mrb[58].mxu1 }
0x1f49   : > { %2802 = vpow2.f32 %v2390_v34 }
0x1f51   : > { %v2801_v33 = vpop.eup %2800 }
0x1f52   : > { %1753 = vrot.lane.b32.xlu0 %v2801_v33, %s2847_s7 }
0x1f53   : > { %v2803_v35 = vpop.eup %2802 }
0x1f54   : > { %v1747_v36 = vadd.f32 1.0, %v2803_v35 }
0x1f56   : > { %2804 = vrcp.f32 %v1747_v36 }
0x1f60   : > { %v2805_v37 = vpop.eup %2804 }
0x1f61   : > { %v1751_v40 = vmul.f32 %v2805_v37, %v1635_v6 }
0x1fc4   : > { %v1754_v38 = vpop.permute.xlu0 %1753 }
0x1fc5   : > { %v1756_v39 = vmul.f32 %v2805_v37, %v1754_v38 }
0x1fc7   : > { %1758 = vrot.lane.b32.xlu1 %v1756_v39, %s2848_s8 }
0x2039   : > { %v1759_v41 = vpop.permute.xlu1 %1758 }
0x203a   : > { %v1761_v42 = vadd.f32 %v1759_v41, %v1751_v40 }
0x203c   : > { %2806 = vtanh.f32 %v1761_v42 }
0x2046   : > { %v2807_v47 = vpop.eup %2806 }
0x2047   : > { %1764 = vrot.lane.b32.xlu0 %v2807_v47, %s2849_s14 }
0x20b9   : > { %v1765_v1 = vpop.permute.xlu0 %1764 }
0x20ba   : > { %v3306_v48 = vmul.f32 %v2805_v37, %v1765_v1 }
0x20bc   : > { %v1779_v49 = vpack.c.bf16 %v3306_v48, %v3306_v48 }
0x20be   : > { %1781 = vrot.lane.b32.xlu1 %v1779_v49, %s2850_s16 }
0x2130   : > { %v1782_v54 = vpop.permute.xlu1 %1781 }
0x2131   : > { %2654 = vmatmul.mubr.msk.bf16.vlgmr.msra.gmra.mrb[48].mxu0 %vm251_vm2, %v1782_v54  ;;  %v2692_v54 = vpop.f32.mrb[59].mxu1 }
0x2132   : > { %2666 = vmatpush3.bf16.msra.mxu0 %v3278_v24  ;;  %2667 = vmatprep.mubr.msk.bf16.mxu0 %vm2845_vm0, %v2844_v0 }
0x2133   : > { %2679 = vmatprep.subr.bf16.mxu0 %v2844_v0 }
0x2204   : > { %v1820_v55 = vpop.f32.mrb[48].mxu0 }
0x2205   : > { %v1864_v57 = vadd.f32 %v1863_v51, %v1820_v55  ;;  %v2655_v58 = vpop.f32.mrb[49].mxu0 }
0x2206   : > { %v1823_v59 = vpop.f32.mrb[50].mxu0 }
0x2207   : > { %v1869_v60 = vadd.f32 %v3285_v29, %v1864_v57  ;;  %v2656_v2 = vpop.f32.mrb[51].mxu0 }
0x2209   : > { %2808 = vtanh.f32 %v1869_v60  ;;  %v2394_v62 = vmul.f32 -1.442695, %v1869_v60 }
0x220b   : > { %2810 = vpow2.f32 %v2394_v62 }
0x2213   : > { %v2809_v61 = vpop.eup %2808 }
0x2214   : > { %1879 = vrot.lane.b32.xlu0 %v2809_v61, %s2847_s7 }
0x2215   : > { %v2811_v63 = vpop.eup %2810 }
0x2216   : > { %v1873_v4 = vadd.f32 1.0, %v2811_v63 }
0x2218   : > { %2812 = vrcp.f32 %v1873_v4 }
0x2222   : > { %v2813_v10 = vpop.eup %2812 }
0x2223   : > { %v1877_v7 = vmul.f32 %v2813_v10, %v1761_v42 }
0x2286   : > { %v1880_v5 = vpop.permute.xlu0 %1879 }
0x2287   : > { %v1882_v6 = vmul.f32 %v2813_v10, %v1880_v5 }
0x2289   : > { %1884 = vrot.lane.b32.xlu1 %v1882_v6, %s2848_s8 }
0x22fb   : > { %v1885_v9 = vpop.permute.xlu1 %1884 }
0x22fc   : > { %v1887_v12 = vadd.f32 %v1885_v9, %v1877_v7 }
0x22fe   : > { %2814 = vtanh.f32 %v1887_v12 }
0x2308   : > { %v2815_v17 = vpop.eup %2814 }
0x2309   : > { %1890 = vrot.lane.b32.xlu0 %v2815_v17, %s2849_s14 }
0x237b   : > { %v1891_v19 = vpop.permute.xlu0 %1890 }
0x237c   : > { %v3334_v20 = vmul.f32 %v2813_v10, %v1891_v19 }
0x237e   : > { %v1905_v21 = vpack.c.bf16 %v3334_v20, %v3334_v20 }
0x2380   : > { %1907 = vrot.lane.b32.xlu1 %v1905_v21, %s2850_s16 }
0x23f2   : > { %v1908_v27 = vpop.permute.xlu1 %1907 }
0x23f3   : > { %2668 = vmatmul.mubr.msk.bf16.vlgmr.msra.gmra.mrb[52].mxu0 %vm251_vm2, %v1908_v27 }
0x23f4   : > { %2680 = vmatpush3.bf16.msra.mxu0 %v3278_v24  ;;  %2681 = vmatprep.mubr.msk.bf16.mxu0 %vm2845_vm0, %v2844_v0 }
0x24c6   : > { %v1946_v11 = vpop.f32.mrb[52].mxu0 }
0x24c7   : > { %v1990_v28 = vadd.f32 %v1989_v22, %v1946_v11  ;;  %v2669_v31 = vpop.f32.mrb[53].mxu0 }
0x24c8   : > { %v1949_v32 = vpop.f32.mrb[54].mxu0 }
0x24c9   : > { %v1995_v33 = vadd.f32 %v3285_v29, %v1990_v28  ;;  %v2670_v34 = vpop.f32.mrb[55].mxu0 }
0x24cb   : > { %2816 = vtanh.f32 %v1995_v33  ;;  %v2398_v36 = vmul.f32 -1.442695, %v1995_v33 }
0x24cd   : > { %2818 = vpow2.f32 %v2398_v36 }
0x24d5   : > { %v2817_v35 = vpop.eup %2816 }
0x24d6   : > { %2005 = vrot.lane.b32.xlu0 %v2817_v35, %s2847_s7 }
0x24d7   : > { %v2819_v37 = vpop.eup %2818 }
0x24d8   : > { %v1999_v24 = vadd.f32 1.0, %v2819_v37 }
0x24da   : > { %2820 = vrcp.f32 %v1999_v24 }
0x24e4   : > { %v2821_v38 = vpop.eup %2820 }
0x24e5   : > { %v2003_v40 = vmul.f32 %v2821_v38, %v1887_v12 }
0x2548   : > { %v2006_v0 = vpop.permute.xlu0 %2005 }
0x2549   : > { %v2008_v39 = vmul.f32 %v2821_v38, %v2006_v0 }
0x254b   : > { %2010 = vrot.lane.b32.xlu1 %v2008_v39, %s2848_s8 }
0x25bd   : > { %v2011_v41 = vpop.permute.xlu1 %2010 }
0x25be   : > { %v2013_v42 = vadd.f32 %v2011_v41, %v2003_v40 }
0x25c0   : > { %2822 = vtanh.f32 %v2013_v42 }
0x25ca   : > { %v2823_v47 = vpop.eup %2822 }
0x25cb   : > { %2016 = vrot.lane.b32.xlu0 %v2823_v47, %s2849_s14 }
0x263d   : > { %v2017_v1 = vpop.permute.xlu0 %2016 }
0x263e   : > { %v2019_v49 = vmul.f32 %v2821_v38, %v2017_v1 }
0x2640   : > { %v2031_v51 = vpack.c.bf16 %v2019_v49, %v2019_v49 }
0x2642   : > { %2033 = vrot.lane.b32.xlu1 %v2031_v51, %s2850_s16 }
0x26b4   : > { %v2034_v55 = vpop.permute.xlu1 %2033 }
0x26b5   : > { %2682 = vmatmul.mubr.msk.bf16.vlgmr.msra.gmra.mrb[56].mxu0 %vm251_vm2, %v2034_v55 }
0x2788   : > { %v2072_v57 = vpop.f32.mrb[56].mxu0 }
0x2789   : > { %v2116_v58 = vadd.f32 %v2115_v52, %v2072_v57  ;;  %v2683_v59 = vpop.f32.mrb[57].mxu0 }
0x278a   : > { %v2075_v60 = vpop.f32.mrb[58].mxu0 }
0x278b   : > { %v2121_v2 = vadd.f32 %v3285_v29, %v2116_v58  ;;  %v2684_v61 = vpop.f32.mrb[59].mxu0 }
0x278d   : > { %2824 = vtanh.f32 %v2121_v2  ;;  %v2402_v63 = vmul.f32 -1.442695, %v2121_v2 }
0x278f   : > { %2826 = vpow2.f32 %v2402_v63 }
0x2797   : > { %v2825_v62 = vpop.eup %2824 }
0x2798   : > { %2131 = vrot.lane.b32.xlu0 %v2825_v62, %s2847_s7  ;;  %s2693_s7 = smul.u32 30, %s2891_s17  ;;  %s2348_s17 = sshll.u32 %s2961_s10, 1 }
0x2799   : > { %v2827_v4 = vpop.eup %2826 }
0x279a   : > { %v2125_v10 = vadd.f32 1.0, %v2827_v4  ;;  %s3379_s24 = scalar_lea.vmem %s3448_s4, %s2693_s7  ;;  %s2357_s7 = sshll.u32 %s3019_s27, 1 }
0x279b   : > { %s387_s6 = scalar_lea.vmem %s3379_s24, %s2344_s23  ;;  %s639_s12 = scalar_lea.vmem %s3379_s24, %s2353_s18 }
0x279c   : > { %2828 = vrcp.f32 %v2125_v10  ;;  %s765_s9 = scalar_lea.vmem %s3379_s24, %s2357_s7  ;;  %s2370_s23 = sshll.u32 %s3106_s30, 1 }
0x279d   : > { %s1143_s27 = scalar_lea.vmem %s3379_s24, %s2370_s23  ;;  %s2387_s18 = sshll.u32 %s3222_s19, 1 }
0x279e   : > { %s2399_s19 = sshll.u32 %s3321_s29, 1 }
0x27a6   : > { %v2829_v5 = vpop.eup %2828 }
0x280a   : > { %v2132_v6 = vpop.permute.xlu0 %2131 }
0x280b   : > { %v2134_v7 = vmul.f32 %v2829_v5, %v2132_v6 }
0x280d   : > { %2136 = vrot.lane.b32.xlu1 %v2134_v7, %s2848_s8  ;;  %s2362_s8 = sshll.u32 %s3048_s11, 1  ;;  %s2374_s11 = sshll.u32 %s3135_s21, 1 }
0x280e   : > { %s891_s10 = scalar_lea.vmem %s3379_s24, %s2362_s8  ;;  %s1269_s22 = scalar_lea.vmem %s3379_s24, %s2374_s11 }
0x280f   : > { %s2025_s8 = scalar_lea.vmem %s3379_s24, %s2399_s19 }
0x2811   : > { %383 = vrot.lane.b32.xlu1 %v2975_v30, %s2850_s16  ;;  %v2129_v30 = vmul.f32 %v2829_v5, %v2013_v42 }
0x2815   : > { %635 = vrot.lane.b32.xlu1 %v3033_v23, %s2850_s16 }
0x2819   : > { %887 = vrot.lane.b32.xlu1 %v3091_v18, %s2850_s16 }
0x281d   : > { %1139 = vrot.lane.b32.xlu1 %v3149_v15, %s2850_s16 }
0x2821   : > { %1391 = vrot.lane.b32.xlu1 %v3207_v14, %s2850_s16 }
0x2825   : > { %1643 = vrot.lane.b32.xlu1 %v3271_v13, %s2850_s16 }
0x2829   : > { %1895 = vrot.lane.b32.xlu1 %v3334_v20, %s2850_s16 }
0x287f   : > { %v2137_v23 = vpop.permute.xlu1 %2136 }
0x2880   : > { %v2139_v18 = vadd.f32 %v2137_v23, %v2129_v30 }
0x2882   : > { %2830 = vtanh.f32 %v2139_v18 }
0x2883   : > { %v384_v15 = vpop.permute.xlu1 %383 }
0x2884   : > { %389 = vst.msk [vmem:[%s387_s6] sm:$0x3] %vm388_vm3, %v384_v15  ;;  %s2379_s6 = sshll.u32 %s3164_s5, 1  ;;  %s1647_s5 = scalar_lea.vmem %s3379_s24, %s2387_s18 }
0x2885   : > { %s1395_s30 = scalar_lea.vmem %s3379_s24, %s2379_s6 }
0x288c   : > { %v2831_v14 = vpop.eup %2830 }
0x288d   : > { %2142 = vrot.lane.b32.xlu0 %v2831_v14, %s2849_s14  ;;  %s513_s14 = scalar_lea.vmem %s3379_s24, %s2348_s17  ;;  %s2383_s17 = sshll.u32 %s3193_s25, 1 }
0x288e   : > { %s1521_s21 = scalar_lea.vmem %s3379_s24, %s2383_s17 }
0x2891   : > { %509 = vrot.lane.b32.xlu0 %v3004_v56, %s2850_s16  ;;  %v636_v56 = vpop.permute.xlu1 %635 }
0x2895   : > { %761 = vrot.lane.b32.xlu0 %v3062_v50, %s2850_s16 }
0x2899   : > { %1013 = vrot.lane.b32.xlu0 %v3120_v46, %s2850_s16  ;;  %v888_v46 = vpop.permute.xlu1 %887 }
0x289d   : > { %1265 = vrot.lane.b32.xlu0 %v3178_v44, %s2850_s16 }
0x28a1   : > { %1517 = vrot.lane.b32.xlu0 %v3236_v45, %s2850_s16  ;;  %v1140_v45 = vpop.permute.xlu1 %1139 }
0x28a5   : > { %1769 = vrot.lane.b32.xlu0 %v3306_v48, %s2850_s16  ;;  %v1392_v9 = vpop.permute.xlu1 %1391 }
0x28a9   : > { %2021 = vrot.lane.b32.xlu0 %v2019_v49, %s2850_s16  ;;  %v1644_v16 = vpop.permute.xlu1 %1643 }
0x28ad   : > { %v1896_v20 = vpop.permute.xlu1 %1895 }
0x28ff   : > { %v2143_v50 = vpop.permute.xlu0 %2142 }
0x2900   : > { %v2145_v13 = vmul.f32 %v2829_v5, %v2143_v50 }
0x2902   : > { %2147 = vrot.lane.b32.xlu1 %v2145_v13, %s2850_s16  ;;  %s1017_s16 = scalar_lea.vmem %s3379_s24, %s2366_s20 }
0x2903   : > { %v510_v44 = vpop.permute.xlu0 %509 }
0x2904   : > { %514 = vst.msk [vmem:[%s513_s14] sm:$0x3] %vm388_vm3, %v510_v44  ;;  %s2391_s14 = sshll.u32 %s3251_s13, 1  ;;  %s2403_s13 = sshll.u32 %s3348_s28, 1 }
0x2905   : > { %640 = vst.msk [vmem:[%s639_s12] sm:$0x3] %vm388_vm3, %v636_v56  ;;  %s2395_s12 = sshll.u32 %s3292_s26, 1  ;;  %s1773_s7 = scalar_lea.vmem %s3379_s24, %s2391_s14 }
0x2906   : > { %s1899_s25 = scalar_lea.vmem %s3379_s24, %s2395_s12  ;;  %s2151_s26 = scalar_lea.vmem %s3379_s24, %s2403_s13 }
0x2907   : > { %v762_v29 = vpop.permute.xlu0 %761 }
0x2908   : > { %766 = vst.msk [vmem:[%s765_s9] sm:$0x3] %vm388_vm3, %v762_v29 }
0x2909   : > { %892 = vst.msk [vmem:[%s891_s10] sm:$0x3] %vm388_vm3, %v888_v46 }
0x290b   : > { %v1014_v48 = vpop.permute.xlu0 %1013 }
0x290c   : > { %1018 = vst.msk [vmem:[%s1017_s16] sm:$0x3] %vm388_vm3, %v1014_v48 }
0x290d   : > { %1144 = vst.msk [vmem:[%s1143_s27] sm:$0x3] %vm388_vm3, %v1140_v45 }
0x290f   : > { %v1266_v12 = vpop.permute.xlu0 %1265 }
0x2910   : > { %1270 = vst.msk [vmem:[%s1269_s22] sm:$0x3] %vm388_vm3, %v1266_v12 }
0x2911   : > { %1396 = vst.msk [vmem:[%s1395_s30] sm:$0x3] %vm388_vm3, %v1392_v9 }
0x2913   : > { %v1518_v17 = vpop.permute.xlu0 %1517 }
0x2914   : > { %1522 = vst.msk [vmem:[%s1521_s21] sm:$0x3] %vm388_vm3, %v1518_v17 }
0x2915   : > { %1648 = vst.msk [vmem:[%s1647_s5] sm:$0x3] %vm388_vm3, %v1644_v16 }
0x2917   : > { %v1770_v19 = vpop.permute.xlu0 %1769 }
0x2918   : > { %1774 = vst.msk [vmem:[%s1773_s7] sm:$0x3] %vm388_vm3, %v1770_v19 }
0x2919   : > { %1900 = vst.msk [vmem:[%s1899_s25] sm:$0x3] %vm388_vm3, %v1896_v20 }
0x291b   : > { %v2022_v21 = vpop.permute.xlu0 %2021 }
0x291c   : > { %2026 = vst.msk [vmem:[%s2025_s8] sm:$0x3] %vm388_vm3, %v2022_v21 }
0x2974   : > { %v2148_v22 = vpop.permute.xlu1 %2147 }
0x2975   : > { %2152 = vst.msk [vmem:[%s2151_s26] sm:$0x3] %vm388_vm3, %v2148_v22 }
0x2976 PF: > { %s14_s15 = sadd.s32 1, %s2842_s15  }
0x2977   : > { %p11_p5 = scmp.ge.s32.totalorder %s14_s15, 4  }
0x2979   :  { %13 = sbr.rel (!%p11_p5) target bundleno = 1 (0x1), region = 102 }

// kernel: _lambda_.17
= control target key start
LH: loop header
LB: loop body
LE: loop exit
PB: predicated region body
PF: predicated region fallthrough
CT: control target
= control target key end

     0   :  { %s648_s18 = smov 0   ;;  %s698_s0 = inlined_call_operand.vmem [shape: f32[128,16], index: 0, kind: input, shape index: {}]   ;;  %s699_s1 = inlined_call_operand.vmem [shape: f32[128,16], index: 1, kind: input, shape index: {}]   ;;  %s700_s2 = inlined_call_operand.vmem [shape: bf16[16,16], index: 2, kind: input, shape index: {}]   ;;  %s701_s3 = inlined_call_operand.vmem [shape: bf16[16,8], index: 3, kind: input, shape index: {}]   ;;  %s702_s4 = inlined_call_operand.vmem [shape: f32[1,16], index: 4, kind: input, shape index: {}]   ;;  %s703_s5 = inlined_call_operand.vmem [shape: f32[128,8], index: 5, kind: output, shape index: {}]  }
   0x1 LB: > { %s546_s19 = sadd.s32 4294967295, %s616_s18   ;;  %p550_p0 = scmp.ge.s32.totalorder %s616_s18, 1  ;;  %s616_s18 = sphi %s648_s18, %s15_s18  }
   0x2   : > { %p199_p1 = scmp.lt.s32.totalorder %s616_s18, 3 }
   0x4   : > { %p200_p2 = pnand %p550_p0, %p199_p1 }
   0x5   : > { %v608_v0 = vld [vmem:[%s700_s2] sm:$0xff] (!%p200_p2)   ;;  %s551_s22 = sshll.u32 (!%p200_p2), %s546_s19, 3  ;;  %vm294_vm0 = vcmask (!%p200_p2), 130048   ;;  %vm469_vm1 = vcmask (!%p200_p2), 64512  }
   0x6   : > { %203 = sbr.rel (%p200_p2) target bundleno = 469 (0x1d5), region = 40  ;;  %p233_p3 = scmp.lt.s32.totalorder (!%p200_p2), %s551_s22, 15  ;;  %580 = vmatprep.subr.bf16.mxu0 (!%p200_p2), %v608_v0  ;;  %v609_v29 = vld [vmem:[%s701_s3] sm:$0xff] (!%p200_p2)  }
   0x7   : > { %581 = vmatpush3.bf16.msra.mxu0 (!%p200_p2), %v608_v0  ;;  %590 = vmatprep.subr.bf16.mxu1 (!%p200_p2), %v609_v29  ;;  %v557_v30 = vld [vmem:[%s702_s4] ss:$0 sm:$0xff] (!%p200_p2) }
   0x8   : > { %591 = vmatpush3.bf16.msra.mxu1 (!%p200_p2), %v609_v29 }
   0xd   : > { %s705_s22 = smov (!%p233_p3, %s551_s22), 15 }
   0xe   : > { %s659_s23 = sshll.u32 %s705_s22, 3 }
   0xf   : > { %s236_s26 = scalar_lea.vmem %s698_s0, %s659_s23  ;;  %s242_s29 = scalar_lea.vmem %s699_s1, %s659_s23 }
  0x10   : > { %v251_v1 = vld [vmem:[%s236_s26] sm:$0xff]  ;;  %v252_v2 = vld [vmem:[%s236_s26 + $0x8] sm:$0xff]  ;;  %v253_v6 = vld [vmem:[%s236_s26 + $0x10] sm:$0xff]  ;;  %s248_s11 = scalar_lea.vmem %s703_s5, %s659_s23 }
  0x11   : > { %v259_v3 = vld [vmem:[%s242_s29] sm:$0xff]  ;;  %v260_v4 = vld [vmem:[%s242_s29 + $0x8] sm:$0xff]  ;;  %v254_v7 = vld [vmem:[%s236_s26 + $0x18] sm:$0xff] }
  0x12   : > { %v267_v5 = vadd.f32 %v259_v3, %v251_v1  ;;  %v268_v8 = vadd.f32 %v260_v4, %v252_v2  ;;  %v261_v9 = vld [vmem:[%s242_s29 + $0x10] sm:$0xff]  ;;  %v262_v10 = vld [vmem:[%s242_s29 + $0x18] sm:$0xff]  ;;  %v255_v11 = vld [vmem:[%s236_s26 + $0x20] sm:$0xff] }
  0x13   : > { %v269_v12 = vadd.f32 %v261_v9, %v253_v6  ;;  %v270_v13 = vadd.f32 %v262_v10, %v254_v7  ;;  %v256_v14 = vld [vmem:[%s236_s26 + $0x28] sm:$0xff]  ;;  %v263_v15 = vld [vmem:[%s242_s29 + $0x20] sm:$0xff]  ;;  %v257_v20 = vld [vmem:[%s236_s26 + $0x30] sm:$0xff] }
  0x14   : > { %v264_v16 = vld [vmem:[%s242_s29 + $0x28] sm:$0xff]  ;;  %v275_v17 = vpack.c.bf16 %v268_v8, %v267_v5  ;;  %v271_v18 = vadd.f32 %v263_v15, %v255_v11  ;;  %v258_v21 = vld [vmem:[%s236_s26 + $0x38] sm:$0xff]  ;;  %v265_v22 = vld [vmem:[%s242_s29 + $0x30] sm:$0xff] }
  0x15   : > { %v272_v19 = vadd.f32 %v264_v16, %v256_v14  ;;  %v276_v23 = vpack.c.bf16 %v270_v13, %v269_v12  ;;  %v266_v24 = vld [vmem:[%s242_s29 + $0x38] sm:$0xff]  ;;  %v273_v26 = vadd.f32 %v265_v22, %v257_v20 }
  0x16   : > { %582 = vmatprep.mubr.msk.bf16.mxu0 %vm294_vm0, %v275_v17  ;;  %v274_v27 = vadd.f32 %v266_v24, %v258_v21 }
  0x17   : > { %v277_v25 = vpack.c.bf16 %v272_v19, %v271_v18  ;;  %583 = vmatmul.mubr.msk.bf16.vlgmr.msra.gmra.mrb[0].mxu0 %vm294_vm0, %v276_v23 }
  0x18   : > { %v278_v28 = vpack.c.bf16 %v274_v27, %v273_v26 }
  0x19   : > { %586 = vmatprep.mubr.msk.bf16.mxu0 %vm294_vm0, %v277_v25 }
  0x1f   : > { %587 = vmatmul.mubr.msk.bf16.gmra.mrb[4].mxu0 %vm294_vm0, %v278_v28 }
  0xea   : > { %v584_v31 = vpop.f32.mrb[0].mxu0 }
  0xeb   : > { %v350_v32 = vadd.f32 %v584_v31, %v557_v30  ;;  %v341_v33 = vpop.f32.mrb[1].mxu0 }
  0xec   : > { %v342_v34 = vadd.f32 %v557_v30, %v341_v33  ;;  %v585_v35 = vpop.f32.mrb[2].mxu0 }
  0xed   : > { %v353_v36 = vadd.f32 %v585_v35, %v557_v30  ;;  %v344_v37 = vpop.f32.mrb[3].mxu0  ;;  %v374_v39 = vmax.f32 %v350_v32, 0.0 }
  0xee   : > { %v345_v38 = vadd.f32 %v557_v30, %v344_v37  ;;  %v372_v41 = vmax.f32 %v342_v34, 0.0 }
  0xef   : > { %v375_v40 = vmax.f32 %v353_v36, 0.0 }
  0xf0   : > { %v373_v42 = vmax.f32 %v345_v38, 0.0 }
  0xf1   : > { %v381_v43 = vpack.c.bf16 %v375_v40, %v374_v39 }
  0xf2   : > { %v588_v44 = vpop.f32.mrb[4].mxu0  ;;  %v380_v45 = vpack.c.bf16 %v373_v42, %v372_v41 }
  0xf3   : > { %v366_v46 = vadd.f32 %v588_v44, %v557_v30  ;;  %v357_v47 = vpop.f32.mrb[5].mxu0 }
  0xf4   : > { %v358_v48 = vadd.f32 %v557_v30, %v357_v47  ;;  %v589_v49 = vpop.f32.mrb[6].mxu0  ;;  %592 = vmatprep.mubr.msk.bf16.mxu1 %vm294_vm0, %v380_v45 }
  0xf5   : > { %v369_v50 = vadd.f32 %v589_v49, %v557_v30  ;;  %v360_v51 = vpop.f32.mrb[7].mxu0  ;;  %593 = vmatmul.mubr.msk.bf16.vlgmr.msra.gmra.mrb[0].mxu1 %vm294_vm0, %v381_v43  ;;  %v378_v53 = vmax.f32 %v366_v46, 0.0 }
  0xf6   : > { %v361_v52 = vadd.f32 %v557_v30, %v360_v51  ;;  %v376_v55 = vmax.f32 %v358_v48, 0.0 }
  0xf7   : > { %v379_v54 = vmax.f32 %v369_v50, 0.0 }
  0xf8   : > { %v377_v56 = vmax.f32 %v361_v52, 0.0 }
  0xf9   : > { %v383_v57 = vpack.c.bf16 %v379_v54, %v378_v53 }
  0xfa   : > { %v382_v58 = vpack.c.bf16 %v377_v56, %v376_v55 }
  0xfc   : > { %596 = vmatprep.mubr.msk.bf16.mxu1 %vm294_vm0, %v382_v58 }
  0xfd   : > { %597 = vmatmul.mubr.msk.bf16.gmra.mrb[4].mxu1 %vm294_vm0, %v383_v57 }
 0x1c8   : > { %v594_v59 = vpop.f32.mrb[0].mxu1 }
 0x1c9   : > { %472 = vst.msk [vmem:[%s248_s11 + $0x10] sm:$0xff] %vm469_vm1, %v594_v59  ;;  %v438_v60 = vpop.f32.mrb[1].mxu1 }
 0x1ca   : > { %470 = vst.msk [vmem:[%s248_s11] sm:$0xff] %vm469_vm1, %v438_v60  ;;  %v595_v61 = vpop.f32.mrb[2].mxu1 }
 0x1cb   : > { %473 = vst.msk [vmem:[%s248_s11 + $0x18] sm:$0xff] %vm469_vm1, %v595_v61  ;;  %v441_v62 = vpop.f32.mrb[3].mxu1 }
 0x1cc   : > { %471 = vst.msk [vmem:[%s248_s11 + $0x8] sm:$0xff] %vm469_vm1, %v441_v62 }
 0x1d0   : > { %v598_v63 = vpop.f32.mrb[4].mxu1 }
 0x1d1   : > { %476 = vst.msk [vmem:[%s248_s11 + $0x30] sm:$0xff] %vm469_vm1, %v598_v63  ;;  %v454_v0 = vpop.f32.mrb[5].mxu1 }
 0x1d2   : > { %474 = vst.msk [vmem:[%s248_s11 + $0x20] sm:$0xff] %vm469_vm1, %v454_v0  ;;  %v599_v1 = vpop.f32.mrb[6].mxu1 }
 0x1d3   : > { %477 = vst.msk [vmem:[%s248_s11 + $0x38] sm:$0xff] %vm469_vm1, %v599_v1  ;;  %v457_v2 = vpop.f32.mrb[7].mxu1 }
 0x1d4   : > { %475 = vst.msk [vmem:[%s248_s11 + $0x28] sm:$0xff] %vm469_vm1, %v457_v2 }
 0x1d5 PF: > { %s15_s18 = sadd.s32 1, %s616_s18  }
 0x1d6   : > { %p12_p4 = scmp.ge.s32.totalorder %s15_s18, 4  }
 0x1d8   :  { %14 = sbr.rel (!%p12_p4) target bundleno = 1 (0x1), region = 73 }

</bundles_post_ra>
